<compile_context>
chip_gen: v5e
topology: v5e:2x2
jax: 0.10.0
libtpu: 0.0.40
codegen_flags: <defaults>
</compile_context>

<pallas_src>
import functools

import jax
import jax.numpy as jnp
from jax.experimental import pallas as pl
from jax.experimental.pallas import tpu as pltpu


_VMEM_LIMIT_BYTES = 64 * 1024 * 1024


# ----------------------------------------------------------------------------
# In-kernel helpers (pure jnp, traced inside the Pallas kernels)
# ----------------------------------------------------------------------------
def _layernorm(x, g, b, eps):
    mu = jnp.mean(x, axis=-1, keepdims=True)
    xc = x - mu
    var = jnp.mean(xc * xc, axis=-1, keepdims=True)
    return xc * jax.lax.rsqrt(var + eps) * g + b


def _mha_block(xq, xkv, wqkv_ref, bqkv_ref, wo_ref, bo, num_heads, prefix=()):
    """Multi-head causal attention on VMEM-resident activations.

    xq: (Sq, D), xkv: (Sk, D)
    wqkv_ref[prefix]: (3*H, D, Dh)  stacked as [q_heads | k_heads | v_heads]
    bqkv_ref[prefix]: (3*H, 1, Dh)
    wo_ref[prefix]:   (H, Dh, D)    per-head slice of the output projection
    bo:               (1, D)        already-loaded value
    `prefix` is a static index tuple selecting the layer slice (stacked case).
    """
    sq = xq.shape[0]
    sk = xkv.shape[0]
    dh = wqkv_ref.shape[-1]
    scale = 1.0 / float(dh) ** 0.5

    qi = jax.lax.broadcasted_iota(jnp.int32, (sq, sk), 0)
    ki = jax.lax.broadcasted_iota(jnp.int32, (sq, sk), 1)
    causal = ki <= qi

    out = None
    for h in range(num_heads):
        q = (jnp.dot(xq, wqkv_ref[prefix + (h,)],
                     preferred_element_type=jnp.float32)
             + bqkv_ref[prefix + (h,)]) * scale
        k = (jnp.dot(xkv, wqkv_ref[prefix + (num_heads + h,)],
                     preferred_element_type=jnp.float32)
             + bqkv_ref[prefix + (num_heads + h,)])
        v = (jnp.dot(xkv, wqkv_ref[prefix + (2 * num_heads + h,)],
                     preferred_element_type=jnp.float32)
             + bqkv_ref[prefix + (2 * num_heads + h,)])
        s = jax.lax.dot_general(q, k, (((1,), (1,)), ((), ())),
                                preferred_element_type=jnp.float32)
        s = jnp.where(causal, s, -1e30)
        m = jnp.max(s, axis=-1, keepdims=True)
        p = jnp.exp(s - m)
        inv = pl.reciprocal(jnp.sum(p, axis=-1, keepdims=True), approx=True)
        # TODO(synk): at long sequence lengths this becomes a flash-style
        # online softmax over KV tiles; at S<=8 the full score matrix is tiny.
        o_h = jnp.dot(p * inv, v, preferred_element_type=jnp.float32)      # (Sq, Dh)
        proj = jnp.dot(o_h, wo_ref[prefix + (h,)],
                       preferred_element_type=jnp.float32)                 # (Sq, D)
        out = proj if out is None else out + proj
    return out + bo


def _encoder_body(x, refs, num_heads, eps, prefix=()):
    """One post-LN transformer encoder layer on a (S, D) VMEM slab."""
    (wqkv, bqkv, wo, bo, g1, bt1, w1, b1, w2, b2, g2, bt2) = refs
    ld = (lambda r: r[prefix]) if prefix else (lambda r: r[...])
    a = _mha_block(x, x, wqkv, bqkv, wo, ld(bo), num_heads, prefix)
    x = _layernorm(x + a, ld(g1), ld(bt1), eps)
    h = jnp.maximum(
        jnp.dot(x, ld(w1), preferred_element_type=jnp.float32) + ld(b1), 0.0)
    f = jnp.dot(h, ld(w2), preferred_element_type=jnp.float32) + ld(b2)
    return _layernorm(x + f, ld(g2), ld(bt2), eps)


# ----------------------------------------------------------------------------
# Fused kernels
# ----------------------------------------------------------------------------
def _encoder_stack_kernel(x_ref, wqkv, bqkv, wo, bo, g1, bt1, w1, b1, w2, b2,
                          g2, bt2, o_ref, *, num_heads, eps):
    """grid=(B, L): all encoder layers for one batch row; activations stay in
    VMEM across the layer ("arbitrary") axis via the resident output block."""
    @pl.when(pl.program_id(1) == 0)
    def _():
        o_ref[0] = x_ref[0]
    x = o_ref[0]
    y = _encoder_body(x, (wqkv, bqkv, wo, bo, g1, bt1, w1, b1, w2, b2, g2, bt2),
                      num_heads, eps, prefix=(0,))
    o_ref[0] = y.astype(o_ref.dtype)


def _encoder_layer_head_kernel(x_ref, wqkv, bqkv, wo, bo, g1, bt1, w1, b1, w2,
                               b2, g2, bt2, wh_ref, bh_ref, o_ref, *,
                               num_heads, eps):
    """Single encoder layer fused with a lane-dense linear head."""
    x = x_ref[0]
    y = _encoder_body(x, (wqkv, bqkv, wo, bo, g1, bt1, w1, b1, w2, b2, g2, bt2),
                      num_heads, eps)
    o_ref[0] = (jnp.dot(y, wh_ref[...], preferred_element_type=jnp.float32)
                + bh_ref[...]).astype(o_ref.dtype)


def _decoder_layer_head_kernel(tgt_ref, mem_ref,
                               wqkv_s, bqkv_s, wo_s, bo_s, g1, bt1,
                               wqkv_c, bqkv_c, wo_c, bo_c, g2, bt2,
                               w1, b1, w2, b2, g3, bt3,
                               wh_ref, bh_ref, o_ref, *, num_heads, eps):
    """Decoder layer (self-attn + causal memory cross-attn + FFN) fused with a
    lane-dense linear head (GMM parameter projection)."""
    x = tgt_ref[0]
    mem = mem_ref[0]
    a = _mha_block(x, x, wqkv_s, bqkv_s, wo_s, bo_s[...], num_heads)
    x = _layernorm(x + a, g1[...], bt1[...], eps)
    # TODO(synk): CausalMemoryDecoder source unavailable; causal mask applied to
    # memory cross-attention (tgt step t attends to memory[:t+1]).
    c = _mha_block(x, mem, wqkv_c, bqkv_c, wo_c, bo_c[...], num_heads)
    x = _layernorm(x + c, g2[...], bt2[...], eps)
    h = jnp.maximum(
        jnp.dot(x, w1[...], preferred_element_type=jnp.float32) + b1[...], 0.0)
    f = jnp.dot(h, w2[...], preferred_element_type=jnp.float32) + b2[...]
    x = _layernorm(x + f, g3[...], bt3[...], eps)
    o_ref[0] = (jnp.dot(x, wh_ref[...], preferred_element_type=jnp.float32)
                + bh_ref[...]).astype(o_ref.dtype)


# ----------------------------------------------------------------------------
# pallas_call wrappers
# ----------------------------------------------------------------------------
def _stacked_spec(shape):
    """Per-layer block of a layer-stacked weight; indexed by the layer axis."""
    n = len(shape) - 1
    return pl.BlockSpec((1,) + tuple(shape[1:]),
                        lambda b, l, _n=n: (l,) + (0,) * _n)


def _bcast_spec(shape):
    """Full-array block, same for every batch grid step."""
    n = len(shape)
    return pl.BlockSpec(tuple(shape), lambda b, _n=n: (0,) * _n)


def encoder_stack(x, p, num_heads, eps=1e-5):
    """x: (B, S, D) with S a multiple of 8. All layers in one pallas_call."""
    B, S, D = x.shape
    L = p["wqkv"].shape[0]
    names = ("wqkv", "bqkv", "wo", "bo", "ln1_g", "ln1_b",
             "w1", "b1", "w2", "b2", "ln2_g", "ln2_b")
    return pl.pallas_call(
        functools.partial(_encoder_stack_kernel, num_heads=num_heads, eps=eps),
        out_shape=jax.ShapeDtypeStruct((B, S, D), jnp.float32),
        grid=(B, L),
        in_specs=[pl.BlockSpec((1, S, D), lambda b, l: (b, 0, 0))]
        + [_stacked_spec(p[n].shape) for n in names],
        out_specs=pl.BlockSpec((1, S, D), lambda b, l: (b, 0, 0)),
        compiler_params=pltpu.CompilerParams(
            dimension_semantics=("parallel", "arbitrary"),
            vmem_limit_bytes=_VMEM_LIMIT_BYTES),
    )(x.astype(jnp.float32), *[p[n] for n in names])


def encoder_layer_with_head(x, p, head, num_heads, eps=1e-5):
    """Single encoder layer + linear head (lane-padded dout) in one call."""
    B, S, D = x.shape
    dout = head["w"].shape[-1]
    names = ("wqkv", "bqkv", "wo", "bo", "ln1_g", "ln1_b",
             "w1", "b1", "w2", "b2", "ln2_g", "ln2_b")
    in_specs = ([pl.BlockSpec((1, S, D), lambda b: (b, 0, 0))]
                + [_bcast_spec(p[n].shape) for n in names]
                + [_bcast_spec(head["w"].shape), _bcast_spec(head["b"].shape)])
    return pl.pallas_call(
        functools.partial(_encoder_layer_head_kernel, num_heads=num_heads, eps=eps),
        out_shape=jax.ShapeDtypeStruct((B, S, dout), jnp.float32),
        grid=(B,),
        in_specs=in_specs,
        out_specs=pl.BlockSpec((1, S, dout), lambda b: (b, 0, 0)),
        compiler_params=pltpu.CompilerParams(
            dimension_semantics=("parallel",),
            vmem_limit_bytes=_VMEM_LIMIT_BYTES),
    )(x.astype(jnp.float32), *[p[n] for n in names], head["w"], head["b"])


def decoder_layer_with_head(tgt, memory, p, head, num_heads, eps=1e-5):
    """Fused decoder layer (self-attn + causal cross-attn + FFN) + linear head."""
    B, S, D = tgt.shape
    dout = head["w"].shape[-1]
    sa, ca = p["self_attn"], p["cross_attn"]
    args = [tgt.astype(jnp.float32), memory.astype(jnp.float32),
            sa["wqkv"], sa["bqkv"], sa["wo"], sa["bo"], p["ln1_g"], p["ln1_b"],
            ca["wqkv"], ca["bqkv"], ca["wo"], ca["bo"], p["ln2_g"], p["ln2_b"],
            p["w1"], p["b1"], p["w2"], p["b2"], p["ln3_g"], p["ln3_b"],
            head["w"], head["b"]]
    in_specs = ([pl.BlockSpec((1, S, D), lambda b: (b, 0, 0)),
                 pl.BlockSpec((1, S, D), lambda b: (b, 0, 0))]
                + [_bcast_spec(a.shape) for a in args[2:]])
    return pl.pallas_call(
        functools.partial(_decoder_layer_head_kernel, num_heads=num_heads, eps=eps),
        out_shape=jax.ShapeDtypeStruct((B, S, dout), jnp.float32),
        grid=(B,),
        in_specs=in_specs,
        out_specs=pl.BlockSpec((1, S, dout), lambda b: (b, 0, 0)),
        compiler_params=pltpu.CompilerParams(
            dimension_semantics=("parallel",),
            vmem_limit_bytes=_VMEM_LIMIT_BYTES),
    )(*args)


# ----------------------------------------------------------------------------
# Input embedding & GMM post-processing (plain-JAX glue)
# ----------------------------------------------------------------------------
def time_encoding(t, d_embed, lambda_min, lambda_max):
    """Sinusoidal encoding with geometric wavelengths in [lambda_min, lambda_max]."""
    n = d_embed // 2
    expo = jnp.arange(n, dtype=jnp.float32) / max(n - 1, 1)
    lambdas = lambda_min * (lambda_max / lambda_min) ** expo
    ang = 2.0 * jnp.pi * t[..., None] / lambdas
    return jnp.concatenate([jnp.sin(ang), jnp.cos(ang)], axis=-1)


def source_input(params, region_id, arrival_time, duration, cfg):
    # TODO(synk): SourceInput source unavailable; d_model = 4*d_embed is built as
    # [arrival_enc | departure_enc | duration_enc | region_emb] so that the
    # [..., :2*d_embed] / [..., :3*d_embed] slices match d_travel / d_duration.
    d_embed = cfg["d_embed"]
    arrival_enc = time_encoding(arrival_time, d_embed, cfg["lambda_min"], cfg["lambda_max"])
    departure_enc = time_encoding(
        arrival_time + duration, d_embed, cfg["lambda_min"], cfg["lambda_max"])
    duration_enc = time_encoding(duration, d_embed, cfg["lambda_min"], cfg["lambda_max"])
    region_emb = params["region_emb"][region_id]  # gather in plain JAX (glue)
    return jnp.concatenate([arrival_enc, departure_enc, duration_enc, region_emb], axis=-1)


def _gmm_postprocess(y):
    # TODO(synk): GMM source unavailable; assumed Linear(d, 3K) -> pi/mu/sigma.
    pi_logits, mu, log_sigma = jnp.split(y, 3, axis=-1)
    return {"pi": jax.nn.softmax(pi_logits, axis=-1),
            "mu": mu,
            "sigma": jnp.exp(log_sigma)}


# ----------------------------------------------------------------------------
# Parameter initialization (deterministic; weights stored in kernel layout)
# ----------------------------------------------------------------------------
def _init_mha(key, d_model, num_heads, scale=0.02, num_layers=None):
    dh = d_model // num_heads
    lead = () if num_layers is None else (num_layers,)
    k1, k2 = jax.random.split(key)
    return {
        "wqkv": jax.random.normal(k1, lead + (3 * num_heads, d_model, dh), jnp.float32) * scale,
        "bqkv": jnp.zeros(lead + (3 * num_heads, 1, dh), jnp.float32),
        "wo": jax.random.normal(k2, lead + (num_heads, dh, d_model), jnp.float32) * scale,
        "bo": jnp.zeros(lead + (1, d_model), jnp.float32),
    }


def _init_encoder_params(key, d_model, d_ff, num_heads, num_layers=None, scale=0.02):
    lead = () if num_layers is None else (num_layers,)
    k1, k2, k3 = jax.random.split(key, 3)
    p = _init_mha(k1, d_model, num_heads, scale, num_layers)
    p["w1"] = jax.random.normal(k2, lead + (d_model, d_ff), jnp.float32) * scale
    p["b1"] = jnp.zeros(lead + (1, d_ff), jnp.float32)
    p["w2"] = jax.random.normal(k3, lead + (d_ff, d_model), jnp.float32) * scale
    p["b2"] = jnp.zeros(lead + (1, d_model), jnp.float32)
    for i in (1, 2):
        p[f"ln{i}_g"] = jnp.ones(lead + (1, d_model), jnp.float32)
        p[f"ln{i}_b"] = jnp.zeros(lead + (1, d_model), jnp.float32)
    return p


def _init_decoder_params(key, d_model, d_ff, num_heads, scale=0.02):
    k1, k2, k3, k4 = jax.random.split(key, 4)
    p = {"self_attn": _init_mha(k1, d_model, num_heads, scale),
         "cross_attn": _init_mha(k2, d_model, num_heads, scale),
         "w1": jax.random.normal(k3, (d_model, d_ff), jnp.float32) * scale,
         "b1": jnp.zeros((1, d_ff), jnp.float32),
         "w2": jax.random.normal(k4, (d_ff, d_model), jnp.float32) * scale,
         "b2": jnp.zeros((1, d_model), jnp.float32)}
    for i in (1, 2, 3):
        p[f"ln{i}_g"] = jnp.ones((1, d_model), jnp.float32)
        p[f"ln{i}_b"] = jnp.zeros((1, d_model), jnp.float32)
    return p


def _init_head(key, din, dout, scale=0.02):
    # Output lanes padded to a multiple of 128 so the fused head store inside
    # the kernel is an unmasked, lane-dense vst; real columns live in [:dout].
    d_pad = -(-dout // 128) * 128
    w = jnp.zeros((din, d_pad), jnp.float32)
    w = w.at[:, :dout].set(jax.random.normal(key, (din, dout), jnp.float32) * scale)
    return {"w": w, "b": jnp.zeros((1, d_pad), jnp.float32)}


def init_trajgpt_params(key, cfg):
    d_embed = cfg["d_embed"]
    d_model = 4 * d_embed
    d_travel = 2 * d_embed
    d_duration = 3 * d_embed
    d_ff = cfg["d_feedforward"]
    K = cfg["num_gaussians"]
    H = cfg["num_heads"]
    keys = jax.random.split(key, 8)
    # TODO(synk): CausalEncoder does not receive d_feedforward; FFN width assumed 2*d_model.
    return {
        "region_emb": jax.random.normal(keys[0], (cfg["num_regions"], d_embed), jnp.float32) * 0.02,
        "encoder": _init_encoder_params(keys[1], d_model, 2 * d_model, H,
                                        num_layers=cfg["num_layers"]),
        "region_decoder": _init_encoder_params(keys[2], d_model, 2 * d_model, H),
        "region_head": _init_head(keys[3], d_model, cfg["num_regions"]),
        "travel_decoder": _init_decoder_params(keys[4], d_travel, d_ff, H),
        "travel_head": _init_head(keys[5], d_travel, 3 * K),
        "duration_decoder": _init_decoder_params(keys[6], d_duration, d_ff, H),
        "duration_head": _init_head(keys[7], d_duration, 3 * K),
    }


# ----------------------------------------------------------------------------
# Full forward
# ----------------------------------------------------------------------------
def trajgpt_forward(params, region_id, arrival_time, duration, cfg):
    num_heads = cfg["num_heads"]
    d_embed = cfg["d_embed"]
    d_travel = 2 * d_embed
    d_duration = 3 * d_embed
    K = cfg["num_gaussians"]

    seq = source_input(params, region_id, arrival_time, duration, cfg)  # (B, S, d_model)
    src = seq[:, :-1, :]
    tgt = seq[:, 1:, :]
    B, T, _ = src.shape

    # Pad sequence length to a multiple of 8 (sublane alignment). Padded
    # positions sit at the end, so the causal masks keep them from influencing
    # any valid position; padded rows are sliced off after the heads.
    Tp = -(-T // 8) * 8
    src = jnp.pad(src, ((0, 0), (0, Tp - T), (0, 0)))
    tgt = jnp.pad(tgt, ((0, 0), (0, Tp - T), (0, 0)))

    # Encoder: all layers in one pallas_call (grid over batch x layer).
    memory = encoder_stack(src, params["encoder"], num_heads)

    # Region head: single encoder layer + logits head fused.
    region_logits = encoder_layer_with_head(
        memory, params["region_decoder"], params["region_head"], num_heads)
    region_id_out = region_logits[:, :T, :cfg["num_regions"]]

    # Travel-time head: decoder layer + GMM projection fused.
    travel_y = decoder_layer_with_head(
        tgt[..., :d_travel], memory[..., :d_travel],
        params["travel_decoder"], params["travel_head"], num_heads)
    travel_out = _gmm_postprocess(travel_y[:, :T, :3 * K])

    # Duration head: decoder layer + GMM projection fused.
    duration_y = decoder_layer_with_head(
        tgt[..., :d_duration], memory[..., :d_duration],
        params["duration_decoder"], params["duration_head"], num_heads)
    duration_out = _gmm_postprocess(duration_y[:, :T, :3 * K])

    return {"region_id": region_id_out, "travel_time": travel_out, "duration": duration_out}


# ----------------------------------------------------------------------------
# Main
# ----------------------------------------------------------------------------
if __name__ == "__main__":
    cfg = {
        "num_regions": 10,
        "sequence_len": 8,
        "lambda_min": 1.0,
        "lambda_max": 1000.0,
        "num_heads": 2,
        "num_layers": 4,
        "num_gaussians": 3,
        "d_feedforward": 32,
        "d_embed": 32,
    }
    B, S = 2, cfg["sequence_len"]

    key = jax.random.PRNGKey(0)
    k_param, k_rid, k_at, k_dur = jax.random.split(key, 4)

    params = init_trajgpt_params(k_param, cfg)
    region_id = jax.random.randint(k_rid, (B, S), 0, cfg["num_regions"], dtype=jnp.int32)
    arrival_gaps = jax.random.uniform(k_at, (B, S), jnp.float32, 1.0, 50.0)
    arrival_time = jnp.cumsum(arrival_gaps, axis=-1)
    duration = jax.random.uniform(k_dur, (B, S), jnp.float32, 0.5, 10.0)

    fwd = jax.jit(functools.partial(trajgpt_forward, cfg=cfg))
    out = fwd(params, region_id, arrival_time, duration)
    out = jax.block_until_ready(out)

    assert out["region_id"].shape == (B, S - 1, cfg["num_regions"])
    assert out["travel_time"]["mu"].shape == (B, S - 1, cfg["num_gaussians"])
    assert out["duration"]["sigma"].shape == (B, S - 1, cfg["num_gaussians"])
    assert all(bool(jnp.all(jnp.isfinite(v))) for v in
               [out["region_id"], out["travel_time"]["pi"], out["travel_time"]["mu"],
                out["travel_time"]["sigma"], out["duration"]["pi"], out["duration"]["mu"],
                out["duration"]["sigma"]])
    print("KERNEL_OK")
</pallas_src>

<mosaic_0001>
module attributes {stable_mosaic.version = 11 : i64} {
  func.func @_encoder_stack_kernel(%arg0: i32, %arg1: i32, %arg2: memref<1x8x128xf32, #tpu.memory_space<vmem>>, %arg3: memref<1x6x128x64xf32, #tpu.memory_space<vmem>>, %arg4: memref<1x6x1x64xf32, #tpu.memory_space<vmem>>, %arg5: memref<1x2x64x128xf32, #tpu.memory_space<vmem>>, %arg6: memref<1x1x128xf32, #tpu.memory_space<vmem>>, %arg7: memref<1x1x128xf32, #tpu.memory_space<vmem>>, %arg8: memref<1x1x128xf32, #tpu.memory_space<vmem>>, %arg9: memref<1x128x256xf32, #tpu.memory_space<vmem>>, %arg10: memref<1x1x256xf32, #tpu.memory_space<vmem>>, %arg11: memref<1x256x128xf32, #tpu.memory_space<vmem>>, %arg12: memref<1x1x128xf32, #tpu.memory_space<vmem>>, %arg13: memref<1x1x128xf32, #tpu.memory_space<vmem>>, %arg14: memref<1x1x128xf32, #tpu.memory_space<vmem>>, %arg15: memref<1x8x128xf32, #tpu.memory_space<vmem>>) attributes {dimension_semantics = [#tpu.dimension_semantics<parallel>, #tpu.dimension_semantics<arbitrary>], iteration_bounds = array<i64: 2, 4>, scalar_prefetch = 0 : i64, scratch_operands = 0 : i64, tpu.core_type = #tpu.core_type<tc>, window_params = [{transform_indices = @transform_0, window_bounds = array<i64: 1, 8, 128>}, {transform_indices = @transform_1, window_bounds = array<i64: 1, 6, 128, 64>}, {transform_indices = @transform_2, window_bounds = array<i64: 1, 6, 1, 64>}, {transform_indices = @transform_3, window_bounds = array<i64: 1, 2, 64, 128>}, {transform_indices = @transform_4, window_bounds = array<i64: 1, 1, 128>}, {transform_indices = @transform_5, window_bounds = array<i64: 1, 1, 128>}, {transform_indices = @transform_6, window_bounds = array<i64: 1, 1, 128>}, {transform_indices = @transform_7, window_bounds = array<i64: 1, 128, 256>}, {transform_indices = @transform_8, window_bounds = array<i64: 1, 1, 256>}, {transform_indices = @transform_9, window_bounds = array<i64: 1, 256, 128>}, {transform_indices = @transform_10, window_bounds = array<i64: 1, 1, 128>}, {transform_indices = @transform_11, window_bounds = array<i64: 1, 1, 128>}, {transform_indices = @transform_12, window_bounds = array<i64: 1, 1, 128>}, {transform_indices = @transform_13, window_bounds = array<i64: 1, 8, 128>}]} {
    %c0_i32 = arith.constant 0 : i32
    %0 = arith.cmpi eq, %arg1, %c0_i32 : i32
    %1 = arith.extui %0 : i1 to i32
    %c0_i32_0 = arith.constant 0 : i32
    %2 = arith.cmpi ne, %1, %c0_i32_0 : i32
    scf.if %2 {
      %c0_116 = arith.constant 0 : index
      %c0_117 = arith.constant 0 : index
      %c0_118 = arith.constant 0 : index
      %162 = vector.load %arg2[%c0_116, %c0_117, %c0_118] : memref<1x8x128xf32, #tpu.memory_space<vmem>>, vector<1x8x128xf32>
      %163 = vector.shape_cast %162 : vector<1x8x128xf32> to vector<8x128xf32>
      %c0_119 = arith.constant 0 : index
      %c0_120 = arith.constant 0 : index
      %c0_121 = arith.constant 0 : index
      %164 = vector.load %arg15[%c0_119, %c0_120, %c0_121] : memref<1x8x128xf32, #tpu.memory_space<vmem>>, vector<1x8x128xf32>
      %165 = vector.shape_cast %164 : vector<1x8x128xf32> to vector<8x128xf32>
      %166 = vector.shape_cast %163 : vector<8x128xf32> to vector<1x8x128xf32>
      tpu.vector_store %arg15[%c0_119, %c0_120, %c0_121], %166 {strides = array<i32>} : memref<1x8x128xf32, #tpu.memory_space<vmem>>, vector<1x8x128xf32>,
    } else {
    }
    %c0 = arith.constant 0 : index
    %c0_1 = arith.constant 0 : index
    %c0_2 = arith.constant 0 : index
    %3 = vector.load %arg15[%c0, %c0_1, %c0_2] : memref<1x8x128xf32, #tpu.memory_space<vmem>>, vector<1x8x128xf32>
    %4 = vector.shape_cast %3 : vector<1x8x128xf32> to vector<8x128xf32>
    %c0_3 = arith.constant 0 : index
    %c0_4 = arith.constant 0 : index
    %c0_5 = arith.constant 0 : index
    %5 = vector.load %arg6[%c0_3, %c0_4, %c0_5] : memref<1x1x128xf32, #tpu.memory_space<vmem>>, vector<1x1x128xf32>
    %6 = vector.shape_cast %5 : vector<1x1x128xf32> to vector<1x128xf32>
    %7 = tpu.iota {dimensions = array<i32: 0>} : vector<8x8xi32>
    %8 = tpu.iota {dimensions = array<i32: 1>} : vector<8x8xi32>
    %9 = arith.cmpi sle, %8, %7 : vector<8x8xi32>
    %c0_6 = arith.constant 0 : index
    %c0_7 = arith.constant 0 : index
    %c0_8 = arith.constant 0 : index
    %c0_9 = arith.constant 0 : index
    %10 = vector.load %arg3[%c0_6, %c0_7, %c0_8, %c0_9] : memref<1x6x128x64xf32, #tpu.memory_space<vmem>>, vector<1x1x128x64xf32>
    %11 = vector.shape_cast %10 : vector<1x1x128x64xf32> to vector<128x64xf32>
    %cst = arith.constant dense<0.000000e+00> : vector<8x64xf32>
    %12 = tpu.matmul %4, %11, %cst {dimension_numbers = #tpu.dot_dimension_numbers<[1], [0], [0], [1], [0, 0, 1, 1], [], []>} : vector<8x128xf32>, vector<128x64xf32>, vector<8x64xf32> -> vector<8x64xf32>
    %c0_10 = arith.constant 0 : index
    %c0_11 = arith.constant 0 : index
    %c0_12 = arith.constant 0 : index
    %c0_13 = arith.constant 0 : index
    %13 = vector.load %arg4[%c0_10, %c0_11, %c0_12, %c0_13] : memref<1x6x1x64xf32, #tpu.memory_space<vmem>>, vector<1x1x1x64xf32>
    %14 = vector.shape_cast %13 : vector<1x1x1x64xf32> to vector<1x64xf32>
    %15 = vector.broadcast %14 : vector<1x64xf32> to vector<8x64xf32>
    %16 = arith.addf %12, %15 : vector<8x64xf32>
    %cst_14 = arith.constant 1.250000e-01 : f32
    %17 = vector.broadcast %cst_14 : f32 to vector<8x64xf32>
    %18 = arith.mulf %16, %17 : vector<8x64xf32>
    %c0_15 = arith.constant 0 : index
    %c2 = arith.constant 2 : index
    %c0_16 = arith.constant 0 : index
    %c0_17 = arith.constant 0 : index
    %19 = vector.load %arg3[%c0_15, %c2, %c0_16, %c0_17] : memref<1x6x128x64xf32, #tpu.memory_space<vmem>>, vector<1x1x128x64xf32>
    %20 = vector.shape_cast %19 : vector<1x1x128x64xf32> to vector<128x64xf32>
    %cst_18 = arith.constant dense<0.000000e+00> : vector<8x64xf32>
    %21 = tpu.matmul %4, %20, %cst_18 {dimension_numbers = #tpu.dot_dimension_numbers<[1], [0], [0], [1], [0, 0, 1, 1], [], []>} : vector<8x128xf32>, vector<128x64xf32>, vector<8x64xf32> -> vector<8x64xf32>
    %c0_19 = arith.constant 0 : index
    %c2_20 = arith.constant 2 : index
    %c0_21 = arith.constant 0 : index
    %c0_22 = arith.constant 0 : index
    %22 = vector.load %arg4[%c0_19, %c2_20, %c0_21, %c0_22] : memref<1x6x1x64xf32, #tpu.memory_space<vmem>>, vector<1x1x1x64xf32>
    %23 = vector.shape_cast %22 : vector<1x1x1x64xf32> to vector<1x64xf32>
    %24 = vector.broadcast %23 : vector<1x64xf32> to vector<8x64xf32>
    %25 = arith.addf %21, %24 : vector<8x64xf32>
    %c0_23 = arith.constant 0 : index
    %c4 = arith.constant 4 : index
    %c0_24 = arith.constant 0 : index
    %c0_25 = arith.constant 0 : index
    %26 = vector.load %arg3[%c0_23, %c4, %c0_24, %c0_25] : memref<1x6x128x64xf32, #tpu.memory_space<vmem>>, vector<1x1x128x64xf32>
    %27 = vector.shape_cast %26 : vector<1x1x128x64xf32> to vector<128x64xf32>
    %cst_26 = arith.constant dense<0.000000e+00> : vector<8x64xf32>
    %28 = tpu.matmul %4, %27, %cst_26 {dimension_numbers = #tpu.dot_dimension_numbers<[1], [0], [0], [1], [0, 0, 1, 1], [], []>} : vector<8x128xf32>, vector<128x64xf32>, vector<8x64xf32> -> vector<8x64xf32>
    %c0_27 = arith.constant 0 : index
    %c4_28 = arith.constant 4 : index
    %c0_29 = arith.constant 0 : index
    %c0_30 = arith.constant 0 : index
    %29 = vector.load %arg4[%c0_27, %c4_28, %c0_29, %c0_30] : memref<1x6x1x64xf32, #tpu.memory_space<vmem>>, vector<1x1x1x64xf32>
    %30 = vector.shape_cast %29 : vector<1x1x1x64xf32> to vector<1x64xf32>
    %31 = vector.broadcast %30 : vector<1x64xf32> to vector<8x64xf32>
    %32 = arith.addf %28, %31 : vector<8x64xf32>
    %cst_31 = arith.constant dense<0.000000e+00> : vector<8x8xf32>
    %33 = tpu.matmul %18, %25, %cst_31 {dimension_numbers = #tpu.dot_dimension_numbers<[1], [1], [0], [0], [0, 0, 1, 0], [], []>} : vector<8x64xf32>, vector<8x64xf32>, vector<8x8xf32> -> vector<8x8xf32>
    %cst_32 = arith.constant -1.000000e+30 : f32
    %34 = vector.broadcast %cst_32 : f32 to vector<8x8xf32>
    %35 = arith.select %9, %33, %34 : vector<8x8xi1>, vector<8x8xf32>
    %cst_33 = arith.constant dense<0xFF800000> : vector<8xf32>
    %36 = vector.multi_reduction <maximumf>, %35, %cst_33 [1] : vector<8x8xf32> to vector<8xf32>
    %37 = vector.shape_cast %36 : vector<8xf32> to vector<8x1xf32>
    %38 = vector.broadcast %37 : vector<8x1xf32> to vector<8x8xf32>
    %39 = arith.subf %35, %38 : vector<8x8xf32>
    %40 = math.exp %39 : vector<8x8xf32>
    %cst_34 = arith.constant dense<0.000000e+00> : vector<8xf32>
    %41 = vector.multi_reduction <add>, %40, %cst_34 [1] : vector<8x8xf32> to vector<8xf32>
    %42 = vector.shape_cast %41 : vector<8xf32> to vector<8x1xf32>
    %43 = tpu.reciprocal %42 {approx = true} : vector<8x1xf32> -> vector<8x1xf32>
    %44 = vector.broadcast %43 : vector<8x1xf32> to vector<8x8xf32>
    %45 = arith.mulf %40, %44 : vector<8x8xf32>
    %cst_35 = arith.constant dense<0.000000e+00> : vector<8x64xf32>
    %46 = tpu.matmul %45, %32, %cst_35 {dimension_numbers = #tpu.dot_dimension_numbers<[1], [0], [0], [1], [0, 0, 1, 1], [], []>} : vector<8x8xf32>, vector<8x64xf32>, vector<8x64xf32> -> vector<8x64xf32>
    %c0_36 = arith.constant 0 : index
    %c0_37 = arith.constant 0 : index
    %c0_38 = arith.constant 0 : index
    %c0_39 = arith.constant 0 : index
    %47 = vector.load %arg5[%c0_36, %c0_37, %c0_38, %c0_39] : memref<1x2x64x128xf32, #tpu.memory_space<vmem>>, vector<1x1x64x128xf32>
    %48 = vector.shape_cast %47 : vector<1x1x64x128xf32> to vector<64x128xf32>
    %cst_40 = arith.constant dense<0.000000e+00> : vector<8x128xf32>
    %49 = tpu.matmul %46, %48, %cst_40 {dimension_numbers = #tpu.dot_dimension_numbers<[1], [0], [0], [1], [0, 0, 1, 1], [], []>} : vector<8x64xf32>, vector<64x128xf32>, vector<8x128xf32> -> vector<8x128xf32>
    %c0_41 = arith.constant 0 : index
    %c1 = arith.constant 1 : index
    %c0_42 = arith.constant 0 : index
    %c0_43 = arith.constant 0 : index
    %50 = vector.load %arg3[%c0_41, %c1, %c0_42, %c0_43] : memref<1x6x128x64xf32, #tpu.memory_space<vmem>>, vector<1x1x128x64xf32>
    %51 = vector.shape_cast %50 : vector<1x1x128x64xf32> to vector<128x64xf32>
    %cst_44 = arith.constant dense<0.000000e+00> : vector<8x64xf32>
    %52 = tpu.matmul %4, %51, %cst_44 {dimension_numbers = #tpu.dot_dimension_numbers<[1], [0], [0], [1], [0, 0, 1, 1], [], []>} : vector<8x128xf32>, vector<128x64xf32>, vector<8x64xf32> -> vector<8x64xf32>
    %c0_45 = arith.constant 0 : index
    %c1_46 = arith.constant 1 : index
    %c0_47 = arith.constant 0 : index
    %c0_48 = arith.constant 0 : index
    %53 = vector.load %arg4[%c0_45, %c1_46, %c0_47, %c0_48] : memref<1x6x1x64xf32, #tpu.memory_space<vmem>>, vector<1x1x1x64xf32>
    %54 = vector.shape_cast %53 : vector<1x1x1x64xf32> to vector<1x64xf32>
    %55 = vector.broadcast %54 : vector<1x64xf32> to vector<8x64xf32>
    %56 = arith.addf %52, %55 : vector<8x64xf32>
    %cst_49 = arith.constant 1.250000e-01 : f32
    %57 = vector.broadcast %cst_49 : f32 to vector<8x64xf32>
    %58 = arith.mulf %56, %57 : vector<8x64xf32>
    %c0_50 = arith.constant 0 : index
    %c3 = arith.constant 3 : index
    %c0_51 = arith.constant 0 : index
    %c0_52 = arith.constant 0 : index
    %59 = vector.load %arg3[%c0_50, %c3, %c0_51, %c0_52] : memref<1x6x128x64xf32, #tpu.memory_space<vmem>>, vector<1x1x128x64xf32>
    %60 = vector.shape_cast %59 : vector<1x1x128x64xf32> to vector<128x64xf32>
    %cst_53 = arith.constant dense<0.000000e+00> : vector<8x64xf32>
    %61 = tpu.matmul %4, %60, %cst_53 {dimension_numbers = #tpu.dot_dimension_numbers<[1], [0], [0], [1], [0, 0, 1, 1], [], []>} : vector<8x128xf32>, vector<128x64xf32>, vector<8x64xf32> -> vector<8x64xf32>
    %c0_54 = arith.constant 0 : index
    %c3_55 = arith.constant 3 : index
    %c0_56 = arith.constant 0 : index
    %c0_57 = arith.constant 0 : index
    %62 = vector.load %arg4[%c0_54, %c3_55, %c0_56, %c0_57] : memref<1x6x1x64xf32, #tpu.memory_space<vmem>>, vector<1x1x1x64xf32>
    %63 = vector.shape_cast %62 : vector<1x1x1x64xf32> to vector<1x64xf32>
    %64 = vector.broadcast %63 : vector<1x64xf32> to vector<8x64xf32>
    %65 = arith.addf %61, %64 : vector<8x64xf32>
    %c0_58 = arith.constant 0 : index
    %c5 = arith.constant 5 : index
    %c0_59 = arith.constant 0 : index
    %c0_60 = arith.constant 0 : index
    %66 = vector.load %arg3[%c0_58, %c5, %c0_59, %c0_60] : memref<1x6x128x64xf32, #tpu.memory_space<vmem>>, vector<1x1x128x64xf32>
    %67 = vector.shape_cast %66 : vector<1x1x128x64xf32> to vector<128x64xf32>
    %cst_61 = arith.constant dense<0.000000e+00> : vector<8x64xf32>
    %68 = tpu.matmul %4, %67, %cst_61 {dimension_numbers = #tpu.dot_dimension_numbers<[1], [0], [0], [1], [0, 0, 1, 1], [], []>} : vector<8x128xf32>, vector<128x64xf32>, vector<8x64xf32> -> vector<8x64xf32>
    %c0_62 = arith.constant 0 : index
    %c5_63 = arith.constant 5 : index
    %c0_64 = arith.constant 0 : index
    %c0_65 = arith.constant 0 : index
    %69 = vector.load %arg4[%c0_62, %c5_63, %c0_64, %c0_65] : memref<1x6x1x64xf32, #tpu.memory_space<vmem>>, vector<1x1x1x64xf32>
    %70 = vector.shape_cast %69 : vector<1x1x1x64xf32> to vector<1x64xf32>
    %71 = vector.broadcast %70 : vector<1x64xf32> to vector<8x64xf32>
    %72 = arith.addf %68, %71 : vector<8x64xf32>
    %cst_66 = arith.constant dense<0.000000e+00> : vector<8x8xf32>
    %73 = tpu.matmul %58, %65, %cst_66 {dimension_numbers = #tpu.dot_dimension_numbers<[1], [1], [0], [0], [0, 0, 1, 0], [], []>} : vector<8x64xf32>, vector<8x64xf32>, vector<8x8xf32> -> vector<8x8xf32>
    %cst_67 = arith.constant -1.000000e+30 : f32
    %74 = vector.broadcast %cst_67 : f32 to vector<8x8xf32>
    %75 = arith.select %9, %73, %74 : vector<8x8xi1>, vector<8x8xf32>
    %cst_68 = arith.constant dense<0xFF800000> : vector<8xf32>
    %76 = vector.multi_reduction <maximumf>, %75, %cst_68 [1] : vector<8x8xf32> to vector<8xf32>
    %77 = vector.shape_cast %76 : vector<8xf32> to vector<8x1xf32>
    %78 = vector.broadcast %77 : vector<8x1xf32> to vector<8x8xf32>
    %79 = arith.subf %75, %78 : vector<8x8xf32>
    %80 = math.exp %79 : vector<8x8xf32>
    %cst_69 = arith.constant dense<0.000000e+00> : vector<8xf32>
    %81 = vector.multi_reduction <add>, %80, %cst_69 [1] : vector<8x8xf32> to vector<8xf32>
    %82 = vector.shape_cast %81 : vector<8xf32> to vector<8x1xf32>
    %83 = tpu.reciprocal %82 {approx = true} : vector<8x1xf32> -> vector<8x1xf32>
    %84 = vector.broadcast %83 : vector<8x1xf32> to vector<8x8xf32>
    %85 = arith.mulf %80, %84 : vector<8x8xf32>
    %cst_70 = arith.constant dense<0.000000e+00> : vector<8x64xf32>
    %86 = tpu.matmul %85, %72, %cst_70 {dimension_numbers = #tpu.dot_dimension_numbers<[1], [0], [0], [1], [0, 0, 1, 1], [], []>} : vector<8x8xf32>, vector<8x64xf32>, vector<8x64xf32> -> vector<8x64xf32>
    %c0_71 = arith.constant 0 : index
    %c1_72 = arith.constant 1 : index
    %c0_73 = arith.constant 0 : index
    %c0_74 = arith.constant 0 : index
    %87 = vector.load %arg5[%c0_71, %c1_72, %c0_73, %c0_74] : memref<1x2x64x128xf32, #tpu.memory_space<vmem>>, vector<1x1x64x128xf32>
    %88 = vector.shape_cast %87 : vector<1x1x64x128xf32> to vector<64x128xf32>
    %cst_75 = arith.constant dense<0.000000e+00> : vector<8x128xf32>
    %89 = tpu.matmul %86, %88, %cst_75 {dimension_numbers = #tpu.dot_dimension_numbers<[1], [0], [0], [1], [0, 0, 1, 1], [], []>} : vector<8x64xf32>, vector<64x128xf32>, vector<8x128xf32> -> vector<8x128xf32>
    %90 = arith.addf %49, %89 : vector<8x128xf32>
    %91 = vector.broadcast %6 : vector<1x128xf32> to vector<8x128xf32>
    %92 = arith.addf %90, %91 : vector<8x128xf32>
    %93 = arith.addf %4, %92 : vector<8x128xf32>
    %c0_76 = arith.constant 0 : index
    %c0_77 = arith.constant 0 : index
    %c0_78 = arith.constant 0 : index
    %94 = vector.load %arg7[%c0_76, %c0_77, %c0_78] : memref<1x1x128xf32, #tpu.memory_space<vmem>>, vector<1x1x128xf32>
    %95 = vector.shape_cast %94 : vector<1x1x128xf32> to vector<1x128xf32>
    %c0_79 = arith.constant 0 : index
    %c0_80 = arith.constant 0 : index
    %c0_81 = arith.constant 0 : index
    %96 = vector.load %arg8[%c0_79, %c0_80, %c0_81] : memref<1x1x128xf32, #tpu.memory_space<vmem>>, vector<1x1x128xf32>
    %97 = vector.shape_cast %96 : vector<1x1x128xf32> to vector<1x128xf32>
    %cst_82 = arith.constant dense<0.000000e+00> : vector<8xf32>
    %98 = vector.multi_reduction <add>, %93, %cst_82 [1] : vector<8x128xf32> to vector<8xf32>
    %99 = vector.shape_cast %98 : vector<8xf32> to vector<8x1xf32>
    %cst_83 = arith.constant 1.280000e+02 : f32
    %100 = vector.broadcast %cst_83 : f32 to vector<8x1xf32>
    %101 = arith.divf %99, %100 : vector<8x1xf32>
    %102 = vector.broadcast %101 : vector<8x1xf32> to vector<8x128xf32>
    %103 = arith.subf %93, %102 : vector<8x128xf32>
    %104 = arith.mulf %103, %103 : vector<8x128xf32>
    %cst_84 = arith.constant dense<0.000000e+00> : vector<8xf32>
    %105 = vector.multi_reduction <add>, %104, %cst_84 [1] : vector<8x128xf32> to vector<8xf32>
    %106 = vector.shape_cast %105 : vector<8xf32> to vector<8x1xf32>
    %cst_85 = arith.constant 1.280000e+02 : f32
    %107 = vector.broadcast %cst_85 : f32 to vector<8x1xf32>
    %108 = arith.divf %106, %107 : vector<8x1xf32>
    %cst_86 = arith.constant 9.99999974E-6 : f32
    %109 = vector.broadcast %cst_86 : f32 to vector<8x1xf32>
    %110 = arith.addf %108, %109 : vector<8x1xf32>
    %111 = math.rsqrt %110 : vector<8x1xf32>
    %112 = vector.broadcast %111 : vector<8x1xf32> to vector<8x128xf32>
    %113 = arith.mulf %103, %112 : vector<8x128xf32>
    %114 = vector.broadcast %95 : vector<1x128xf32> to vector<8x128xf32>
    %115 = arith.mulf %113, %114 : vector<8x128xf32>
    %116 = vector.broadcast %97 : vector<1x128xf32> to vector<8x128xf32>
    %117 = arith.addf %115, %116 : vector<8x128xf32>
    %c0_87 = arith.constant 0 : index
    %c0_88 = arith.constant 0 : index
    %c0_89 = arith.constant 0 : index
    %118 = vector.load %arg9[%c0_87, %c0_88, %c0_89] : memref<1x128x256xf32, #tpu.memory_space<vmem>>, vector<1x128x256xf32>
    %119 = vector.shape_cast %118 : vector<1x128x256xf32> to vector<128x256xf32>
    %cst_90 = arith.constant dense<0.000000e+00> : vector<8x256xf32>
    %120 = tpu.matmul %117, %119, %cst_90 {dimension_numbers = #tpu.dot_dimension_numbers<[1], [0], [0], [1], [0, 0, 1, 1], [], []>} : vector<8x128xf32>, vector<128x256xf32>, vector<8x256xf32> -> vector<8x256xf32>
    %c0_91 = arith.constant 0 : index
    %c0_92 = arith.constant 0 : index
    %c0_93 = arith.constant 0 : index
    %121 = vector.load %arg10[%c0_91, %c0_92, %c0_93] : memref<1x1x256xf32, #tpu.memory_space<vmem>>, vector<1x1x256xf32>
    %122 = vector.shape_cast %121 : vector<1x1x256xf32> to vector<1x256xf32>
    %123 = vector.broadcast %122 : vector<1x256xf32> to vector<8x256xf32>
    %124 = arith.addf %120, %123 : vector<8x256xf32>
    %cst_94 = arith.constant 0.000000e+00 : f32
    %125 = vector.broadcast %cst_94 : f32 to vector<8x256xf32>
    %126 = arith.maximumf %124, %125 : vector<8x256xf32>
    %c0_95 = arith.constant 0 : index
    %c0_96 = arith.constant 0 : index
    %c0_97 = arith.constant 0 : index
    %127 = vector.load %arg11[%c0_95, %c0_96, %c0_97] : memref<1x256x128xf32, #tpu.memory_space<vmem>>, vector<1x256x128xf32>
    %128 = vector.shape_cast %127 : vector<1x256x128xf32> to vector<256x128xf32>
    %cst_98 = arith.constant dense<0.000000e+00> : vector<8x128xf32>
    %129 = tpu.matmul %126, %128, %cst_98 {dimension_numbers = #tpu.dot_dimension_numbers<[1], [0], [0], [1], [0, 0, 1, 1], [], []>} : vector<8x256xf32>, vector<256x128xf32>, vector<8x128xf32> -> vector<8x128xf32>
    %c0_99 = arith.constant 0 : index
    %c0_100 = arith.constant 0 : index
    %c0_101 = arith.constant 0 : index
    %130 = vector.load %arg12[%c0_99, %c0_100, %c0_101] : memref<1x1x128xf32, #tpu.memory_space<vmem>>, vector<1x1x128xf32>
    %131 = vector.shape_cast %130 : vector<1x1x128xf32> to vector<1x128xf32>
    %132 = vector.broadcast %131 : vector<1x128xf32> to vector<8x128xf32>
    %133 = arith.addf %129, %132 : vector<8x128xf32>
    %134 = arith.addf %117, %133 : vector<8x128xf32>
    %c0_102 = arith.constant 0 : index
    %c0_103 = arith.constant 0 : index
    %c0_104 = arith.constant 0 : index
    %135 = vector.load %arg13[%c0_102, %c0_103, %c0_104] : memref<1x1x128xf32, #tpu.memory_space<vmem>>, vector<1x1x128xf32>
    %136 = vector.shape_cast %135 : vector<1x1x128xf32> to vector<1x128xf32>
    %c0_105 = arith.constant 0 : index
    %c0_106 = arith.constant 0 : index
    %c0_107 = arith.constant 0 : index
    %137 = vector.load %arg14[%c0_105, %c0_106, %c0_107] : memref<1x1x128xf32, #tpu.memory_space<vmem>>, vector<1x1x128xf32>
    %138 = vector.shape_cast %137 : vector<1x1x128xf32> to vector<1x128xf32>
    %cst_108 = arith.constant dense<0.000000e+00> : vector<8xf32>
    %139 = vector.multi_reduction <add>, %134, %cst_108 [1] : vector<8x128xf32> to vector<8xf32>
    %140 = vector.shape_cast %139 : vector<8xf32> to vector<8x1xf32>
    %cst_109 = arith.constant 1.280000e+02 : f32
    %141 = vector.broadcast %cst_109 : f32 to vector<8x1xf32>
    %142 = arith.divf %140, %141 : vector<8x1xf32>
    %143 = vector.broadcast %142 : vector<8x1xf32> to vector<8x128xf32>
    %144 = arith.subf %134, %143 : vector<8x128xf32>
    %145 = arith.mulf %144, %144 : vector<8x128xf32>
    %cst_110 = arith.constant dense<0.000000e+00> : vector<8xf32>
    %146 = vector.multi_reduction <add>, %145, %cst_110 [1] : vector<8x128xf32> to vector<8xf32>
    %147 = vector.shape_cast %146 : vector<8xf32> to vector<8x1xf32>
    %cst_111 = arith.constant 1.280000e+02 : f32
    %148 = vector.broadcast %cst_111 : f32 to vector<8x1xf32>
    %149 = arith.divf %147, %148 : vector<8x1xf32>
    %cst_112 = arith.constant 9.99999974E-6 : f32
    %150 = vector.broadcast %cst_112 : f32 to vector<8x1xf32>
    %151 = arith.addf %149, %150 : vector<8x1xf32>
    %152 = math.rsqrt %151 : vector<8x1xf32>
    %153 = vector.broadcast %152 : vector<8x1xf32> to vector<8x128xf32>
    %154 = arith.mulf %144, %153 : vector<8x128xf32>
    %155 = vector.broadcast %136 : vector<1x128xf32> to vector<8x128xf32>
    %156 = arith.mulf %154, %155 : vector<8x128xf32>
    %157 = vector.broadcast %138 : vector<1x128xf32> to vector<8x128xf32>
    %158 = arith.addf %156, %157 : vector<8x128xf32>
    %c0_113 = arith.constant 0 : index
    %c0_114 = arith.constant 0 : index
    %c0_115 = arith.constant 0 : index
    %159 = vector.load %arg15[%c0_113, %c0_114, %c0_115] : memref<1x8x128xf32, #tpu.memory_space<vmem>>, vector<1x8x128xf32>
    %160 = vector.shape_cast %159 : vector<1x8x128xf32> to vector<8x128xf32>
    %161 = vector.shape_cast %158 : vector<8x128xf32> to vector<1x8x128xf32>
    tpu.vector_store %arg15[%c0_113, %c0_114, %c0_115], %161 {strides = array<i32>} : memref<1x8x128xf32, #tpu.memory_space<vmem>>, vector<1x8x128xf32>,
    return
  }
  func.func @transform_0(%arg0: i32, %arg1: i32) -> (i32, i32, i32) {
    %c0_i32 = arith.constant 0 : i32
    %c0_i32_0 = arith.constant 0 : i32
    %c0_i32_1 = arith.constant 0 : i32
    return %arg0, %c0_i32, %c0_i32_0 : i32, i32, i32
  }
  func.func @transform_1(%arg0: i32, %arg1: i32) -> (i32, i32, i32, i32) {
    %c0_i32 = arith.constant 0 : i32
    %c0_i32_0 = arith.constant 0 : i32
    %c0_i32_1 = arith.constant 0 : i32
    %c0_i32_2 = arith.constant 0 : i32
    return %arg1, %c0_i32, %c0_i32_0, %c0_i32_1 : i32, i32, i32, i32
  }
  func.func @transform_2(%arg0: i32, %arg1: i32) -> (i32, i32, i32, i32) {
    %c0_i32 = arith.constant 0 : i32
    %c0_i32_0 = arith.constant 0 : i32
    %c0_i32_1 = arith.constant 0 : i32
    %c0_i32_2 = arith.constant 0 : i32
    return %arg1, %c0_i32, %c0_i32_0, %c0_i32_1 : i32, i32, i32, i32
  }
  func.func @transform_3(%arg0: i32, %arg1: i32) -> (i32, i32, i32, i32) {
    %c0_i32 = arith.constant 0 : i32
    %c0_i32_0 = arith.constant 0 : i32
    %c0_i32_1 = arith.constant 0 : i32
    %c0_i32_2 = arith.constant 0 : i32
    return %arg1, %c0_i32, %c0_i32_0, %c0_i32_1 : i32, i32, i32, i32
  }
  func.func @transform_4(%arg0: i32, %arg1: i32) -> (i32, i32, i32) {
    %c0_i32 = arith.constant 0 : i32
    %c0_i32_0 = arith.constant 0 : i32
    %c0_i32_1 = arith.constant 0 : i32
    return %arg1, %c0_i32, %c0_i32_0 : i32, i32, i32
  }
  func.func @transform_5(%arg0: i32, %arg1: i32) -> (i32, i32, i32) {
    %c0_i32 = arith.constant 0 : i32
    %c0_i32_0 = arith.constant 0 : i32
    %c0_i32_1 = arith.constant 0 : i32
    return %arg1, %c0_i32, %c0_i32_0 : i32, i32, i32
  }
  func.func @transform_6(%arg0: i32, %arg1: i32) -> (i32, i32, i32) {
    %c0_i32 = arith.constant 0 : i32
    %c0_i32_0 = arith.constant 0 : i32
    %c0_i32_1 = arith.constant 0 : i32
    return %arg1, %c0_i32, %c0_i32_0 : i32, i32, i32
  }
  func.func @transform_7(%arg0: i32, %arg1: i32) -> (i32, i32, i32) {
    %c0_i32 = arith.constant 0 : i32
    %c0_i32_0 = arith.constant 0 : i32
    %c0_i32_1 = arith.constant 0 : i32
    return %arg1, %c0_i32, %c0_i32_0 : i32, i32, i32
  }
  func.func @transform_8(%arg0: i32, %arg1: i32) -> (i32, i32, i32) {
    %c0_i32 = arith.constant 0 : i32
    %c0_i32_0 = arith.constant 0 : i32
    %c0_i32_1 = arith.constant 0 : i32
    return %arg1, %c0_i32, %c0_i32_0 : i32, i32, i32
  }
  func.func @transform_9(%arg0: i32, %arg1: i32) -> (i32, i32, i32) {
    %c0_i32 = arith.constant 0 : i32
    %c0_i32_0 = arith.constant 0 : i32
    %c0_i32_1 = arith.constant 0 : i32
    return %arg1, %c0_i32, %c0_i32_0 : i32, i32, i32
  }
  func.func @transform_10(%arg0: i32, %arg1: i32) -> (i32, i32, i32) {
    %c0_i32 = arith.constant 0 : i32
    %c0_i32_0 = arith.constant 0 : i32
    %c0_i32_1 = arith.constant 0 : i32
    return %arg1, %c0_i32, %c0_i32_0 : i32, i32, i32
  }
  func.func @transform_11(%arg0: i32, %arg1: i32) -> (i32, i32, i32) {
    %c0_i32 = arith.constant 0 : i32
    %c0_i32_0 = arith.constant 0 : i32
    %c0_i32_1 = arith.constant 0 : i32
    return %arg1, %c0_i32, %c0_i32_0 : i32, i32, i32
  }
  func.func @transform_12(%arg0: i32, %arg1: i32) -> (i32, i32, i32) {
    %c0_i32 = arith.constant 0 : i32
    %c0_i32_0 = arith.constant 0 : i32
    %c0_i32_1 = arith.constant 0 : i32
    return %arg1, %c0_i32, %c0_i32_0 : i32, i32, i32
  }
  func.func @transform_13(%arg0: i32, %arg1: i32) -> (i32, i32, i32) {
    %c0_i32 = arith.constant 0 : i32
    %c0_i32_0 = arith.constant 0 : i32
    %c0_i32_1 = arith.constant 0 : i32
    return %arg0, %c0_i32, %c0_i32_0 : i32, i32, i32
  }
}

module attributes {stable_mosaic.version = 11 : i64} {
  func.func @_decoder_layer_head_kernel(%arg0: i32, %arg1: memref<1x8x64xf32, #tpu.memory_space<vmem>>, %arg2: memref<1x8x64xf32, #tpu.memory_space<vmem>>, %arg3: memref<6x64x32xf32, #tpu.memory_space<vmem>>, %arg4: memref<6x1x32xf32, #tpu.memory_space<vmem>>, %arg5: memref<2x32x64xf32, #tpu.memory_space<vmem>>, %arg6: memref<1x64xf32, #tpu.memory_space<vmem>>, %arg7: memref<1x64xf32, #tpu.memory_space<vmem>>, %arg8: memref<1x64xf32, #tpu.memory_space<vmem>>, %arg9: memref<6x64x32xf32, #tpu.memory_space<vmem>>, %arg10: memref<6x1x32xf32, #tpu.memory_space<vmem>>, %arg11: memref<2x32x64xf32, #tpu.memory_space<vmem>>, %arg12: memref<1x64xf32, #tpu.memory_space<vmem>>, %arg13: memref<1x64xf32, #tpu.memory_space<vmem>>, %arg14: memref<1x64xf32, #tpu.memory_space<vmem>>, %arg15: memref<64x32xf32, #tpu.memory_space<vmem>>, %arg16: memref<1x32xf32, #tpu.memory_space<vmem>>, %arg17: memref<32x64xf32, #tpu.memory_space<vmem>>, %arg18: memref<1x64xf32, #tpu.memory_space<vmem>>, %arg19: memref<1x64xf32, #tpu.memory_space<vmem>>, %arg20: memref<1x64xf32, #tpu.memory_space<vmem>>, %arg21: memref<64x128xf32, #tpu.memory_space<vmem>>, %arg22: memref<1x128xf32, #tpu.memory_space<vmem>>, %arg23: memref<1x8x128xf32, #tpu.memory_space<vmem>>) attributes {dimension_semantics = [#tpu.dimension_semantics<parallel>], iteration_bounds = array<i64: 2>, scalar_prefetch = 0 : i64, scratch_operands = 0 : i64, tpu.core_type = #tpu.core_type<tc>, window_params = [{transform_indices = @transform_0, window_bounds = array<i64: 1, 8, 64>}, {transform_indices = @transform_1, window_bounds = array<i64: 1, 8, 64>}, {pipeline_mode = #tpu.pipeline_mode<synchronous>, transform_indices = @transform_2, window_bounds = array<i64: 6, 64, 32>}, {pipeline_mode = #tpu.pipeline_mode<synchronous>, transform_indices = @transform_3, window_bounds = array<i64: 6, 1, 32>}, {pipeline_mode = #tpu.pipeline_mode<synchronous>, transform_indices = @transform_4, window_bounds = array<i64: 2, 32, 64>}, {pipeline_mode = #tpu.pipeline_mode<synchronous>, transform_indices = @transform_5, window_bounds = array<i64: 1, 64>}, {pipeline_mode = #tpu.pipeline_mode<synchronous>, transform_indices = @transform_6, window_bounds = array<i64: 1, 64>}, {pipeline_mode = #tpu.pipeline_mode<synchronous>, transform_indices = @transform_7, window_bounds = array<i64: 1, 64>}, {pipeline_mode = #tpu.pipeline_mode<synchronous>, transform_indices = @transform_8, window_bounds = array<i64: 6, 64, 32>}, {pipeline_mode = #tpu.pipeline_mode<synchronous>, transform_indices = @transform_9, window_bounds = array<i64: 6, 1, 32>}, {pipeline_mode = #tpu.pipeline_mode<synchronous>, transform_indices = @transform_10, window_bounds = array<i64: 2, 32, 64>}, {pipeline_mode = #tpu.pipeline_mode<synchronous>, transform_indices = @transform_11, window_bounds = array<i64: 1, 64>}, {pipeline_mode = #tpu.pipeline_mode<synchronous>, transform_indices = @transform_12, window_bounds = array<i64: 1, 64>}, {pipeline_mode = #tpu.pipeline_mode<synchronous>, transform_indices = @transform_13, window_bounds = array<i64: 1, 64>}, {pipeline_mode = #tpu.pipeline_mode<synchronous>, transform_indices = @transform_14, window_bounds = array<i64: 64, 32>}, {pipeline_mode = #tpu.pipeline_mode<synchronous>, transform_indices = @transform_15, window_bounds = array<i64: 1, 32>}, {pipeline_mode = #tpu.pipeline_mode<synchronous>, transform_indices = @transform_16, window_bounds = array<i64: 32, 64>}, {pipeline_mode = #tpu.pipeline_mode<synchronous>, transform_indices = @transform_17, window_bounds = array<i64: 1, 64>}, {pipeline_mode = #tpu.pipeline_mode<synchronous>, transform_indices = @transform_18, window_bounds = array<i64: 1, 64>}, {pipeline_mode = #tpu.pipeline_mode<synchronous>, transform_indices = @transform_19, window_bounds = array<i64: 1, 64>}, {pipeline_mode = #tpu.pipeline_mode<synchronous>, transform_indices = @transform_20, window_bounds = array<i64: 64, 128>}, {pipeline_mode = #tpu.pipeline_mode<synchronous>, transform_indices = @transform_21, window_bounds = array<i64: 1, 128>}, {transform_indices = @transform_22, window_bounds = array<i64: 1, 8, 128>}]} {
    %c0 = arith.constant 0 : index
    %c0_0 = arith.constant 0 : index
    %c0_1 = arith.constant 0 : index
    %0 = vector.load %arg1[%c0, %c0_0, %c0_1] : memref<1x8x64xf32, #tpu.memory_space<vmem>>, vector<1x8x64xf32>
    %1 = vector.shape_cast %0 : vector<1x8x64xf32> to vector<8x64xf32>
    %c0_2 = arith.constant 0 : index
    %c0_3 = arith.constant 0 : index
    %c0_4 = arith.constant 0 : index
    %2 = vector.load %arg2[%c0_2, %c0_3, %c0_4] : memref<1x8x64xf32, #tpu.memory_space<vmem>>, vector<1x8x64xf32>
    %3 = vector.shape_cast %2 : vector<1x8x64xf32> to vector<8x64xf32>
    %c0_5 = arith.constant 0 : index
    %c0_6 = arith.constant 0 : index
    %4 = vector.load %arg6[%c0_5, %c0_6] : memref<1x64xf32, #tpu.memory_space<vmem>>, vector<1x64xf32>
    %5 = tpu.iota {dimensions = array<i32: 0>} : vector<8x8xi32>
    %6 = tpu.iota {dimensions = array<i32: 1>} : vector<8x8xi32>
    %7 = arith.cmpi sle, %6, %5 : vector<8x8xi32>
    %c0_7 = arith.constant 0 : index
    %c0_8 = arith.constant 0 : index
    %c0_9 = arith.constant 0 : index
    %8 = vector.load %arg3[%c0_7, %c0_8, %c0_9] : memref<6x64x32xf32, #tpu.memory_space<vmem>>, vector<1x64x32xf32>
    %9 = vector.shape_cast %8 : vector<1x64x32xf32> to vector<64x32xf32>
    %cst = arith.constant dense<0.000000e+00> : vector<8x32xf32>
    %10 = tpu.matmul %1, %9, %cst {dimension_numbers = #tpu.dot_dimension_numbers<[1], [0], [0], [1], [0, 0, 1, 1], [], []>} : vector<8x64xf32>, vector<64x32xf32>, vector<8x32xf32> -> vector<8x32xf32>
    %c0_10 = arith.constant 0 : index
    %c0_11 = arith.constant 0 : index
    %c0_12 = arith.constant 0 : index
    %11 = vector.load %arg4[%c0_10, %c0_11, %c0_12] : memref<6x1x32xf32, #tpu.memory_space<vmem>>, vector<1x1x32xf32>
    %12 = vector.shape_cast %11 : vector<1x1x32xf32> to vector<1x32xf32>
    %13 = vector.broadcast %12 : vector<1x32xf32> to vector<8x32xf32>
    %14 = arith.addf %10, %13 : vector<8x32xf32>
    %cst_13 = arith.constant 0.176776692 : f32
    %15 = vector.broadcast %cst_13 : f32 to vector<8x32xf32>
    %16 = arith.mulf %14, %15 : vector<8x32xf32>
    %c2 = arith.constant 2 : index
    %c0_14 = arith.constant 0 : index
    %c0_15 = arith.constant 0 : index
    %17 = vector.load %arg3[%c2, %c0_14, %c0_15] : memref<6x64x32xf32, #tpu.memory_space<vmem>>, vector<1x64x32xf32>
    %18 = vector.shape_cast %17 : vector<1x64x32xf32> to vector<64x32xf32>
    %cst_16 = arith.constant dense<0.000000e+00> : vector<8x32xf32>
    %19 = tpu.matmul %1, %18, %cst_16 {dimension_numbers = #tpu.dot_dimension_numbers<[1], [0], [0], [1], [0, 0, 1, 1], [], []>} : vector<8x64xf32>, vector<64x32xf32>, vector<8x32xf32> -> vector<8x32xf32>
    %c2_17 = arith.constant 2 : index
    %c0_18 = arith.constant 0 : index
    %c0_19 = arith.constant 0 : index
    %20 = vector.load %arg4[%c2_17, %c0_18, %c0_19] : memref<6x1x32xf32, #tpu.memory_space<vmem>>, vector<1x1x32xf32>
    %21 = vector.shape_cast %20 : vector<1x1x32xf32> to vector<1x32xf32>
    %22 = vector.broadcast %21 : vector<1x32xf32> to vector<8x32xf32>
    %23 = arith.addf %19, %22 : vector<8x32xf32>
    %c4 = arith.constant 4 : index
    %c0_20 = arith.constant 0 : index
    %c0_21 = arith.constant 0 : index
    %24 = vector.load %arg3[%c4, %c0_20, %c0_21] : memref<6x64x32xf32, #tpu.memory_space<vmem>>, vector<1x64x32xf32>
    %25 = vector.shape_cast %24 : vector<1x64x32xf32> to vector<64x32xf32>
    %cst_22 = arith.constant dense<0.000000e+00> : vector<8x32xf32>
    %26 = tpu.matmul %1, %25, %cst_22 {dimension_numbers = #tpu.dot_dimension_numbers<[1], [0], [0], [1], [0, 0, 1, 1], [], []>} : vector<8x64xf32>, vector<64x32xf32>, vector<8x32xf32> -> vector<8x32xf32>
    %c4_23 = arith.constant 4 : index
    %c0_24 = arith.constant 0 : index
    %c0_25 = arith.constant 0 : index
    %27 = vector.load %arg4[%c4_23, %c0_24, %c0_25] : memref<6x1x32xf32, #tpu.memory_space<vmem>>, vector<1x1x32xf32>
    %28 = vector.shape_cast %27 : vector<1x1x32xf32> to vector<1x32xf32>
    %29 = vector.broadcast %28 : vector<1x32xf32> to vector<8x32xf32>
    %30 = arith.addf %26, %29 : vector<8x32xf32>
    %cst_26 = arith.constant dense<0.000000e+00> : vector<8x8xf32>
    %31 = tpu.matmul %16, %23, %cst_26 {dimension_numbers = #tpu.dot_dimension_numbers<[1], [1], [0], [0], [0, 0, 1, 0], [], []>} : vector<8x32xf32>, vector<8x32xf32>, vector<8x8xf32> -> vector<8x8xf32>
    %cst_27 = arith.constant -1.000000e+30 : f32
    %32 = vector.broadcast %cst_27 : f32 to vector<8x8xf32>
    %33 = arith.select %7, %31, %32 : vector<8x8xi1>, vector<8x8xf32>
    %cst_28 = arith.constant dense<0xFF800000> : vector<8xf32>
    %34 = vector.multi_reduction <maximumf>, %33, %cst_28 [1] : vector<8x8xf32> to vector<8xf32>
    %35 = vector.shape_cast %34 : vector<8xf32> to vector<8x1xf32>
    %36 = vector.broadcast %35 : vector<8x1xf32> to vector<8x8xf32>
    %37 = arith.subf %33, %36 : vector<8x8xf32>
    %38 = math.exp %37 : vector<8x8xf32>
    %cst_29 = arith.constant dense<0.000000e+00> : vector<8xf32>
    %39 = vector.multi_reduction <add>, %38, %cst_29 [1] : vector<8x8xf32> to vector<8xf32>
    %40 = vector.shape_cast %39 : vector<8xf32> to vector<8x1xf32>
    %41 = tpu.reciprocal %40 {approx = true} : vector<8x1xf32> -> vector<8x1xf32>
    %42 = vector.broadcast %41 : vector<8x1xf32> to vector<8x8xf32>
    %43 = arith.mulf %38, %42 : vector<8x8xf32>
    %cst_30 = arith.constant dense<0.000000e+00> : vector<8x32xf32>
    %44 = tpu.matmul %43, %30, %cst_30 {dimension_numbers = #tpu.dot_dimension_numbers<[1], [0], [0], [1], [0, 0, 1, 1], [], []>} : vector<8x8xf32>, vector<8x32xf32>, vector<8x32xf32> -> vector<8x32xf32>
    %c0_31 = arith.constant 0 : index
    %c0_32 = arith.constant 0 : index
    %c0_33 = arith.constant 0 : index
    %45 = vector.load %arg5[%c0_31, %c0_32, %c0_33] : memref<2x32x64xf32, #tpu.memory_space<vmem>>, vector<1x32x64xf32>
    %46 = vector.shape_cast %45 : vector<1x32x64xf32> to vector<32x64xf32>
    %cst_34 = arith.constant dense<0.000000e+00> : vector<8x64xf32>
    %47 = tpu.matmul %44, %46, %cst_34 {dimension_numbers = #tpu.dot_dimension_numbers<[1], [0], [0], [1], [0, 0, 1, 1], [], []>} : vector<8x32xf32>, vector<32x64xf32>, vector<8x64xf32> -> vector<8x64xf32>
    %c1 = arith.constant 1 : index
    %c0_35 = arith.constant 0 : index
    %c0_36 = arith.constant 0 : index
    %48 = vector.load %arg3[%c1, %c0_35, %c0_36] : memref<6x64x32xf32, #tpu.memory_space<vmem>>, vector<1x64x32xf32>
    %49 = vector.shape_cast %48 : vector<1x64x32xf32> to vector<64x32xf32>
    %cst_37 = arith.constant dense<0.000000e+00> : vector<8x32xf32>
    %50 = tpu.matmul %1, %49, %cst_37 {dimension_numbers = #tpu.dot_dimension_numbers<[1], [0], [0], [1], [0, 0, 1, 1], [], []>} : vector<8x64xf32>, vector<64x32xf32>, vector<8x32xf32> -> vector<8x32xf32>
    %c1_38 = arith.constant 1 : index
    %c0_39 = arith.constant 0 : index
    %c0_40 = arith.constant 0 : index
    %51 = vector.load %arg4[%c1_38, %c0_39, %c0_40] : memref<6x1x32xf32, #tpu.memory_space<vmem>>, vector<1x1x32xf32>
    %52 = vector.shape_cast %51 : vector<1x1x32xf32> to vector<1x32xf32>
    %53 = vector.broadcast %52 : vector<1x32xf32> to vector<8x32xf32>
    %54 = arith.addf %50, %53 : vector<8x32xf32>
    %cst_41 = arith.constant 0.176776692 : f32
    %55 = vector.broadcast %cst_41 : f32 to vector<8x32xf32>
    %56 = arith.mulf %54, %55 : vector<8x32xf32>
    %c3 = arith.constant 3 : index
    %c0_42 = arith.constant 0 : index
    %c0_43 = arith.constant 0 : index
    %57 = vector.load %arg3[%c3, %c0_42, %c0_43] : memref<6x64x32xf32, #tpu.memory_space<vmem>>, vector<1x64x32xf32>
    %58 = vector.shape_cast %57 : vector<1x64x32xf32> to vector<64x32xf32>
    %cst_44 = arith.constant dense<0.000000e+00> : vector<8x32xf32>
    %59 = tpu.matmul %1, %58, %cst_44 {dimension_numbers = #tpu.dot_dimension_numbers<[1], [0], [0], [1], [0, 0, 1, 1], [], []>} : vector<8x64xf32>, vector<64x32xf32>, vector<8x32xf32> -> vector<8x32xf32>
    %c3_45 = arith.constant 3 : index
    %c0_46 = arith.constant 0 : index
    %c0_47 = arith.constant 0 : index
    %60 = vector.load %arg4[%c3_45, %c0_46, %c0_47] : memref<6x1x32xf32, #tpu.memory_space<vmem>>, vector<1x1x32xf32>
    %61 = vector.shape_cast %60 : vector<1x1x32xf32> to vector<1x32xf32>
    %62 = vector.broadcast %61 : vector<1x32xf32> to vector<8x32xf32>
    %63 = arith.addf %59, %62 : vector<8x32xf32>
    %c5 = arith.constant 5 : index
    %c0_48 = arith.constant 0 : index
    %c0_49 = arith.constant 0 : index
    %64 = vector.load %arg3[%c5, %c0_48, %c0_49] : memref<6x64x32xf32, #tpu.memory_space<vmem>>, vector<1x64x32xf32>
    %65 = vector.shape_cast %64 : vector<1x64x32xf32> to vector<64x32xf32>
    %cst_50 = arith.constant dense<0.000000e+00> : vector<8x32xf32>
    %66 = tpu.matmul %1, %65, %cst_50 {dimension_numbers = #tpu.dot_dimension_numbers<[1], [0], [0], [1], [0, 0, 1, 1], [], []>} : vector<8x64xf32>, vector<64x32xf32>, vector<8x32xf32> -> vector<8x32xf32>
    %c5_51 = arith.constant 5 : index
    %c0_52 = arith.constant 0 : index
    %c0_53 = arith.constant 0 : index
    %67 = vector.load %arg4[%c5_51, %c0_52, %c0_53] : memref<6x1x32xf32, #tpu.memory_space<vmem>>, vector<1x1x32xf32>
    %68 = vector.shape_cast %67 : vector<1x1x32xf32> to vector<1x32xf32>
    %69 = vector.broadcast %68 : vector<1x32xf32> to vector<8x32xf32>
    %70 = arith.addf %66, %69 : vector<8x32xf32>
    %cst_54 = arith.constant dense<0.000000e+00> : vector<8x8xf32>
    %71 = tpu.matmul %56, %63, %cst_54 {dimension_numbers = #tpu.dot_dimension_numbers<[1], [1], [0], [0], [0, 0, 1, 0], [], []>} : vector<8x32xf32>, vector<8x32xf32>, vector<8x8xf32> -> vector<8x8xf32>
    %cst_55 = arith.constant -1.000000e+30 : f32
    %72 = vector.broadcast %cst_55 : f32 to vector<8x8xf32>
    %73 = arith.select %7, %71, %72 : vector<8x8xi1>, vector<8x8xf32>
    %cst_56 = arith.constant dense<0xFF800000> : vector<8xf32>
    %74 = vector.multi_reduction <maximumf>, %73, %cst_56 [1] : vector<8x8xf32> to vector<8xf32>
    %75 = vector.shape_cast %74 : vector<8xf32> to vector<8x1xf32>
    %76 = vector.broadcast %75 : vector<8x1xf32> to vector<8x8xf32>
    %77 = arith.subf %73, %76 : vector<8x8xf32>
    %78 = math.exp %77 : vector<8x8xf32>
    %cst_57 = arith.constant dense<0.000000e+00> : vector<8xf32>
    %79 = vector.multi_reduction <add>, %78, %cst_57 [1] : vector<8x8xf32> to vector<8xf32>
    %80 = vector.shape_cast %79 : vector<8xf32> to vector<8x1xf32>
    %81 = tpu.reciprocal %80 {approx = true} : vector<8x1xf32> -> vector<8x1xf32>
    %82 = vector.broadcast %81 : vector<8x1xf32> to vector<8x8xf32>
    %83 = arith.mulf %78, %82 : vector<8x8xf32>
    %cst_58 = arith.constant dense<0.000000e+00> : vector<8x32xf32>
    %84 = tpu.matmul %83, %70, %cst_58 {dimension_numbers = #tpu.dot_dimension_numbers<[1], [0], [0], [1], [0, 0, 1, 1], [], []>} : vector<8x8xf32>, vector<8x32xf32>, vector<8x32xf32> -> vector<8x32xf32>
    %c1_59 = arith.constant 1 : index
    %c0_60 = arith.constant 0 : index
    %c0_61 = arith.constant 0 : index
    %85 = vector.load %arg5[%c1_59, %c0_60, %c0_61] : memref<2x32x64xf32, #tpu.memory_space<vmem>>, vector<1x32x64xf32>
    %86 = vector.shape_cast %85 : vector<1x32x64xf32> to vector<32x64xf32>
    %cst_62 = arith.constant dense<0.000000e+00> : vector<8x64xf32>
    %87 = tpu.matmul %84, %86, %cst_62 {dimension_numbers = #tpu.dot_dimension_numbers<[1], [0], [0], [1], [0, 0, 1, 1], [], []>} : vector<8x32xf32>, vector<32x64xf32>, vector<8x64xf32> -> vector<8x64xf32>
    %88 = arith.addf %47, %87 : vector<8x64xf32>
    %89 = vector.broadcast %4 : vector<1x64xf32> to vector<8x64xf32>
    %90 = arith.addf %88, %89 : vector<8x64xf32>
    %91 = arith.addf %1, %90 : vector<8x64xf32>
    %c0_63 = arith.constant 0 : index
    %c0_64 = arith.constant 0 : index
    %92 = vector.load %arg7[%c0_63, %c0_64] : memref<1x64xf32, #tpu.memory_space<vmem>>, vector<1x64xf32>
    %c0_65 = arith.constant 0 : index
    %c0_66 = arith.constant 0 : index
    %93 = vector.load %arg8[%c0_65, %c0_66] : memref<1x64xf32, #tpu.memory_space<vmem>>, vector<1x64xf32>
    %cst_67 = arith.constant dense<0.000000e+00> : vector<8xf32>
    %94 = vector.multi_reduction <add>, %91, %cst_67 [1] : vector<8x64xf32> to vector<8xf32>
    %95 = vector.shape_cast %94 : vector<8xf32> to vector<8x1xf32>
    %cst_68 = arith.constant 6.400000e+01 : f32
    %96 = vector.broadcast %cst_68 : f32 to vector<8x1xf32>
    %97 = arith.divf %95, %96 : vector<8x1xf32>
    %98 = vector.broadcast %97 : vector<8x1xf32> to vector<8x64xf32>
    %99 = arith.subf %91, %98 : vector<8x64xf32>
    %100 = arith.mulf %99, %99 : vector<8x64xf32>
    %cst_69 = arith.constant dense<0.000000e+00> : vector<8xf32>
    %101 = vector.multi_reduction <add>, %100, %cst_69 [1] : vector<8x64xf32> to vector<8xf32>
    %102 = vector.shape_cast %101 : vector<8xf32> to vector<8x1xf32>
    %cst_70 = arith.constant 6.400000e+01 : f32
    %103 = vector.broadcast %cst_70 : f32 to vector<8x1xf32>
    %104 = arith.divf %102, %103 : vector<8x1xf32>
    %cst_71 = arith.constant 9.99999974E-6 : f32
    %105 = vector.broadcast %cst_71 : f32 to vector<8x1xf32>
    %106 = arith.addf %104, %105 : vector<8x1xf32>
    %107 = math.rsqrt %106 : vector<8x1xf32>
    %108 = vector.broadcast %107 : vector<8x1xf32> to vector<8x64xf32>
    %109 = arith.mulf %99, %108 : vector<8x64xf32>
    %110 = vector.broadcast %92 : vector<1x64xf32> to vector<8x64xf32>
    %111 = arith.mulf %109, %110 : vector<8x64xf32>
    %112 = vector.broadcast %93 : vector<1x64xf32> to vector<8x64xf32>
    %113 = arith.addf %111, %112 : vector<8x64xf32>
    %c0_72 = arith.constant 0 : index
    %c0_73 = arith.constant 0 : index
    %114 = vector.load %arg12[%c0_72, %c0_73] : memref<1x64xf32, #tpu.memory_space<vmem>>, vector<1x64xf32>
    %115 = tpu.iota {dimensions = array<i32: 0>} : vector<8x8xi32>
    %116 = tpu.iota {dimensions = array<i32: 1>} : vector<8x8xi32>
    %117 = arith.cmpi sle, %116, %115 : vector<8x8xi32>
    %c0_74 = arith.constant 0 : index
    %c0_75 = arith.constant 0 : index
    %c0_76 = arith.constant 0 : index
    %118 = vector.load %arg9[%c0_74, %c0_75, %c0_76] : memref<6x64x32xf32, #tpu.memory_space<vmem>>, vector<1x64x32xf32>
    %119 = vector.shape_cast %118 : vector<1x64x32xf32> to vector<64x32xf32>
    %cst_77 = arith.constant dense<0.000000e+00> : vector<8x32xf32>
    %120 = tpu.matmul %113, %119, %cst_77 {dimension_numbers = #tpu.dot_dimension_numbers<[1], [0], [0], [1], [0, 0, 1, 1], [], []>} : vector<8x64xf32>, vector<64x32xf32>, vector<8x32xf32> -> vector<8x32xf32>
    %c0_78 = arith.constant 0 : index
    %c0_79 = arith.constant 0 : index
    %c0_80 = arith.constant 0 : index
    %121 = vector.load %arg10[%c0_78, %c0_79, %c0_80] : memref<6x1x32xf32, #tpu.memory_space<vmem>>, vector<1x1x32xf32>
    %122 = vector.shape_cast %121 : vector<1x1x32xf32> to vector<1x32xf32>
    %123 = vector.broadcast %122 : vector<1x32xf32> to vector<8x32xf32>
    %124 = arith.addf %120, %123 : vector<8x32xf32>
    %cst_81 = arith.constant 0.176776692 : f32
    %125 = vector.broadcast %cst_81 : f32 to vector<8x32xf32>
    %126 = arith.mulf %124, %125 : vector<8x32xf32>
    %c2_82 = arith.constant 2 : index
    %c0_83 = arith.constant 0 : index
    %c0_84 = arith.constant 0 : index
    %127 = vector.load %arg9[%c2_82, %c0_83, %c0_84] : memref<6x64x32xf32, #tpu.memory_space<vmem>>, vector<1x64x32xf32>
    %128 = vector.shape_cast %127 : vector<1x64x32xf32> to vector<64x32xf32>
    %cst_85 = arith.constant dense<0.000000e+00> : vector<8x32xf32>
    %129 = tpu.matmul %3, %128, %cst_85 {dimension_numbers = #tpu.dot_dimension_numbers<[1], [0], [0], [1], [0, 0, 1, 1], [], []>} : vector<8x64xf32>, vector<64x32xf32>, vector<8x32xf32> -> vector<8x32xf32>
    %c2_86 = arith.constant 2 : index
    %c0_87 = arith.constant 0 : index
    %c0_88 = arith.constant 0 : index
    %130 = vector.load %arg10[%c2_86, %c0_87, %c0_88] : memref<6x1x32xf32, #tpu.memory_space<vmem>>, vector<1x1x32xf32>
    %131 = vector.shape_cast %130 : vector<1x1x32xf32> to vector<1x32xf32>
    %132 = vector.broadcast %131 : vector<1x32xf32> to vector<8x32xf32>
    %133 = arith.addf %129, %132 : vector<8x32xf32>
    %c4_89 = arith.constant 4 : index
    %c0_90 = arith.constant 0 : index
    %c0_91 = arith.constant 0 : index
    %134 = vector.load %arg9[%c4_89, %c0_90, %c0_91] : memref<6x64x32xf32, #tpu.memory_space<vmem>>, vector<1x64x32xf32>
    %135 = vector.shape_cast %134 : vector<1x64x32xf32> to vector<64x32xf32>
    %cst_92 = arith.constant dense<0.000000e+00> : vector<8x32xf32>
    %136 = tpu.matmul %3, %135, %cst_92 {dimension_numbers = #tpu.dot_dimension_numbers<[1], [0], [0], [1], [0, 0, 1, 1], [], []>} : vector<8x64xf32>, vector<64x32xf32>, vector<8x32xf32> -> vector<8x32xf32>
    %c4_93 = arith.constant 4 : index
    %c0_94 = arith.constant 0 : index
    %c0_95 = arith.constant 0 : index
    %137 = vector.load %arg10[%c4_93, %c0_94, %c0_95] : memref<6x1x32xf32, #tpu.memory_space<vmem>>, vector<1x1x32xf32>
    %138 = vector.shape_cast %137 : vector<1x1x32xf32> to vector<1x32xf32>
    %139 = vector.broadcast %138 : vector<1x32xf32> to vector<8x32xf32>
    %140 = arith.addf %136, %139 : vector<8x32xf32>
    %cst_96 = arith.constant dense<0.000000e+00> : vector<8x8xf32>
    %141 = tpu.matmul %126, %133, %cst_96 {dimension_numbers = #tpu.dot_dimension_numbers<[1], [1], [0], [0], [0, 0, 1, 0], [], []>} : vector<8x32xf32>, vector<8x32xf32>, vector<8x8xf32> -> vector<8x8xf32>
    %cst_97 = arith.constant -1.000000e+30 : f32
    %142 = vector.broadcast %cst_97 : f32 to vector<8x8xf32>
    %143 = arith.select %117, %141, %142 : vector<8x8xi1>, vector<8x8xf32>
    %cst_98 = arith.constant dense<0xFF800000> : vector<8xf32>
    %144 = vector.multi_reduction <maximumf>, %143, %cst_98 [1] : vector<8x8xf32> to vector<8xf32>
    %145 = vector.shape_cast %144 : vector<8xf32> to vector<8x1xf32>
    %146 = vector.broadcast %145 : vector<8x1xf32> to vector<8x8xf32>
    %147 = arith.subf %143, %146 : vector<8x8xf32>
    %148 = math.exp %147 : vector<8x8xf32>
    %cst_99 = arith.constant dense<0.000000e+00> : vector<8xf32>
    %149 = vector.multi_reduction <add>, %148, %cst_99 [1] : vector<8x8xf32> to vector<8xf32>
    %150 = vector.shape_cast %149 : vector<8xf32> to vector<8x1xf32>
    %151 = tpu.reciprocal %150 {approx = true} : vector<8x1xf32> -> vector<8x1xf32>
    %152 = vector.broadcast %151 : vector<8x1xf32> to vector<8x8xf32>
    %153 = arith.mulf %148, %152 : vector<8x8xf32>
    %cst_100 = arith.constant dense<0.000000e+00> : vector<8x32xf32>
    %154 = tpu.matmul %153, %140, %cst_100 {dimension_numbers = #tpu.dot_dimension_numbers<[1], [0], [0], [1], [0, 0, 1, 1], [], []>} : vector<8x8xf32>, vector<8x32xf32>, vector<8x32xf32> -> vector<8x32xf32>
    %c0_101 = arith.constant 0 : index
    %c0_102 = arith.constant 0 : index
    %c0_103 = arith.constant 0 : index
    %155 = vector.load %arg11[%c0_101, %c0_102, %c0_103] : memref<2x32x64xf32, #tpu.memory_space<vmem>>, vector<1x32x64xf32>
    %156 = vector.shape_cast %155 : vector<1x32x64xf32> to vector<32x64xf32>
    %cst_104 = arith.constant dense<0.000000e+00> : vector<8x64xf32>
    %157 = tpu.matmul %154, %156, %cst_104 {dimension_numbers = #tpu.dot_dimension_numbers<[1], [0], [0], [1], [0, 0, 1, 1], [], []>} : vector<8x32xf32>, vector<32x64xf32>, vector<8x64xf32> -> vector<8x64xf32>
    %c1_105 = arith.constant 1 : index
    %c0_106 = arith.constant 0 : index
    %c0_107 = arith.constant 0 : index
    %158 = vector.load %arg9[%c1_105, %c0_106, %c0_107] : memref<6x64x32xf32, #tpu.memory_space<vmem>>, vector<1x64x32xf32>
    %159 = vector.shape_cast %158 : vector<1x64x32xf32> to vector<64x32xf32>
    %cst_108 = arith.constant dense<0.000000e+00> : vector<8x32xf32>
    %160 = tpu.matmul %113, %159, %cst_108 {dimension_numbers = #tpu.dot_dimension_numbers<[1], [0], [0], [1], [0, 0, 1, 1], [], []>} : vector<8x64xf32>, vector<64x32xf32>, vector<8x32xf32> -> vector<8x32xf32>
    %c1_109 = arith.constant 1 : index
    %c0_110 = arith.constant 0 : index
    %c0_111 = arith.constant 0 : index
    %161 = vector.load %arg10[%c1_109, %c0_110, %c0_111] : memref<6x1x32xf32, #tpu.memory_space<vmem>>, vector<1x1x32xf32>
    %162 = vector.shape_cast %161 : vector<1x1x32xf32> to vector<1x32xf32>
    %163 = vector.broadcast %162 : vector<1x32xf32> to vector<8x32xf32>
    %164 = arith.addf %160, %163 : vector<8x32xf32>
    %cst_112 = arith.constant 0.176776692 : f32
    %165 = vector.broadcast %cst_112 : f32 to vector<8x32xf32>
    %166 = arith.mulf %164, %165 : vector<8x32xf32>
    %c3_113 = arith.constant 3 : index
    %c0_114 = arith.constant 0 : index
    %c0_115 = arith.constant 0 : index
    %167 = vector.load %arg9[%c3_113, %c0_114, %c0_115] : memref<6x64x32xf32, #tpu.memory_space<vmem>>, vector<1x64x32xf32>
    %168 = vector.shape_cast %167 : vector<1x64x32xf32> to vector<64x32xf32>
    %cst_116 = arith.constant dense<0.000000e+00> : vector<8x32xf32>
    %169 = tpu.matmul %3, %168, %cst_116 {dimension_numbers = #tpu.dot_dimension_numbers<[1], [0], [0], [1], [0, 0, 1, 1], [], []>} : vector<8x64xf32>, vector<64x32xf32>, vector<8x32xf32> -> vector<8x32xf32>
    %c3_117 = arith.constant 3 : index
    %c0_118 = arith.constant 0 : index
    %c0_119 = arith.constant 0 : index
    %170 = vector.load %arg10[%c3_117, %c0_118, %c0_119] : memref<6x1x32xf32, #tpu.memory_space<vmem>>, vector<1x1x32xf32>
    %171 = vector.shape_cast %170 : vector<1x1x32xf32> to vector<1x32xf32>
    %172 = vector.broadcast %171 : vector<1x32xf32> to vector<8x32xf32>
    %173 = arith.addf %169, %172 : vector<8x32xf32>
    %c5_120 = arith.constant 5 : index
    %c0_121 = arith.constant 0 : index
    %c0_122 = arith.constant 0 : index
    %174 = vector.load %arg9[%c5_120, %c0_121, %c0_122] : memref<6x64x32xf32, #tpu.memory_space<vmem>>, vector<1x64x32xf32>
    %175 = vector.shape_cast %174 : vector<1x64x32xf32> to vector<64x32xf32>
    %cst_123 = arith.constant dense<0.000000e+00> : vector<8x32xf32>
    %176 = tpu.matmul %3, %175, %cst_123 {dimension_numbers = #tpu.dot_dimension_numbers<[1], [0], [0], [1], [0, 0, 1, 1], [], []>} : vector<8x64xf32>, vector<64x32xf32>, vector<8x32xf32> -> vector<8x32xf32>
    %c5_124 = arith.constant 5 : index
    %c0_125 = arith.constant 0 : index
    %c0_126 = arith.constant 0 : index
    %177 = vector.load %arg10[%c5_124, %c0_125, %c0_126] : memref<6x1x32xf32, #tpu.memory_space<vmem>>, vector<1x1x32xf32>
    %178 = vector.shape_cast %177 : vector<1x1x32xf32> to vector<1x32xf32>
    %179 = vector.broadcast %178 : vector<1x32xf32> to vector<8x32xf32>
    %180 = arith.addf %176, %179 : vector<8x32xf32>
    %cst_127 = arith.constant dense<0.000000e+00> : vector<8x8xf32>
    %181 = tpu.matmul %166, %173, %cst_127 {dimension_numbers = #tpu.dot_dimension_numbers<[1], [1], [0], [0], [0, 0, 1, 0], [], []>} : vector<8x32xf32>, vector<8x32xf32>, vector<8x8xf32> -> vector<8x8xf32>
    %cst_128 = arith.constant -1.000000e+30 : f32
    %182 = vector.broadcast %cst_128 : f32 to vector<8x8xf32>
    %183 = arith.select %117, %181, %182 : vector<8x8xi1>, vector<8x8xf32>
    %cst_129 = arith.constant dense<0xFF800000> : vector<8xf32>
    %184 = vector.multi_reduction <maximumf>, %183, %cst_129 [1] : vector<8x8xf32> to vector<8xf32>
    %185 = vector.shape_cast %184 : vector<8xf32> to vector<8x1xf32>
    %186 = vector.broadcast %185 : vector<8x1xf32> to vector<8x8xf32>
    %187 = arith.subf %183, %186 : vector<8x8xf32>
    %188 = math.exp %187 : vector<8x8xf32>
    %cst_130 = arith.constant dense<0.000000e+00> : vector<8xf32>
    %189 = vector.multi_reduction <add>, %188, %cst_130 [1] : vector<8x8xf32> to vector<8xf32>
    %190 = vector.shape_cast %189 : vector<8xf32> to vector<8x1xf32>
    %191 = tpu.reciprocal %190 {approx = true} : vector<8x1xf32> -> vector<8x1xf32>
    %192 = vector.broadcast %191 : vector<8x1xf32> to vector<8x8xf32>
    %193 = arith.mulf %188, %192 : vector<8x8xf32>
    %cst_131 = arith.constant dense<0.000000e+00> : vector<8x32xf32>
    %194 = tpu.matmul %193, %180, %cst_131 {dimension_numbers = #tpu.dot_dimension_numbers<[1], [0], [0], [1], [0, 0, 1, 1], [], []>} : vector<8x8xf32>, vector<8x32xf32>, vector<8x32xf32> -> vector<8x32xf32>
    %c1_132 = arith.constant 1 : index
    %c0_133 = arith.constant 0 : index
    %c0_134 = arith.constant 0 : index
    %195 = vector.load %arg11[%c1_132, %c0_133, %c0_134] : memref<2x32x64xf32, #tpu.memory_space<vmem>>, vector<1x32x64xf32>
    %196 = vector.shape_cast %195 : vector<1x32x64xf32> to vector<32x64xf32>
    %cst_135 = arith.constant dense<0.000000e+00> : vector<8x64xf32>
    %197 = tpu.matmul %194, %196, %cst_135 {dimension_numbers = #tpu.dot_dimension_numbers<[1], [0], [0], [1], [0, 0, 1, 1], [], []>} : vector<8x32xf32>, vector<32x64xf32>, vector<8x64xf32> -> vector<8x64xf32>
    %198 = arith.addf %157, %197 : vector<8x64xf32>
    %199 = vector.broadcast %114 : vector<1x64xf32> to vector<8x64xf32>
    %200 = arith.addf %198, %199 : vector<8x64xf32>
    %201 = arith.addf %113, %200 : vector<8x64xf32>
    %c0_136 = arith.constant 0 : index
    %c0_137 = arith.constant 0 : index
    %202 = vector.load %arg13[%c0_136, %c0_137] : memref<1x64xf32, #tpu.memory_space<vmem>>, vector<1x64xf32>
    %c0_138 = arith.constant 0 : index
    %c0_139 = arith.constant 0 : index
    %203 = vector.load %arg14[%c0_138, %c0_139] : memref<1x64xf32, #tpu.memory_space<vmem>>, vector<1x64xf32>
    %cst_140 = arith.constant dense<0.000000e+00> : vector<8xf32>
    %204 = vector.multi_reduction <add>, %201, %cst_140 [1] : vector<8x64xf32> to vector<8xf32>
    %205 = vector.shape_cast %204 : vector<8xf32> to vector<8x1xf32>
    %cst_141 = arith.constant 6.400000e+01 : f32
    %206 = vector.broadcast %cst_141 : f32 to vector<8x1xf32>
    %207 = arith.divf %205, %206 : vector<8x1xf32>
    %208 = vector.broadcast %207 : vector<8x1xf32> to vector<8x64xf32>
    %209 = arith.subf %201, %208 : vector<8x64xf32>
    %210 = arith.mulf %209, %209 : vector<8x64xf32>
    %cst_142 = arith.constant dense<0.000000e+00> : vector<8xf32>
    %211 = vector.multi_reduction <add>, %210, %cst_142 [1] : vector<8x64xf32> to vector<8xf32>
    %212 = vector.shape_cast %211 : vector<8xf32> to vector<8x1xf32>
    %cst_143 = arith.constant 6.400000e+01 : f32
    %213 = vector.broadcast %cst_143 : f32 to vector<8x1xf32>
    %214 = arith.divf %212, %213 : vector<8x1xf32>
    %cst_144 = arith.constant 9.99999974E-6 : f32
    %215 = vector.broadcast %cst_144 : f32 to vector<8x1xf32>
    %216 = arith.addf %214, %215 : vector<8x1xf32>
    %217 = math.rsqrt %216 : vector<8x1xf32>
    %218 = vector.broadcast %217 : vector<8x1xf32> to vector<8x64xf32>
    %219 = arith.mulf %209, %218 : vector<8x64xf32>
    %220 = vector.broadcast %202 : vector<1x64xf32> to vector<8x64xf32>
    %221 = arith.mulf %219, %220 : vector<8x64xf32>
    %222 = vector.broadcast %203 : vector<1x64xf32> to vector<8x64xf32>
    %223 = arith.addf %221, %222 : vector<8x64xf32>
    %c0_145 = arith.constant 0 : index
    %c0_146 = arith.constant 0 : index
    %224 = vector.load %arg15[%c0_145, %c0_146] : memref<64x32xf32, #tpu.memory_space<vmem>>, vector<64x32xf32>
    %cst_147 = arith.constant dense<0.000000e+00> : vector<8x32xf32>
    %225 = tpu.matmul %223, %224, %cst_147 {dimension_numbers = #tpu.dot_dimension_numbers<[1], [0], [0], [1], [0, 0, 1, 1], [], []>} : vector<8x64xf32>, vector<64x32xf32>, vector<8x32xf32> -> vector<8x32xf32>
    %c0_148 = arith.constant 0 : index
    %c0_149 = arith.constant 0 : index
    %226 = vector.load %arg16[%c0_148, %c0_149] : memref<1x32xf32, #tpu.memory_space<vmem>>, vector<1x32xf32>
    %227 = vector.broadcast %226 : vector<1x32xf32> to vector<8x32xf32>
    %228 = arith.addf %225, %227 : vector<8x32xf32>
    %cst_150 = arith.constant 0.000000e+00 : f32
    %229 = vector.broadcast %cst_150 : f32 to vector<8x32xf32>
    %230 = arith.maximumf %228, %229 : vector<8x32xf32>
    %c0_151 = arith.constant 0 : index
    %c0_152 = arith.constant 0 : index
    %231 = vector.load %arg17[%c0_151, %c0_152] : memref<32x64xf32, #tpu.memory_space<vmem>>, vector<32x64xf32>
    %cst_153 = arith.constant dense<0.000000e+00> : vector<8x64xf32>
    %232 = tpu.matmul %230, %231, %cst_153 {dimension_numbers = #tpu.dot_dimension_numbers<[1], [0], [0], [1], [0, 0, 1, 1], [], []>} : vector<8x32xf32>, vector<32x64xf32>, vector<8x64xf32> -> vector<8x64xf32>
    %c0_154 = arith.constant 0 : index
    %c0_155 = arith.constant 0 : index
    %233 = vector.load %arg18[%c0_154, %c0_155] : memref<1x64xf32, #tpu.memory_space<vmem>>, vector<1x64xf32>
    %234 = vector.broadcast %233 : vector<1x64xf32> to vector<8x64xf32>
    %235 = arith.addf %232, %234 : vector<8x64xf32>
    %236 = arith.addf %223, %235 : vector<8x64xf32>
    %c0_156 = arith.constant 0 : index
    %c0_157 = arith.constant 0 : index
    %237 = vector.load %arg19[%c0_156, %c0_157] : memref<1x64xf32, #tpu.memory_space<vmem>>, vector<1x64xf32>
    %c0_158 = arith.constant 0 : index
    %c0_159 = arith.constant 0 : index
    %238 = vector.load %arg20[%c0_158, %c0_159] : memref<1x64xf32, #tpu.memory_space<vmem>>, vector<1x64xf32>
    %cst_160 = arith.constant dense<0.000000e+00> : vector<8xf32>
    %239 = vector.multi_reduction <add>, %236, %cst_160 [1] : vector<8x64xf32> to vector<8xf32>
    %240 = vector.shape_cast %239 : vector<8xf32> to vector<8x1xf32>
    %cst_161 = arith.constant 6.400000e+01 : f32
    %241 = vector.broadcast %cst_161 : f32 to vector<8x1xf32>
    %242 = arith.divf %240, %241 : vector<8x1xf32>
    %243 = vector.broadcast %242 : vector<8x1xf32> to vector<8x64xf32>
    %244 = arith.subf %236, %243 : vector<8x64xf32>
    %245 = arith.mulf %244, %244 : vector<8x64xf32>
    %cst_162 = arith.constant dense<0.000000e+00> : vector<8xf32>
    %246 = vector.multi_reduction <add>, %245, %cst_162 [1] : vector<8x64xf32> to vector<8xf32>
    %247 = vector.shape_cast %246 : vector<8xf32> to vector<8x1xf32>
    %cst_163 = arith.constant 6.400000e+01 : f32
    %248 = vector.broadcast %cst_163 : f32 to vector<8x1xf32>
    %249 = arith.divf %247, %248 : vector<8x1xf32>
    %cst_164 = arith.constant 9.99999974E-6 : f32
    %250 = vector.broadcast %cst_164 : f32 to vector<8x1xf32>
    %251 = arith.addf %249, %250 : vector<8x1xf32>
    %252 = math.rsqrt %251 : vector<8x1xf32>
    %253 = vector.broadcast %252 : vector<8x1xf32> to vector<8x64xf32>
    %254 = arith.mulf %244, %253 : vector<8x64xf32>
    %255 = vector.broadcast %237 : vector<1x64xf32> to vector<8x64xf32>
    %256 = arith.mulf %254, %255 : vector<8x64xf32>
    %257 = vector.broadcast %238 : vector<1x64xf32> to vector<8x64xf32>
    %258 = arith.addf %256, %257 : vector<8x64xf32>
    %c0_165 = arith.constant 0 : index
    %c0_166 = arith.constant 0 : index
    %259 = vector.load %arg21[%c0_165, %c0_166] : memref<64x128xf32, #tpu.memory_space<vmem>>, vector<64x128xf32>
    %cst_167 = arith.constant dense<0.000000e+00> : vector<8x128xf32>
    %260 = tpu.matmul %258, %259, %cst_167 {dimension_numbers = #tpu.dot_dimension_numbers<[1], [0], [0], [1], [0, 0, 1, 1], [], []>} : vector<8x64xf32>, vector<64x128xf32>, vector<8x128xf32> -> vector<8x128xf32>
    %c0_168 = arith.constant 0 : index
    %c0_169 = arith.constant 0 : index
    %261 = vector.load %arg22[%c0_168, %c0_169] : memref<1x128xf32, #tpu.memory_space<vmem>>, vector<1x128xf32>
    %262 = vector.broadcast %261 : vector<1x128xf32> to vector<8x128xf32>
    %263 = arith.addf %260, %262 : vector<8x128xf32>
    %c0_170 = arith.constant 0 : index
    %c0_171 = arith.constant 0 : index
    %c0_172 = arith.constant 0 : index
    %264 = vector.load %arg23[%c0_170, %c0_171, %c0_172] : memref<1x8x128xf32, #tpu.memory_space<vmem>>, vector<1x8x128xf32>
    %265 = vector.shape_cast %264 : vector<1x8x128xf32> to vector<8x128xf32>
    %266 = vector.shape_cast %263 : vector<8x128xf32> to vector<1x8x128xf32>
    tpu.vector_store %arg23[%c0_170, %c0_171, %c0_172], %266 {strides = array<i32>} : memref<1x8x128xf32, #tpu.memory_space<vmem>>, vector<1x8x128xf32>,
    return
  }
  func.func @transform_0(%arg0: i32) -> (i32, i32, i32) {
    %c0_i32 = arith.constant 0 : i32
    %c0_i32_0 = arith.constant 0 : i32
    %c0_i32_1 = arith.constant 0 : i32
    return %arg0, %c0_i32, %c0_i32_0 : i32, i32, i32
  }
  func.func @transform_1(%arg0: i32) -> (i32, i32, i32) {
    %c0_i32 = arith.constant 0 : i32
    %c0_i32_0 = arith.constant 0 : i32
    %c0_i32_1 = arith.constant 0 : i32
    return %arg0, %c0_i32, %c0_i32_0 : i32, i32, i32
  }
  func.func @transform_2(%arg0: i32) -> (i32, i32, i32) {
    %c0_i32 = arith.constant 0 : i32
    %c0_i32_0 = arith.constant 0 : i32
    %c0_i32_1 = arith.constant 0 : i32
    %c0_i32_2 = arith.constant 0 : i32
    return %c0_i32, %c0_i32_0, %c0_i32_1 : i32, i32, i32
  }
  func.func @transform_3(%arg0: i32) -> (i32, i32, i32) {
    %c0_i32 = arith.constant 0 : i32
    %c0_i32_0 = arith.constant 0 : i32
    %c0_i32_1 = arith.constant 0 : i32
    %c0_i32_2 = arith.constant 0 : i32
    return %c0_i32, %c0_i32_0, %c0_i32_1 : i32, i32, i32
  }
  func.func @transform_4(%arg0: i32) -> (i32, i32, i32) {
    %c0_i32 = arith.constant 0 : i32
    %c0_i32_0 = arith.constant 0 : i32
    %c0_i32_1 = arith.constant 0 : i32
    %c0_i32_2 = arith.constant 0 : i32
    return %c0_i32, %c0_i32_0, %c0_i32_1 : i32, i32, i32
  }
  func.func @transform_5(%arg0: i32) -> (i32, i32) {
    %c0_i32 = arith.constant 0 : i32
    %c0_i32_0 = arith.constant 0 : i32
    %c0_i32_1 = arith.constant 0 : i32
    return %c0_i32, %c0_i32_0 : i32, i32
  }
  func.func @transform_6(%arg0: i32) -> (i32, i32) {
    %c0_i32 = arith.constant 0 : i32
    %c0_i32_0 = arith.constant 0 : i32
    %c0_i32_1 = arith.constant 0 : i32
    return %c0_i32, %c0_i32_0 : i32, i32
  }
  func.func @transform_7(%arg0: i32) -> (i32, i32) {
    %c0_i32 = arith.constant 0 : i32
    %c0_i32_0 = arith.constant 0 : i32
    %c0_i32_1 = arith.constant 0 : i32
    return %c0_i32, %c0_i32_0 : i32, i32
  }
  func.func @transform_8(%arg0: i32) -> (i32, i32, i32) {
    %c0_i32 = arith.constant 0 : i32
    %c0_i32_0 = arith.constant 0 : i32
    %c0_i32_1 = arith.constant 0 : i32
    %c0_i32_2 = arith.constant 0 : i32
    return %c0_i32, %c0_i32_0, %c0_i32_1 : i32, i32, i32
  }
  func.func @transform_9(%arg0: i32) -> (i32, i32, i32) {
    %c0_i32 = arith.constant 0 : i32
    %c0_i32_0 = arith.constant 0 : i32
    %c0_i32_1 = arith.constant 0 : i32
    %c0_i32_2 = arith.constant 0 : i32
    return %c0_i32, %c0_i32_0, %c0_i32_1 : i32, i32, i32
  }
  func.func @transform_10(%arg0: i32) -> (i32, i32, i32) {
    %c0_i32 = arith.constant 0 : i32
    %c0_i32_0 = arith.constant 0 : i32
    %c0_i32_1 = arith.constant 0 : i32
    %c0_i32_2 = arith.constant 0 : i32
    return %c0_i32, %c0_i32_0, %c0_i32_1 : i32, i32, i32
  }
  func.func @transform_11(%arg0: i32) -> (i32, i32) {
    %c0_i32 = arith.constant 0 : i32
    %c0_i32_0 = arith.constant 0 : i32
    %c0_i32_1 = arith.constant 0 : i32
    return %c0_i32, %c0_i32_0 : i32, i32
  }
  func.func @transform_12(%arg0: i32) -> (i32, i32) {
    %c0_i32 = arith.constant 0 : i32
    %c0_i32_0 = arith.constant 0 : i32
    %c0_i32_1 = arith.constant 0 : i32
    return %c0_i32, %c0_i32_0 : i32, i32
  }
  func.func @transform_13(%arg0: i32) -> (i32, i32) {
    %c0_i32 = arith.constant 0 : i32
    %c0_i32_0 = arith.constant 0 : i32
    %c0_i32_1 = arith.constant 0 : i32
    return %c0_i32, %c0_i32_0 : i32, i32
  }
  func.func @transform_14(%arg0: i32) -> (i32, i32) {
    %c0_i32 = arith.constant 0 : i32
    %c0_i32_0 = arith.constant 0 : i32
    %c0_i32_1 = arith.constant 0 : i32
    return %c0_i32, %c0_i32_0 : i32, i32
  }
  func.func @transform_15(%arg0: i32) -> (i32, i32) {
    %c0_i32 = arith.constant 0 : i32
    %c0_i32_0 = arith.constant 0 : i32
    %c0_i32_1 = arith.constant 0 : i32
    return %c0_i32, %c0_i32_0 : i32, i32
  }
  func.func @transform_16(%arg0: i32) -> (i32, i32) {
    %c0_i32 = arith.constant 0 : i32
    %c0_i32_0 = arith.constant 0 : i32
    %c0_i32_1 = arith.constant 0 : i32
    return %c0_i32, %c0_i32_0 : i32, i32
  }
  func.func @transform_17(%arg0: i32) -> (i32, i32) {
    %c0_i32 = arith.constant 0 : i32
    %c0_i32_0 = arith.constant 0 : i32
    %c0_i32_1 = arith.constant 0 : i32
    return %c0_i32, %c0_i32_0 : i32, i32
  }
  func.func @transform_18(%arg0: i32) -> (i32, i32) {
    %c0_i32 = arith.constant 0 : i32
    %c0_i32_0 = arith.constant 0 : i32
    %c0_i32_1 = arith.constant 0 : i32
    return %c0_i32, %c0_i32_0 : i32, i32
  }
  func.func @transform_19(%arg0: i32) -> (i32, i32) {
    %c0_i32 = arith.constant 0 : i32
    %c0_i32_0 = arith.constant 0 : i32
    %c0_i32_1 = arith.constant 0 : i32
    return %c0_i32, %c0_i32_0 : i32, i32
  }
  func.func @transform_20(%arg0: i32) -> (i32, i32) {
    %c0_i32 = arith.constant 0 : i32
    %c0_i32_0 = arith.constant 0 : i32
    %c0_i32_1 = arith.constant 0 : i32
    return %c0_i32, %c0_i32_0 : i32, i32
  }
  func.func @transform_21(%arg0: i32) -> (i32, i32) {
    %c0_i32 = arith.constant 0 : i32
    %c0_i32_0 = arith.constant 0 : i32
    %c0_i32_1 = arith.constant 0 : i32
    return %c0_i32, %c0_i32_0 : i32, i32
  }
  func.func @transform_22(%arg0: i32) -> (i32, i32, i32) {
    %c0_i32 = arith.constant 0 : i32
    %c0_i32_0 = arith.constant 0 : i32
    %c0_i32_1 = arith.constant 0 : i32
    return %arg0, %c0_i32, %c0_i32_0 : i32, i32, i32
  }
}

module attributes {stable_mosaic.version = 11 : i64} {
  func.func @_decoder_layer_head_kernel(%arg0: i32, %arg1: memref<1x8x96xf32, #tpu.memory_space<vmem>>, %arg2: memref<1x8x96xf32, #tpu.memory_space<vmem>>, %arg3: memref<6x96x48xf32, #tpu.memory_space<vmem>>, %arg4: memref<6x1x48xf32, #tpu.memory_space<vmem>>, %arg5: memref<2x48x96xf32, #tpu.memory_space<vmem>>, %arg6: memref<1x96xf32, #tpu.memory_space<vmem>>, %arg7: memref<1x96xf32, #tpu.memory_space<vmem>>, %arg8: memref<1x96xf32, #tpu.memory_space<vmem>>, %arg9: memref<6x96x48xf32, #tpu.memory_space<vmem>>, %arg10: memref<6x1x48xf32, #tpu.memory_space<vmem>>, %arg11: memref<2x48x96xf32, #tpu.memory_space<vmem>>, %arg12: memref<1x96xf32, #tpu.memory_space<vmem>>, %arg13: memref<1x96xf32, #tpu.memory_space<vmem>>, %arg14: memref<1x96xf32, #tpu.memory_space<vmem>>, %arg15: memref<96x32xf32, #tpu.memory_space<vmem>>, %arg16: memref<1x32xf32, #tpu.memory_space<vmem>>, %arg17: memref<32x96xf32, #tpu.memory_space<vmem>>, %arg18: memref<1x96xf32, #tpu.memory_space<vmem>>, %arg19: memref<1x96xf32, #tpu.memory_space<vmem>>, %arg20: memref<1x96xf32, #tpu.memory_space<vmem>>, %arg21: memref<96x128xf32, #tpu.memory_space<vmem>>, %arg22: memref<1x128xf32, #tpu.memory_space<vmem>>, %arg23: memref<1x8x128xf32, #tpu.memory_space<vmem>>) attributes {dimension_semantics = [#tpu.dimension_semantics<parallel>], iteration_bounds = array<i64: 2>, scalar_prefetch = 0 : i64, scratch_operands = 0 : i64, tpu.core_type = #tpu.core_type<tc>, window_params = [{transform_indices = @transform_0, window_bounds = array<i64: 1, 8, 96>}, {transform_indices = @transform_1, window_bounds = array<i64: 1, 8, 96>}, {pipeline_mode = #tpu.pipeline_mode<synchronous>, transform_indices = @transform_2, window_bounds = array<i64: 6, 96, 48>}, {pipeline_mode = #tpu.pipeline_mode<synchronous>, transform_indices = @transform_3, window_bounds = array<i64: 6, 1, 48>}, {pipeline_mode = #tpu.pipeline_mode<synchronous>, transform_indices = @transform_4, window_bounds = array<i64: 2, 48, 96>}, {pipeline_mode = #tpu.pipeline_mode<synchronous>, transform_indices = @transform_5, window_bounds = array<i64: 1, 96>}, {pipeline_mode = #tpu.pipeline_mode<synchronous>, transform_indices = @transform_6, window_bounds = array<i64: 1, 96>}, {pipeline_mode = #tpu.pipeline_mode<synchronous>, transform_indices = @transform_7, window_bounds = array<i64: 1, 96>}, {pipeline_mode = #tpu.pipeline_mode<synchronous>, transform_indices = @transform_8, window_bounds = array<i64: 6, 96, 48>}, {pipeline_mode = #tpu.pipeline_mode<synchronous>, transform_indices = @transform_9, window_bounds = array<i64: 6, 1, 48>}, {pipeline_mode = #tpu.pipeline_mode<synchronous>, transform_indices = @transform_10, window_bounds = array<i64: 2, 48, 96>}, {pipeline_mode = #tpu.pipeline_mode<synchronous>, transform_indices = @transform_11, window_bounds = array<i64: 1, 96>}, {pipeline_mode = #tpu.pipeline_mode<synchronous>, transform_indices = @transform_12, window_bounds = array<i64: 1, 96>}, {pipeline_mode = #tpu.pipeline_mode<synchronous>, transform_indices = @transform_13, window_bounds = array<i64: 1, 96>}, {pipeline_mode = #tpu.pipeline_mode<synchronous>, transform_indices = @transform_14, window_bounds = array<i64: 96, 32>}, {pipeline_mode = #tpu.pipeline_mode<synchronous>, transform_indices = @transform_15, window_bounds = array<i64: 1, 32>}, {pipeline_mode = #tpu.pipeline_mode<synchronous>, transform_indices = @transform_16, window_bounds = array<i64: 32, 96>}, {pipeline_mode = #tpu.pipeline_mode<synchronous>, transform_indices = @transform_17, window_bounds = array<i64: 1, 96>}, {pipeline_mode = #tpu.pipeline_mode<synchronous>, transform_indices = @transform_18, window_bounds = array<i64: 1, 96>}, {pipeline_mode = #tpu.pipeline_mode<synchronous>, transform_indices = @transform_19, window_bounds = array<i64: 1, 96>}, {pipeline_mode = #tpu.pipeline_mode<synchronous>, transform_indices = @transform_20, window_bounds = array<i64: 96, 128>}, {pipeline_mode = #tpu.pipeline_mode<synchronous>, transform_indices = @transform_21, window_bounds = array<i64: 1, 128>}, {transform_indices = @transform_22, window_bounds = array<i64: 1, 8, 128>}]} {
    %c0 = arith.constant 0 : index
    %c0_0 = arith.constant 0 : index
    %c0_1 = arith.constant 0 : index
    %0 = vector.load %arg1[%c0, %c0_0, %c0_1] : memref<1x8x96xf32, #tpu.memory_space<vmem>>, vector<1x8x96xf32>
    %1 = vector.shape_cast %0 : vector<1x8x96xf32> to vector<8x96xf32>
    %c0_2 = arith.constant 0 : index
    %c0_3 = arith.constant 0 : index
    %c0_4 = arith.constant 0 : index
    %2 = vector.load %arg2[%c0_2, %c0_3, %c0_4] : memref<1x8x96xf32, #tpu.memory_space<vmem>>, vector<1x8x96xf32>
    %3 = vector.shape_cast %2 : vector<1x8x96xf32> to vector<8x96xf32>
    %c0_5 = arith.constant 0 : index
    %c0_6 = arith.constant 0 : index
    %4 = vector.load %arg6[%c0_5, %c0_6] : memref<1x96xf32, #tpu.memory_space<vmem>>, vector<1x96xf32>
    %5 = tpu.iota {dimensions = array<i32: 0>} : vector<8x8xi32>
    %6 = tpu.iota {dimensions = array<i32: 1>} : vector<8x8xi32>
    %7 = arith.cmpi sle, %6, %5 : vector<8x8xi32>
    %c0_7 = arith.constant 0 : index
    %c0_8 = arith.constant 0 : index
    %c0_9 = arith.constant 0 : index
    %8 = vector.load %arg3[%c0_7, %c0_8, %c0_9] : memref<6x96x48xf32, #tpu.memory_space<vmem>>, vector<1x96x48xf32>
    %9 = vector.shape_cast %8 : vector<1x96x48xf32> to vector<96x48xf32>
    %cst = arith.constant dense<0.000000e+00> : vector<8x48xf32>
    %10 = tpu.matmul %1, %9, %cst {dimension_numbers = #tpu.dot_dimension_numbers<[1], [0], [0], [1], [0, 0, 1, 1], [], []>} : vector<8x96xf32>, vector<96x48xf32>, vector<8x48xf32> -> vector<8x48xf32>
    %c0_10 = arith.constant 0 : index
    %c0_11 = arith.constant 0 : index
    %c0_12 = arith.constant 0 : index
    %11 = vector.load %arg4[%c0_10, %c0_11, %c0_12] : memref<6x1x48xf32, #tpu.memory_space<vmem>>, vector<1x1x48xf32>
    %12 = vector.shape_cast %11 : vector<1x1x48xf32> to vector<1x48xf32>
    %13 = vector.broadcast %12 : vector<1x48xf32> to vector<8x48xf32>
    %14 = arith.addf %10, %13 : vector<8x48xf32>
    %cst_13 = arith.constant 0.144337565 : f32
    %15 = vector.broadcast %cst_13 : f32 to vector<8x48xf32>
    %16 = arith.mulf %14, %15 : vector<8x48xf32>
    %c2 = arith.constant 2 : index
    %c0_14 = arith.constant 0 : index
    %c0_15 = arith.constant 0 : index
    %17 = vector.load %arg3[%c2, %c0_14, %c0_15] : memref<6x96x48xf32, #tpu.memory_space<vmem>>, vector<1x96x48xf32>
    %18 = vector.shape_cast %17 : vector<1x96x48xf32> to vector<96x48xf32>
    %cst_16 = arith.constant dense<0.000000e+00> : vector<8x48xf32>
    %19 = tpu.matmul %1, %18, %cst_16 {dimension_numbers = #tpu.dot_dimension_numbers<[1], [0], [0], [1], [0, 0, 1, 1], [], []>} : vector<8x96xf32>, vector<96x48xf32>, vector<8x48xf32> -> vector<8x48xf32>
    %c2_17 = arith.constant 2 : index
    %c0_18 = arith.constant 0 : index
    %c0_19 = arith.constant 0 : index
    %20 = vector.load %arg4[%c2_17, %c0_18, %c0_19] : memref<6x1x48xf32, #tpu.memory_space<vmem>>, vector<1x1x48xf32>
    %21 = vector.shape_cast %20 : vector<1x1x48xf32> to vector<1x48xf32>
    %22 = vector.broadcast %21 : vector<1x48xf32> to vector<8x48xf32>
    %23 = arith.addf %19, %22 : vector<8x48xf32>
    %c4 = arith.constant 4 : index
    %c0_20 = arith.constant 0 : index
    %c0_21 = arith.constant 0 : index
    %24 = vector.load %arg3[%c4, %c0_20, %c0_21] : memref<6x96x48xf32, #tpu.memory_space<vmem>>, vector<1x96x48xf32>
    %25 = vector.shape_cast %24 : vector<1x96x48xf32> to vector<96x48xf32>
    %cst_22 = arith.constant dense<0.000000e+00> : vector<8x48xf32>
    %26 = tpu.matmul %1, %25, %cst_22 {dimension_numbers = #tpu.dot_dimension_numbers<[1], [0], [0], [1], [0, 0, 1, 1], [], []>} : vector<8x96xf32>, vector<96x48xf32>, vector<8x48xf32> -> vector<8x48xf32>
    %c4_23 = arith.constant 4 : index
    %c0_24 = arith.constant 0 : index
    %c0_25 = arith.constant 0 : index
    %27 = vector.load %arg4[%c4_23, %c0_24, %c0_25] : memref<6x1x48xf32, #tpu.memory_space<vmem>>, vector<1x1x48xf32>
    %28 = vector.shape_cast %27 : vector<1x1x48xf32> to vector<1x48xf32>
    %29 = vector.broadcast %28 : vector<1x48xf32> to vector<8x48xf32>
    %30 = arith.addf %26, %29 : vector<8x48xf32>
    %cst_26 = arith.constant dense<0.000000e+00> : vector<8x8xf32>
    %31 = tpu.matmul %16, %23, %cst_26 {dimension_numbers = #tpu.dot_dimension_numbers<[1], [1], [0], [0], [0, 0, 1, 0], [], []>} : vector<8x48xf32>, vector<8x48xf32>, vector<8x8xf32> -> vector<8x8xf32>
    %cst_27 = arith.constant -1.000000e+30 : f32
    %32 = vector.broadcast %cst_27 : f32 to vector<8x8xf32>
    %33 = arith.select %7, %31, %32 : vector<8x8xi1>, vector<8x8xf32>
    %cst_28 = arith.constant dense<0xFF800000> : vector<8xf32>
    %34 = vector.multi_reduction <maximumf>, %33, %cst_28 [1] : vector<8x8xf32> to vector<8xf32>
    %35 = vector.shape_cast %34 : vector<8xf32> to vector<8x1xf32>
    %36 = vector.broadcast %35 : vector<8x1xf32> to vector<8x8xf32>
    %37 = arith.subf %33, %36 : vector<8x8xf32>
    %38 = math.exp %37 : vector<8x8xf32>
    %cst_29 = arith.constant dense<0.000000e+00> : vector<8xf32>
    %39 = vector.multi_reduction <add>, %38, %cst_29 [1] : vector<8x8xf32> to vector<8xf32>
    %40 = vector.shape_cast %39 : vector<8xf32> to vector<8x1xf32>
    %41 = tpu.reciprocal %40 {approx = true} : vector<8x1xf32> -> vector<8x1xf32>
    %42 = vector.broadcast %41 : vector<8x1xf32> to vector<8x8xf32>
    %43 = arith.mulf %38, %42 : vector<8x8xf32>
    %cst_30 = arith.constant dense<0.000000e+00> : vector<8x48xf32>
    %44 = tpu.matmul %43, %30, %cst_30 {dimension_numbers = #tpu.dot_dimension_numbers<[1], [0], [0], [1], [0, 0, 1, 1], [], []>} : vector<8x8xf32>, vector<8x48xf32>, vector<8x48xf32> -> vector<8x48xf32>
    %c0_31 = arith.constant 0 : index
    %c0_32 = arith.constant 0 : index
    %c0_33 = arith.constant 0 : index
    %45 = vector.load %arg5[%c0_31, %c0_32, %c0_33] : memref<2x48x96xf32, #tpu.memory_space<vmem>>, vector<1x48x96xf32>
    %46 = vector.shape_cast %45 : vector<1x48x96xf32> to vector<48x96xf32>
    %cst_34 = arith.constant dense<0.000000e+00> : vector<8x96xf32>
    %47 = tpu.matmul %44, %46, %cst_34 {dimension_numbers = #tpu.dot_dimension_numbers<[1], [0], [0], [1], [0, 0, 1, 1], [], []>} : vector<8x48xf32>, vector<48x96xf32>, vector<8x96xf32> -> vector<8x96xf32>
    %c1 = arith.constant 1 : index
    %c0_35 = arith.constant 0 : index
    %c0_36 = arith.constant 0 : index
    %48 = vector.load %arg3[%c1, %c0_35, %c0_36] : memref<6x96x48xf32, #tpu.memory_space<vmem>>, vector<1x96x48xf32>
    %49 = vector.shape_cast %48 : vector<1x96x48xf32> to vector<96x48xf32>
    %cst_37 = arith.constant dense<0.000000e+00> : vector<8x48xf32>
    %50 = tpu.matmul %1, %49, %cst_37 {dimension_numbers = #tpu.dot_dimension_numbers<[1], [0], [0], [1], [0, 0, 1, 1], [], []>} : vector<8x96xf32>, vector<96x48xf32>, vector<8x48xf32> -> vector<8x48xf32>
    %c1_38 = arith.constant 1 : index
    %c0_39 = arith.constant 0 : index
    %c0_40 = arith.constant 0 : index
    %51 = vector.load %arg4[%c1_38, %c0_39, %c0_40] : memref<6x1x48xf32, #tpu.memory_space<vmem>>, vector<1x1x48xf32>
    %52 = vector.shape_cast %51 : vector<1x1x48xf32> to vector<1x48xf32>
    %53 = vector.broadcast %52 : vector<1x48xf32> to vector<8x48xf32>
    %54 = arith.addf %50, %53 : vector<8x48xf32>
    %cst_41 = arith.constant 0.144337565 : f32
    %55 = vector.broadcast %cst_41 : f32 to vector<8x48xf32>
    %56 = arith.mulf %54, %55 : vector<8x48xf32>
    %c3 = arith.constant 3 : index
    %c0_42 = arith.constant 0 : index
    %c0_43 = arith.constant 0 : index
    %57 = vector.load %arg3[%c3, %c0_42, %c0_43] : memref<6x96x48xf32, #tpu.memory_space<vmem>>, vector<1x96x48xf32>
    %58 = vector.shape_cast %57 : vector<1x96x48xf32> to vector<96x48xf32>
    %cst_44 = arith.constant dense<0.000000e+00> : vector<8x48xf32>
    %59 = tpu.matmul %1, %58, %cst_44 {dimension_numbers = #tpu.dot_dimension_numbers<[1], [0], [0], [1], [0, 0, 1, 1], [], []>} : vector<8x96xf32>, vector<96x48xf32>, vector<8x48xf32> -> vector<8x48xf32>
    %c3_45 = arith.constant 3 : index
    %c0_46 = arith.constant 0 : index
    %c0_47 = arith.constant 0 : index
    %60 = vector.load %arg4[%c3_45, %c0_46, %c0_47] : memref<6x1x48xf32, #tpu.memory_space<vmem>>, vector<1x1x48xf32>
    %61 = vector.shape_cast %60 : vector<1x1x48xf32> to vector<1x48xf32>
    %62 = vector.broadcast %61 : vector<1x48xf32> to vector<8x48xf32>
    %63 = arith.addf %59, %62 : vector<8x48xf32>
    %c5 = arith.constant 5 : index
    %c0_48 = arith.constant 0 : index
    %c0_49 = arith.constant 0 : index
    %64 = vector.load %arg3[%c5, %c0_48, %c0_49] : memref<6x96x48xf32, #tpu.memory_space<vmem>>, vector<1x96x48xf32>
    %65 = vector.shape_cast %64 : vector<1x96x48xf32> to vector<96x48xf32>
    %cst_50 = arith.constant dense<0.000000e+00> : vector<8x48xf32>
    %66 = tpu.matmul %1, %65, %cst_50 {dimension_numbers = #tpu.dot_dimension_numbers<[1], [0], [0], [1], [0, 0, 1, 1], [], []>} : vector<8x96xf32>, vector<96x48xf32>, vector<8x48xf32> -> vector<8x48xf32>
    %c5_51 = arith.constant 5 : index
    %c0_52 = arith.constant 0 : index
    %c0_53 = arith.constant 0 : index
    %67 = vector.load %arg4[%c5_51, %c0_52, %c0_53] : memref<6x1x48xf32, #tpu.memory_space<vmem>>, vector<1x1x48xf32>
    %68 = vector.shape_cast %67 : vector<1x1x48xf32> to vector<1x48xf32>
    %69 = vector.broadcast %68 : vector<1x48xf32> to vector<8x48xf32>
    %70 = arith.addf %66, %69 : vector<8x48xf32>
    %cst_54 = arith.constant dense<0.000000e+00> : vector<8x8xf32>
    %71 = tpu.matmul %56, %63, %cst_54 {dimension_numbers = #tpu.dot_dimension_numbers<[1], [1], [0], [0], [0, 0, 1, 0], [], []>} : vector<8x48xf32>, vector<8x48xf32>, vector<8x8xf32> -> vector<8x8xf32>
    %cst_55 = arith.constant -1.000000e+30 : f32
    %72 = vector.broadcast %cst_55 : f32 to vector<8x8xf32>
    %73 = arith.select %7, %71, %72 : vector<8x8xi1>, vector<8x8xf32>
    %cst_56 = arith.constant dense<0xFF800000> : vector<8xf32>
    %74 = vector.multi_reduction <maximumf>, %73, %cst_56 [1] : vector<8x8xf32> to vector<8xf32>
    %75 = vector.shape_cast %74 : vector<8xf32> to vector<8x1xf32>
    %76 = vector.broadcast %75 : vector<8x1xf32> to vector<8x8xf32>
    %77 = arith.subf %73, %76 : vector<8x8xf32>
    %78 = math.exp %77 : vector<8x8xf32>
    %cst_57 = arith.constant dense<0.000000e+00> : vector<8xf32>
    %79 = vector.multi_reduction <add>, %78, %cst_57 [1] : vector<8x8xf32> to vector<8xf32>
    %80 = vector.shape_cast %79 : vector<8xf32> to vector<8x1xf32>
    %81 = tpu.reciprocal %80 {approx = true} : vector<8x1xf32> -> vector<8x1xf32>
    %82 = vector.broadcast %81 : vector<8x1xf32> to vector<8x8xf32>
    %83 = arith.mulf %78, %82 : vector<8x8xf32>
    %cst_58 = arith.constant dense<0.000000e+00> : vector<8x48xf32>
    %84 = tpu.matmul %83, %70, %cst_58 {dimension_numbers = #tpu.dot_dimension_numbers<[1], [0], [0], [1], [0, 0, 1, 1], [], []>} : vector<8x8xf32>, vector<8x48xf32>, vector<8x48xf32> -> vector<8x48xf32>
    %c1_59 = arith.constant 1 : index
    %c0_60 = arith.constant 0 : index
    %c0_61 = arith.constant 0 : index
    %85 = vector.load %arg5[%c1_59, %c0_60, %c0_61] : memref<2x48x96xf32, #tpu.memory_space<vmem>>, vector<1x48x96xf32>
    %86 = vector.shape_cast %85 : vector<1x48x96xf32> to vector<48x96xf32>
    %cst_62 = arith.constant dense<0.000000e+00> : vector<8x96xf32>
    %87 = tpu.matmul %84, %86, %cst_62 {dimension_numbers = #tpu.dot_dimension_numbers<[1], [0], [0], [1], [0, 0, 1, 1], [], []>} : vector<8x48xf32>, vector<48x96xf32>, vector<8x96xf32> -> vector<8x96xf32>
    %88 = arith.addf %47, %87 : vector<8x96xf32>
    %89 = vector.broadcast %4 : vector<1x96xf32> to vector<8x96xf32>
    %90 = arith.addf %88, %89 : vector<8x96xf32>
    %91 = arith.addf %1, %90 : vector<8x96xf32>
    %c0_63 = arith.constant 0 : index
    %c0_64 = arith.constant 0 : index
    %92 = vector.load %arg7[%c0_63, %c0_64] : memref<1x96xf32, #tpu.memory_space<vmem>>, vector<1x96xf32>
    %c0_65 = arith.constant 0 : index
    %c0_66 = arith.constant 0 : index
    %93 = vector.load %arg8[%c0_65, %c0_66] : memref<1x96xf32, #tpu.memory_space<vmem>>, vector<1x96xf32>
    %cst_67 = arith.constant dense<0.000000e+00> : vector<8xf32>
    %94 = vector.multi_reduction <add>, %91, %cst_67 [1] : vector<8x96xf32> to vector<8xf32>
    %95 = vector.shape_cast %94 : vector<8xf32> to vector<8x1xf32>
    %cst_68 = arith.constant 9.600000e+01 : f32
    %96 = vector.broadcast %cst_68 : f32 to vector<8x1xf32>
    %97 = arith.divf %95, %96 : vector<8x1xf32>
    %98 = vector.broadcast %97 : vector<8x1xf32> to vector<8x96xf32>
    %99 = arith.subf %91, %98 : vector<8x96xf32>
    %100 = arith.mulf %99, %99 : vector<8x96xf32>
    %cst_69 = arith.constant dense<0.000000e+00> : vector<8xf32>
    %101 = vector.multi_reduction <add>, %100, %cst_69 [1] : vector<8x96xf32> to vector<8xf32>
    %102 = vector.shape_cast %101 : vector<8xf32> to vector<8x1xf32>
    %cst_70 = arith.constant 9.600000e+01 : f32
    %103 = vector.broadcast %cst_70 : f32 to vector<8x1xf32>
    %104 = arith.divf %102, %103 : vector<8x1xf32>
    %cst_71 = arith.constant 9.99999974E-6 : f32
    %105 = vector.broadcast %cst_71 : f32 to vector<8x1xf32>
    %106 = arith.addf %104, %105 : vector<8x1xf32>
    %107 = math.rsqrt %106 : vector<8x1xf32>
    %108 = vector.broadcast %107 : vector<8x1xf32> to vector<8x96xf32>
    %109 = arith.mulf %99, %108 : vector<8x96xf32>
    %110 = vector.broadcast %92 : vector<1x96xf32> to vector<8x96xf32>
    %111 = arith.mulf %109, %110 : vector<8x96xf32>
    %112 = vector.broadcast %93 : vector<1x96xf32> to vector<8x96xf32>
    %113 = arith.addf %111, %112 : vector<8x96xf32>
    %c0_72 = arith.constant 0 : index
    %c0_73 = arith.constant 0 : index
    %114 = vector.load %arg12[%c0_72, %c0_73] : memref<1x96xf32, #tpu.memory_space<vmem>>, vector<1x96xf32>
    %115 = tpu.iota {dimensions = array<i32: 0>} : vector<8x8xi32>
    %116 = tpu.iota {dimensions = array<i32: 1>} : vector<8x8xi32>
    %117 = arith.cmpi sle, %116, %115 : vector<8x8xi32>
    %c0_74 = arith.constant 0 : index
    %c0_75 = arith.constant 0 : index
    %c0_76 = arith.constant 0 : index
    %118 = vector.load %arg9[%c0_74, %c0_75, %c0_76] : memref<6x96x48xf32, #tpu.memory_space<vmem>>, vector<1x96x48xf32>
    %119 = vector.shape_cast %118 : vector<1x96x48xf32> to vector<96x48xf32>
    %cst_77 = arith.constant dense<0.000000e+00> : vector<8x48xf32>
    %120 = tpu.matmul %113, %119, %cst_77 {dimension_numbers = #tpu.dot_dimension_numbers<[1], [0], [0], [1], [0, 0, 1, 1], [], []>} : vector<8x96xf32>, vector<96x48xf32>, vector<8x48xf32> -> vector<8x48xf32>
    %c0_78 = arith.constant 0 : index
    %c0_79 = arith.constant 0 : index
    %c0_80 = arith.constant 0 : index
    %121 = vector.load %arg10[%c0_78, %c0_79, %c0_80] : memref<6x1x48xf32, #tpu.memory_space<vmem>>, vector<1x1x48xf32>
    %122 = vector.shape_cast %121 : vector<1x1x48xf32> to vector<1x48xf32>
    %123 = vector.broadcast %122 : vector<1x48xf32> to vector<8x48xf32>
    %124 = arith.addf %120, %123 : vector<8x48xf32>
    %cst_81 = arith.constant 0.144337565 : f32
    %125 = vector.broadcast %cst_81 : f32 to vector<8x48xf32>
    %126 = arith.mulf %124, %125 : vector<8x48xf32>
    %c2_82 = arith.constant 2 : index
    %c0_83 = arith.constant 0 : index
    %c0_84 = arith.constant 0 : index
    %127 = vector.load %arg9[%c2_82, %c0_83, %c0_84] : memref<6x96x48xf32, #tpu.memory_space<vmem>>, vector<1x96x48xf32>
    %128 = vector.shape_cast %127 : vector<1x96x48xf32> to vector<96x48xf32>
    %cst_85 = arith.constant dense<0.000000e+00> : vector<8x48xf32>
    %129 = tpu.matmul %3, %128, %cst_85 {dimension_numbers = #tpu.dot_dimension_numbers<[1], [0], [0], [1], [0, 0, 1, 1], [], []>} : vector<8x96xf32>, vector<96x48xf32>, vector<8x48xf32> -> vector<8x48xf32>
    %c2_86 = arith.constant 2 : index
    %c0_87 = arith.constant 0 : index
    %c0_88 = arith.constant 0 : index
    %130 = vector.load %arg10[%c2_86, %c0_87, %c0_88] : memref<6x1x48xf32, #tpu.memory_space<vmem>>, vector<1x1x48xf32>
    %131 = vector.shape_cast %130 : vector<1x1x48xf32> to vector<1x48xf32>
    %132 = vector.broadcast %131 : vector<1x48xf32> to vector<8x48xf32>
    %133 = arith.addf %129, %132 : vector<8x48xf32>
    %c4_89 = arith.constant 4 : index
    %c0_90 = arith.constant 0 : index
    %c0_91 = arith.constant 0 : index
    %134 = vector.load %arg9[%c4_89, %c0_90, %c0_91] : memref<6x96x48xf32, #tpu.memory_space<vmem>>, vector<1x96x48xf32>
    %135 = vector.shape_cast %134 : vector<1x96x48xf32> to vector<96x48xf32>
    %cst_92 = arith.constant dense<0.000000e+00> : vector<8x48xf32>
    %136 = tpu.matmul %3, %135, %cst_92 {dimension_numbers = #tpu.dot_dimension_numbers<[1], [0], [0], [1], [0, 0, 1, 1], [], []>} : vector<8x96xf32>, vector<96x48xf32>, vector<8x48xf32> -> vector<8x48xf32>
    %c4_93 = arith.constant 4 : index
    %c0_94 = arith.constant 0 : index
    %c0_95 = arith.constant 0 : index
    %137 = vector.load %arg10[%c4_93, %c0_94, %c0_95] : memref<6x1x48xf32, #tpu.memory_space<vmem>>, vector<1x1x48xf32>
    %138 = vector.shape_cast %137 : vector<1x1x48xf32> to vector<1x48xf32>
    %139 = vector.broadcast %138 : vector<1x48xf32> to vector<8x48xf32>
    %140 = arith.addf %136, %139 : vector<8x48xf32>
    %cst_96 = arith.constant dense<0.000000e+00> : vector<8x8xf32>
    %141 = tpu.matmul %126, %133, %cst_96 {dimension_numbers = #tpu.dot_dimension_numbers<[1], [1], [0], [0], [0, 0, 1, 0], [], []>} : vector<8x48xf32>, vector<8x48xf32>, vector<8x8xf32> -> vector<8x8xf32>
    %cst_97 = arith.constant -1.000000e+30 : f32
    %142 = vector.broadcast %cst_97 : f32 to vector<8x8xf32>
    %143 = arith.select %117, %141, %142 : vector<8x8xi1>, vector<8x8xf32>
    %cst_98 = arith.constant dense<0xFF800000> : vector<8xf32>
    %144 = vector.multi_reduction <maximumf>, %143, %cst_98 [1] : vector<8x8xf32> to vector<8xf32>
    %145 = vector.shape_cast %144 : vector<8xf32> to vector<8x1xf32>
    %146 = vector.broadcast %145 : vector<8x1xf32> to vector<8x8xf32>
    %147 = arith.subf %143, %146 : vector<8x8xf32>
    %148 = math.exp %147 : vector<8x8xf32>
    %cst_99 = arith.constant dense<0.000000e+00> : vector<8xf32>
    %149 = vector.multi_reduction <add>, %148, %cst_99 [1] : vector<8x8xf32> to vector<8xf32>
    %150 = vector.shape_cast %149 : vector<8xf32> to vector<8x1xf32>
    %151 = tpu.reciprocal %150 {approx = true} : vector<8x1xf32> -> vector<8x1xf32>
    %152 = vector.broadcast %151 : vector<8x1xf32> to vector<8x8xf32>
    %153 = arith.mulf %148, %152 : vector<8x8xf32>
    %cst_100 = arith.constant dense<0.000000e+00> : vector<8x48xf32>
    %154 = tpu.matmul %153, %140, %cst_100 {dimension_numbers = #tpu.dot_dimension_numbers<[1], [0], [0], [1], [0, 0, 1, 1], [], []>} : vector<8x8xf32>, vector<8x48xf32>, vector<8x48xf32> -> vector<8x48xf32>
    %c0_101 = arith.constant 0 : index
    %c0_102 = arith.constant 0 : index
    %c0_103 = arith.constant 0 : index
    %155 = vector.load %arg11[%c0_101, %c0_102, %c0_103] : memref<2x48x96xf32, #tpu.memory_space<vmem>>, vector<1x48x96xf32>
    %156 = vector.shape_cast %155 : vector<1x48x96xf32> to vector<48x96xf32>
    %cst_104 = arith.constant dense<0.000000e+00> : vector<8x96xf32>
    %157 = tpu.matmul %154, %156, %cst_104 {dimension_numbers = #tpu.dot_dimension_numbers<[1], [0], [0], [1], [0, 0, 1, 1], [], []>} : vector<8x48xf32>, vector<48x96xf32>, vector<8x96xf32> -> vector<8x96xf32>
    %c1_105 = arith.constant 1 : index
    %c0_106 = arith.constant 0 : index
    %c0_107 = arith.constant 0 : index
    %158 = vector.load %arg9[%c1_105, %c0_106, %c0_107] : memref<6x96x48xf32, #tpu.memory_space<vmem>>, vector<1x96x48xf32>
    %159 = vector.shape_cast %158 : vector<1x96x48xf32> to vector<96x48xf32>
    %cst_108 = arith.constant dense<0.000000e+00> : vector<8x48xf32>
    %160 = tpu.matmul %113, %159, %cst_108 {dimension_numbers = #tpu.dot_dimension_numbers<[1], [0], [0], [1], [0, 0, 1, 1], [], []>} : vector<8x96xf32>, vector<96x48xf32>, vector<8x48xf32> -> vector<8x48xf32>
    %c1_109 = arith.constant 1 : index
    %c0_110 = arith.constant 0 : index
    %c0_111 = arith.constant 0 : index
    %161 = vector.load %arg10[%c1_109, %c0_110, %c0_111] : memref<6x1x48xf32, #tpu.memory_space<vmem>>, vector<1x1x48xf32>
    %162 = vector.shape_cast %161 : vector<1x1x48xf32> to vector<1x48xf32>
    %163 = vector.broadcast %162 : vector<1x48xf32> to vector<8x48xf32>
    %164 = arith.addf %160, %163 : vector<8x48xf32>
    %cst_112 = arith.constant 0.144337565 : f32
    %165 = vector.broadcast %cst_112 : f32 to vector<8x48xf32>
    %166 = arith.mulf %164, %165 : vector<8x48xf32>
    %c3_113 = arith.constant 3 : index
    %c0_114 = arith.constant 0 : index
    %c0_115 = arith.constant 0 : index
    %167 = vector.load %arg9[%c3_113, %c0_114, %c0_115] : memref<6x96x48xf32, #tpu.memory_space<vmem>>, vector<1x96x48xf32>
    %168 = vector.shape_cast %167 : vector<1x96x48xf32> to vector<96x48xf32>
    %cst_116 = arith.constant dense<0.000000e+00> : vector<8x48xf32>
    %169 = tpu.matmul %3, %168, %cst_116 {dimension_numbers = #tpu.dot_dimension_numbers<[1], [0], [0], [1], [0, 0, 1, 1], [], []>} : vector<8x96xf32>, vector<96x48xf32>, vector<8x48xf32> -> vector<8x48xf32>
    %c3_117 = arith.constant 3 : index
    %c0_118 = arith.constant 0 : index
    %c0_119 = arith.constant 0 : index
    %170 = vector.load %arg10[%c3_117, %c0_118, %c0_119] : memref<6x1x48xf32, #tpu.memory_space<vmem>>, vector<1x1x48xf32>
    %171 = vector.shape_cast %170 : vector<1x1x48xf32> to vector<1x48xf32>
    %172 = vector.broadcast %171 : vector<1x48xf32> to vector<8x48xf32>
    %173 = arith.addf %169, %172 : vector<8x48xf32>
    %c5_120 = arith.constant 5 : index
    %c0_121 = arith.constant 0 : index
    %c0_122 = arith.constant 0 : index
    %174 = vector.load %arg9[%c5_120, %c0_121, %c0_122] : memref<6x96x48xf32, #tpu.memory_space<vmem>>, vector<1x96x48xf32>
    %175 = vector.shape_cast %174 : vector<1x96x48xf32> to vector<96x48xf32>
    %cst_123 = arith.constant dense<0.000000e+00> : vector<8x48xf32>
    %176 = tpu.matmul %3, %175, %cst_123 {dimension_numbers = #tpu.dot_dimension_numbers<[1], [0], [0], [1], [0, 0, 1, 1], [], []>} : vector<8x96xf32>, vector<96x48xf32>, vector<8x48xf32> -> vector<8x48xf32>
    %c5_124 = arith.constant 5 : index
    %c0_125 = arith.constant 0 : index
    %c0_126 = arith.constant 0 : index
    %177 = vector.load %arg10[%c5_124, %c0_125, %c0_126] : memref<6x1x48xf32, #tpu.memory_space<vmem>>, vector<1x1x48xf32>
    %178 = vector.shape_cast %177 : vector<1x1x48xf32> to vector<1x48xf32>
    %179 = vector.broadcast %178 : vector<1x48xf32> to vector<8x48xf32>
    %180 = arith.addf %176, %179 : vector<8x48xf32>
    %cst_127 = arith.constant dense<0.000000e+00> : vector<8x8xf32>
    %181 = tpu.matmul %166, %173, %cst_127 {dimension_numbers = #tpu.dot_dimension_numbers<[1], [1], [0], [0], [0, 0, 1, 0], [], []>} : vector<8x48xf32>, vector<8x48xf32>, vector<8x8xf32> -> vector<8x8xf32>
    %cst_128 = arith.constant -1.000000e+30 : f32
    %182 = vector.broadcast %cst_128 : f32 to vector<8x8xf32>
    %183 = arith.select %117, %181, %182 : vector<8x8xi1>, vector<8x8xf32>
    %cst_129 = arith.constant dense<0xFF800000> : vector<8xf32>
    %184 = vector.multi_reduction <maximumf>, %183, %cst_129 [1] : vector<8x8xf32> to vector<8xf32>
    %185 = vector.shape_cast %184 : vector<8xf32> to vector<8x1xf32>
    %186 = vector.broadcast %185 : vector<8x1xf32> to vector<8x8xf32>
    %187 = arith.subf %183, %186 : vector<8x8xf32>
    %188 = math.exp %187 : vector<8x8xf32>
    %cst_130 = arith.constant dense<0.000000e+00> : vector<8xf32>
    %189 = vector.multi_reduction <add>, %188, %cst_130 [1] : vector<8x8xf32> to vector<8xf32>
    %190 = vector.shape_cast %189 : vector<8xf32> to vector<8x1xf32>
    %191 = tpu.reciprocal %190 {approx = true} : vector<8x1xf32> -> vector<8x1xf32>
    %192 = vector.broadcast %191 : vector<8x1xf32> to vector<8x8xf32>
    %193 = arith.mulf %188, %192 : vector<8x8xf32>
    %cst_131 = arith.constant dense<0.000000e+00> : vector<8x48xf32>
    %194 = tpu.matmul %193, %180, %cst_131 {dimension_numbers = #tpu.dot_dimension_numbers<[1], [0], [0], [1], [0, 0, 1, 1], [], []>} : vector<8x8xf32>, vector<8x48xf32>, vector<8x48xf32> -> vector<8x48xf32>
    %c1_132 = arith.constant 1 : index
    %c0_133 = arith.constant 0 : index
    %c0_134 = arith.constant 0 : index
    %195 = vector.load %arg11[%c1_132, %c0_133, %c0_134] : memref<2x48x96xf32, #tpu.memory_space<vmem>>, vector<1x48x96xf32>
    %196 = vector.shape_cast %195 : vector<1x48x96xf32> to vector<48x96xf32>
    %cst_135 = arith.constant dense<0.000000e+00> : vector<8x96xf32>
    %197 = tpu.matmul %194, %196, %cst_135 {dimension_numbers = #tpu.dot_dimension_numbers<[1], [0], [0], [1], [0, 0, 1, 1], [], []>} : vector<8x48xf32>, vector<48x96xf32>, vector<8x96xf32> -> vector<8x96xf32>
    %198 = arith.addf %157, %197 : vector<8x96xf32>
    %199 = vector.broadcast %114 : vector<1x96xf32> to vector<8x96xf32>
    %200 = arith.addf %198, %199 : vector<8x96xf32>
    %201 = arith.addf %113, %200 : vector<8x96xf32>
    %c0_136 = arith.constant 0 : index
    %c0_137 = arith.constant 0 : index
    %202 = vector.load %arg13[%c0_136, %c0_137] : memref<1x96xf32, #tpu.memory_space<vmem>>, vector<1x96xf32>
    %c0_138 = arith.constant 0 : index
    %c0_139 = arith.constant 0 : index
    %203 = vector.load %arg14[%c0_138, %c0_139] : memref<1x96xf32, #tpu.memory_space<vmem>>, vector<1x96xf32>
    %cst_140 = arith.constant dense<0.000000e+00> : vector<8xf32>
    %204 = vector.multi_reduction <add>, %201, %cst_140 [1] : vector<8x96xf32> to vector<8xf32>
    %205 = vector.shape_cast %204 : vector<8xf32> to vector<8x1xf32>
    %cst_141 = arith.constant 9.600000e+01 : f32
    %206 = vector.broadcast %cst_141 : f32 to vector<8x1xf32>
    %207 = arith.divf %205, %206 : vector<8x1xf32>
    %208 = vector.broadcast %207 : vector<8x1xf32> to vector<8x96xf32>
    %209 = arith.subf %201, %208 : vector<8x96xf32>
    %210 = arith.mulf %209, %209 : vector<8x96xf32>
    %cst_142 = arith.constant dense<0.000000e+00> : vector<8xf32>
    %211 = vector.multi_reduction <add>, %210, %cst_142 [1] : vector<8x96xf32> to vector<8xf32>
    %212 = vector.shape_cast %211 : vector<8xf32> to vector<8x1xf32>
    %cst_143 = arith.constant 9.600000e+01 : f32
    %213 = vector.broadcast %cst_143 : f32 to vector<8x1xf32>
    %214 = arith.divf %212, %213 : vector<8x1xf32>
    %cst_144 = arith.constant 9.99999974E-6 : f32
    %215 = vector.broadcast %cst_144 : f32 to vector<8x1xf32>
    %216 = arith.addf %214, %215 : vector<8x1xf32>
    %217 = math.rsqrt %216 : vector<8x1xf32>
    %218 = vector.broadcast %217 : vector<8x1xf32> to vector<8x96xf32>
    %219 = arith.mulf %209, %218 : vector<8x96xf32>
    %220 = vector.broadcast %202 : vector<1x96xf32> to vector<8x96xf32>
    %221 = arith.mulf %219, %220 : vector<8x96xf32>
    %222 = vector.broadcast %203 : vector<1x96xf32> to vector<8x96xf32>
    %223 = arith.addf %221, %222 : vector<8x96xf32>
    %c0_145 = arith.constant 0 : index
    %c0_146 = arith.constant 0 : index
    %224 = vector.load %arg15[%c0_145, %c0_146] : memref<96x32xf32, #tpu.memory_space<vmem>>, vector<96x32xf32>
    %cst_147 = arith.constant dense<0.000000e+00> : vector<8x32xf32>
    %225 = tpu.matmul %223, %224, %cst_147 {dimension_numbers = #tpu.dot_dimension_numbers<[1], [0], [0], [1], [0, 0, 1, 1], [], []>} : vector<8x96xf32>, vector<96x32xf32>, vector<8x32xf32> -> vector<8x32xf32>
    %c0_148 = arith.constant 0 : index
    %c0_149 = arith.constant 0 : index
    %226 = vector.load %arg16[%c0_148, %c0_149] : memref<1x32xf32, #tpu.memory_space<vmem>>, vector<1x32xf32>
    %227 = vector.broadcast %226 : vector<1x32xf32> to vector<8x32xf32>
    %228 = arith.addf %225, %227 : vector<8x32xf32>
    %cst_150 = arith.constant 0.000000e+00 : f32
    %229 = vector.broadcast %cst_150 : f32 to vector<8x32xf32>
    %230 = arith.maximumf %228, %229 : vector<8x32xf32>
    %c0_151 = arith.constant 0 : index
    %c0_152 = arith.constant 0 : index
    %231 = vector.load %arg17[%c0_151, %c0_152] : memref<32x96xf32, #tpu.memory_space<vmem>>, vector<32x96xf32>
    %cst_153 = arith.constant dense<0.000000e+00> : vector<8x96xf32>
    %232 = tpu.matmul %230, %231, %cst_153 {dimension_numbers = #tpu.dot_dimension_numbers<[1], [0], [0], [1], [0, 0, 1, 1], [], []>} : vector<8x32xf32>, vector<32x96xf32>, vector<8x96xf32> -> vector<8x96xf32>
    %c0_154 = arith.constant 0 : index
    %c0_155 = arith.constant 0 : index
    %233 = vector.load %arg18[%c0_154, %c0_155] : memref<1x96xf32, #tpu.memory_space<vmem>>, vector<1x96xf32>
    %234 = vector.broadcast %233 : vector<1x96xf32> to vector<8x96xf32>
    %235 = arith.addf %232, %234 : vector<8x96xf32>
    %236 = arith.addf %223, %235 : vector<8x96xf32>
    %c0_156 = arith.constant 0 : index
    %c0_157 = arith.constant 0 : index
    %237 = vector.load %arg19[%c0_156, %c0_157] : memref<1x96xf32, #tpu.memory_space<vmem>>, vector<1x96xf32>
    %c0_158 = arith.constant 0 : index
    %c0_159 = arith.constant 0 : index
    %238 = vector.load %arg20[%c0_158, %c0_159] : memref<1x96xf32, #tpu.memory_space<vmem>>, vector<1x96xf32>
    %cst_160 = arith.constant dense<0.000000e+00> : vector<8xf32>
    %239 = vector.multi_reduction <add>, %236, %cst_160 [1] : vector<8x96xf32> to vector<8xf32>
    %240 = vector.shape_cast %239 : vector<8xf32> to vector<8x1xf32>
    %cst_161 = arith.constant 9.600000e+01 : f32
    %241 = vector.broadcast %cst_161 : f32 to vector<8x1xf32>
    %242 = arith.divf %240, %241 : vector<8x1xf32>
    %243 = vector.broadcast %242 : vector<8x1xf32> to vector<8x96xf32>
    %244 = arith.subf %236, %243 : vector<8x96xf32>
    %245 = arith.mulf %244, %244 : vector<8x96xf32>
    %cst_162 = arith.constant dense<0.000000e+00> : vector<8xf32>
    %246 = vector.multi_reduction <add>, %245, %cst_162 [1] : vector<8x96xf32> to vector<8xf32>
    %247 = vector.shape_cast %246 : vector<8xf32> to vector<8x1xf32>
    %cst_163 = arith.constant 9.600000e+01 : f32
    %248 = vector.broadcast %cst_163 : f32 to vector<8x1xf32>
    %249 = arith.divf %247, %248 : vector<8x1xf32>
    %cst_164 = arith.constant 9.99999974E-6 : f32
    %250 = vector.broadcast %cst_164 : f32 to vector<8x1xf32>
    %251 = arith.addf %249, %250 : vector<8x1xf32>
    %252 = math.rsqrt %251 : vector<8x1xf32>
    %253 = vector.broadcast %252 : vector<8x1xf32> to vector<8x96xf32>
    %254 = arith.mulf %244, %253 : vector<8x96xf32>
    %255 = vector.broadcast %237 : vector<1x96xf32> to vector<8x96xf32>
    %256 = arith.mulf %254, %255 : vector<8x96xf32>
    %257 = vector.broadcast %238 : vector<1x96xf32> to vector<8x96xf32>
    %258 = arith.addf %256, %257 : vector<8x96xf32>
    %c0_165 = arith.constant 0 : index
    %c0_166 = arith.constant 0 : index
    %259 = vector.load %arg21[%c0_165, %c0_166] : memref<96x128xf32, #tpu.memory_space<vmem>>, vector<96x128xf32>
    %cst_167 = arith.constant dense<0.000000e+00> : vector<8x128xf32>
    %260 = tpu.matmul %258, %259, %cst_167 {dimension_numbers = #tpu.dot_dimension_numbers<[1], [0], [0], [1], [0, 0, 1, 1], [], []>} : vector<8x96xf32>, vector<96x128xf32>, vector<8x128xf32> -> vector<8x128xf32>
    %c0_168 = arith.constant 0 : index
    %c0_169 = arith.constant 0 : index
    %261 = vector.load %arg22[%c0_168, %c0_169] : memref<1x128xf32, #tpu.memory_space<vmem>>, vector<1x128xf32>
    %262 = vector.broadcast %261 : vector<1x128xf32> to vector<8x128xf32>
    %263 = arith.addf %260, %262 : vector<8x128xf32>
    %c0_170 = arith.constant 0 : index
    %c0_171 = arith.constant 0 : index
    %c0_172 = arith.constant 0 : index
    %264 = vector.load %arg23[%c0_170, %c0_171, %c0_172] : memref<1x8x128xf32, #tpu.memory_space<vmem>>, vector<1x8x128xf32>
    %265 = vector.shape_cast %264 : vector<1x8x128xf32> to vector<8x128xf32>
    %266 = vector.shape_cast %263 : vector<8x128xf32> to vector<1x8x128xf32>
    tpu.vector_store %arg23[%c0_170, %c0_171, %c0_172], %266 {strides = array<i32>} : memref<1x8x128xf32, #tpu.memory_space<vmem>>, vector<1x8x128xf32>,
    return
  }
  func.func @transform_0(%arg0: i32) -> (i32, i32, i32) {
    %c0_i32 = arith.constant 0 : i32
    %c0_i32_0 = arith.constant 0 : i32
    %c0_i32_1 = arith.constant 0 : i32
    return %arg0, %c0_i32, %c0_i32_0 : i32, i32, i32
  }
  func.func @transform_1(%arg0: i32) -> (i32, i32, i32) {
    %c0_i32 = arith.constant 0 : i32
    %c0_i32_0 = arith.constant 0 : i32
    %c0_i32_1 = arith.constant 0 : i32
    return %arg0, %c0_i32, %c0_i32_0 : i32, i32, i32
  }
  func.func @transform_2(%arg0: i32) -> (i32, i32, i32) {
    %c0_i32 = arith.constant 0 : i32
    %c0_i32_0 = arith.constant 0 : i32
    %c0_i32_1 = arith.constant 0 : i32
    %c0_i32_2 = arith.constant 0 : i32
    return %c0_i32, %c0_i32_0, %c0_i32_1 : i32, i32, i32
  }
  func.func @transform_3(%arg0: i32) -> (i32, i32, i32) {
    %c0_i32 = arith.constant 0 : i32
    %c0_i32_0 = arith.constant 0 : i32
    %c0_i32_1 = arith.constant 0 : i32
    %c0_i32_2 = arith.constant 0 : i32
    return %c0_i32, %c0_i32_0, %c0_i32_1 : i32, i32, i32
  }
  func.func @transform_4(%arg0: i32) -> (i32, i32, i32) {
    %c0_i32 = arith.constant 0 : i32
    %c0_i32_0 = arith.constant 0 : i32
    %c0_i32_1 = arith.constant 0 : i32
    %c0_i32_2 = arith.constant 0 : i32
    return %c0_i32, %c0_i32_0, %c0_i32_1 : i32, i32, i32
  }
  func.func @transform_5(%arg0: i32) -> (i32, i32) {
    %c0_i32 = arith.constant 0 : i32
    %c0_i32_0 = arith.constant 0 : i32
    %c0_i32_1 = arith.constant 0 : i32
    return %c0_i32, %c0_i32_0 : i32, i32
  }
  func.func @transform_6(%arg0: i32) -> (i32, i32) {
    %c0_i32 = arith.constant 0 : i32
    %c0_i32_0 = arith.constant 0 : i32
    %c0_i32_1 = arith.constant 0 : i32
    return %c0_i32, %c0_i32_0 : i32, i32
  }
  func.func @transform_7(%arg0: i32) -> (i32, i32) {
    %c0_i32 = arith.constant 0 : i32
    %c0_i32_0 = arith.constant 0 : i32
    %c0_i32_1 = arith.constant 0 : i32
    return %c0_i32, %c0_i32_0 : i32, i32
  }
  func.func @transform_8(%arg0: i32) -> (i32, i32, i32) {
    %c0_i32 = arith.constant 0 : i32
    %c0_i32_0 = arith.constant 0 : i32
    %c0_i32_1 = arith.constant 0 : i32
    %c0_i32_2 = arith.constant 0 : i32
    return %c0_i32, %c0_i32_0, %c0_i32_1 : i32, i32, i32
  }
  func.func @transform_9(%arg0: i32) -> (i32, i32, i32) {
    %c0_i32 = arith.constant 0 : i32
    %c0_i32_0 = arith.constant 0 : i32
    %c0_i32_1 = arith.constant 0 : i32
    %c0_i32_2 = arith.constant 0 : i32
    return %c0_i32, %c0_i32_0, %c0_i32_1 : i32, i32, i32
  }
  func.func @transform_10(%arg0: i32) -> (i32, i32, i32) {
    %c0_i32 = arith.constant 0 : i32
    %c0_i32_0 = arith.constant 0 : i32
    %c0_i32_1 = arith.constant 0 : i32
    %c0_i32_2 = arith.constant 0 : i32
    return %c0_i32, %c0_i32_0, %c0_i32_1 : i32, i32, i32
  }
  func.func @transform_11(%arg0: i32) -> (i32, i32) {
    %c0_i32 = arith.constant 0 : i32
    %c0_i32_0 = arith.constant 0 : i32
    %c0_i32_1 = arith.constant 0 : i32
    return %c0_i32, %c0_i32_0 : i32, i32
  }
  func.func @transform_12(%arg0: i32) -> (i32, i32) {
    %c0_i32 = arith.constant 0 : i32
    %c0_i32_0 = arith.constant 0 : i32
    %c0_i32_1 = arith.constant 0 : i32
    return %c0_i32, %c0_i32_0 : i32, i32
  }
  func.func @transform_13(%arg0: i32) -> (i32, i32) {
    %c0_i32 = arith.constant 0 : i32
    %c0_i32_0 = arith.constant 0 : i32
    %c0_i32_1 = arith.constant 0 : i32
    return %c0_i32, %c0_i32_0 : i32, i32
  }
  func.func @transform_14(%arg0: i32) -> (i32, i32) {
    %c0_i32 = arith.constant 0 : i32
    %c0_i32_0 = arith.constant 0 : i32
    %c0_i32_1 = arith.constant 0 : i32
    return %c0_i32, %c0_i32_0 : i32, i32
  }
  func.func @transform_15(%arg0: i32) -> (i32, i32) {
    %c0_i32 = arith.constant 0 : i32
    %c0_i32_0 = arith.constant 0 : i32
    %c0_i32_1 = arith.constant 0 : i32
    return %c0_i32, %c0_i32_0 : i32, i32
  }
  func.func @transform_16(%arg0: i32) -> (i32, i32) {
    %c0_i32 = arith.constant 0 : i32
    %c0_i32_0 = arith.constant 0 : i32
    %c0_i32_1 = arith.constant 0 : i32
    return %c0_i32, %c0_i32_0 : i32, i32
  }
  func.func @transform_17(%arg0: i32) -> (i32, i32) {
    %c0_i32 = arith.constant 0 : i32
    %c0_i32_0 = arith.constant 0 : i32
    %c0_i32_1 = arith.constant 0 : i32
    return %c0_i32, %c0_i32_0 : i32, i32
  }
  func.func @transform_18(%arg0: i32) -> (i32, i32) {
    %c0_i32 = arith.constant 0 : i32
    %c0_i32_0 = arith.constant 0 : i32
    %c0_i32_1 = arith.constant 0 : i32
    return %c0_i32, %c0_i32_0 : i32, i32
  }
  func.func @transform_19(%arg0: i32) -> (i32, i32) {
    %c0_i32 = arith.constant 0 : i32
    %c0_i32_0 = arith.constant 0 : i32
    %c0_i32_1 = arith.constant 0 : i32
    return %c0_i32, %c0_i32_0 : i32, i32
  }
  func.func @transform_20(%arg0: i32) -> (i32, i32) {
    %c0_i32 = arith.constant 0 : i32
    %c0_i32_0 = arith.constant 0 : i32
    %c0_i32_1 = arith.constant 0 : i32
    return %c0_i32, %c0_i32_0 : i32, i32
  }
  func.func @transform_21(%arg0: i32) -> (i32, i32) {
    %c0_i32 = arith.constant 0 : i32
    %c0_i32_0 = arith.constant 0 : i32
    %c0_i32_1 = arith.constant 0 : i32
    return %c0_i32, %c0_i32_0 : i32, i32
  }
  func.func @transform_22(%arg0: i32) -> (i32, i32, i32) {
    %c0_i32 = arith.constant 0 : i32
    %c0_i32_0 = arith.constant 0 : i32
    %c0_i32_1 = arith.constant 0 : i32
    return %arg0, %c0_i32, %c0_i32_0 : i32, i32, i32
  }
}

module attributes {stable_mosaic.version = 11 : i64} {
  func.func @_encoder_layer_head_kernel(%arg0: i32, %arg1: memref<1x8x128xf32, #tpu.memory_space<vmem>>, %arg2: memref<6x128x64xf32, #tpu.memory_space<vmem>>, %arg3: memref<6x1x64xf32, #tpu.memory_space<vmem>>, %arg4: memref<2x64x128xf32, #tpu.memory_space<vmem>>, %arg5: memref<1x128xf32, #tpu.memory_space<vmem>>, %arg6: memref<1x128xf32, #tpu.memory_space<vmem>>, %arg7: memref<1x128xf32, #tpu.memory_space<vmem>>, %arg8: memref<128x256xf32, #tpu.memory_space<vmem>>, %arg9: memref<1x256xf32, #tpu.memory_space<vmem>>, %arg10: memref<256x128xf32, #tpu.memory_space<vmem>>, %arg11: memref<1x128xf32, #tpu.memory_space<vmem>>, %arg12: memref<1x128xf32, #tpu.memory_space<vmem>>, %arg13: memref<1x128xf32, #tpu.memory_space<vmem>>, %arg14: memref<128x128xf32, #tpu.memory_space<vmem>>, %arg15: memref<1x128xf32, #tpu.memory_space<vmem>>, %arg16: memref<1x8x128xf32, #tpu.memory_space<vmem>>) attributes {dimension_semantics = [#tpu.dimension_semantics<parallel>], iteration_bounds = array<i64: 2>, scalar_prefetch = 0 : i64, scratch_operands = 0 : i64, tpu.core_type = #tpu.core_type<tc>, window_params = [{transform_indices = @transform_0, window_bounds = array<i64: 1, 8, 128>}, {pipeline_mode = #tpu.pipeline_mode<synchronous>, transform_indices = @transform_1, window_bounds = array<i64: 6, 128, 64>}, {pipeline_mode = #tpu.pipeline_mode<synchronous>, transform_indices = @transform_2, window_bounds = array<i64: 6, 1, 64>}, {pipeline_mode = #tpu.pipeline_mode<synchronous>, transform_indices = @transform_3, window_bounds = array<i64: 2, 64, 128>}, {pipeline_mode = #tpu.pipeline_mode<synchronous>, transform_indices = @transform_4, window_bounds = array<i64: 1, 128>}, {pipeline_mode = #tpu.pipeline_mode<synchronous>, transform_indices = @transform_5, window_bounds = array<i64: 1, 128>}, {pipeline_mode = #tpu.pipeline_mode<synchronous>, transform_indices = @transform_6, window_bounds = array<i64: 1, 128>}, {pipeline_mode = #tpu.pipeline_mode<synchronous>, transform_indices = @transform_7, window_bounds = array<i64: 128, 256>}, {pipeline_mode = #tpu.pipeline_mode<synchronous>, transform_indices = @transform_8, window_bounds = array<i64: 1, 256>}, {pipeline_mode = #tpu.pipeline_mode<synchronous>, transform_indices = @transform_9, window_bounds = array<i64: 256, 128>}, {pipeline_mode = #tpu.pipeline_mode<synchronous>, transform_indices = @transform_10, window_bounds = array<i64: 1, 128>}, {pipeline_mode = #tpu.pipeline_mode<synchronous>, transform_indices = @transform_11, window_bounds = array<i64: 1, 128>}, {pipeline_mode = #tpu.pipeline_mode<synchronous>, transform_indices = @transform_12, window_bounds = array<i64: 1, 128>}, {pipeline_mode = #tpu.pipeline_mode<synchronous>, transform_indices = @transform_13, window_bounds = array<i64: 128, 128>}, {pipeline_mode = #tpu.pipeline_mode<synchronous>, transform_indices = @transform_14, window_bounds = array<i64: 1, 128>}, {transform_indices = @transform_15, window_bounds = array<i64: 1, 8, 128>}]} {
    %c0 = arith.constant 0 : index
    %c0_0 = arith.constant 0 : index
    %c0_1 = arith.constant 0 : index
    %0 = vector.load %arg1[%c0, %c0_0, %c0_1] : memref<1x8x128xf32, #tpu.memory_space<vmem>>, vector<1x8x128xf32>
    %1 = vector.shape_cast %0 : vector<1x8x128xf32> to vector<8x128xf32>
    %c0_2 = arith.constant 0 : index
    %c0_3 = arith.constant 0 : index
    %2 = vector.load %arg5[%c0_2, %c0_3] : memref<1x128xf32, #tpu.memory_space<vmem>>, vector<1x128xf32>
    %3 = tpu.iota {dimensions = array<i32: 0>} : vector<8x8xi32>
    %4 = tpu.iota {dimensions = array<i32: 1>} : vector<8x8xi32>
    %5 = arith.cmpi sle, %4, %3 : vector<8x8xi32>
    %c0_4 = arith.constant 0 : index
    %c0_5 = arith.constant 0 : index
    %c0_6 = arith.constant 0 : index
    %6 = vector.load %arg2[%c0_4, %c0_5, %c0_6] : memref<6x128x64xf32, #tpu.memory_space<vmem>>, vector<1x128x64xf32>
    %7 = vector.shape_cast %6 : vector<1x128x64xf32> to vector<128x64xf32>
    %cst = arith.constant dense<0.000000e+00> : vector<8x64xf32>
    %8 = tpu.matmul %1, %7, %cst {dimension_numbers = #tpu.dot_dimension_numbers<[1], [0], [0], [1], [0, 0, 1, 1], [], []>} : vector<8x128xf32>, vector<128x64xf32>, vector<8x64xf32> -> vector<8x64xf32>
    %c0_7 = arith.constant 0 : index
    %c0_8 = arith.constant 0 : index
    %c0_9 = arith.constant 0 : index
    %9 = vector.load %arg3[%c0_7, %c0_8, %c0_9] : memref<6x1x64xf32, #tpu.memory_space<vmem>>, vector<1x1x64xf32>
    %10 = vector.shape_cast %9 : vector<1x1x64xf32> to vector<1x64xf32>
    %11 = vector.broadcast %10 : vector<1x64xf32> to vector<8x64xf32>
    %12 = arith.addf %8, %11 : vector<8x64xf32>
    %cst_10 = arith.constant 1.250000e-01 : f32
    %13 = vector.broadcast %cst_10 : f32 to vector<8x64xf32>
    %14 = arith.mulf %12, %13 : vector<8x64xf32>
    %c2 = arith.constant 2 : index
    %c0_11 = arith.constant 0 : index
    %c0_12 = arith.constant 0 : index
    %15 = vector.load %arg2[%c2, %c0_11, %c0_12] : memref<6x128x64xf32, #tpu.memory_space<vmem>>, vector<1x128x64xf32>
    %16 = vector.shape_cast %15 : vector<1x128x64xf32> to vector<128x64xf32>
    %cst_13 = arith.constant dense<0.000000e+00> : vector<8x64xf32>
    %17 = tpu.matmul %1, %16, %cst_13 {dimension_numbers = #tpu.dot_dimension_numbers<[1], [0], [0], [1], [0, 0, 1, 1], [], []>} : vector<8x128xf32>, vector<128x64xf32>, vector<8x64xf32> -> vector<8x64xf32>
    %c2_14 = arith.constant 2 : index
    %c0_15 = arith.constant 0 : index
    %c0_16 = arith.constant 0 : index
    %18 = vector.load %arg3[%c2_14, %c0_15, %c0_16] : memref<6x1x64xf32, #tpu.memory_space<vmem>>, vector<1x1x64xf32>
    %19 = vector.shape_cast %18 : vector<1x1x64xf32> to vector<1x64xf32>
    %20 = vector.broadcast %19 : vector<1x64xf32> to vector<8x64xf32>
    %21 = arith.addf %17, %20 : vector<8x64xf32>
    %c4 = arith.constant 4 : index
    %c0_17 = arith.constant 0 : index
    %c0_18 = arith.constant 0 : index
    %22 = vector.load %arg2[%c4, %c0_17, %c0_18] : memref<6x128x64xf32, #tpu.memory_space<vmem>>, vector<1x128x64xf32>
    %23 = vector.shape_cast %22 : vector<1x128x64xf32> to vector<128x64xf32>
    %cst_19 = arith.constant dense<0.000000e+00> : vector<8x64xf32>
    %24 = tpu.matmul %1, %23, %cst_19 {dimension_numbers = #tpu.dot_dimension_numbers<[1], [0], [0], [1], [0, 0, 1, 1], [], []>} : vector<8x128xf32>, vector<128x64xf32>, vector<8x64xf32> -> vector<8x64xf32>
    %c4_20 = arith.constant 4 : index
    %c0_21 = arith.constant 0 : index
    %c0_22 = arith.constant 0 : index
    %25 = vector.load %arg3[%c4_20, %c0_21, %c0_22] : memref<6x1x64xf32, #tpu.memory_space<vmem>>, vector<1x1x64xf32>
    %26 = vector.shape_cast %25 : vector<1x1x64xf32> to vector<1x64xf32>
    %27 = vector.broadcast %26 : vector<1x64xf32> to vector<8x64xf32>
    %28 = arith.addf %24, %27 : vector<8x64xf32>
    %cst_23 = arith.constant dense<0.000000e+00> : vector<8x8xf32>
    %29 = tpu.matmul %14, %21, %cst_23 {dimension_numbers = #tpu.dot_dimension_numbers<[1], [1], [0], [0], [0, 0, 1, 0], [], []>} : vector<8x64xf32>, vector<8x64xf32>, vector<8x8xf32> -> vector<8x8xf32>
    %cst_24 = arith.constant -1.000000e+30 : f32
    %30 = vector.broadcast %cst_24 : f32 to vector<8x8xf32>
    %31 = arith.select %5, %29, %30 : vector<8x8xi1>, vector<8x8xf32>
    %cst_25 = arith.constant dense<0xFF800000> : vector<8xf32>
    %32 = vector.multi_reduction <maximumf>, %31, %cst_25 [1] : vector<8x8xf32> to vector<8xf32>
    %33 = vector.shape_cast %32 : vector<8xf32> to vector<8x1xf32>
    %34 = vector.broadcast %33 : vector<8x1xf32> to vector<8x8xf32>
    %35 = arith.subf %31, %34 : vector<8x8xf32>
    %36 = math.exp %35 : vector<8x8xf32>
    %cst_26 = arith.constant dense<0.000000e+00> : vector<8xf32>
    %37 = vector.multi_reduction <add>, %36, %cst_26 [1] : vector<8x8xf32> to vector<8xf32>
    %38 = vector.shape_cast %37 : vector<8xf32> to vector<8x1xf32>
    %39 = tpu.reciprocal %38 {approx = true} : vector<8x1xf32> -> vector<8x1xf32>
    %40 = vector.broadcast %39 : vector<8x1xf32> to vector<8x8xf32>
    %41 = arith.mulf %36, %40 : vector<8x8xf32>
    %cst_27 = arith.constant dense<0.000000e+00> : vector<8x64xf32>
    %42 = tpu.matmul %41, %28, %cst_27 {dimension_numbers = #tpu.dot_dimension_numbers<[1], [0], [0], [1], [0, 0, 1, 1], [], []>} : vector<8x8xf32>, vector<8x64xf32>, vector<8x64xf32> -> vector<8x64xf32>
    %c0_28 = arith.constant 0 : index
    %c0_29 = arith.constant 0 : index
    %c0_30 = arith.constant 0 : index
    %43 = vector.load %arg4[%c0_28, %c0_29, %c0_30] : memref<2x64x128xf32, #tpu.memory_space<vmem>>, vector<1x64x128xf32>
    %44 = vector.shape_cast %43 : vector<1x64x128xf32> to vector<64x128xf32>
    %cst_31 = arith.constant dense<0.000000e+00> : vector<8x128xf32>
    %45 = tpu.matmul %42, %44, %cst_31 {dimension_numbers = #tpu.dot_dimension_numbers<[1], [0], [0], [1], [0, 0, 1, 1], [], []>} : vector<8x64xf32>, vector<64x128xf32>, vector<8x128xf32> -> vector<8x128xf32>
    %c1 = arith.constant 1 : index
    %c0_32 = arith.constant 0 : index
    %c0_33 = arith.constant 0 : index
    %46 = vector.load %arg2[%c1, %c0_32, %c0_33] : memref<6x128x64xf32, #tpu.memory_space<vmem>>, vector<1x128x64xf32>
    %47 = vector.shape_cast %46 : vector<1x128x64xf32> to vector<128x64xf32>
    %cst_34 = arith.constant dense<0.000000e+00> : vector<8x64xf32>
    %48 = tpu.matmul %1, %47, %cst_34 {dimension_numbers = #tpu.dot_dimension_numbers<[1], [0], [0], [1], [0, 0, 1, 1], [], []>} : vector<8x128xf32>, vector<128x64xf32>, vector<8x64xf32> -> vector<8x64xf32>
    %c1_35 = arith.constant 1 : index
    %c0_36 = arith.constant 0 : index
    %c0_37 = arith.constant 0 : index
    %49 = vector.load %arg3[%c1_35, %c0_36, %c0_37] : memref<6x1x64xf32, #tpu.memory_space<vmem>>, vector<1x1x64xf32>
    %50 = vector.shape_cast %49 : vector<1x1x64xf32> to vector<1x64xf32>
    %51 = vector.broadcast %50 : vector<1x64xf32> to vector<8x64xf32>
    %52 = arith.addf %48, %51 : vector<8x64xf32>
    %cst_38 = arith.constant 1.250000e-01 : f32
    %53 = vector.broadcast %cst_38 : f32 to vector<8x64xf32>
    %54 = arith.mulf %52, %53 : vector<8x64xf32>
    %c3 = arith.constant 3 : index
    %c0_39 = arith.constant 0 : index
    %c0_40 = arith.constant 0 : index
    %55 = vector.load %arg2[%c3, %c0_39, %c0_40] : memref<6x128x64xf32, #tpu.memory_space<vmem>>, vector<1x128x64xf32>
    %56 = vector.shape_cast %55 : vector<1x128x64xf32> to vector<128x64xf32>
    %cst_41 = arith.constant dense<0.000000e+00> : vector<8x64xf32>
    %57 = tpu.matmul %1, %56, %cst_41 {dimension_numbers = #tpu.dot_dimension_numbers<[1], [0], [0], [1], [0, 0, 1, 1], [], []>} : vector<8x128xf32>, vector<128x64xf32>, vector<8x64xf32> -> vector<8x64xf32>
    %c3_42 = arith.constant 3 : index
    %c0_43 = arith.constant 0 : index
    %c0_44 = arith.constant 0 : index
    %58 = vector.load %arg3[%c3_42, %c0_43, %c0_44] : memref<6x1x64xf32, #tpu.memory_space<vmem>>, vector<1x1x64xf32>
    %59 = vector.shape_cast %58 : vector<1x1x64xf32> to vector<1x64xf32>
    %60 = vector.broadcast %59 : vector<1x64xf32> to vector<8x64xf32>
    %61 = arith.addf %57, %60 : vector<8x64xf32>
    %c5 = arith.constant 5 : index
    %c0_45 = arith.constant 0 : index
    %c0_46 = arith.constant 0 : index
    %62 = vector.load %arg2[%c5, %c0_45, %c0_46] : memref<6x128x64xf32, #tpu.memory_space<vmem>>, vector<1x128x64xf32>
    %63 = vector.shape_cast %62 : vector<1x128x64xf32> to vector<128x64xf32>
    %cst_47 = arith.constant dense<0.000000e+00> : vector<8x64xf32>
    %64 = tpu.matmul %1, %63, %cst_47 {dimension_numbers = #tpu.dot_dimension_numbers<[1], [0], [0], [1], [0, 0, 1, 1], [], []>} : vector<8x128xf32>, vector<128x64xf32>, vector<8x64xf32> -> vector<8x64xf32>
    %c5_48 = arith.constant 5 : index
    %c0_49 = arith.constant 0 : index
    %c0_50 = arith.constant 0 : index
    %65 = vector.load %arg3[%c5_48, %c0_49, %c0_50] : memref<6x1x64xf32, #tpu.memory_space<vmem>>, vector<1x1x64xf32>
    %66 = vector.shape_cast %65 : vector<1x1x64xf32> to vector<1x64xf32>
    %67 = vector.broadcast %66 : vector<1x64xf32> to vector<8x64xf32>
    %68 = arith.addf %64, %67 : vector<8x64xf32>
    %cst_51 = arith.constant dense<0.000000e+00> : vector<8x8xf32>
    %69 = tpu.matmul %54, %61, %cst_51 {dimension_numbers = #tpu.dot_dimension_numbers<[1], [1], [0], [0], [0, 0, 1, 0], [], []>} : vector<8x64xf32>, vector<8x64xf32>, vector<8x8xf32> -> vector<8x8xf32>
    %cst_52 = arith.constant -1.000000e+30 : f32
    %70 = vector.broadcast %cst_52 : f32 to vector<8x8xf32>
    %71 = arith.select %5, %69, %70 : vector<8x8xi1>, vector<8x8xf32>
    %cst_53 = arith.constant dense<0xFF800000> : vector<8xf32>
    %72 = vector.multi_reduction <maximumf>, %71, %cst_53 [1] : vector<8x8xf32> to vector<8xf32>
    %73 = vector.shape_cast %72 : vector<8xf32> to vector<8x1xf32>
    %74 = vector.broadcast %73 : vector<8x1xf32> to vector<8x8xf32>
    %75 = arith.subf %71, %74 : vector<8x8xf32>
    %76 = math.exp %75 : vector<8x8xf32>
    %cst_54 = arith.constant dense<0.000000e+00> : vector<8xf32>
    %77 = vector.multi_reduction <add>, %76, %cst_54 [1] : vector<8x8xf32> to vector<8xf32>
    %78 = vector.shape_cast %77 : vector<8xf32> to vector<8x1xf32>
    %79 = tpu.reciprocal %78 {approx = true} : vector<8x1xf32> -> vector<8x1xf32>
    %80 = vector.broadcast %79 : vector<8x1xf32> to vector<8x8xf32>
    %81 = arith.mulf %76, %80 : vector<8x8xf32>
    %cst_55 = arith.constant dense<0.000000e+00> : vector<8x64xf32>
    %82 = tpu.matmul %81, %68, %cst_55 {dimension_numbers = #tpu.dot_dimension_numbers<[1], [0], [0], [1], [0, 0, 1, 1], [], []>} : vector<8x8xf32>, vector<8x64xf32>, vector<8x64xf32> -> vector<8x64xf32>
    %c1_56 = arith.constant 1 : index
    %c0_57 = arith.constant 0 : index
    %c0_58 = arith.constant 0 : index
    %83 = vector.load %arg4[%c1_56, %c0_57, %c0_58] : memref<2x64x128xf32, #tpu.memory_space<vmem>>, vector<1x64x128xf32>
    %84 = vector.shape_cast %83 : vector<1x64x128xf32> to vector<64x128xf32>
    %cst_59 = arith.constant dense<0.000000e+00> : vector<8x128xf32>
    %85 = tpu.matmul %82, %84, %cst_59 {dimension_numbers = #tpu.dot_dimension_numbers<[1], [0], [0], [1], [0, 0, 1, 1], [], []>} : vector<8x64xf32>, vector<64x128xf32>, vector<8x128xf32> -> vector<8x128xf32>
    %86 = arith.addf %45, %85 : vector<8x128xf32>
    %87 = vector.broadcast %2 : vector<1x128xf32> to vector<8x128xf32>
    %88 = arith.addf %86, %87 : vector<8x128xf32>
    %89 = arith.addf %1, %88 : vector<8x128xf32>
    %c0_60 = arith.constant 0 : index
    %c0_61 = arith.constant 0 : index
    %90 = vector.load %arg6[%c0_60, %c0_61] : memref<1x128xf32, #tpu.memory_space<vmem>>, vector<1x128xf32>
    %c0_62 = arith.constant 0 : index
    %c0_63 = arith.constant 0 : index
    %91 = vector.load %arg7[%c0_62, %c0_63] : memref<1x128xf32, #tpu.memory_space<vmem>>, vector<1x128xf32>
    %cst_64 = arith.constant dense<0.000000e+00> : vector<8xf32>
    %92 = vector.multi_reduction <add>, %89, %cst_64 [1] : vector<8x128xf32> to vector<8xf32>
    %93 = vector.shape_cast %92 : vector<8xf32> to vector<8x1xf32>
    %cst_65 = arith.constant 1.280000e+02 : f32
    %94 = vector.broadcast %cst_65 : f32 to vector<8x1xf32>
    %95 = arith.divf %93, %94 : vector<8x1xf32>
    %96 = vector.broadcast %95 : vector<8x1xf32> to vector<8x128xf32>
    %97 = arith.subf %89, %96 : vector<8x128xf32>
    %98 = arith.mulf %97, %97 : vector<8x128xf32>
    %cst_66 = arith.constant dense<0.000000e+00> : vector<8xf32>
    %99 = vector.multi_reduction <add>, %98, %cst_66 [1] : vector<8x128xf32> to vector<8xf32>
    %100 = vector.shape_cast %99 : vector<8xf32> to vector<8x1xf32>
    %cst_67 = arith.constant 1.280000e+02 : f32
    %101 = vector.broadcast %cst_67 : f32 to vector<8x1xf32>
    %102 = arith.divf %100, %101 : vector<8x1xf32>
    %cst_68 = arith.constant 9.99999974E-6 : f32
    %103 = vector.broadcast %cst_68 : f32 to vector<8x1xf32>
    %104 = arith.addf %102, %103 : vector<8x1xf32>
    %105 = math.rsqrt %104 : vector<8x1xf32>
    %106 = vector.broadcast %105 : vector<8x1xf32> to vector<8x128xf32>
    %107 = arith.mulf %97, %106 : vector<8x128xf32>
    %108 = vector.broadcast %90 : vector<1x128xf32> to vector<8x128xf32>
    %109 = arith.mulf %107, %108 : vector<8x128xf32>
    %110 = vector.broadcast %91 : vector<1x128xf32> to vector<8x128xf32>
    %111 = arith.addf %109, %110 : vector<8x128xf32>
    %c0_69 = arith.constant 0 : index
    %c0_70 = arith.constant 0 : index
    %112 = vector.load %arg8[%c0_69, %c0_70] : memref<128x256xf32, #tpu.memory_space<vmem>>, vector<128x256xf32>
    %cst_71 = arith.constant dense<0.000000e+00> : vector<8x256xf32>
    %113 = tpu.matmul %111, %112, %cst_71 {dimension_numbers = #tpu.dot_dimension_numbers<[1], [0], [0], [1], [0, 0, 1, 1], [], []>} : vector<8x128xf32>, vector<128x256xf32>, vector<8x256xf32> -> vector<8x256xf32>
    %c0_72 = arith.constant 0 : index
    %c0_73 = arith.constant 0 : index
    %114 = vector.load %arg9[%c0_72, %c0_73] : memref<1x256xf32, #tpu.memory_space<vmem>>, vector<1x256xf32>
    %115 = vector.broadcast %114 : vector<1x256xf32> to vector<8x256xf32>
    %116 = arith.addf %113, %115 : vector<8x256xf32>
    %cst_74 = arith.constant 0.000000e+00 : f32
    %117 = vector.broadcast %cst_74 : f32 to vector<8x256xf32>
    %118 = arith.maximumf %116, %117 : vector<8x256xf32>
    %c0_75 = arith.constant 0 : index
    %c0_76 = arith.constant 0 : index
    %119 = vector.load %arg10[%c0_75, %c0_76] : memref<256x128xf32, #tpu.memory_space<vmem>>, vector<256x128xf32>
    %cst_77 = arith.constant dense<0.000000e+00> : vector<8x128xf32>
    %120 = tpu.matmul %118, %119, %cst_77 {dimension_numbers = #tpu.dot_dimension_numbers<[1], [0], [0], [1], [0, 0, 1, 1], [], []>} : vector<8x256xf32>, vector<256x128xf32>, vector<8x128xf32> -> vector<8x128xf32>
    %c0_78 = arith.constant 0 : index
    %c0_79 = arith.constant 0 : index
    %121 = vector.load %arg11[%c0_78, %c0_79] : memref<1x128xf32, #tpu.memory_space<vmem>>, vector<1x128xf32>
    %122 = vector.broadcast %121 : vector<1x128xf32> to vector<8x128xf32>
    %123 = arith.addf %120, %122 : vector<8x128xf32>
    %124 = arith.addf %111, %123 : vector<8x128xf32>
    %c0_80 = arith.constant 0 : index
    %c0_81 = arith.constant 0 : index
    %125 = vector.load %arg12[%c0_80, %c0_81] : memref<1x128xf32, #tpu.memory_space<vmem>>, vector<1x128xf32>
    %c0_82 = arith.constant 0 : index
    %c0_83 = arith.constant 0 : index
    %126 = vector.load %arg13[%c0_82, %c0_83] : memref<1x128xf32, #tpu.memory_space<vmem>>, vector<1x128xf32>
    %cst_84 = arith.constant dense<0.000000e+00> : vector<8xf32>
    %127 = vector.multi_reduction <add>, %124, %cst_84 [1] : vector<8x128xf32> to vector<8xf32>
    %128 = vector.shape_cast %127 : vector<8xf32> to vector<8x1xf32>
    %cst_85 = arith.constant 1.280000e+02 : f32
    %129 = vector.broadcast %cst_85 : f32 to vector<8x1xf32>
    %130 = arith.divf %128, %129 : vector<8x1xf32>
    %131 = vector.broadcast %130 : vector<8x1xf32> to vector<8x128xf32>
    %132 = arith.subf %124, %131 : vector<8x128xf32>
    %133 = arith.mulf %132, %132 : vector<8x128xf32>
    %cst_86 = arith.constant dense<0.000000e+00> : vector<8xf32>
    %134 = vector.multi_reduction <add>, %133, %cst_86 [1] : vector<8x128xf32> to vector<8xf32>
    %135 = vector.shape_cast %134 : vector<8xf32> to vector<8x1xf32>
    %cst_87 = arith.constant 1.280000e+02 : f32
    %136 = vector.broadcast %cst_87 : f32 to vector<8x1xf32>
    %137 = arith.divf %135, %136 : vector<8x1xf32>
    %cst_88 = arith.constant 9.99999974E-6 : f32
    %138 = vector.broadcast %cst_88 : f32 to vector<8x1xf32>
    %139 = arith.addf %137, %138 : vector<8x1xf32>
    %140 = math.rsqrt %139 : vector<8x1xf32>
    %141 = vector.broadcast %140 : vector<8x1xf32> to vector<8x128xf32>
    %142 = arith.mulf %132, %141 : vector<8x128xf32>
    %143 = vector.broadcast %125 : vector<1x128xf32> to vector<8x128xf32>
    %144 = arith.mulf %142, %143 : vector<8x128xf32>
    %145 = vector.broadcast %126 : vector<1x128xf32> to vector<8x128xf32>
    %146 = arith.addf %144, %145 : vector<8x128xf32>
    %c0_89 = arith.constant 0 : index
    %c0_90 = arith.constant 0 : index
    %147 = vector.load %arg14[%c0_89, %c0_90] : memref<128x128xf32, #tpu.memory_space<vmem>>, vector<128x128xf32>
    %cst_91 = arith.constant dense<0.000000e+00> : vector<8x128xf32>
    %148 = tpu.matmul %146, %147, %cst_91 {dimension_numbers = #tpu.dot_dimension_numbers<[1], [0], [0], [1], [0, 0, 1, 1], [], []>} : vector<8x128xf32>, vector<128x128xf32>, vector<8x128xf32> -> vector<8x128xf32>
    %c0_92 = arith.constant 0 : index
    %c0_93 = arith.constant 0 : index
    %149 = vector.load %arg15[%c0_92, %c0_93] : memref<1x128xf32, #tpu.memory_space<vmem>>, vector<1x128xf32>
    %150 = vector.broadcast %149 : vector<1x128xf32> to vector<8x128xf32>
    %151 = arith.addf %148, %150 : vector<8x128xf32>
    %c0_94 = arith.constant 0 : index
    %c0_95 = arith.constant 0 : index
    %c0_96 = arith.constant 0 : index
    %152 = vector.load %arg16[%c0_94, %c0_95, %c0_96] : memref<1x8x128xf32, #tpu.memory_space<vmem>>, vector<1x8x128xf32>
    %153 = vector.shape_cast %152 : vector<1x8x128xf32> to vector<8x128xf32>
    %154 = vector.shape_cast %151 : vector<8x128xf32> to vector<1x8x128xf32>
    tpu.vector_store %arg16[%c0_94, %c0_95, %c0_96], %154 {strides = array<i32>} : memref<1x8x128xf32, #tpu.memory_space<vmem>>, vector<1x8x128xf32>,
    return
  }
  func.func @transform_0(%arg0: i32) -> (i32, i32, i32) {
    %c0_i32 = arith.constant 0 : i32
    %c0_i32_0 = arith.constant 0 : i32
    %c0_i32_1 = arith.constant 0 : i32
    return %arg0, %c0_i32, %c0_i32_0 : i32, i32, i32
  }
  func.func @transform_1(%arg0: i32) -> (i32, i32, i32) {
    %c0_i32 = arith.constant 0 : i32
    %c0_i32_0 = arith.constant 0 : i32
    %c0_i32_1 = arith.constant 0 : i32
    %c0_i32_2 = arith.constant 0 : i32
    return %c0_i32, %c0_i32_0, %c0_i32_1 : i32, i32, i32
  }
  func.func @transform_2(%arg0: i32) -> (i32, i32, i32) {
    %c0_i32 = arith.constant 0 : i32
    %c0_i32_0 = arith.constant 0 : i32
    %c0_i32_1 = arith.constant 0 : i32
    %c0_i32_2 = arith.constant 0 : i32
    return %c0_i32, %c0_i32_0, %c0_i32_1 : i32, i32, i32
  }
  func.func @transform_3(%arg0: i32) -> (i32, i32, i32) {
    %c0_i32 = arith.constant 0 : i32
    %c0_i32_0 = arith.constant 0 : i32
    %c0_i32_1 = arith.constant 0 : i32
    %c0_i32_2 = arith.constant 0 : i32
    return %c0_i32, %c0_i32_0, %c0_i32_1 : i32, i32, i32
  }
  func.func @transform_4(%arg0: i32) -> (i32, i32) {
    %c0_i32 = arith.constant 0 : i32
    %c0_i32_0 = arith.constant 0 : i32
    %c0_i32_1 = arith.constant 0 : i32
    return %c0_i32, %c0_i32_0 : i32, i32
  }
  func.func @transform_5(%arg0: i32) -> (i32, i32) {
    %c0_i32 = arith.constant 0 : i32
    %c0_i32_0 = arith.constant 0 : i32
    %c0_i32_1 = arith.constant 0 : i32
    return %c0_i32, %c0_i32_0 : i32, i32
  }
  func.func @transform_6(%arg0: i32) -> (i32, i32) {
    %c0_i32 = arith.constant 0 : i32
    %c0_i32_0 = arith.constant 0 : i32
    %c0_i32_1 = arith.constant 0 : i32
    return %c0_i32, %c0_i32_0 : i32, i32
  }
  func.func @transform_7(%arg0: i32) -> (i32, i32) {
    %c0_i32 = arith.constant 0 : i32
    %c0_i32_0 = arith.constant 0 : i32
    %c0_i32_1 = arith.constant 0 : i32
    return %c0_i32, %c0_i32_0 : i32, i32
  }
  func.func @transform_8(%arg0: i32) -> (i32, i32) {
    %c0_i32 = arith.constant 0 : i32
    %c0_i32_0 = arith.constant 0 : i32
    %c0_i32_1 = arith.constant 0 : i32
    return %c0_i32, %c0_i32_0 : i32, i32
  }
  func.func @transform_9(%arg0: i32) -> (i32, i32) {
    %c0_i32 = arith.constant 0 : i32
    %c0_i32_0 = arith.constant 0 : i32
    %c0_i32_1 = arith.constant 0 : i32
    return %c0_i32, %c0_i32_0 : i32, i32
  }
  func.func @transform_10(%arg0: i32) -> (i32, i32) {
    %c0_i32 = arith.constant 0 : i32
    %c0_i32_0 = arith.constant 0 : i32
    %c0_i32_1 = arith.constant 0 : i32
    return %c0_i32, %c0_i32_0 : i32, i32
  }
  func.func @transform_11(%arg0: i32) -> (i32, i32) {
    %c0_i32 = arith.constant 0 : i32
    %c0_i32_0 = arith.constant 0 : i32
    %c0_i32_1 = arith.constant 0 : i32
    return %c0_i32, %c0_i32_0 : i32, i32
  }
  func.func @transform_12(%arg0: i32) -> (i32, i32) {
    %c0_i32 = arith.constant 0 : i32
    %c0_i32_0 = arith.constant 0 : i32
    %c0_i32_1 = arith.constant 0 : i32
    return %c0_i32, %c0_i32_0 : i32, i32
  }
  func.func @transform_13(%arg0: i32) -> (i32, i32) {
    %c0_i32 = arith.constant 0 : i32
    %c0_i32_0 = arith.constant 0 : i32
    %c0_i32_1 = arith.constant 0 : i32
    return %c0_i32, %c0_i32_0 : i32, i32
  }
  func.func @transform_14(%arg0: i32) -> (i32, i32) {
    %c0_i32 = arith.constant 0 : i32
    %c0_i32_0 = arith.constant 0 : i32
    %c0_i32_1 = arith.constant 0 : i32
    return %c0_i32, %c0_i32_0 : i32, i32
  }
  func.func @transform_15(%arg0: i32) -> (i32, i32, i32) {
    %c0_i32 = arith.constant 0 : i32
    %c0_i32_0 = arith.constant 0 : i32
    %c0_i32_1 = arith.constant 0 : i32
    return %arg0, %c0_i32, %c0_i32_0 : i32, i32, i32
  }
}

</mosaic_0001>

<bundles_post_ra>
// kernel: trajgpt_forward.4
= control target key start
LH: loop header
LB: loop body
LE: loop exit
PB: predicated region body
PF: predicated region fallthrough
CT: control target
= control target key end

     0   :  { %s1820_s25 = smov 0   ;;  %s1822_s26 = smov 0   ;;  %s2202_s0 = inlined_call_operand.vmem [shape: f32[2,8,128], index: 0, kind: input, shape index: {}]   ;;  %s2203_s1 = inlined_call_operand.vmem [shape: f32[4,6,128,64], index: 1, kind: input, shape index: {}]   ;;  %s2204_s2 = inlined_call_operand.vmem [shape: f32[4,6,1,64], index: 2, kind: input, shape index: {}]   ;;  %s2205_s3 = inlined_call_operand.vmem [shape: f32[4,2,64,128], index: 3, kind: input, shape index: {}]   ;;  %s2206_s4 = inlined_call_operand.vmem [shape: f32[4,1,128], index: 4, kind: input, shape index: {}]   ;;  %s2207_s5 = inlined_call_operand.vmem [shape: f32[4,1,128], index: 5, kind: input, shape index: {}]   ;;  %s2208_s6 = inlined_call_operand.vmem [shape: f32[4,1,128], index: 6, kind: input, shape index: {}]   ;;  %s2209_s7 = inlined_call_operand.vmem [shape: f32[4,128,256], index: 7, kind: input, shape index: {}]   ;;  %s2210_s8 = inlined_call_operand.vmem [shape: f32[4,1,256], index: 8, kind: input, shape index: {}]   ;;  %s2211_s9 = inlined_call_operand.vmem [shape: f32[4,256,128], index: 9, kind: input, shape index: {}]   ;;  %s2212_s10 = inlined_call_operand.vmem [shape: f32[4,1,128], index: 10, kind: input, shape index: {}]   ;;  %s2213_s11 = inlined_call_operand.vmem [shape: f32[4,1,128], index: 11, kind: input, shape index: {}]   ;;  %s2214_s12 = inlined_call_operand.vmem [shape: f32[4,1,128], index: 12, kind: input, shape index: {}]   ;;  %s2215_s13 = inlined_call_operand.vmem [shape: f32[2,8,128], index: 13, kind: output, shape index: {}]  }
   0x1   :  { %2220 = sst [smem:[#allocation8_spill]] %s2202_s0  ;;  %s1824_s27 = smov 0  }
   0x2   :  { %2221 = sst [smem:[#allocation9_spill]] %s2203_s1  ;;  %s1826_s28 = smov 0  }
   0x3   :  { %2222 = sst [smem:[#allocation10_spill]] %s2204_s2  ;;  %s1828_s29 = smov 0  }
   0x4   :  { %2223 = sst [smem:[#allocation11_spill]] %s2205_s3 }
   0x5   :  { %2224 = sst [smem:[#allocation12_spill]] %s2208_s6 }
   0x6   :  { %2225 = sst [smem:[#allocation13_spill]] %s2209_s7 }
   0x7   :  { %2226 = sst [smem:[#allocation14_spill]] %s2210_s8 }
   0x8   :  { %2227 = sst [smem:[#allocation15_spill]] %s2214_s12 }
   0x9   :  { %2228 = sst [smem:[#allocation16_spill]] %s2215_s13 }
   0xa LB: > { %2229 = sst [smem:[#allocation2_spill]] %s1731_s25  ;;  %s32_s30 = sadd.s32 1, %s1739_s27  ;;  %s1747_s29 = sphi %s1828_s29, %s23_s29   ;;  %s1743_s28 = sphi %s1826_s28, %s2254_s28   ;;  %s1739_s27 = sphi %s1824_s27, %s2253_s27   ;;  %s1735_s26 = sphi %s1822_s26, %s2252_s26   ;;  %s1731_s25 = sphi %s1820_s25, %s2251_s25  }
   0xb   : > { %2230 = sst [smem:[#allocation3_spill]] %s1739_s27  ;;  %s35_s14 = sadd.s32 1, %s1743_s28 }
   0xc   : > { %2231 = sst [smem:[#allocation4_spill]] %s1743_s28  ;;  %p33_p0 = scmp.ge.s32.totalorder %s32_s30, 4 }
   0xd   : > { %2232 = sst [smem:[#allocation5_spill]] %s1747_s29  ;;  %p1522_p1 = scmp.ge.s32.totalorder %s1747_s29, 1 }
   0xe   : > { %p504_p2 = scmp.lt.s32.totalorder %s1747_s29, 9  ;;  %s2256_s30 = smov (%p33_p0, %s32_s30), 0 }
   0xf   : > { %2233 = sst [smem:[#allocation6_spill]] %s2256_s30  ;;  %s2258_s14 = smov (!%p33_p0, %s35_s14), %s1743_s28 }
  0x10   : > { %p505_p3 = pnand %p1522_p1, %p504_p2  ;;  %p37_p4 = scmp.ge.s32.totalorder %s2258_s14, 2 }
  0x11   : > { %p592_p5 = scmp.lt.s32.totalorder (!%p505_p3), %s1735_s26, 1  ;;  %p596_p6 = scmp.lt.s32.totalorder (!%p505_p3), %s1731_s25, 3 }
  0x12   : > { %s2260_s14 = smov (%p37_p4, %s2258_s14), 0  ;;  %508 = sbr.rel (%p505_p3) target bundleno = 2202 (0x89a), region = 72 }
  0x13   : > { %2234 = sst [smem:[#allocation7_spill]] %s2260_s14 }
  0x14   : > { %s2235_s0 = sld [smem:[#allocation8_spill]] (!%p505_p3) }
  0x15   : > { %s2236_s1 = sld [smem:[#allocation9_spill]] (!%p505_p3) }
  0x16   : > { %s2237_s3 = sld [smem:[#allocation11_spill]] (!%p505_p3) }
  0x17   : > { %s2262_s26 = smov (!%p592_p5, %s1735_s26), 1  ;;  %s2238_s2 = sld [smem:[#allocation10_spill]] }
  0x18   : > { %s1854_s15 = scalar_select %p596_p6, %s1731_s25, 3 }
  0x19   : > { %s1523_s16 = sshll.u32 %s2262_s26, 3  ;;  %s2240_s7 = sld [smem:[#allocation13_spill]] }
  0x1a   : > { %s595_s19 = scalar_lea.vmem %s2235_s0, %s1523_s16  ;;  %s1640_s20 = smul.u32 768, %s1854_s15 }
  0x1b   : > { %s1641_s21 = smul.u32 6, %s1854_s15  ;;  %s1637_s22 = sshll.u32 %s1854_s15, 7 }
  0x1c   : > { %s1865_s14 = scalar_lea.vmem %s2236_s1, %s1640_s20  ;;  %s1870_s27 = scalar_lea.vmem %s2237_s3, %s1637_s22 }
  0x1d   : > { %s1875_s17 = scalar_lea.vmem %s2238_s2, %s1641_s21  ;;  %s1638_s28 = sshll.u32 %s1854_s15, 8 }
  0x1e   : > { %s1529_s30 = sshll.u32 %s1854_s15, 1  ;;  %s2241_s8 = sld [smem:[#allocation14_spill]] }
  0x1f   : > { %s1894_s29 = scalar_lea.vmem %s2240_s7, %s1638_s28  ;;  %s1904_s12 = scalar_lea.vmem %s2211_s9, %s1638_s28 }
  0x20   : > { %s635_s24 = scalar_lea.vmem %s2212_s10, %s1854_s15  ;;  %s638_s3 = scalar_lea.vmem %s2213_s11, %s1854_s15 }
  0x21   : > { %s2242_s7 = sld [smem:[#allocation15_spill]] }
  0x22   : > { %s2243_s26 = sld [smem:[#allocation16_spill]] }
  0x23   : > { %s2244_s25 = sld [smem:[#allocation2_spill]] }
  0x24   : > { %s1899_s0 = scalar_lea.vmem %s2241_s8, %s1529_s30 }
  0x27   : > { %s641_s6 = scalar_lea.vmem %s2242_s7, %s1854_s15 }
  0x28   : > { %s1921_s8 = scalar_lea.vmem %s2243_s26, %s1523_s16 }
  0x29   : > { %p1533_p7 = scmp.ne.s32.totalorder %s2244_s25, 0 }
  0x2b   : > { %649 = sbr.rel (%p1533_p7) target bundleno = 50 (0x32), region = 76 }
  0x30   : > { %v650_v0 = vld [vmem:[%s595_s19] sm:$0xff] }
  0x31   : > { %651 = vst [vmem:[%s1921_s8] sm:$0xff] %v650_v0 }
  0x32 PF: > { %v1549_v1 = vld [vmem:[%s1865_s14 + $0x178] sm:$0xff]  ;;  %v1548_v3 = vld [vmem:[%s1865_s14 + $0x170] sm:$0xff]  ;;  %v1547_v5 = vld [vmem:[%s1865_s14 + $0x168] sm:$0xff]  ;;  %vm784_vm0 = vcmask 523264   ;;  %v654_v52 = vlaneseq  ;;  %vm812_vm2 = vcmask 64512   ;;  %s2245_s7 = scalar_lea.vmem %s2206_s4, %s1854_s15  ;;  %s2246_s16 = scalar_lea.vmem %s2207_s5, %s1854_s15 }
  0x33   : > { %v674_v2 = vld [vmem:[%s1865_s14 + $0x78] sm:$0xff]  ;;  %722 = vmatpush.msra.mxu1 %v1549_v1  ;;  %v673_v4 = vld [vmem:[%s1865_s14 + $0x70] sm:$0xff]  ;;  %v672_v6 = vld [vmem:[%s1865_s14 + $0x68] sm:$0xff]  ;;  %s2247_s23 = sld [smem:[#allocation12_spill]] }
  0x34   : > { %679 = vmatpush.msra.mxu0 %v674_v2  ;;  %v1546_v7 = vld [vmem:[%s1865_s14 + $0x160] sm:$0xff]  ;;  %v1545_v9 = vld [vmem:[%s1865_s14 + $0x158] sm:$0xff]  ;;  %v1544_v11 = vld [vmem:[%s1865_s14 + $0x150] sm:$0xff]  ;;  %v1979_v55 = vshrl.u32 %v654_v52, 7  ;;  %v1981_v56 = vand.u32 127, %v654_v52 }
  0x35   : > { %723 = vmatpush.msra.mxu1 %v1548_v3  ;;  %v671_v8 = vld [vmem:[%s1865_s14 + $0x60] sm:$0xff]  ;;  %v670_v10 = vld [vmem:[%s1865_s14 + $0x58] sm:$0xff]  ;;  %v669_v12 = vld [vmem:[%s1865_s14 + $0x50] sm:$0xff] }
  0x36   : > { %680 = vmatpush.msra.mxu0 %v673_v4  ;;  %v1543_v13 = vld [vmem:[%s1865_s14 + $0x148] sm:$0xff]  ;;  %v1542_v15 = vld [vmem:[%s1865_s14 + $0x140] sm:$0xff]  ;;  %v1541_v17 = vld [vmem:[%s1865_s14 + $0x138] sm:$0xff]  ;;  %vm658_vm1 = vcmp.le.s32.totalorder %v1981_v56, %v1979_v55 }
  0x37   : > { %724 = vmatpush.msra.mxu1 %v1547_v5  ;;  %v668_v14 = vld [vmem:[%s1865_s14 + $0x48] sm:$0xff]  ;;  %v667_v16 = vld [vmem:[%s1865_s14 + $0x40] sm:$0xff]  ;;  %v666_v18 = vld [vmem:[%s1865_s14 + $0x38] sm:$0xff] }
  0x38   : > { %681 = vmatpush.msra.mxu0 %v672_v6  ;;  %v1540_v19 = vld [vmem:[%s1865_s14 + $0x130] sm:$0xff]  ;;  %v1539_v21 = vld [vmem:[%s1865_s14 + $0x128] sm:$0xff]  ;;  %v1538_v23 = vld [vmem:[%s1865_s14 + $0x120] sm:$0xff] }
  0x39   : > { %725 = vmatpush.msra.mxu1 %v1546_v7  ;;  %v665_v20 = vld [vmem:[%s1865_s14 + $0x30] sm:$0xff]  ;;  %v664_v22 = vld [vmem:[%s1865_s14 + $0x28] sm:$0xff]  ;;  %v663_v24 = vld [vmem:[%s1865_s14 + $0x20] sm:$0xff]  ;;  %s2248_s28 = scalar_lea.vmem %s2247_s23, %s1854_s15 }
  0x3a   : > { %682 = vmatpush.msra.mxu0 %v671_v8  ;;  %v1537_v25 = vld [vmem:[%s1865_s14 + $0x118] sm:$0xff]  ;;  %v1536_v27 = vld [vmem:[%s1865_s14 + $0x110] sm:$0xff]  ;;  %v1535_v29 = vld [vmem:[%s1865_s14 + $0x108] sm:$0xff] }
  0x3b   : > { %726 = vmatpush.msra.mxu1 %v1545_v9  ;;  %v662_v26 = vld [vmem:[%s1865_s14 + $0x18] sm:$0xff]  ;;  %v661_v28 = vld [vmem:[%s1865_s14 + $0x10] sm:$0xff]  ;;  %v660_v30 = vld [vmem:[%s1865_s14 + $0x8] sm:$0xff] }
  0x3c   : > { %683 = vmatpush.msra.mxu0 %v670_v10  ;;  %v1534_v31 = vld [vmem:[%s1865_s14 + $0x100] sm:$0xff]  ;;  %v1566_v41 = vld [vmem:[%s1865_s14 + $0x278] sm:$0xff]  ;;  %v1565_v42 = vld [vmem:[%s1865_s14 + $0x270] sm:$0xff] }
  0x3d   : > { %727 = vmatpush.msra.mxu1 %v1544_v11  ;;  %v659_v32 = vld [vmem:[%s1865_s14] sm:$0xff]  ;;  %764 = vmatpush.msra.mxu2 %v1566_v41  ;;  %v1564_v43 = vld [vmem:[%s1865_s14 + $0x268] sm:$0xff]  ;;  %v1562_v45 = vld [vmem:[%s1865_s14 + $0x258] sm:$0xff] }
  0x3e   : > { %684 = vmatpush.msra.mxu0 %v669_v12  ;;  %v1958_v33 = vld [vmem:[%s1921_s8] sm:$0xff]  ;;  %v1561_v46 = vld [vmem:[%s1865_s14 + $0x250] sm:$0xff]  ;;  %v1560_v47 = vld [vmem:[%s1865_s14 + $0x248] sm:$0xff] }
  0x3f   : > { %728 = vmatpush.msra.mxu1 %v1543_v13  ;;  %v1683_v34 = vld [vmem:[%s1875_s17 + $0x2] ss:$0 sm:$0xff]  ;;  %v1684_v35 = vld [vmem:[%s1875_s17] ss:$0 sm:$0xff]  ;;  %765 = vmatpush.msra.mxu2 %v1565_v42  ;;  %v1558_v49 = vld [vmem:[%s1865_s14 + $0x238] sm:$0xff] }
  0x40   : > { %685 = vmatpush.msra.mxu0 %v668_v14  ;;  %v1563_v44 = vld [vmem:[%s1865_s14 + $0x260] sm:$0xff]  ;;  %v1557_v50 = vld [vmem:[%s1865_s14 + $0x230] sm:$0xff]  ;;  %v1556_v51 = vld [vmem:[%s1865_s14 + $0x228] sm:$0xff] }
  0x41   : > { %729 = vmatpush.msra.mxu1 %v1542_v15  ;;  %766 = vmatpush.msra.mxu2 %v1564_v43  ;;  %v1559_v48 = vld [vmem:[%s1865_s14 + $0x240] sm:$0xff]  ;;  %v1554_v54 = vld [vmem:[%s1865_s14 + $0x218] sm:$0xff]  ;;  %v1553_v57 = vld [vmem:[%s1865_s14 + $0x210] sm:$0xff] }
  0x42   : > { %686 = vmatpush.msra.mxu0 %v667_v16  ;;  %v1555_v53 = vld [vmem:[%s1865_s14 + $0x220] sm:$0xff]  ;;  %v1552_v58 = vld [vmem:[%s1865_s14 + $0x208] sm:$0xff]  ;;  %v1603_v63 = vld [vmem:[%s1865_s14 + $0x1f8] sm:$0xff] }
  0x43   : > { %730 = vmatpush.msra.mxu1 %v1541_v17  ;;  %767 = vmatpush.msra.mxu2 %v1563_v44  ;;  %v1551_v59 = vld [vmem:[%s1865_s14 + $0x200] sm:$0xff]  ;;  %v1602_v0 = vld [vmem:[%s1865_s14 + $0x1f0] sm:$0xff]  ;;  %v1601_v1 = vld [vmem:[%s1865_s14 + $0x1e8] sm:$0xff] }
  0x44   : > { %687 = vmatpush.msra.mxu0 %v666_v18  ;;  %v1600_v2 = vld [vmem:[%s1865_s14 + $0x1e0] sm:$0xff]  ;;  %v1599_v3 = vld [vmem:[%s1865_s14 + $0x1d8] sm:$0xff]  ;;  %v1598_v4 = vld [vmem:[%s1865_s14 + $0x1d0] sm:$0xff] }
  0x45   : > { %731 = vmatpush.msra.mxu1 %v1540_v19  ;;  %768 = vmatpush.msra.mxu2 %v1562_v45  ;;  %v1597_v6 = vld [vmem:[%s1865_s14 + $0x1c8] sm:$0xff]  ;;  %v1685_v11 = vld [vmem:[%s1875_s17 + $0x4] ss:$0 sm:$0xff]  ;;  %v1586_v14 = vld [vmem:[%s1865_s14 + $0xf8] sm:$0xff] }
  0x46   : > { %688 = vmatpush.msra.mxu0 %v665_v20  ;;  %v1585_v15 = vld [vmem:[%s1865_s14 + $0xf0] sm:$0xff]  ;;  %v1584_v16 = vld [vmem:[%s1865_s14 + $0xe8] sm:$0xff]  ;;  %v1583_v17 = vld [vmem:[%s1865_s14 + $0xe0] sm:$0xff] }
  0x47   : > { %732 = vmatpush.msra.mxu1 %v1539_v21  ;;  %769 = vmatpush.msra.mxu2 %v1561_v46  ;;  %v1582_v18 = vld [vmem:[%s1865_s14 + $0xd8] sm:$0xff]  ;;  %v1581_v19 = vld [vmem:[%s1865_s14 + $0xd0] sm:$0xff]  ;;  %v1580_v20 = vld [vmem:[%s1865_s14 + $0xc8] sm:$0xff] }
  0x48   : > { %689 = vmatpush.msra.mxu0 %v664_v22  ;;  %v1579_v21 = vld [vmem:[%s1865_s14 + $0xc0] sm:$0xff]  ;;  %v1619_v52 = vld [vmem:[%s1865_s14 + $0x2f0] sm:$0xff] }
  0x49   : > { %733 = vmatpush.msra.mxu1 %v1538_v23  ;;  %770 = vmatpush.msra.mxu2 %v1560_v47  ;;  %v1596_v22 = vld [vmem:[%s1865_s14 + $0x1c0] sm:$0xff]  ;;  %v1578_v23 = vld [vmem:[%s1865_s14 + $0xb8] sm:$0xff] }
  0x4a   : > { %690 = vmatpush.msra.mxu0 %v663_v24  ;;  %v1595_v24 = vld [vmem:[%s1865_s14 + $0x1b8] sm:$0xff]  ;;  %v1686_v43 = vld [vmem:[%s1875_s17 + $0x3] ss:$0 sm:$0xff]  ;;  %v1687_v47 = vld [vmem:[%s1875_s17 + $0x1] ss:$0 sm:$0xff] }
  0x4b   : > { %734 = vmatpush.msra.mxu1 %v1537_v25  ;;  %771 = vmatpush.msra.mxu2 %v1559_v48  ;;  %v1577_v25 = vld [vmem:[%s1865_s14 + $0xb0] sm:$0xff]  ;;  %v1688_v56 = vld [vmem:[%s1875_s17 + $0x5] ss:$0 sm:$0xff] }
  0x4c   : > { %691 = vmatpush.msra.mxu0 %v662_v26  ;;  %v1594_v26 = vld [vmem:[%s1865_s14 + $0x1b0] sm:$0xff] }
  0x4d   : > { %735 = vmatpush.msra.mxu1 %v1536_v27  ;;  %772 = vmatpush.msra.mxu2 %v1558_v49  ;;  %v1576_v27 = vld [vmem:[%s1865_s14 + $0xa8] sm:$0xff] }
  0x4e   : > { %692 = vmatpush.msra.mxu0 %v661_v28  ;;  %v1593_v28 = vld [vmem:[%s1865_s14 + $0x1a8] sm:$0xff] }
  0x4f   : > { %736 = vmatpush.msra.mxu1 %v1535_v29  ;;  %773 = vmatpush.msra.mxu2 %v1557_v50  ;;  %v1575_v29 = vld [vmem:[%s1865_s14 + $0xa0] sm:$0xff] }
  0x50   : > { %693 = vmatpush.msra.mxu0 %v660_v30  ;;  %v1592_v30 = vld [vmem:[%s1865_s14 + $0x1a0] sm:$0xff] }
  0x51   : > { %737 = vmatpush.msra.mxu1 %v1534_v31  ;;  %774 = vmatpush.msra.mxu2 %v1556_v51  ;;  %v1574_v31 = vld [vmem:[%s1865_s14 + $0x98] sm:$0xff] }
  0x52   : > { %694 = vmatpush.msra.mxu0 %v659_v32  ;;  %738 = vmatmul.f32.vlgmr.msra.gmra.mxu1 %v1958_v33  ;;  %v1591_v32 = vld [vmem:[%s1865_s14 + $0x198] sm:$0xff] }
  0x53   : > { %695 = vmatmul.f32.vlgmr.msra.gmra.mxu0 %v1958_v33  ;;  %775 = vmatpush.msra.mxu2 %v1555_v53  ;;  %v1620_v51 = vld [vmem:[%s1865_s14 + $0x2f8] sm:$0xff]  ;;  %v1618_v53 = vld [vmem:[%s1865_s14 + $0x2e8] sm:$0xff] }
  0x54   : > { %920 = vmatpush.msrb.mxu0 %v1603_v63  ;;  %962 = vmatpush.msrb.mxu1 %v1620_v51  ;;  %v1610_v63 = vld [vmem:[%s1865_s14 + $0x2a8] sm:$0xff] }
  0x55   : > { %776 = vmatpush.msra.mxu2 %v1554_v54  ;;  %v1617_v54 = vld [vmem:[%s1865_s14 + $0x2e0] sm:$0xff] }
  0x56   : > { %921 = vmatpush.msrb.mxu0 %v1602_v0  ;;  %963 = vmatpush.msrb.mxu1 %v1619_v52  ;;  %v1609_v0 = vld [vmem:[%s1865_s14 + $0x2a0] sm:$0xff] }
  0x57   : > { %777 = vmatpush.msra.mxu2 %v1553_v57  ;;  %v1616_v57 = vld [vmem:[%s1865_s14 + $0x2d8] sm:$0xff] }
  0x58   : > { %922 = vmatpush.msrb.mxu0 %v1601_v1  ;;  %964 = vmatpush.msrb.mxu1 %v1618_v53  ;;  %v1608_v1 = vld [vmem:[%s1865_s14 + $0x298] sm:$0xff] }
  0x59   : > { %778 = vmatpush.msra.mxu2 %v1552_v58  ;;  %v1615_v58 = vld [vmem:[%s1865_s14 + $0x2d0] sm:$0xff] }
  0x5a   : > { %923 = vmatpush.msrb.mxu0 %v1600_v2  ;;  %965 = vmatpush.msrb.mxu1 %v1617_v54  ;;  %v1607_v2 = vld [vmem:[%s1865_s14 + $0x290] sm:$0xff] }
  0x5b   : > { %779 = vmatpush.msra.mxu2 %v1551_v59  ;;  %v1614_v59 = vld [vmem:[%s1865_s14 + $0x2c8] sm:$0xff] }
  0x5c   : > { %780 = vmatmul.f32.vlgmr.msra.gmra.mxu2 %v1958_v33  ;;  %924 = vmatpush.msrb.mxu0 %v1599_v3  ;;  %v1606_v3 = vld [vmem:[%s1865_s14 + $0x288] sm:$0xff] }
  0x5d   : > { %966 = vmatpush.msrb.mxu1 %v1616_v57  ;;  %v1166_v57 = vld [vmem:[%s1894_s29 + $0xd0] sm:$0xff] }
  0x5e   : > { %925 = vmatpush.msrb.mxu0 %v1598_v4 }
  0x5f   : > { %967 = vmatpush.msrb.mxu1 %v1615_v58  ;;  %v1167_v58 = vld [vmem:[%s1894_s29 + $0xd8] sm:$0xff] }
  0x60   : > { %926 = vmatpush.msrb.mxu0 %v1597_v6 }
  0x61   : > { %968 = vmatpush.msrb.mxu1 %v1614_v59  ;;  %v1164_v59 = vld [vmem:[%s1894_s29 + $0xc0] sm:$0xff] }
  0x62   : > { %927 = vmatpush.msrb.mxu0 %v1596_v22  ;;  %v1632_v22 = vld [vmem:[%s1870_s27 + $0x78] sm:$0xff] }
  0x64   : > { %928 = vmatpush.msrb.mxu0 %v1595_v24  ;;  %v1630_v24 = vld [vmem:[%s1870_s27 + $0x68] sm:$0xff] }
  0x66   : > { %929 = vmatpush.msrb.mxu0 %v1594_v26  ;;  %v1628_v26 = vld [vmem:[%s1870_s27 + $0x58] sm:$0xff] }
  0x68   : > { %930 = vmatpush.msrb.mxu0 %v1593_v28  ;;  %v1626_v28 = vld [vmem:[%s1870_s27 + $0x48] sm:$0xff] }
  0x6a   : > { %931 = vmatpush.msrb.mxu0 %v1592_v30 }
  0x6c   : > { %932 = vmatpush.msrb.mxu0 %v1591_v32  ;;  %v1625_v32 = vld [vmem:[%s1870_s27 + $0x40] sm:$0xff] }
  0xcf   : > { %v739_v36 = vpop.f32.mrf.mxu1 }
  0xd0   : > { %v696_v37 = vpop.f32.mrf.mxu0  ;;  %v740_v38 = vadd.f32 %v1683_v34, %v739_v36  ;;  %v1573_v34 = vld [vmem:[%s1865_s14 + $0x90] sm:$0xff]  ;;  %v1572_v36 = vld [vmem:[%s1865_s14 + $0x88] sm:$0xff] }
  0xd1   : > { %v697_v39 = vadd.f32 %v1684_v35, %v696_v37  ;;  %v1590_v35 = vld [vmem:[%s1865_s14 + $0x190] sm:$0xff]  ;;  %v1589_v37 = vld [vmem:[%s1865_s14 + $0x188] sm:$0xff] }
  0xd2   : > { %1568 = vmatpush.xpose.msk.msra.mxu3 %vm784_vm0, %v740_v38  ;;  %933 = vmatpush.msrb.mxu0 %v1590_v35  ;;  %v1571_v38 = vld [vmem:[%s1865_s14 + $0x80] sm:$0xff] }
  0xd3   : > { %v699_v40 = vmul.f32 0.125, %v697_v39  ;;  %v1588_v39 = vld [vmem:[%s1865_s14 + $0x180] sm:$0xff] }
  0xd4   : > { %934 = vmatpush.msrb.mxu0 %v1589_v37  ;;  %v1689_v35 = vld [vmem:[%s2245_s7] ss:$0 sm:$0xff] }
  0xd5   : > { %1569 = vmatmul.msk.f32.vlgmr.msra.gmra.mxu3 %vm784_vm0, %v699_v40 }
  0xd6   : > { %935 = vmatpush.msrb.mxu0 %v1588_v39 }
  0xd7   : > { %936 = vmatmul.f32.vlgmr.msrb.gmra.mxu0 %v1958_v33 }
  0xdf   : > { %v781_v12 = vpop.f32.mrf.mxu2 }
  0xe0   : > { %v782_v13 = vadd.f32 %v1685_v11, %v781_v12 }
  0xe2   : > { %842 = vmatpush.msrb.mxu3 %v782_v13 }
  0xe4   : > { %877 = vmatpush.msra.mxu3 %v1586_v14  ;;  %v854_v14 = vld [vmem:[%s1870_s27 + $0x38] sm:$0xff] }
  0xe6   : > { %878 = vmatpush.msra.mxu3 %v1585_v15  ;;  %v853_v15 = vld [vmem:[%s1870_s27 + $0x30] sm:$0xff] }
  0xe8   : > { %879 = vmatpush.msra.mxu3 %v1584_v16  ;;  %v852_v16 = vld [vmem:[%s1870_s27 + $0x28] sm:$0xff] }
  0xea   : > { %880 = vmatpush.msra.mxu3 %v1583_v17  ;;  %v851_v17 = vld [vmem:[%s1870_s27 + $0x20] sm:$0xff] }
  0xec   : > { %881 = vmatpush.msra.mxu3 %v1582_v18  ;;  %v850_v18 = vld [vmem:[%s1870_s27 + $0x18] sm:$0xff] }
  0xee   : > { %882 = vmatpush.msra.mxu3 %v1581_v19  ;;  %v849_v19 = vld [vmem:[%s1870_s27 + $0x10] sm:$0xff] }
  0xf0   : > { %883 = vmatpush.msra.mxu3 %v1580_v20  ;;  %v848_v20 = vld [vmem:[%s1870_s27 + $0x8] sm:$0xff] }
  0xf2   : > { %884 = vmatpush.msra.mxu3 %v1579_v21  ;;  %v847_v21 = vld [vmem:[%s1870_s27] sm:$0xff] }
  0xf4   : > { %885 = vmatpush.msra.mxu3 %v1578_v23  ;;  %v1631_v23 = vld [vmem:[%s1870_s27 + $0x70] sm:$0xff] }
  0xf6   : > { %886 = vmatpush.msra.mxu3 %v1577_v25  ;;  %v1629_v25 = vld [vmem:[%s1870_s27 + $0x60] sm:$0xff] }
  0xf8   : > { %887 = vmatpush.msra.mxu3 %v1576_v27  ;;  %v1627_v27 = vld [vmem:[%s1870_s27 + $0x50] sm:$0xff] }
  0xfa   : > { %888 = vmatpush.msra.mxu3 %v1575_v29 }
  0xfc   : > { %889 = vmatpush.msra.mxu3 %v1574_v31 }
  0xfe   : > { %890 = vmatpush.msra.mxu3 %v1573_v34 }
 0x100   : > { %891 = vmatpush.msra.mxu3 %v1572_v36 }
 0x102   : > { %892 = vmatpush.msra.mxu3 %v1571_v38 }
 0x154   : > { %v937_v44 = vpop.f32.mrf.mxu0 }
 0x155   : > { %v938_v45 = vadd.f32 %v1686_v43, %v937_v44  ;;  %v1171_v43 = vld [vmem:[%s1894_s29 + $0xf8] sm:$0xff]  ;;  %v1168_v44 = vld [vmem:[%s1894_s29 + $0xe0] sm:$0xff] }
 0x156   : > { %1198 = vmatpush.msra.mxu0 %v1171_v43  ;;  %v1242_v43 = vld [vmem:[%s1904_s12 + $0xb0] sm:$0xff] }
 0x157   : > { %1622 = vmatpush.xpose.msk.msrb.mxu2 %vm784_vm0, %v938_v45  ;;  %v1169_v45 = vld [vmem:[%s1894_s29 + $0xe8] sm:$0xff] }
 0x158   : > { %v808_v60 = vpop.f32.mrf.mxu3  ;;  %1199 = vmatpush.msra.mxu0 %v1169_v45  ;;  %v1226_v45 = vld [vmem:[%s1904_s12 + $0x30] sm:$0xff] }
 0x159   : > { %v811_v61 = vsel %vm658_vm1, %v808_v60, -1e+30  ;;  %v1613_v60 = vld [vmem:[%s1865_s14 + $0x2c0] sm:$0xff] }
 0x15a   : > { %v813_v62 = vsel %vm812_vm2, %v811_v61, -inf  ;;  %969 = vmatpush.msrb.mxu1 %v1613_v60  ;;  %1200 = vmatpush.msra.mxu0 %v1167_v58  ;;  %v1165_v60 = vld [vmem:[%s1894_s29 + $0xc8] sm:$0xff]  ;;  %v1691_v58 = vld [vmem:[%s2248_s28] ss:$0 sm:$0xff] }
 0x15b   : > { %814 = vmax.xlane.f32.xlu0 %v813_v62  ;;  %v1611_v62 = vld [vmem:[%s1865_s14 + $0x2b0] sm:$0xff] }
 0x15c   : > { %1201 = vmatpush.msra.mxu0 %v1165_v60 }
 0x1ce   : > { %v815_v5 = vpop.xlane.xlu0 %814 }
 0x1cf   : > { %v816_v7 = vsub.f32 %v811_v61, %v815_v5  ;;  %v1612_v61 = vld [vmem:[%s1865_s14 + $0x2b8] sm:$0xff] }
 0x1d0   : > { %970 = vmatpush.msrb.mxu1 %v1612_v61  ;;  %v1162_v61 = vld [vmem:[%s1894_s29 + $0xb0] sm:$0xff] }
 0x1d1   : > { %v817_v8 = vmul.f32 1.442695, %v816_v7  ;;  %v1605_v7 = vld [vmem:[%s1865_s14 + $0x280] sm:$0xff] }
 0x1d2   : > { %971 = vmatpush.msrb.mxu1 %v1611_v62  ;;  %v1163_v62 = vld [vmem:[%s1894_s29 + $0xb8] sm:$0xff] }
 0x1d3   : > { %1695 = vpow2.f32 %v817_v8  ;;  %1202 = vmatpush.msra.mxu0 %v1163_v62  ;;  %v1238_v62 = vld [vmem:[%s1904_s12 + $0x90] sm:$0xff] }
 0x1d4   : > { %972 = vmatpush.msrb.mxu1 %v1610_v63  ;;  %v1160_v63 = vld [vmem:[%s1894_s29 + $0xa0] sm:$0xff] }
 0x1d6   : > { %973 = vmatpush.msrb.mxu1 %v1609_v0  ;;  %v1161_v0 = vld [vmem:[%s1894_s29 + $0xa8] sm:$0xff] }
 0x1d7   : > { %1203 = vmatpush.msra.mxu0 %v1161_v0  ;;  %v1237_v0 = vld [vmem:[%s1904_s12 + $0x88] sm:$0xff] }
 0x1d8   : > { %974 = vmatpush.msrb.mxu1 %v1608_v1  ;;  %v1158_v1 = vld [vmem:[%s1894_s29 + $0x90] sm:$0xff] }
 0x1d9   : > { %v1696_v9 = vpop.eup %1695 }
 0x1da   : > { %v819_v10 = vsel %vm812_vm2, %v1696_v9, 0.0  ;;  %975 = vmatpush.msrb.mxu1 %v1607_v2  ;;  %v1159_v2 = vld [vmem:[%s1894_s29 + $0x98] sm:$0xff] }
 0x1db   : > { %820 = vadd.xlane.f32.xlu0 %v819_v10  ;;  %1204 = vmatpush.msra.mxu0 %v1159_v2  ;;  %v1222_v2 = vld [vmem:[%s1904_s12 + $0x10] sm:$0xff] }
 0x1dc   : > { %976 = vmatpush.msrb.mxu1 %v1606_v3  ;;  %v1156_v3 = vld [vmem:[%s1894_s29 + $0x80] sm:$0xff] }
 0x1de   : > { %977 = vmatpush.msrb.mxu1 %v1605_v7  ;;  %v1152_v7 = vld [vmem:[%s1894_s29 + $0x60] sm:$0xff] }
 0x1df   : > { %978 = vmatmul.f32.vlgmr.msrb.gmra.mxu1 %v1958_v33 }
 0x24e   : > { %v821_v40 = vpop.xlane.xlu0 %820 }
 0x24f   : > { %1697 = vrcp.f32 %v821_v40 }
 0x255   : > { %v1698_v41 = vpop.eup %1697 }
 0x256   : > { %v823_v42 = vmul.f32 %v1698_v41, %v1696_v9  ;;  %v1749_v41 = vmov 128.0  }
 0x258   : > { %1570 = vmatmul.msk.f32.vlgmr.msrb.gmra.mxu3 %vm812_vm2, %v823_v42  ;;  %v1170_v42 = vld [vmem:[%s1894_s29 + $0xf0] sm:$0xff] }
 0x259   : > { %1063 = vmatpush.msrb.mxu3 %v1632_v22  ;;  %v1234_v22 = vld [vmem:[%s1904_s12 + $0x70] sm:$0xff] }
 0x25b   : > { %1064 = vmatpush.msrb.mxu3 %v1631_v23  ;;  %v1249_v23 = vld [vmem:[%s1904_s12 + $0xe8] sm:$0xff] }
 0x25c   : > { %v979_v12 = vpop.f32.mrf.mxu1 }
 0x25d   : > { %v980_v13 = vadd.f32 %v1688_v56, %v979_v12  ;;  %1065 = vmatpush.msrb.mxu3 %v1630_v24  ;;  %v1146_v56 = vld [vmem:[%s1894_s29 + $0x30] sm:$0xff]  ;;  %v1147_v12 = vld [vmem:[%s1894_s29 + $0x38] sm:$0xff] }
 0x25f   : > { %1038 = vmatpush.msra.mxu2 %v980_v13  ;;  %1066 = vmatpush.msrb.mxu3 %v1629_v25  ;;  %v1144_v13 = vld [vmem:[%s1894_s29 + $0x20] sm:$0xff]  ;;  %v1233_v25 = vld [vmem:[%s1904_s12 + $0x68] sm:$0xff] }
 0x260   : > { %893 = vmatmul.f32.vlgmr.msra.gmra.mxu3 %v1958_v33 }
 0x261   : > { %1067 = vmatpush.msrb.mxu3 %v1628_v26 }
 0x263   : > { %1068 = vmatpush.msrb.mxu3 %v1627_v27  ;;  %v1248_v27 = vld [vmem:[%s1904_s12 + $0xe0] sm:$0xff] }
 0x265   : > { %1069 = vmatpush.msrb.mxu3 %v1626_v28  ;;  %v1232_v28 = vld [vmem:[%s1904_s12 + $0x60] sm:$0xff] }
 0x267   : > { %1070 = vmatpush.msrb.mxu3 %v1625_v32  ;;  %v1246_v32 = vld [vmem:[%s1904_s12 + $0xd0] sm:$0xff] }
 0x269   : > { %1178 = vmatpush.msra.mxu3 %v1170_v42  ;;  %v1227_v42 = vld [vmem:[%s1904_s12 + $0x38] sm:$0xff] }
 0x26b   : > { %1179 = vmatpush.msra.mxu3 %v1168_v44 }
 0x26d   : > { %1180 = vmatpush.msra.mxu3 %v1166_v57 }
 0x26f   : > { %1181 = vmatpush.msra.mxu3 %v1164_v59 }
 0x271   : > { %1182 = vmatpush.msra.mxu3 %v1162_v61  ;;  %v1225_v61 = vld [vmem:[%s1904_s12 + $0x28] sm:$0xff] }
 0x273   : > { %1183 = vmatpush.msra.mxu3 %v1160_v63  ;;  %v1224_v63 = vld [vmem:[%s1904_s12 + $0x20] sm:$0xff] }
 0x275   : > { %1184 = vmatpush.msra.mxu3 %v1158_v1  ;;  %v1236_v1 = vld [vmem:[%s1904_s12 + $0x80] sm:$0xff] }
 0x277   : > { %1185 = vmatpush.msra.mxu3 %v1156_v3  ;;  %v1221_v3 = vld [vmem:[%s1904_s12 + $0x8] sm:$0xff] }
 0x2db   : > { %v2032_v46 = vpop.f32.mrf.mxu3 }
 0x2e3   : > { %v894_v48 = vpop.f32.mrf.mxu3 }
 0x2e4   : > { %v895_v49 = vadd.f32 %v1687_v47, %v894_v48 }
 0x2e6   : > { %v897_v50 = vmul.f32 0.125, %v895_v49 }
 0x2e8   : > { %1623 = vmatmul.msk.f32.vlgmr.msrb.gmra.mxu2 %vm784_vm0, %v897_v50 }
 0x2e9   : > { %1086 = vmatpush.msrb.mxu2 %v854_v14  ;;  %v1145_v14 = vld [vmem:[%s1894_s29 + $0x28] sm:$0xff] }
 0x2eb   : > { %1087 = vmatpush.msrb.mxu2 %v853_v15  ;;  %v1142_v15 = vld [vmem:[%s1894_s29 + $0x10] sm:$0xff] }
 0x2ed   : > { %1088 = vmatpush.msrb.mxu2 %v852_v16  ;;  %v1143_v16 = vld [vmem:[%s1894_s29 + $0x18] sm:$0xff] }
 0x2ef   : > { %1089 = vmatpush.msrb.mxu2 %v851_v17  ;;  %v1140_v17 = vld [vmem:[%s1894_s29] sm:$0xff] }
 0x2f1   : > { %1090 = vmatpush.msrb.mxu2 %v850_v18  ;;  %v1141_v18 = vld [vmem:[%s1894_s29 + $0x8] sm:$0xff] }
 0x2f3   : > { %1091 = vmatpush.msrb.mxu2 %v849_v19  ;;  %v1251_v19 = vld [vmem:[%s1904_s12 + $0xf8] sm:$0xff] }
 0x2f5   : > { %1092 = vmatpush.msrb.mxu2 %v848_v20  ;;  %v1250_v20 = vld [vmem:[%s1904_s12 + $0xf0] sm:$0xff] }
 0x2f7   : > { %1093 = vmatpush.msrb.mxu2 %v847_v21  ;;  %v1235_v21 = vld [vmem:[%s1904_s12 + $0x78] sm:$0xff] }
 0x2f8   : > { %1256 = vmatpush.msra.mxu1 %v1235_v21 }
 0x2fa   : > { %1257 = vmatpush.msra.mxu1 %v1234_v22 }
 0x2fc   : > { %1258 = vmatpush.msra.mxu1 %v1233_v25 }
 0x2fe   : > { %1259 = vmatpush.msra.mxu1 %v1232_v28 }
 0x36b   : > { %v1005_v4 = vpop.f32.mrf.mxu2 }
 0x36c   : > { %v1008_v5 = vsel %vm658_vm1, %v1005_v4, -1e+30  ;;  %v1157_v4 = vld [vmem:[%s1894_s29 + $0x88] sm:$0xff] }
 0x36d   : > { %v1009_v6 = vsel %vm812_vm2, %v1008_v5, -inf  ;;  %1205 = vmatpush.msra.mxu0 %v1157_v4  ;;  %v1220_v4 = vld [vmem:[%s1904_s12] sm:$0xff] }
 0x36e   : > { %1010 = vmax.xlane.f32.xlu1 %v1009_v6  ;;  %v1155_v6 = vld [vmem:[%s1894_s29 + $0x78] sm:$0xff] }
 0x36f   : > { %1206 = vmatpush.msra.mxu0 %v1155_v6 }
 0x3e1   : > { %v1011_v8 = vpop.xlane.xlu1 %1010 }
 0x3e2   : > { %v1012_v9 = vsub.f32 %v1008_v5, %v1011_v8  ;;  %v1154_v5 = vld [vmem:[%s1894_s29 + $0x70] sm:$0xff]  ;;  %v1153_v8 = vld [vmem:[%s1894_s29 + $0x68] sm:$0xff] }
 0x3e3   : > { %1186 = vmatpush.msra.mxu3 %v1154_v5  ;;  %1207 = vmatpush.msra.mxu0 %v1153_v8  ;;  %v1172_v5 = vld [vmem:[%s1899_s0] sm:$0x3] }
 0x3e4   : > { %v1013_v10 = vmul.f32 1.442695, %v1012_v9  ;;  %v1150_v9 = vld [vmem:[%s1894_s29 + $0x50] sm:$0xff]  ;;  %v1175_v6 = vperm.slane %v1172_v5, 1 }
 0x3e5   : > { %1187 = vmatpush.msra.mxu3 %v1152_v7 }
 0x3e6   : > { %1699 = vpow2.f32 %v1013_v10  ;;  %v1151_v10 = vld [vmem:[%s1894_s29 + $0x58] sm:$0xff] }
 0x3e7   : > { %1188 = vmatpush.msra.mxu3 %v1150_v9  ;;  %1208 = vmatpush.msra.mxu0 %v1151_v10  ;;  %v1174_v10 = vperm.slane %v1172_v5, 0 }
 0x3ec   : > { %v1700_v11 = vpop.eup %1699 }
 0x3ed   : > { %v1015_v55 = vsel %vm812_vm2, %v1700_v11, 0.0 }
 0x3ee   : > { %1016 = vadd.xlane.f32.xlu1 %v1015_v55  ;;  %v1149_v55 = vld [vmem:[%s1894_s29 + $0x48] sm:$0xff] }
 0x3ef   : > { %1209 = vmatpush.msra.mxu0 %v1149_v55 }
 0x3f1   : > { %1210 = vmatpush.msra.mxu0 %v1147_v12  ;;  %v1692_v12 = vld [vmem:[%s635_s24] ss:$0 sm:$0xff] }
 0x3f3   : > { %1211 = vmatpush.msra.mxu0 %v1145_v14 }
 0x3f5   : > { %1212 = vmatpush.msra.mxu0 %v1143_v16 }
 0x3f7   : > { %1213 = vmatpush.msra.mxu0 %v1141_v18 }
 0x461   : > { %v1017_v29 = vpop.xlane.xlu1 %1016 }
 0x462   : > { %1701 = vrcp.f32 %v1017_v29 }
 0x463   : > { %1703 = vrcp.f32 %v1749_v41 }
 0x468   : > { %v1702_v30 = vpop.eup %1701 }
 0x469   : > { %v1019_v31 = vmul.f32 %v1702_v30, %v1700_v11  ;;  %v1148_v11 = vld [vmem:[%s1894_s29 + $0x40] sm:$0xff]  ;;  %v1247_v30 = vld [vmem:[%s1904_s12 + $0xd8] sm:$0xff] }
 0x46a   : > { %1189 = vmatpush.msra.mxu3 %v1148_v11 }
 0x46b   : > { %1624 = vmatmul.msk.f32.vlgmr.msra.gmra.mxu2 %vm812_vm2, %v1019_v31  ;;  %v1231_v31 = vld [vmem:[%s1904_s12 + $0x58] sm:$0xff] }
 0x46c   : > { %1190 = vmatpush.msra.mxu3 %v1146_v56  ;;  %1276 = vmatpush.msra.mxu2 %v1251_v19 }
 0x46d   : > { %1260 = vmatpush.msra.mxu1 %v1231_v31  ;;  %v1693_v31 = vld [vmem:[%s638_s3] ss:$0 sm:$0xff] }
 0x46e   : > { %1191 = vmatpush.msra.mxu3 %v1144_v13  ;;  %1277 = vmatpush.msra.mxu2 %v1250_v20 }
 0x470   : > { %1192 = vmatpush.msra.mxu3 %v1142_v15  ;;  %1278 = vmatpush.msra.mxu2 %v1249_v23 }
 0x472   : > { %1193 = vmatpush.msra.mxu3 %v1140_v17  ;;  %1279 = vmatpush.msra.mxu2 %v1248_v27 }
 0x473   : > { %1634 = vmatmul.msk.f32.vlgmr.msrb.gmra.mxu2 %vm784_vm0, %v2032_v46  ;;  %v1704_v46 = vpop.eup %1703 }
 0x474   : > { %v1108_v47 = vmul.f32 128.0, %v1704_v46  ;;  %vm1112_vm3 = vweird.f32 %v1704_v46  ;;  %1280 = vmatpush.msra.mxu2 %v1247_v30 }
 0x476   : > { %v1109_v48 = vsub.f32 1.0, %v1108_v47  ;;  %1281 = vmatpush.msra.mxu2 %v1246_v32 }
 0x478   : > { %v1110_v49 = vmul.f32 %v1704_v46, %v1109_v48  ;;  %v1240_v48 = vld [vmem:[%s1904_s12 + $0xa0] sm:$0xff] }
 0x4ee   : > { %v1040_v34 = vpop.f32.mrf.mxu2 }
 0x4ef   : > { %1633 = vmatmul.msk.f32.vlgmr.msrb.gmra.mxu3 %vm784_vm0, %v1040_v34  ;;  %v1230_v34 = vld [vmem:[%s1904_s12 + $0x50] sm:$0xff] }
 0x4f0   : > { %1261 = vmatpush.msra.mxu1 %v1230_v34 }
 0x4f6   : > { %v1095_v36 = vpop.f32.mrf.mxu2 }
 0x572   : > { %v1072_v37 = vpop.f32.mrf.mxu3 }
 0x573   : > { %v1096_v38 = vadd.f32 %v1095_v36, %v1072_v37  ;;  %v1229_v36 = vld [vmem:[%s1904_s12 + $0x48] sm:$0xff]  ;;  %v1244_v37 = vld [vmem:[%s1904_s12 + $0xc0] sm:$0xff] }
 0x574   : > { %1262 = vmatpush.msra.mxu1 %v1229_v36 }
 0x575   : > { %v1101_v39 = vadd.f32 %v1689_v35, %v1096_v38  ;;  %v1245_v35 = vld [vmem:[%s1904_s12 + $0xc8] sm:$0xff]  ;;  %v1228_v38 = vld [vmem:[%s1904_s12 + $0x40] sm:$0xff] }
 0x576   : > { %1282 = vmatpush.msra.mxu2 %v1245_v35  ;;  %1263 = vmatpush.msra.mxu1 %v1228_v38 }
 0x577   : > { %v1102_v40 = vadd.f32 %v1101_v39, %v1958_v33  ;;  %v1111_v33 = vadd.f32 %v1704_v46, %v1110_v49 }
 0x578   : > { %1283 = vmatpush.msra.mxu2 %v1244_v37  ;;  %1264 = vmatpush.msra.mxu1 %v1227_v42 }
 0x579   : > { %1105 = vadd.xlane.f32.xlu2 %v1102_v40  ;;  %v2089_v50 = vsel %vm1112_vm3, %v1704_v46, %v1111_v33  ;;  %v1241_v46 = vld [vmem:[%s1904_s12 + $0xa8] sm:$0xff]  ;;  %v1239_v33 = vld [vmem:[%s1904_s12 + $0x98] sm:$0xff] }
 0x57a   : > { %1265 = vmatpush.msra.mxu1 %v1226_v45 }
 0x57c   : > { %1266 = vmatpush.msra.mxu1 %v1225_v61 }
 0x57e   : > { %1267 = vmatpush.msra.mxu1 %v1224_v63 }
 0x5ec   : > { %v1106_v51 = vpop.xlane.xlu2 %1105 }
 0x5ed   : > { %v1114_v52 = vmul.f32 %v2089_v50, %v1106_v51 }
 0x5ef   : > { %v2092_v53 = vsub.f32 %v1102_v40, %v1114_v52  ;;  %v1243_v40 = vld [vmem:[%s1904_s12 + $0xb8] sm:$0xff]  ;;  %v1690_v52 = vld [vmem:[%s2246_s16] ss:$0 sm:$0xff] }
 0x5f0   : > { %1284 = vmatpush.msra.mxu2 %v1243_v40 }
 0x5f1   : > { %v1116_v54 = vmul.f32 %v2092_v53, %v2092_v53 }
 0x5f2   : > { %1285 = vmatpush.msra.mxu2 %v1242_v43 }
 0x5f3   : > { %1117 = vadd.xlane.f32.xlu2 %v1116_v54 }
 0x5f4   : > { %1286 = vmatpush.msra.mxu2 %v1241_v46 }
 0x5f6   : > { %1287 = vmatpush.msra.mxu2 %v1240_v48 }
 0x5f8   : > { %1288 = vmatpush.msra.mxu2 %v1239_v33 }
 0x5fa   : > { %1289 = vmatpush.msra.mxu2 %v1238_v62 }
 0x5fc   : > { %1290 = vmatpush.msra.mxu2 %v1237_v0 }
 0x5fe   : > { %1291 = vmatpush.msra.mxu2 %v1236_v1 }
 0x666   : > { %v1118_v24 = vpop.xlane.xlu2 %1117 }
 0x667   : > { %v1119_v26 = vmul.f32 %v1118_v24, %v2089_v50 }
 0x669   : > { %v1120_v29 = vadd.f32 1e-05, %v1119_v26 }
 0x66b   : > { %1705 = vrsqrt.f32 %v1120_v29  ;;  %vm1127_vm5 = vweird.f32 %v1120_v29 }
 0x671   : > { %v1706_v39 = vpop.eup %1705 }
 0x672   : > { %v1122_v41 = vmul.f32 %v1706_v39, %v1120_v29  ;;  %vm1128_vm4 = vweird.f32 %v1706_v39 }
 0x673   : > { %vm1129_vm6 = vmor %vm1127_vm5, %vm1128_vm4 }
 0x674   : > { %v1123_v44 = vmul.f32 %v1706_v39, %v1122_v41 }
 0x676   : > { %v1124_v47 = vmul.f32 0.5, %v1123_v44 }
 0x678   : > { %v1125_v49 = vsub.f32 1.5, %v1124_v47 }
 0x67a   : > { %v1126_v51 = vmul.f32 %v1706_v39, %v1125_v49 }
 0x67c   : > { %v1130_v54 = vsel %vm1129_vm6, %v1706_v39, %v1126_v51 }
 0x67d   : > { %v1131_v57 = vmul.f32 %v1130_v54, %v2092_v53  ;;  %v1223_v53 = vld [vmem:[%s1904_s12 + $0x18] sm:$0xff] }
 0x67e   : > { %1268 = vmatpush.msra.mxu1 %v1223_v53 }
 0x67f   : > { %v1135_v59 = vmul.f32 %v1690_v52, %v1131_v57 }
 0x680   : > { %1269 = vmatpush.msra.mxu1 %v1222_v2 }
 0x681   : > { %v1139_v60 = vadd.f32 %v1691_v58, %v1135_v59 }
 0x682   : > { %1270 = vmatpush.msra.mxu1 %v1221_v3 }
 0x683   : > { %1194 = vmatmul.f32.vlgmr.msra.gmra.mxu3 %v1139_v60  ;;  %1214 = vmatmul.f32.vlgmr.msra.gmra.mxu0 %v1139_v60 }
 0x684   : > { %1271 = vmatpush.msra.mxu1 %v1220_v4 }
 0x700   : > { %v1215_v7 = vpop.f32.mrf.mxu0 }
 0x701   : > { %v1216_v8 = vadd.f32 %v1215_v7, %v1175_v6 }
 0x703   : > { %v1219_v9 = vmax.f32 %v1216_v8, 0.0 }
 0x705   : > { %1292 = vmatmul.f32.vlgmr.msra.gmra.mxu2 %v1219_v9 }
 0x706   : > { %v1195_v11 = vpop.f32.mrf.mxu3 }
 0x707   : > { %v1196_v55 = vadd.f32 %v1195_v11, %v1174_v10 }
 0x709   : > { %v1218_v56 = vmax.f32 %v1196_v55, 0.0 }
 0x70b   : > { %1272 = vmatmul.f32.vlgmr.msra.gmra.mxu1 %v1218_v56 }
 0x788   : > { %v1273_v13 = vpop.f32.mrf.mxu1  ;;  %v1293_v15 = vpop.f32.mrf.mxu2 }
 0x789   : > { %v1274_v14 = vadd.f32 %v1692_v12, %v1273_v13 }
 0x78b   : > { %v1294_v16 = vadd.f32 %v1293_v15, %v1274_v14 }
 0x78d   : > { %v1296_v17 = vadd.f32 %v1294_v16, %v1139_v60 }
 0x78f   : > { %1299 = vadd.xlane.f32.xlu0 %v1296_v17 }
 0x802   : > { %v1300_v18 = vpop.xlane.xlu0 %1299 }
 0x803   : > { %v1301_v19 = vmul.f32 %v1300_v18, %v2089_v50 }
 0x805   : > { %v1302_v20 = vsub.f32 %v1296_v17, %v1301_v19 }
 0x807   : > { %v1303_v21 = vmul.f32 %v1302_v20, %v1302_v20 }
 0x809   : > { %1304 = vadd.xlane.f32.xlu1 %v1303_v21 }
 0x87c   : > { %v1305_v22 = vpop.xlane.xlu1 %1304 }
 0x87d   : > { %v1306_v23 = vmul.f32 %v1305_v22, %v2089_v50  ;;  %v1694_v50 = vld [vmem:[%s641_s6] ss:$0 sm:$0xff] }
 0x87f   : > { %v1307_v24 = vadd.f32 1e-05, %v1306_v23 }
 0x881   : > { %1707 = vrsqrt.f32 %v1307_v24  ;;  %vm1314_vm8 = vweird.f32 %v1307_v24 }
 0x887   : > { %v1708_v25 = vpop.eup %1707 }
 0x888   : > { %v1309_v26 = vmul.f32 %v1708_v25, %v1307_v24  ;;  %vm1315_vm7 = vweird.f32 %v1708_v25 }
 0x889   : > { %vm1316_vm9 = vmor %vm1314_vm8, %vm1315_vm7 }
 0x88a   : > { %v1310_v27 = vmul.f32 %v1708_v25, %v1309_v26 }
 0x88c   : > { %v1311_v28 = vmul.f32 0.5, %v1310_v27 }
 0x88e   : > { %v1312_v29 = vsub.f32 1.5, %v1311_v28 }
 0x890   : > { %v1313_v30 = vmul.f32 %v1708_v25, %v1312_v29 }
 0x892   : > { %v1317_v32 = vsel %vm1316_vm9, %v1708_v25, %v1313_v30 }
 0x893   : > { %v1318_v34 = vmul.f32 %v1317_v32, %v1302_v20 }
 0x895   : > { %v1322_v35 = vmul.f32 %v1693_v31, %v1318_v34 }
 0x897   : > { %v1326_v36 = vadd.f32 %v1694_v50, %v1322_v35 }
 0x899   : > { %1327 = vst [vmem:[%s1921_s8] sm:$0xff] %v1326_v36 }
 0x89a PF: > { %s2250_s22 = sld [smem:[#allocation5_spill]] }
 0x89b   : > { %s2251_s25 = sld [smem:[#allocation3_spill]] }
 0x89c   : > { %s2252_s26 = sld [smem:[#allocation4_spill]] }
 0x89d   : > { %s2253_s27 = sld [smem:[#allocation6_spill]] }
 0x89e   : > { %s2254_s28 = sld [smem:[#allocation7_spill]] }
 0x8a0   : > { %s23_s29 = sadd.s32 1, %s2250_s22  }
 0x8a1   : > { %p20_p8 = scmp.ge.s32.totalorder %s23_s29, 10  }
 0x8a3   :  { %22 = sbr.rel (!%p20_p8) target bundleno = 10 (0xa), region = 153 }

// kernel: trajgpt_forward.6
= control target key start
LH: loop header
LB: loop body
LE: loop exit
PB: predicated region body
PF: predicated region fallthrough
CT: control target
= control target key end

     0   :  { %s3204_s0 = inlined_call_operand.vmem [shape: f32[2,8,64], index: 0, kind: input, shape index: {}]   ;;  %s3205_s1 = inlined_call_operand.vmem [shape: f32[2,8,64], index: 1, kind: input, shape index: {}]   ;;  %s3206_s2 = inlined_call_operand.vmem [shape: f32[6,64,32], index: 2, kind: input, shape index: {}]   ;;  %s3207_s3 = inlined_call_operand.vmem [shape: f32[6,1,32], index: 3, kind: input, shape index: {}]   ;;  %s3208_s4 = inlined_call_operand.vmem [shape: f32[2,32,64], index: 4, kind: input, shape index: {}]   ;;  %s3209_s5 = inlined_call_operand.vmem [shape: f32[1,64], index: 5, kind: input, shape index: {}]   ;;  %s3210_s6 = inlined_call_operand.vmem [shape: f32[1,64], index: 6, kind: input, shape index: {}]   ;;  %s3211_s7 = inlined_call_operand.vmem [shape: f32[1,64], index: 7, kind: input, shape index: {}]   ;;  %s3212_s8 = inlined_call_operand.vmem [shape: f32[6,64,32], index: 8, kind: input, shape index: {}]   ;;  %s3213_s9 = inlined_call_operand.vmem [shape: f32[6,1,32], index: 9, kind: input, shape index: {}]   ;;  %s3214_s10 = inlined_call_operand.vmem [shape: f32[2,32,64], index: 10, kind: input, shape index: {}]   ;;  %s3215_s11 = inlined_call_operand.vmem [shape: f32[1,64], index: 11, kind: input, shape index: {}]   ;;  %s3216_s12 = inlined_call_operand.hbm [shape: f32[1,64], index: 12, kind: input, shape index: {}]   ;;  %s3217_s13 = inlined_call_operand.hbm [shape: f32[1,64], index: 13, kind: input, shape index: {}]   ;;  %s3218_s14 = inlined_call_operand.vmem [shape: f32[64,32], index: 14, kind: input, shape index: {}]   ;;  %s3219_s15 = inlined_call_operand.hbm [shape: f32[1,32], index: 15, kind: input, shape index: {}]   ;;  %s3220_s16 = inlined_call_operand.vmem [shape: f32[32,64], index: 16, kind: input, shape index: {}]   ;;  %s3221_s17 = inlined_call_operand.hbm [shape: f32[1,64], index: 17, kind: input, shape index: {}]   ;;  %s3222_s18 = inlined_call_operand.hbm [shape: f32[1,64], index: 18, kind: input, shape index: {}]   ;;  %s3223_s19 = inlined_call_operand.hbm [shape: f32[1,64], index: 19, kind: input, shape index: {}]   ;;  %s3224_s20 = inlined_call_operand.vmem [shape: f32[64,128], index: 20, kind: input, shape index: {}]   ;;  %s3225_s21 = inlined_call_operand.hbm [shape: f32[1,128], index: 21, kind: input, shape index: {}]   ;;  %s3226_s22 = inlined_call_operand.vmem [shape: f32[2,8,128], index: 22, kind: output, shape index: {}]  }
   0x1   :  { %3230 = sst [smem:[#allocation17_spill]] %s3204_s0 }
   0x2   :  { %3231 = sst [smem:[#allocation18_spill]] %s3205_s1 }
   0x3   :  { %3232 = sst [smem:[#allocation19_spill]] %s3206_s2 }
   0x4   :  { %3233 = sst [smem:[#allocation20_spill]] %s3207_s3 }
   0x5   :  { %3234 = sst [smem:[#allocation21_spill]] %s3208_s4 }
   0x6   :  { %3235 = sst [smem:[#allocation22_spill]] %s3209_s5 }
   0x7   :  { %3236 = sst [smem:[#allocation23_spill]] %s3210_s6 }
   0x8   :  { %3237 = sst [smem:[#allocation24_spill]] %s3217_s13 }
   0x9   :  { %3238 = sst [smem:[#allocation25_spill]] %s3221_s17 }
   0xa   :  { %3239 = sst [smem:[#allocation26_spill]] %s3223_s19 }
   0xb   :  { %27 = vsyncpa [#allocation3], 0 }
   0xc   :  { %28 = vsyncpa [#allocation5], 0 }
   0xd   :  { %29 = vsyncpa [#allocation8], 0 }
   0xe   :  { %30 = vsyncpa [#allocation11], 0  ;;  %s2569_s3 = smov 0  }
   0xf LB: > { %s3240_s13 = sld [smem:[#allocation24_spill]]  ;;  %s2578_s4 = sadd.s32 4294967295, %s2444_s3   ;;  %s2444_s3 = sphi %s2569_s3, %s36_s3  }
  0x10   : > { %p1934_p0 = scmp.ge.s32.totalorder %s2444_s3, 1  ;;  %p539_p1 = scmp.lt.s32.totalorder %s2444_s3, 3 }
  0x11   : > { %p2135_p2 = scmp.eq.s32.totalorder %s2578_s4, 0  ;;  %s2446_s23 = smov [#allocation4]  }
  0x12   : > { %p2583_p3 = pnand %p1934_p0, %p539_p1  ;;  %s595_s1 = sshll.u32 %s2446_s23, 4  ;;  %s596_s1 = int_to_ptr.vmem [resolvable:$true] %s595_s1 }
  0x13   : > { %s3242_s17 = sld [smem:[#allocation25_spill]]  ;;  %s2447_s28 = smov [#allocation7]  }
  0x14   : > { %p2113_p4 = pneg %p2583_p3  ;;  %s3243_s19 = sld [smem:[#allocation26_spill]] }
  0x15   : > { %s593_s30 = sshll.u32 %s3240_s13, 4  ;;  %s625_s29 = sshll.u32 %s2447_s28, 4  ;;  %s594_s30 = int_to_ptr.hbm [resolvable:$true] %s593_s30  ;;  %s626_s29 = int_to_ptr.vmem [resolvable:$true] %s625_s29 }
  0x16   : > { %p2597_p5 = pnand %p2135_p2, %p2113_p4  ;;  %s2448_s23 = smov [#allocation10]  }
  0x17   : > { %s649_s5 = sshll.u32 %s2448_s23, 4  ;;  %s581_s26 = sshll.u32 %s3216_s12, 4  ;;  %s650_s5 = int_to_ptr.vmem [resolvable:$true] %s649_s5  ;;  %s582_s26 = int_to_ptr.hbm [resolvable:$true] %s581_s26 }
  0x18   : > { %2119 = dma.hbm_to_vmem [thread:$0]  (!%p2597_p5), %s594_s30, 16, %s596_s1, [#allocation5]  }
  0x19   : > { %s623_s6 = sshll.u32 %s3242_s17, 4  ;;  %s608_s17 = sshll.u32 %s3219_s15, 4  ;;  %s624_s6 = int_to_ptr.hbm [resolvable:$true] %s623_s6  ;;  %s609_s17 = int_to_ptr.hbm [resolvable:$true] %s608_s17 }
  0x1a   : > { %s647_s2 = sshll.u32 %s3243_s19, 4  ;;  %s2449_s19 = smov [#allocation2]   ;;  %s648_s2 = int_to_ptr.hbm [resolvable:$true] %s647_s2 }
  0x1b   : > { %2125 = dma.hbm_to_vmem [thread:$0]  (!%p2597_p5), %s624_s6, 16, %s626_s29, [#allocation8]  }
  0x1c   : > { %2131 = dma.hbm_to_vmem [thread:$0]  (!%p2597_p5), %s648_s2, 16, %s650_s5, [#allocation11]  }
  0x1d   : > { %s583_s30 = sshll.u32 %s2449_s19, 4  ;;  %s2450_s1 = smov [#allocation6]   ;;  %s584_s30 = int_to_ptr.vmem [resolvable:$true] %s583_s30 }
  0x1e   : > { %2116 = dma.hbm_to_vmem [thread:$0]  (!%p2597_p5), %s582_s26, 16, %s584_s30, [#allocation3]  }
  0x1f   : > { %s610_s6 = sshll.u32 %s2450_s1, 4  ;;  %s635_s24 = sshll.u32 %s3222_s18, 4  ;;  %s611_s6 = int_to_ptr.vmem [resolvable:$true] %s610_s6  ;;  %s636_s24 = int_to_ptr.hbm [resolvable:$true] %s635_s24 }
  0x20   : > { %2122 = dma.hbm_to_vmem [thread:$0]  (!%p2597_p5), %s609_s17, 16, %s611_s6, [#allocation5]  }
  0x21   : > { %s662_s5 = sshll.u32 %s3225_s21, 4  ;;  %s2451_s19 = smov [#allocation9]   ;;  %s663_s5 = int_to_ptr.hbm [resolvable:$true] %s662_s5 }
  0x22   : > { %s637_s25 = sshll.u32 %s2451_s19, 4  ;;  %s2452_s26 = smov [#allocation12]   ;;  %s638_s25 = int_to_ptr.vmem [resolvable:$true] %s637_s25 }
  0x23   : > { %2128 = dma.hbm_to_vmem [thread:$0]  (!%p2597_p5), %s636_s24, 16, %s638_s25, [#allocation8]  }
  0x24   : > { %s664_s28 = sshll.u32 %s2452_s26, 4  ;;  %691 = sbr.rel (%p2583_p3) target bundleno = 3760 (0xeb0), region = 108  ;;  %s665_s28 = int_to_ptr.vmem [resolvable:$true] %s664_s28 }
  0x25   : > { %2134 = dma.hbm_to_vmem [thread:$0]  (!%p2597_p5), %s663_s5, 16, %s665_s28, [#allocation11]  }
  0x29   : > { %2427 = dma.done.wait (%p2135_p2), [#allocation3], 16  }
  0x2a   : > { %2429 = vsyncadd (%p2135_p2), [#allocation3], 4294967280 }
  0x2b   : > { %2431 = dma.done.wait (%p2135_p2), [#allocation5], 32  }
  0x2c   : > { %2433 = vsyncadd (%p2135_p2), [#allocation5], 4294967264 }
  0x2d   : > { %2435 = dma.done.wait (%p2135_p2), [#allocation8], 32  }
  0x2e   : > { %2437 = vsyncadd (%p2135_p2), [#allocation8], 4294967264 }
  0x2f   : > { %2439 = dma.done.wait (%p2135_p2), [#allocation11], 32  }
  0x30   : > { %2441 = vsyncadd (%p2135_p2), [#allocation11], 4294967264  ;;  %p786_p6 = scmp.lt.s32.totalorder %s2578_s4, 1  ;;  %s3245_s27 = sld [smem:[#allocation19_spill]]  ;;  %vm818_vm0 = vcmask 523264   ;;  %vm911_vm1 = vcmask 261120   ;;  %v801_v32 = vlaneseq }
  0x31   : > { %s3246_s6 = sld [smem:[#allocation17_spill]]  ;;  %vm939_vm3 = vcmask 64512  }
  0x32   : > { %s3253_s4 = smov (!%p786_p6, %s2578_s4), 1  ;;  %s3247_s13 = sld [smem:[#allocation20_spill]]  ;;  %v2741_v33 = vshrl.u32 %v801_v32, 7  ;;  %v2743_v34 = vand.u32 127, %v801_v32 }
  0x33   : > { %s2683_s2 = sshll.u32 %s3253_s4, 3  ;;  %s3248_s23 = sld [smem:[#allocation21_spill]] }
  0x34   : > { %vm805_vm2 = vcmp.le.s32.totalorder %v2743_v34, %v2741_v33  ;;  %s3250_s19 = sld [smem:[#allocation18_spill]]  ;;  %v2077_v33 = vld [vmem:[%s3214_s10 + $0x38] sm:$0xff]  ;;  %v2076_v34 = vld [vmem:[%s3214_s10 + $0x30] sm:$0xff]  ;;  %s797_s4 = scalar_lea.vmem %s3226_s22, %s2683_s2 }
  0x36   : > { %v1962_v0 = vld [vmem:[%s3245_s27 + $0xb8] sm:$0xff]  ;;  %v1961_v2 = vld [vmem:[%s3245_s27 + $0xb0] sm:$0xff]  ;;  %v1960_v4 = vld [vmem:[%s3245_s27 + $0xa8] sm:$0xff] }
  0x37   : > { %v813_v1 = vld [vmem:[%s3245_s27 + $0x38] sm:$0xff]  ;;  %865 = vmatpush.msra.mxu1 %v1962_v0  ;;  %v812_v3 = vld [vmem:[%s3245_s27 + $0x30] sm:$0xff]  ;;  %v811_v5 = vld [vmem:[%s3245_s27 + $0x28] sm:$0xff]  ;;  %s789_s29 = scalar_lea.vmem %s3246_s6, %s2683_s2 }
  0x38   : > { %830 = vmatpush.msra.mxu0 %v813_v1  ;;  %v1959_v6 = vld [vmem:[%s3245_s27 + $0xa0] sm:$0xff]  ;;  %v1958_v8 = vld [vmem:[%s3245_s27 + $0x98] sm:$0xff]  ;;  %v1957_v10 = vld [vmem:[%s3245_s27 + $0x90] sm:$0xff] }
  0x39   : > { %866 = vmatpush.msra.mxu1 %v1961_v2  ;;  %v810_v7 = vld [vmem:[%s3245_s27 + $0x20] sm:$0xff]  ;;  %v809_v9 = vld [vmem:[%s3245_s27 + $0x18] sm:$0xff]  ;;  %v808_v11 = vld [vmem:[%s3245_s27 + $0x10] sm:$0xff] }
  0x3a   : > { %831 = vmatpush.msra.mxu0 %v812_v3  ;;  %v1956_v12 = vld [vmem:[%s3245_s27 + $0x88] sm:$0xff]  ;;  %v1955_v14 = vld [vmem:[%s3245_s27 + $0x80] sm:$0xff]  ;;  %v1972_v24 = vld [vmem:[%s3245_s27 + $0x138] sm:$0xff]  ;;  %s793_s25 = scalar_lea.vmem %s3250_s19, %s2683_s2  ;;  %s3251_s19 = sld [smem:[#allocation23_spill]] }
  0x3b   : > { %867 = vmatpush.msra.mxu1 %v1960_v4  ;;  %v807_v13 = vld [vmem:[%s3245_s27 + $0x8] sm:$0xff]  ;;  %v806_v15 = vld [vmem:[%s3245_s27] sm:$0xff]  ;;  %v1971_v25 = vld [vmem:[%s3245_s27 + $0x130] sm:$0xff]  ;;  %899 = vmatpush.msra.mxu2 %v1972_v24 }
  0x3c   : > { %832 = vmatpush.msra.mxu0 %v811_v5  ;;  %v2701_v16 = vld [vmem:[%s789_s29] sm:$0xff]  ;;  %v1970_v26 = vld [vmem:[%s3245_s27 + $0x128] sm:$0xff]  ;;  %v1968_v28 = vld [vmem:[%s3245_s27 + $0x118] sm:$0xff]  ;;  %s3249_s29 = sld [smem:[#allocation22_spill]] }
  0x3d   : > { %868 = vmatpush.msra.mxu1 %v1959_v6  ;;  %v2165_v17 = vld [vmem:[%s3247_s13 + $0x2] ss:$0 sm:$0xff]  ;;  %v2166_v18 = vld [vmem:[%s3247_s13] ss:$0 sm:$0xff]  ;;  %900 = vmatpush.msra.mxu2 %v1971_v25  ;;  %v1967_v29 = vld [vmem:[%s3245_s27 + $0x110] sm:$0xff] }
  0x3e   : > { %833 = vmatpush.msra.mxu0 %v810_v7  ;;  %v1969_v27 = vld [vmem:[%s3245_s27 + $0x120] sm:$0xff]  ;;  %v1966_v30 = vld [vmem:[%s3245_s27 + $0x108] sm:$0xff]  ;;  %v1985_v46 = vld [vmem:[%s3245_s27 + $0x78] sm:$0xff] }
  0x3f   : > { %869 = vmatpush.msra.mxu1 %v1958_v8  ;;  %901 = vmatpush.msra.mxu2 %v1970_v26  ;;  %v1965_v31 = vld [vmem:[%s3245_s27 + $0x100] sm:$0xff]  ;;  %v1995_v47 = vld [vmem:[%s3245_s27 + $0xf8] sm:$0xff]  ;;  %v1984_v48 = vld [vmem:[%s3245_s27 + $0x70] sm:$0xff] }
  0x40   : > { %834 = vmatpush.msra.mxu0 %v809_v9  ;;  %v2167_v38 = vld [vmem:[%s3247_s13 + $0x4] ss:$0 sm:$0xff]  ;;  %v1994_v49 = vld [vmem:[%s3245_s27 + $0xf0] sm:$0xff]  ;;  %v1983_v50 = vld [vmem:[%s3245_s27 + $0x68] sm:$0xff] }
  0x41   : > { %870 = vmatpush.msra.mxu1 %v1957_v10  ;;  %902 = vmatpush.msra.mxu2 %v1969_v27  ;;  %v1993_v51 = vld [vmem:[%s3245_s27 + $0xe8] sm:$0xff]  ;;  %v1982_v52 = vld [vmem:[%s3245_s27 + $0x60] sm:$0xff]  ;;  %v1981_v54 = vld [vmem:[%s3245_s27 + $0x58] sm:$0xff] }
  0x42   : > { %835 = vmatpush.msra.mxu0 %v808_v11  ;;  %v1992_v53 = vld [vmem:[%s3245_s27 + $0xe0] sm:$0xff]  ;;  %v1991_v55 = vld [vmem:[%s3245_s27 + $0xd8] sm:$0xff]  ;;  %v1980_v56 = vld [vmem:[%s3245_s27 + $0x50] sm:$0xff] }
  0x43   : > { %871 = vmatpush.msra.mxu1 %v1956_v12  ;;  %903 = vmatpush.msra.mxu2 %v1968_v28  ;;  %v1990_v57 = vld [vmem:[%s3245_s27 + $0xd0] sm:$0xff]  ;;  %v1979_v58 = vld [vmem:[%s3245_s27 + $0x48] sm:$0xff]  ;;  %v1978_v60 = vld [vmem:[%s3245_s27 + $0x40] sm:$0xff] }
  0x44   : > { %836 = vmatpush.msra.mxu0 %v807_v13  ;;  %v1989_v59 = vld [vmem:[%s3245_s27 + $0xc8] sm:$0xff]  ;;  %v1988_v61 = vld [vmem:[%s3245_s27 + $0xc0] sm:$0xff]  ;;  %v977_v62 = vld [vmem:[%s3248_s23 + $0x18] sm:$0xff] }
  0x45   : > { %872 = vmatpush.msra.mxu1 %v1955_v14  ;;  %904 = vmatpush.msra.mxu2 %v1967_v29  ;;  %v976_v63 = vld [vmem:[%s3248_s23 + $0x10] sm:$0xff]  ;;  %v975_v0 = vld [vmem:[%s3248_s23 + $0x8] sm:$0xff]  ;;  %v974_v4 = vld [vmem:[%s3248_s23] sm:$0xff] }
  0x46   : > { %837 = vmatpush.msra.mxu0 %v806_v15  ;;  %1964 = vmatmul.msk.f32.vlgmr.msra.gmra.mxu1 %vm818_vm0, %v2701_v16  ;;  %v2168_v5 = vld [vmem:[%s3247_s13 + $0x3] ss:$0 sm:$0xff]  ;;  %v2169_v9 = vld [vmem:[%s3247_s13 + $0x1] ss:$0 sm:$0xff]  ;;  %v2005_v13 = vld [vmem:[%s3245_s27 + $0x178] sm:$0xff] }
  0x47   : > { %1954 = vmatmul.msk.f32.vlgmr.msra.gmra.mxu0 %vm818_vm0, %v2701_v16  ;;  %905 = vmatpush.msra.mxu2 %v1966_v30  ;;  %v2004_v14 = vld [vmem:[%s3245_s27 + $0x170] sm:$0xff]  ;;  %v2003_v15 = vld [vmem:[%s3245_s27 + $0x168] sm:$0xff]  ;;  %v1998_v24 = vld [vmem:[%s3245_s27 + $0x140] sm:$0xff] }
  0x48   : > { %1035 = vmatpush.msrb.mxu0 %v1995_v47  ;;  %1069 = vmatpush.msrb.mxu1 %v2005_v13  ;;  %v2170_v30 = vld [vmem:[%s3247_s13 + $0x5] ss:$0 sm:$0xff] }
  0x49   : > { %906 = vmatpush.msra.mxu2 %v1965_v31  ;;  %v2942_v13 = vld [vmem:[%s793_s25] sm:$0xff] }
  0x4a   : > { %1974 = vmatmul.msk.f32.vlgmr.msra.gmra.mxu2 %vm818_vm0, %v2701_v16  ;;  %1036 = vmatpush.msrb.mxu0 %v1994_v49 }
  0x4b   : > { %1070 = vmatpush.msrb.mxu1 %v2004_v14  ;;  %v2048_v14 = vld [vmem:[%s3212_s8 + $0x78] sm:$0xff] }
  0x4c   : > { %1037 = vmatpush.msrb.mxu0 %v1993_v51 }
  0x4d   : > { %1071 = vmatpush.msrb.mxu1 %v2003_v15  ;;  %v2047_v15 = vld [vmem:[%s3212_s8 + $0x70] sm:$0xff] }
  0x4e   : > { %1038 = vmatpush.msrb.mxu0 %v1992_v53 }
  0x50   : > { %1039 = vmatpush.msrb.mxu0 %v1991_v55 }
  0x52   : > { %1040 = vmatpush.msrb.mxu0 %v1990_v57 }
  0x54   : > { %1041 = vmatpush.msrb.mxu0 %v1989_v59 }
  0x56   : > { %1042 = vmatpush.msrb.mxu0 %v1988_v61  ;;  %v2025_v61 = vld [vmem:[%s3212_s8 + $0xb8] sm:$0xff] }
  0x57   : > { %1997 = vmatmul.msk.f32.vlgmr.msrb.gmra.mxu0 %vm818_vm0, %v2701_v16 }
  0x58   : > { %1185 = vmatpush.msra.mxu0 %v977_v62  ;;  %v1245_v62 = vld [vmem:[%s3212_s8 + $0x38] sm:$0xff] }
  0x5a   : > { %1186 = vmatpush.msra.mxu0 %v976_v63  ;;  %v2024_v63 = vld [vmem:[%s3212_s8 + $0xb0] sm:$0xff] }
  0x5c   : > { %1187 = vmatpush.msra.mxu0 %v975_v0  ;;  %v1244_v0 = vld [vmem:[%s3212_s8 + $0x30] sm:$0xff] }
  0x5e   : > { %1188 = vmatpush.msra.mxu0 %v974_v4  ;;  %v1242_v4 = vld [vmem:[%s3212_s8 + $0x20] sm:$0xff] }
  0xc3   : > { %v874_v19 = vpop.f32.mrf.mxu1 }
  0xc4   : > { %v839_v20 = vpop.f32.mrf.mxu0  ;;  %v875_v21 = vadd.f32 %v2165_v17, %v874_v19  ;;  %v2002_v17 = vld [vmem:[%s3245_s27 + $0x160] sm:$0xff]  ;;  %v2000_v19 = vld [vmem:[%s3245_s27 + $0x150] sm:$0xff] }
  0xc5   : > { %v840_v22 = vadd.f32 %v2166_v18, %v839_v20  ;;  %v2001_v18 = vld [vmem:[%s3245_s27 + $0x158] sm:$0xff]  ;;  %1072 = vmatpush.msrb.mxu1 %v2002_v17  ;;  %v1999_v20 = vld [vmem:[%s3245_s27 + $0x148] sm:$0xff] }
  0xc6   : > { %1975 = vmatpush.xpose.msk.msra.mxu3 %vm911_vm1, %v875_v21  ;;  %v2046_v17 = vld [vmem:[%s3212_s8 + $0x68] sm:$0xff] }
  0xc7   : > { %v842_v23 = vmul.f32 0.17677669, %v840_v22  ;;  %1073 = vmatpush.msrb.mxu1 %v2001_v18  ;;  %v2045_v18 = vld [vmem:[%s3212_s8 + $0x60] sm:$0xff] }
  0xc9   : > { %1976 = vmatmul.msk.f32.vlgmr.msra.gmra.mxu3 %vm911_vm1, %v842_v23  ;;  %1074 = vmatpush.msrb.mxu1 %v2000_v19  ;;  %v2044_v19 = vld [vmem:[%s3212_s8 + $0x58] sm:$0xff] }
  0xcb   : > { %1075 = vmatpush.msrb.mxu1 %v1999_v20  ;;  %v2043_v20 = vld [vmem:[%s3212_s8 + $0x50] sm:$0xff] }
  0xcd   : > { %v908_v40 = vpop.f32.mrf.mxu2  ;;  %1076 = vmatpush.msrb.mxu1 %v1998_v24  ;;  %v2041_v24 = vld [vmem:[%s3212_s8 + $0x40] sm:$0xff] }
  0xce   : > { %v909_v42 = vadd.f32 %v2167_v38, %v908_v40  ;;  %2007 = vmatmul.msk.f32.vlgmr.msrb.gmra.mxu1 %vm818_vm0, %v2701_v16  ;;  %v2011_v38 = vld [vmem:[%s3248_s23 + $0x20] sm:$0xff] }
  0xcf   : > { %1261 = vmatpush.msra.mxu1 %v1245_v62 }
  0xd0   : > { %969 = vmatpush.msrb.mxu3 %v909_v42 }
  0xd1   : > { %1262 = vmatpush.msra.mxu1 %v1244_v0  ;;  %v2052_v0 = vld [vmem:[%s3212_s8 + $0xc8] sm:$0xff] }
  0xd2   : > { %1000 = vmatpush.msra.mxu3 %v1985_v46 }
  0xd4   : > { %1001 = vmatpush.msra.mxu3 %v1984_v48  ;;  %v1044_v6 = vpop.f32.mrf.mxu0 }
  0xd5   : > { %v1045_v7 = vadd.f32 %v2168_v5, %v1044_v6  ;;  %v2021_v5 = vld [vmem:[%s3212_s8 + $0x98] sm:$0xff] }
  0xd6   : > { %1002 = vmatpush.msra.mxu3 %v1983_v50  ;;  %v2453_v50 = vmov 64.0   ;;  %v1241_v6 = vld [vmem:[%s3212_s8 + $0x18] sm:$0xff] }
  0xd7   : > { %2008 = vmatpush.xpose.msk.msrb.mxu2 %vm911_vm1, %v1045_v7  ;;  %v2020_v7 = vld [vmem:[%s3212_s8 + $0x90] sm:$0xff] }
  0xd8   : > { %1003 = vmatpush.msra.mxu3 %v1982_v52 }
  0xda   : > { %1004 = vmatpush.msra.mxu3 %v1981_v54 }
  0xdc   : > { %1005 = vmatpush.msra.mxu3 %v1980_v56 }
  0xde   : > { %1006 = vmatpush.msra.mxu3 %v1979_v58 }
  0xe0   : > { %1007 = vmatpush.msra.mxu3 %v1978_v60 }
 0x14b   : > { %v1078_v31 = vpop.f32.mrf.mxu1 }
 0x14c   : > { %v935_v35 = vpop.f32.mrf.mxu3  ;;  %v1079_v32 = vadd.f32 %v2170_v30, %v1078_v31 }
 0x14d   : > { %v938_v36 = vsel %vm805_vm2, %v935_v35, -1e+30  ;;  %v2014_v35 = vld [vmem:[%s3248_s23 + $0x38] sm:$0xff] }
 0x14e   : > { %v940_v37 = vsel %vm939_vm3, %v938_v36, -inf  ;;  %1137 = vmatpush.msra.mxu2 %v1079_v32  ;;  %v2172_v32 = vld [vmem:[%s3251_s19] ss:$0 sm:$0xff] }
 0x14f   : > { %941 = vmax.xlane.f32.xlu0 %v940_v37  ;;  %v2012_v37 = vld [vmem:[%s3248_s23 + $0x28] sm:$0xff] }
 0x1c2   : > { %v942_v39 = vpop.xlane.xlu0 %941 }
 0x1c3   : > { %v943_v41 = vsub.f32 %v938_v36, %v942_v39  ;;  %v2013_v36 = vld [vmem:[%s3248_s23 + $0x30] sm:$0xff] }
 0x1c5   : > { %v944_v43 = vmul.f32 1.442695, %v943_v41 }
 0x1c7   : > { %2188 = vpow2.f32 %v944_v43  ;;  %v2171_v43 = vld [vmem:[%s3249_s29] ss:$0 sm:$0xff] }
 0x1cd   : > { %v2189_v44 = vpop.eup %2188 }
 0x1ce   : > { %v946_v45 = vsel %vm939_vm3, %v2189_v44, 0.0 }
 0x1cf   : > { %947 = vadd.xlane.f32.xlu0 %v946_v45 }
 0x242   : > { %v948_v1 = vpop.xlane.xlu0 %947 }
 0x243   : > { %2190 = vrcp.f32 %v948_v1  ;;  %v2023_v1 = vld [vmem:[%s3212_s8 + $0xa8] sm:$0xff] }
 0x249   : > { %v2191_v2 = vpop.eup %2190 }
 0x24a   : > { %v950_v3 = vmul.f32 %v2191_v2, %v2189_v44  ;;  %v1243_v2 = vld [vmem:[%s3212_s8 + $0x28] sm:$0xff] }
 0x24b   : > { %1263 = vmatpush.msra.mxu1 %v1243_v2  ;;  %v2177_v2 = vld [vmem:[%s3213_s9 + $0x4] ss:$0 sm:$0xff] }
 0x24c   : > { %1977 = vmatmul.msk.f32.vlgmr.msrb.gmra.mxu3 %vm939_vm3, %v950_v3  ;;  %v2022_v3 = vld [vmem:[%s3212_s8 + $0xa0] sm:$0xff] }
 0x24d   : > { %1162 = vmatpush.msrb.mxu3 %v2014_v35  ;;  %1264 = vmatpush.msra.mxu1 %v1242_v4 }
 0x24f   : > { %1163 = vmatpush.msrb.mxu3 %v2013_v36  ;;  %1265 = vmatpush.msra.mxu1 %v1241_v6 }
 0x251   : > { %1164 = vmatpush.msrb.mxu3 %v2012_v37  ;;  %v2173_v37 = vld [vmem:[%s3211_s7] ss:$0 sm:$0xff] }
 0x253   : > { %1165 = vmatpush.msrb.mxu3 %v2011_v38 }
 0x254   : > { %1987 = vmatmul.msk.f32.vlgmr.msra.gmra.mxu3 %vm818_vm0, %v2701_v16 }
 0x2cf   : > { %v971_v8 = vpop.f32.mrf.mxu3 }
 0x2d0   : > { %2016 = vmatmul.msk.f32.vlgmr.msra.gmra.mxu0 %vm911_vm1, %v971_v8  ;;  %v1240_v8 = vld [vmem:[%s3212_s8 + $0x10] sm:$0xff] }
 0x2d1   : > { %1266 = vmatpush.msra.mxu1 %v1240_v8 }
 0x2d7   : > { %v1009_v10 = vpop.f32.mrf.mxu3 }
 0x2d8   : > { %v1010_v11 = vadd.f32 %v2169_v9, %v1009_v10  ;;  %v2019_v9 = vld [vmem:[%s3212_s8 + $0x88] sm:$0xff] }
 0x2d9   : > { %v1239_v10 = vld [vmem:[%s3212_s8 + $0x8] sm:$0xff] }
 0x2da   : > { %v1012_v12 = vmul.f32 0.17677669, %v1010_v11  ;;  %1267 = vmatpush.msra.mxu1 %v1239_v10  ;;  %v2018_v11 = vld [vmem:[%s3212_s8 + $0x80] sm:$0xff] }
 0x2db   : > { %v2178_v10 = vld [vmem:[%s3213_s9 + $0x3] ss:$0 sm:$0xff] }
 0x2dc   : > { %2009 = vmatmul.msk.f32.vlgmr.msrb.gmra.mxu2 %vm911_vm1, %v1012_v12  ;;  %v1238_v12 = vld [vmem:[%s3212_s8] sm:$0xff] }
 0x2dd   : > { %1299 = vmatpush.msrb.mxu2 %v2025_v61  ;;  %1268 = vmatpush.msra.mxu1 %v1238_v12 }
 0x2df   : > { %1300 = vmatpush.msrb.mxu2 %v2024_v63  ;;  %1432 = vmatpush.msrb.mxu1 %v2048_v14 }
 0x2e1   : > { %1301 = vmatpush.msrb.mxu2 %v2023_v1  ;;  %1433 = vmatpush.msrb.mxu1 %v2047_v15  ;;  %v2051_v1 = vld [vmem:[%s3212_s8 + $0xc0] sm:$0xff] }
 0x2e3   : > { %1302 = vmatpush.msrb.mxu2 %v2022_v3  ;;  %1434 = vmatpush.msrb.mxu1 %v2046_v17  ;;  %v2176_v17 = vld [vmem:[%s3213_s9 + $0x1] ss:$0 sm:$0xff] }
 0x2e5   : > { %1303 = vmatpush.msrb.mxu2 %v2021_v5  ;;  %1435 = vmatpush.msrb.mxu1 %v2045_v18 }
 0x2e7   : > { %1304 = vmatpush.msrb.mxu2 %v2020_v7  ;;  %1436 = vmatpush.msrb.mxu1 %v2044_v19 }
 0x2e9   : > { %1305 = vmatpush.msrb.mxu2 %v2019_v9  ;;  %1437 = vmatpush.msrb.mxu1 %v2043_v20 }
 0x2eb   : > { %1306 = vmatpush.msrb.mxu2 %v2018_v11 }
 0x34d   : > { %v1190_v44 = vpop.f32.mrf.mxu0 }
 0x35f   : > { %v1104_v21 = vpop.f32.mrf.mxu2 }
 0x360   : > { %v1107_v22 = vsel %vm805_vm2, %v1104_v21, -1e+30  ;;  %v2042_v21 = vld [vmem:[%s3212_s8 + $0x48] sm:$0xff] }
 0x361   : > { %v1108_v23 = vsel %vm939_vm3, %v1107_v22, -inf  ;;  %1438 = vmatpush.msrb.mxu1 %v2042_v21 }
 0x362   : > { %1109 = vmax.xlane.f32.xlu1 %v1108_v23 }
 0x363   : > { %1439 = vmatpush.msrb.mxu1 %v2041_v24  ;;  %v2066_v24 = vld [vmem:[%s3212_s8 + $0x168] sm:$0xff] }
 0x3d5   : > { %v1110_v25 = vpop.xlane.xlu1 %1109 }
 0x3d6   : > { %v1111_v26 = vsub.f32 %v1107_v22, %v1110_v25 }
 0x3d8   : > { %v1112_v27 = vmul.f32 1.442695, %v1111_v26 }
 0x3da   : > { %2192 = vpow2.f32 %v1112_v27 }
 0x3e0   : > { %v2193_v28 = vpop.eup %2192 }
 0x3e1   : > { %v1114_v29 = vsel %vm939_vm3, %v2193_v28, 0.0 }
 0x3e2   : > { %1115 = vadd.xlane.f32.xlu1 %v1114_v29 }
 0x455   : > { %v1116_v39 = vpop.xlane.xlu1 %1115 }
 0x456   : > { %2194 = vrcp.f32 %v1116_v39 }
 0x457   : > { %2196 = vrcp.f32 %v2453_v50  ;;  %v2033_v50 = vld [vmem:[%s3212_s8 + $0x128] sm:$0xff] }
 0x45c   : > { %v2195_v40 = vpop.eup %2194 }
 0x45d   : > { %v1118_v41 = vmul.f32 %v2195_v40, %v2193_v28  ;;  %v2197_v51 = vpop.eup %2196  ;;  %v2174_v40 = vld [vmem:[%s3213_s9 + $0x2] ss:$0 sm:$0xff] }
 0x45e   : > { %v1204_v52 = vmul.f32 64.0, %v2197_v51  ;;  %vm1208_vm4 = vweird.f32 %v2197_v51 }
 0x45f   : > { %2010 = vmatmul.msk.f32.vlgmr.msra.gmra.mxu2 %vm939_vm3, %v1118_v41 }
 0x460   : > { %v1205_v53 = vsub.f32 1.0, %v1204_v52  ;;  %v2056_v52 = vld [vmem:[%s3212_s8 + $0xe8] sm:$0xff] }
 0x462   : > { %v1206_v54 = vmul.f32 %v2197_v51, %v1205_v53  ;;  %v2032_v53 = vld [vmem:[%s3212_s8 + $0x120] sm:$0xff] }
 0x464   : > { %v1207_v55 = vadd.f32 %v2197_v51, %v1206_v54  ;;  %v2055_v54 = vld [vmem:[%s3212_s8 + $0xe0] sm:$0xff] }
 0x466   : > { %v2882_v56 = vsel %vm1208_vm4, %v2197_v51, %v1207_v55  ;;  %v2057_v51 = vld [vmem:[%s3212_s8 + $0xf0] sm:$0xff]  ;;  %v2031_v55 = vld [vmem:[%s3212_s8 + $0x118] sm:$0xff] }
 0x467   : > { %2027 = vmatmul.msk.f32.vlgmr.msrb.gmra.mxu2 %vm818_vm0, %v2942_v13 }
 0x4e2   : > { %v1139_v42 = vpop.f32.mrf.mxu2 }
 0x4e3   : > { %2015 = vmatmul.msk.f32.vlgmr.msrb.gmra.mxu3 %vm911_vm1, %v1139_v42 }
 0x4ea   : > { %v1308_v41 = vpop.f32.mrf.mxu2 }
 0x4eb   : > { %v1309_v42 = vadd.f32 %v2174_v40, %v1308_v41 }
 0x4ed   : > { %2038 = vmatpush.xpose.msk.msrb.mxu0 %vm911_vm1, %v1309_v42 }
 0x566   : > { %v1167_v45 = vpop.f32.mrf.mxu3 }
 0x567   : > { %v1191_v46 = vadd.f32 %v1190_v44, %v1167_v45 }
 0x569   : > { %v1196_v47 = vadd.f32 %v2171_v43, %v1191_v46  ;;  %v2175_v43 = vld [vmem:[%s3213_s9] ss:$0 sm:$0xff] }
 0x56b   : > { %v1197_v48 = vadd.f32 %v1196_v47, %v2701_v16  ;;  %v2035_v47 = vld [vmem:[%s3212_s8 + $0x138] sm:$0xff] }
 0x56c   : > { %1333 = vmatpush.msra.mxu3 %v2035_v47 }
 0x56d   : > { %v1200_v49 = vsel %vm818_vm0, %v1197_v48, 0.0 }
 0x56e   : > { %1201 = vadd.xlane.f32.xlu2 %v1200_v49  ;;  %v2058_v49 = vld [vmem:[%s3212_s8 + $0xf8] sm:$0xff] }
 0x56f   : > { %1467 = vmatpush.msra.mxu2 %v2058_v49  ;;  %v1409_v49 = vld [vmem:[%s3214_s10 + $0x18] sm:$0xff] }
 0x571   : > { %1468 = vmatpush.msra.mxu2 %v2057_v51  ;;  %v1407_v51 = vld [vmem:[%s3214_s10 + $0x8] sm:$0xff] }
 0x573   : > { %1469 = vmatpush.msra.mxu2 %v2056_v52  ;;  %v1406_v52 = vld [vmem:[%s3214_s10] sm:$0xff] }
 0x575   : > { %1470 = vmatpush.msra.mxu2 %v2055_v54 }
 0x5e1   : > { %v1202_v57 = vpop.xlane.xlu2 %1201 }
 0x5e2   : > { %v1210_v58 = vmul.f32 %v2882_v56, %v1202_v57  ;;  %v2054_v57 = vld [vmem:[%s3212_s8 + $0xd8] sm:$0xff] }
 0x5e3   : > { %1471 = vmatpush.msra.mxu2 %v2054_v57 }
 0x5e4   : > { %v2885_v59 = vsub.f32 %v1197_v48, %v1210_v58  ;;  %v2034_v48 = vld [vmem:[%s3212_s8 + $0x130] sm:$0xff] }
 0x5e5   : > { %1334 = vmatpush.msra.mxu3 %v2034_v48  ;;  %v2030_v58 = vld [vmem:[%s3212_s8 + $0x110] sm:$0xff] }
 0x5e6   : > { %v1212_v16 = vmul.f32 %v2885_v59, %v2885_v59 }
 0x5e7   : > { %1335 = vmatpush.msra.mxu3 %v2033_v50  ;;  %v1408_v50 = vld [vmem:[%s3214_s10 + $0x10] sm:$0xff] }
 0x5e8   : > { %v1213_v60 = vsel %vm818_vm0, %v1212_v16, 0.0  ;;  %v2029_v16 = vld [vmem:[%s3212_s8 + $0x108] sm:$0xff] }
 0x5e9   : > { %1214 = vadd.xlane.f32.xlu2 %v1213_v60  ;;  %1336 = vmatpush.msra.mxu3 %v2032_v53  ;;  %v2028_v60 = vld [vmem:[%s3212_s8 + $0x100] sm:$0xff] }
 0x5eb   : > { %1337 = vmatpush.msra.mxu3 %v2031_v55  ;;  %v2180_v55 = vld [vmem:[%s3215_s11] ss:$0 sm:$0xff] }
 0x5ed   : > { %1338 = vmatpush.msra.mxu3 %v2030_v58 }
 0x5ef   : > { %1339 = vmatpush.msra.mxu3 %v2029_v16 }
 0x5f1   : > { %1340 = vmatpush.msra.mxu3 %v2028_v60 }
 0x5f2   : > { %2037 = vmatmul.msk.f32.vlgmr.msra.gmra.mxu3 %vm818_vm0, %v2942_v13 }
 0x65c   : > { %v1215_v22 = vpop.xlane.xlu2 %1214 }
 0x65d   : > { %v1216_v23 = vmul.f32 %v1215_v22, %v2882_v56  ;;  %v2068_v22 = vld [vmem:[%s3212_s8 + $0x178] sm:$0xff] }
 0x65e   : > { %1501 = vmatpush.msrb.mxu3 %v2068_v22  ;;  %v2181_v22 = vld [vmem:[#allocation2] ss:$0 sm:$0xff] }
 0x65f   : > { %v1217_v25 = vadd.f32 1e-05, %v1216_v23  ;;  %v2067_v23 = vld [vmem:[%s3212_s8 + $0x170] sm:$0xff] }
 0x660   : > { %1502 = vmatpush.msrb.mxu3 %v2067_v23 }
 0x661   : > { %2198 = vrsqrt.f32 %v1217_v25  ;;  %vm1224_vm6 = vweird.f32 %v1217_v25 }
 0x662   : > { %1503 = vmatpush.msrb.mxu3 %v2066_v24 }
 0x667   : > { %v2199_v26 = vpop.eup %2198 }
 0x668   : > { %v1219_v27 = vmul.f32 %v2199_v26, %v1217_v25  ;;  %vm1225_vm5 = vweird.f32 %v2199_v26  ;;  %v2065_v25 = vld [vmem:[%s3212_s8 + $0x160] sm:$0xff] }
 0x669   : > { %vm1226_vm7 = vmor %vm1224_vm6, %vm1225_vm5  ;;  %1504 = vmatpush.msrb.mxu3 %v2065_v25  ;;  %v2182_v25 = vld [vmem:[#allocation4] ss:$0 sm:$0xff] }
 0x66a   : > { %v1220_v28 = vmul.f32 %v2199_v26, %v1219_v27  ;;  %v2063_v27 = vld [vmem:[%s3212_s8 + $0x150] sm:$0xff] }
 0x66c   : > { %v1221_v29 = vmul.f32 0.5, %v1220_v28  ;;  %v2062_v28 = vld [vmem:[%s3212_s8 + $0x148] sm:$0xff] }
 0x66e   : > { %v1222_v30 = vsub.f32 1.5, %v1221_v29  ;;  %v2061_v29 = vld [vmem:[%s3212_s8 + $0x140] sm:$0xff] }
 0x670   : > { %v1223_v31 = vmul.f32 %v2199_v26, %v1222_v30 }
 0x672   : > { %v1227_v35 = vsel %vm1226_vm7, %v2199_v26, %v1223_v31  ;;  %v2064_v26 = vld [vmem:[%s3212_s8 + $0x158] sm:$0xff] }
 0x673   : > { %v1228_v36 = vmul.f32 %v1227_v35, %v2885_v59  ;;  %v2053_v59 = vld [vmem:[%s3212_s8 + $0xd0] sm:$0xff]  ;;  %1505 = vmatpush.msrb.mxu3 %v2064_v26 }
 0x674   : > { %1472 = vmatpush.msra.mxu2 %v2053_v59 }
 0x675   : > { %v1232_v38 = vmul.f32 %v2172_v32, %v1228_v36  ;;  %v1342_v4 = vpop.f32.mrf.mxu3  ;;  %1506 = vmatpush.msrb.mxu3 %v2063_v27  ;;  %v2179_v36 = vld [vmem:[%s3213_s9 + $0x5] ss:$0 sm:$0xff] }
 0x676   : > { %1473 = vmatpush.msra.mxu2 %v2052_v0  ;;  %v1343_v6 = vadd.f32 %v2177_v2, %v1342_v4  ;;  %v1669_v2 = vld [vmem:[%s3218_s14 + $0x38] sm:$0xff]  ;;  %v1666_v4 = vld [vmem:[%s3218_s14 + $0x20] sm:$0xff] }
 0x677   : > { %v2978_v39 = vadd.f32 %v2173_v37, %v1232_v38  ;;  %1507 = vmatpush.msrb.mxu3 %v2062_v28  ;;  %v1699_v28 = vld [vmem:[%s3220_s16 + $0x8] sm:$0xff] }
 0x678   : > { %1474 = vmatpush.msra.mxu2 %v2051_v1  ;;  %1401 = vmatpush.msra.mxu0 %v1343_v6  ;;  %v1664_v6 = vld [vmem:[%s3218_s14 + $0x10] sm:$0xff] }
 0x679   : > { %2017 = vmatmul.msk.f32.vlgmr.msra.gmra.mxu1 %vm818_vm0, %v2978_v39  ;;  %2060 = vmatmul.msk.f32.vlgmr.msra.gmra.mxu2 %vm818_vm0, %v2942_v13 }
 0x67a   : > { %1508 = vmatpush.msrb.mxu3 %v2061_v29  ;;  %1594 = vmatpush.msrb.mxu2 %v2077_v33  ;;  %v1698_v29 = vld [vmem:[%s3220_s16] sm:$0xff] }
 0x67b   : > { %2070 = vmatmul.msk.f32.vlgmr.msrb.gmra.mxu3 %vm818_vm0, %v2942_v13 }
 0x67c   : > { %1595 = vmatpush.msrb.mxu2 %v2076_v34  ;;  %1685 = vmatpush.msra.mxu3 %v1669_v2 }
 0x681   : > { %2050 = vmatmul.msk.f32.vlgmr.msrb.gmra.mxu1 %vm818_vm0, %v2978_v39 }
 0x6f6   : > { %v1270_v44 = vpop.f32.mrf.mxu1 }
 0x6f7   : > { %v1271_v45 = vadd.f32 %v2175_v43, %v1270_v44  ;;  %v2075_v44 = vld [vmem:[%s3214_s10 + $0x28] sm:$0xff] }
 0x6f8   : > { %1596 = vmatpush.msrb.mxu2 %v2075_v44  ;;  %v1769_v44 = vld [vmem:[%s3224_s20 + $0x38] sm:$0xff] }
 0x6f9   : > { %v1273_v46 = vmul.f32 0.17677669, %v1271_v45  ;;  %v2074_v45 = vld [vmem:[%s3214_s10 + $0x20] sm:$0xff]  ;;  %1785 = vmatpush.msra.mxu1 %v1769_v44 }
 0x6fa   : > { %1597 = vmatpush.msrb.mxu2 %v2074_v45  ;;  %v1768_v45 = vld [vmem:[%s3224_s20 + $0x30] sm:$0xff] }
 0x6fb   : > { %2039 = vmatmul.msk.f32.vlgmr.msrb.gmra.mxu0 %vm911_vm1, %v1273_v46  ;;  %1786 = vmatpush.msra.mxu1 %v1768_v45 }
 0x6fc   : > { %v1476_v11 = vpop.f32.mrf.mxu2  ;;  %1617 = vmatpush.msra.mxu2 %v1409_v49  ;;  %v1764_v49 = vld [vmem:[%s3224_s20 + $0x10] sm:$0xff] }
 0x6fd   : > { %v1477_v12 = vadd.f32 %v2178_v10, %v1476_v11  ;;  %v1700_v10 = vld [vmem:[%s3220_s16 + $0x10] sm:$0xff] }
 0x6fe   : > { %v1441_v19 = vpop.f32.mrf.mxu1  ;;  %v1510_v38 = vpop.f32.mrf.mxu3  ;;  %1618 = vmatpush.msra.mxu2 %v1408_v50  ;;  %v1763_v50 = vld [vmem:[%s3224_s20 + $0x8] sm:$0xff] }
 0x6ff   : > { %2071 = vmatpush.xpose.msk.msrb.mxu0 %vm911_vm1, %v1477_v12  ;;  %v1442_v20 = vadd.f32 %v2176_v17, %v1441_v19  ;;  %v1511_v41 = vadd.f32 %v2179_v36, %v1510_v38  ;;  %v2184_v36 = vld [vmem:[#allocation7] ss:$0 sm:$0xff] }
 0x700   : > { %1619 = vmatpush.msra.mxu2 %v1407_v51  ;;  %v1762_v51 = vld [vmem:[%s3224_s20] sm:$0xff] }
 0x701   : > { %v1444_v21 = vmul.f32 0.17677669, %v1442_v20 }
 0x702   : > { %1620 = vmatpush.msra.mxu2 %v1406_v52 }
 0x778   : > { %v1368_v61 = vpop.f32.mrf.mxu0 }
 0x779   : > { %v1371_v62 = vsel %vm805_vm2, %v1368_v61, -1e+30 }
 0x77a   : > { %v1372_v63 = vsel %vm939_vm3, %v1371_v62, -inf }
 0x77b   : > { %1373 = vmax.xlane.f32.xlu0 %v1372_v63 }
 0x7ee   : > { %v1374_v3 = vpop.xlane.xlu0 %1373 }
 0x7ef   : > { %v1375_v5 = vsub.f32 %v1371_v62, %v1374_v3  ;;  %v1667_v3 = vld [vmem:[%s3218_s14 + $0x28] sm:$0xff] }
 0x7f1   : > { %v1376_v7 = vmul.f32 1.442695, %v1375_v5  ;;  %v1665_v5 = vld [vmem:[%s3218_s14 + $0x18] sm:$0xff] }
 0x7f3   : > { %2200 = vpow2.f32 %v1376_v7  ;;  %v1663_v7 = vld [vmem:[%s3218_s14 + $0x8] sm:$0xff] }
 0x7f9   : > { %v2201_v8 = vpop.eup %2200 }
 0x7fa   : > { %v1378_v9 = vsel %vm939_vm3, %v2201_v8, 0.0 }
 0x7fb   : > { %1379 = vadd.xlane.f32.xlu1 %v1378_v9  ;;  %v1701_v9 = vld [vmem:[%s3220_s16 + $0x18] sm:$0xff] }
 0x86e   : > { %v1380_v14 = vpop.xlane.xlu1 %1379 }
 0x86f   : > { %2202 = vrcp.f32 %v1380_v14 }
 0x875   : > { %v2203_v15 = vpop.eup %2202 }
 0x876   : > { %v1382_v18 = vmul.f32 %v2203_v15, %v2201_v8  ;;  %v1662_v8 = vld [vmem:[%s3218_s14] sm:$0xff] }
 0x878   : > { %2040 = vmatmul.msk.f32.vlgmr.msra.gmra.mxu0 %vm939_vm3, %v1382_v18 }
 0x879   : > { %1569 = vmatpush.msra.mxu0 %v1511_v41 }
 0x880   : > { %2072 = vmatmul.msk.f32.vlgmr.msrb.gmra.mxu0 %vm911_vm1, %v1444_v21 }
 0x881   : > { %1721 = vmatpush.msrb.mxu0 %v1701_v9 }
 0x883   : > { %1722 = vmatpush.msrb.mxu0 %v1700_v10 }
 0x885   : > { %1723 = vmatpush.msrb.mxu0 %v1699_v28 }
 0x887   : > { %1724 = vmatpush.msrb.mxu0 %v1698_v29 }
 0x8f5   : > { %v1403_v30 = vpop.f32.mrf.mxu0 }
 0x8fd   : > { %v1536_v31 = vpop.f32.mrf.mxu0 }
 0x8fe   : > { %v1539_v32 = vsel %vm805_vm2, %v1536_v31, -1e+30 }
 0x8ff   : > { %v1540_v35 = vsel %vm939_vm3, %v1539_v32, -inf }
 0x900   : > { %1541 = vmax.xlane.f32.xlu2 %v1540_v35 }
 0x973   : > { %v1542_v37 = vpop.xlane.xlu2 %1541 }
 0x974   : > { %v1543_v40 = vsub.f32 %v1539_v32, %v1542_v37 }
 0x976   : > { %v1544_v42 = vmul.f32 1.442695, %v1543_v40 }
 0x978   : > { %2204 = vpow2.f32 %v1544_v42 }
 0x97e   : > { %v2205_v13 = vpop.eup %2204 }
 0x97f   : > { %v1546_v43 = vsel %vm939_vm3, %v2205_v13, 0.0 }
 0x980   : > { %1547 = vadd.xlane.f32.xlu0 %v1546_v43 }
 0x9f3   : > { %v1548_v46 = vpop.xlane.xlu0 %1547 }
 0x9f4   : > { %2206 = vrcp.f32 %v1548_v46  ;;  %v1767_v46 = vld [vmem:[%s3224_s20 + $0x28] sm:$0xff] }
 0x9f5   : > { %1787 = vmatpush.msra.mxu1 %v1767_v46 }
 0x9fa   : > { %v2207_v47 = vpop.eup %2206 }
 0x9fb   : > { %v1550_v48 = vmul.f32 %v2207_v47, %v2205_v13  ;;  %v1766_v47 = vld [vmem:[%s3224_s20 + $0x20] sm:$0xff] }
 0x9fc   : > { %1788 = vmatpush.msra.mxu1 %v1766_v47 }
 0x9fd   : > { %2073 = vmatmul.msk.f32.vlgmr.msra.gmra.mxu0 %vm939_vm3, %v1550_v48  ;;  %v1765_v48 = vld [vmem:[%s3224_s20 + $0x18] sm:$0xff] }
 0x9fe   : > { %1789 = vmatpush.msra.mxu1 %v1765_v48 }
 0xa00   : > { %1790 = vmatpush.msra.mxu1 %v1764_v49 }
 0xa02   : > { %1791 = vmatpush.msra.mxu1 %v1763_v50 }
 0xa04   : > { %1792 = vmatpush.msra.mxu1 %v1762_v51 }
 0xa7a   : > { %v1571_v53 = vpop.f32.mrf.mxu0 }
 0xa7b   : > { %2078 = vmatmul.msk.f32.vlgmr.msrb.gmra.mxu2 %vm911_vm1, %v1571_v53 }
 0xa83   : > { %2079 = vmatmul.msk.f32.vlgmr.msra.gmra.mxu2 %vm911_vm1, %v1403_v30  ;;  %v2183_v30 = vld [vmem:[#allocation6] ss:$0 sm:$0xff] }
 0xafe   : > { %v1599_v54 = vpop.f32.mrf.mxu2 }
 0xb06   : > { %v1622_v57 = vpop.f32.mrf.mxu2 }
 0xb07   : > { %v1623_v58 = vadd.f32 %v1622_v57, %v1599_v54 }
 0xb09   : > { %v1628_v59 = vadd.f32 %v2180_v55, %v1623_v58 }
 0xb0b   : > { %v1629_v16 = vadd.f32 %v1628_v59, %v2978_v39  ;;  %v1668_v39 = vld [vmem:[%s3218_s14 + $0x30] sm:$0xff] }
 0xb0c   : > { %1686 = vmatpush.msra.mxu3 %v1668_v39 }
 0xb0d   : > { %v1632_v60 = vsel %vm818_vm0, %v1629_v16, 0.0 }
 0xb0e   : > { %1633 = vadd.xlane.f32.xlu1 %v1632_v60  ;;  %1687 = vmatpush.msra.mxu3 %v1667_v3 }
 0xb10   : > { %1688 = vmatpush.msra.mxu3 %v1666_v4 }
 0xb12   : > { %1689 = vmatpush.msra.mxu3 %v1665_v5 }
 0xb14   : > { %1690 = vmatpush.msra.mxu3 %v1664_v6 }
 0xb16   : > { %1691 = vmatpush.msra.mxu3 %v1663_v7 }
 0xb18   : > { %1692 = vmatpush.msra.mxu3 %v1662_v8 }
 0xb81   : > { %v1634_v61 = vpop.xlane.xlu1 %1633 }
 0xb82   : > { %v1635_v62 = vmul.f32 %v1634_v61, %v2882_v56  ;;  %v2185_v61 = vld [vmem:[#allocation9] ss:$0 sm:$0xff] }
 0xb84   : > { %v1636_v63 = vsub.f32 %v1629_v16, %v1635_v62 }
 0xb86   : > { %v1637_v0 = vmul.f32 %v1636_v63, %v1636_v63 }
 0xb88   : > { %v1638_v1 = vsel %vm818_vm0, %v1637_v0, 0.0  ;;  %v2186_v0 = vld [vmem:[#allocation10] ss:$0 sm:$0xff] }
 0xb89   : > { %1639 = vadd.xlane.f32.xlu2 %v1638_v1 }
 0xbfc   : > { %v1640_v11 = vpop.xlane.xlu2 %1639 }
 0xbfd   : > { %v1641_v12 = vmul.f32 %v1640_v11, %v2882_v56 }
 0xbff   : > { %v1642_v14 = vadd.f32 1e-05, %v1641_v12 }
 0xc01   : > { %2208 = vrsqrt.f32 %v1642_v14  ;;  %vm1649_vm9 = vweird.f32 %v1642_v14 }
 0xc07   : > { %v2209_v15 = vpop.eup %2208 }
 0xc08   : > { %v1644_v17 = vmul.f32 %v2209_v15, %v1642_v14  ;;  %vm1650_vm8 = vweird.f32 %v2209_v15 }
 0xc09   : > { %vm1651_vm10 = vmor %vm1649_vm9, %vm1650_vm8 }
 0xc0a   : > { %v1645_v18 = vmul.f32 %v2209_v15, %v1644_v17 }
 0xc0c   : > { %v1646_v19 = vmul.f32 0.5, %v1645_v18 }
 0xc0e   : > { %v1647_v20 = vsub.f32 1.5, %v1646_v19 }
 0xc10   : > { %v1648_v21 = vmul.f32 %v2209_v15, %v1647_v20 }
 0xc12   : > { %v1652_v23 = vsel %vm1651_vm10, %v2209_v15, %v1648_v21 }
 0xc13   : > { %v1653_v24 = vmul.f32 %v1652_v23, %v1636_v63 }
 0xc15   : > { %v1657_v26 = vmul.f32 %v2181_v22, %v1653_v24 }
 0xc17   : > { %v1661_v27 = vadd.f32 %v2182_v25, %v1657_v26 }
 0xc19   : > { %2080 = vmatmul.msk.f32.vlgmr.msra.gmra.mxu3 %vm818_vm0, %v1661_v27 }
 0xc9c   : > { %v1694_v31 = vpop.f32.mrf.mxu3 }
 0xc9d   : > { %v1695_v32 = vadd.f32 %v2183_v30, %v1694_v31 }
 0xc9f   : > { %v1697_v35 = vmax.f32 %v1695_v32, 0.0 }
 0xca1   : > { %2081 = vmatmul.msk.f32.vlgmr.msrb.gmra.mxu0 %vm911_vm1, %v1697_v35 }
 0xd1e   : > { %v1726_v37 = vpop.f32.mrf.mxu0 }
 0xd1f   : > { %v1727_v38 = vadd.f32 %v2184_v36, %v1726_v37 }
 0xd21   : > { %v1729_v40 = vadd.f32 %v1727_v38, %v1661_v27 }
 0xd23   : > { %v1732_v41 = vsel %vm818_vm0, %v1729_v40, 0.0 }
 0xd24   : > { %1733 = vadd.xlane.f32.xlu0 %v1732_v41 }
 0xd97   : > { %v1734_v42 = vpop.xlane.xlu0 %1733 }
 0xd98   : > { %v1735_v13 = vmul.f32 %v1734_v42, %v2882_v56 }
 0xd9a   : > { %v1736_v43 = vsub.f32 %v1729_v40, %v1735_v13 }
 0xd9c   : > { %v1737_v33 = vmul.f32 %v1736_v43, %v1736_v43 }
 0xd9e   : > { %v1738_v34 = vsel %vm818_vm0, %v1737_v33, 0.0 }
 0xd9f   : > { %1739 = vadd.xlane.f32.xlu1 %v1738_v34 }
 0xe12   : > { %v1740_v52 = vpop.xlane.xlu1 %1739 }
 0xe13   : > { %v1741_v53 = vmul.f32 %v1740_v52, %v2882_v56  ;;  %v2187_v56 = vld [vmem:[#allocation12] ss:$0 sm:$0xff] }
 0xe15   : > { %v1742_v54 = vadd.f32 1e-05, %v1741_v53 }
 0xe17   : > { %2210 = vrsqrt.f32 %v1742_v54  ;;  %vm1749_vm12 = vweird.f32 %v1742_v54 }
 0xe1d   : > { %v2211_v55 = vpop.eup %2210 }
 0xe1e   : > { %v1744_v57 = vmul.f32 %v2211_v55, %v1742_v54  ;;  %vm1750_vm11 = vweird.f32 %v2211_v55 }
 0xe1f   : > { %vm1751_vm13 = vmor %vm1749_vm12, %vm1750_vm11 }
 0xe20   : > { %v1745_v58 = vmul.f32 %v2211_v55, %v1744_v57 }
 0xe22   : > { %v1746_v59 = vmul.f32 0.5, %v1745_v58 }
 0xe24   : > { %v1747_v16 = vsub.f32 1.5, %v1746_v59 }
 0xe26   : > { %v1748_v60 = vmul.f32 %v2211_v55, %v1747_v16 }
 0xe28   : > { %v1752_v62 = vsel %vm1751_vm13, %v2211_v55, %v1748_v60 }
 0xe29   : > { %v1753_v63 = vmul.f32 %v1752_v62, %v1736_v43 }
 0xe2b   : > { %v1757_v1 = vmul.f32 %v2185_v61, %v1753_v63 }
 0xe2d   : > { %v1761_v2 = vadd.f32 %v2186_v0, %v1757_v1 }
 0xe2f   : > { %2082 = vmatmul.msk.f32.vlgmr.msra.gmra.mxu1 %vm818_vm0, %v1761_v2 }
 0xeac   : > { %v1794_v39 = vpop.f32.mrf.mxu1 }
 0xead   : > { %v1795_v3 = vadd.f32 %v2187_v56, %v1794_v39 }
 0xeaf   : > { %1797 = vst [vmem:[%s797_s4] sm:$0xff] %v1795_v3 }
 0xeb0 PF: > { %s36_s3 = sadd.s32 1, %s2444_s3  }
 0xeb1   : > { %p33_p7 = scmp.ge.s32.totalorder %s36_s3, 4  }
 0xeb3   :  { %35 = sbr.rel (!%p33_p7) target bundleno = 15 (0xf), region = 192 }
 0xeb8   :  { %1817 = vsyncpa [#allocation3], 1 }
 0xeb9   :  { %1819 = vsyncpa [#allocation3 + $0x1], 1 }
 0xeba   :  { %1820 = vsyncpa [#allocation5], 1 }
 0xebb   :  { %1821 = vsyncpa [#allocation8], 1 }
 0xebc   :  { %1822 = vsyncpa [#allocation11], 1 }

// kernel: trajgpt_forward.5
= control target key start
LH: loop header
LB: loop body
LE: loop exit
PB: predicated region body
PF: predicated region fallthrough
CT: control target
= control target key end

     0   :  { %s1494_s18 = smov 0   ;;  %s2187_s0 = inlined_call_operand.vmem [shape: f32[2,8,128], index: 0, kind: input, shape index: {}]   ;;  %s2188_s1 = inlined_call_operand.vmem [shape: f32[6,128,64], index: 1, kind: input, shape index: {}]   ;;  %s2189_s2 = inlined_call_operand.vmem [shape: f32[6,1,64], index: 2, kind: input, shape index: {}]   ;;  %s2190_s3 = inlined_call_operand.vmem [shape: f32[2,64,128], index: 3, kind: input, shape index: {}]   ;;  %s2191_s4 = inlined_call_operand.vmem [shape: f32[1,128], index: 4, kind: input, shape index: {}]   ;;  %s2192_s5 = inlined_call_operand.vmem [shape: f32[1,128], index: 5, kind: input, shape index: {}]   ;;  %s2193_s6 = inlined_call_operand.vmem [shape: f32[1,128], index: 6, kind: input, shape index: {}]   ;;  %s2194_s7 = inlined_call_operand.vmem [shape: f32[128,256], index: 7, kind: input, shape index: {}]   ;;  %s2195_s8 = inlined_call_operand.vmem [shape: f32[1,256], index: 8, kind: input, shape index: {}]   ;;  %s2196_s9 = inlined_call_operand.vmem [shape: f32[256,128], index: 9, kind: input, shape index: {}]   ;;  %s2197_s10 = inlined_call_operand.vmem [shape: f32[1,128], index: 10, kind: input, shape index: {}]   ;;  %s2198_s11 = inlined_call_operand.vmem [shape: f32[1,128], index: 11, kind: input, shape index: {}]   ;;  %s2199_s12 = inlined_call_operand.vmem [shape: f32[1,128], index: 12, kind: input, shape index: {}]   ;;  %s2200_s13 = inlined_call_operand.vmem [shape: f32[128,128], index: 13, kind: input, shape index: {}]   ;;  %s2201_s14 = inlined_call_operand.vmem [shape: f32[1,128], index: 14, kind: input, shape index: {}]   ;;  %s2202_s15 = inlined_call_operand.vmem [shape: f32[2,8,128], index: 15, kind: output, shape index: {}]  }
   0x1 LB: > { %s1259_s19 = sadd.s32 4294967295, %s1411_s18   ;;  %p1263_p0 = scmp.ge.s32.totalorder %s1411_s18, 1  ;;  %s1411_s18 = sphi %s1494_s18, %s25_s18  }
   0x2   : > { %p436_p1 = scmp.lt.s32.totalorder %s1411_s18, 3 }
   0x4   : > { %p437_p2 = pnand %p1263_p0, %p436_p1 }
   0x5   : > { %p482_p3 = scmp.lt.s32.totalorder (!%p437_p2), %s1259_s19, 1 }
   0x6   : > { %440 = sbr.rel (%p437_p2) target bundleno = 2291 (0x8f3), region = 80 }
   0xb   : > { %v1281_v0 = vld [vmem:[%s2188_s1 + $0x178] sm:$0xff]  ;;  %v1280_v2 = vld [vmem:[%s2188_s1 + $0x170] sm:$0xff]  ;;  %v1279_v4 = vld [vmem:[%s2188_s1 + $0x168] sm:$0xff]  ;;  %s2204_s19 = smov (!%p482_p3, %s1259_s19), 1  ;;  %vm622_vm0 = vcmask 523264   ;;  %v492_v51 = vlaneseq  ;;  %vm650_vm2 = vcmask 64512  }
   0xc   : > { %v512_v1 = vld [vmem:[%s2188_s1 + $0x78] sm:$0xff]  ;;  %560 = vmatpush.msra.mxu1 %v1281_v0  ;;  %v511_v3 = vld [vmem:[%s2188_s1 + $0x70] sm:$0xff]  ;;  %v510_v5 = vld [vmem:[%s2188_s1 + $0x68] sm:$0xff]  ;;  %s1264_s20 = sshll.u32 %s2204_s19, 3 }
   0xd   : > { %517 = vmatpush.msra.mxu0 %v512_v1  ;;  %v1278_v6 = vld [vmem:[%s2188_s1 + $0x160] sm:$0xff]  ;;  %v1277_v8 = vld [vmem:[%s2188_s1 + $0x158] sm:$0xff]  ;;  %v1276_v10 = vld [vmem:[%s2188_s1 + $0x150] sm:$0xff]  ;;  %s485_s16 = scalar_lea.vmem %s2187_s0, %s1264_s20  ;;  %v1661_v54 = vshrl.u32 %v492_v51, 7  ;;  %v1663_v55 = vand.u32 127, %v492_v51  ;;  %s489_s26 = scalar_lea.vmem %s2202_s15, %s1264_s20 }
   0xe   : > { %561 = vmatpush.msra.mxu1 %v1280_v2  ;;  %v509_v7 = vld [vmem:[%s2188_s1 + $0x60] sm:$0xff]  ;;  %v508_v9 = vld [vmem:[%s2188_s1 + $0x58] sm:$0xff]  ;;  %v507_v11 = vld [vmem:[%s2188_s1 + $0x50] sm:$0xff] }
   0xf   : > { %518 = vmatpush.msra.mxu0 %v511_v3  ;;  %v1275_v12 = vld [vmem:[%s2188_s1 + $0x148] sm:$0xff]  ;;  %v1274_v14 = vld [vmem:[%s2188_s1 + $0x140] sm:$0xff]  ;;  %v1273_v16 = vld [vmem:[%s2188_s1 + $0x138] sm:$0xff]  ;;  %vm496_vm1 = vcmp.le.s32.totalorder %v1663_v55, %v1661_v54 }
  0x10   : > { %562 = vmatpush.msra.mxu1 %v1279_v4  ;;  %v506_v13 = vld [vmem:[%s2188_s1 + $0x48] sm:$0xff]  ;;  %v505_v15 = vld [vmem:[%s2188_s1 + $0x40] sm:$0xff]  ;;  %v504_v17 = vld [vmem:[%s2188_s1 + $0x38] sm:$0xff] }
  0x11   : > { %519 = vmatpush.msra.mxu0 %v510_v5  ;;  %v1272_v18 = vld [vmem:[%s2188_s1 + $0x130] sm:$0xff]  ;;  %v1271_v20 = vld [vmem:[%s2188_s1 + $0x128] sm:$0xff]  ;;  %v1270_v22 = vld [vmem:[%s2188_s1 + $0x120] sm:$0xff] }
  0x12   : > { %563 = vmatpush.msra.mxu1 %v1278_v6  ;;  %v503_v19 = vld [vmem:[%s2188_s1 + $0x30] sm:$0xff]  ;;  %v502_v21 = vld [vmem:[%s2188_s1 + $0x28] sm:$0xff]  ;;  %v501_v23 = vld [vmem:[%s2188_s1 + $0x20] sm:$0xff] }
  0x13   : > { %520 = vmatpush.msra.mxu0 %v509_v7  ;;  %v1269_v24 = vld [vmem:[%s2188_s1 + $0x118] sm:$0xff]  ;;  %v1268_v26 = vld [vmem:[%s2188_s1 + $0x110] sm:$0xff]  ;;  %v1267_v28 = vld [vmem:[%s2188_s1 + $0x108] sm:$0xff] }
  0x14   : > { %564 = vmatpush.msra.mxu1 %v1277_v8  ;;  %v500_v25 = vld [vmem:[%s2188_s1 + $0x18] sm:$0xff]  ;;  %v499_v27 = vld [vmem:[%s2188_s1 + $0x10] sm:$0xff]  ;;  %v498_v29 = vld [vmem:[%s2188_s1 + $0x8] sm:$0xff] }
  0x15   : > { %521 = vmatpush.msra.mxu0 %v508_v9  ;;  %v1266_v30 = vld [vmem:[%s2188_s1 + $0x100] sm:$0xff]  ;;  %v1298_v40 = vld [vmem:[%s2188_s1 + $0x278] sm:$0xff]  ;;  %v1297_v41 = vld [vmem:[%s2188_s1 + $0x270] sm:$0xff] }
  0x16   : > { %565 = vmatpush.msra.mxu1 %v1276_v10  ;;  %v497_v31 = vld [vmem:[%s2188_s1] sm:$0xff]  ;;  %602 = vmatpush.msra.mxu2 %v1298_v40  ;;  %v1296_v42 = vld [vmem:[%s2188_s1 + $0x268] sm:$0xff]  ;;  %v1294_v44 = vld [vmem:[%s2188_s1 + $0x258] sm:$0xff] }
  0x17   : > { %522 = vmatpush.msra.mxu0 %v507_v11  ;;  %v1610_v32 = vld [vmem:[%s485_s16] sm:$0xff]  ;;  %v1293_v45 = vld [vmem:[%s2188_s1 + $0x250] sm:$0xff]  ;;  %v1292_v46 = vld [vmem:[%s2188_s1 + $0x248] sm:$0xff] }
  0x18   : > { %566 = vmatpush.msra.mxu1 %v1275_v12  ;;  %v1378_v33 = vld [vmem:[%s2189_s2 + $0x2] ss:$0 sm:$0xff]  ;;  %v1379_v34 = vld [vmem:[%s2189_s2] ss:$0 sm:$0xff]  ;;  %603 = vmatpush.msra.mxu2 %v1297_v41  ;;  %v1290_v48 = vld [vmem:[%s2188_s1 + $0x238] sm:$0xff] }
  0x19   : > { %523 = vmatpush.msra.mxu0 %v506_v13  ;;  %v1295_v43 = vld [vmem:[%s2188_s1 + $0x260] sm:$0xff]  ;;  %v1289_v49 = vld [vmem:[%s2188_s1 + $0x230] sm:$0xff]  ;;  %v1288_v50 = vld [vmem:[%s2188_s1 + $0x228] sm:$0xff] }
  0x1a   : > { %567 = vmatpush.msra.mxu1 %v1274_v14  ;;  %604 = vmatpush.msra.mxu2 %v1296_v42  ;;  %v1291_v47 = vld [vmem:[%s2188_s1 + $0x240] sm:$0xff]  ;;  %v1286_v53 = vld [vmem:[%s2188_s1 + $0x218] sm:$0xff]  ;;  %v1285_v56 = vld [vmem:[%s2188_s1 + $0x210] sm:$0xff] }
  0x1b   : > { %524 = vmatpush.msra.mxu0 %v505_v15  ;;  %v1287_v52 = vld [vmem:[%s2188_s1 + $0x220] sm:$0xff]  ;;  %v1284_v57 = vld [vmem:[%s2188_s1 + $0x208] sm:$0xff]  ;;  %v1335_v62 = vld [vmem:[%s2188_s1 + $0x1f8] sm:$0xff] }
  0x1c   : > { %568 = vmatpush.msra.mxu1 %v1273_v16  ;;  %605 = vmatpush.msra.mxu2 %v1295_v43  ;;  %v1283_v58 = vld [vmem:[%s2188_s1 + $0x200] sm:$0xff]  ;;  %v1334_v63 = vld [vmem:[%s2188_s1 + $0x1f0] sm:$0xff]  ;;  %v1333_v0 = vld [vmem:[%s2188_s1 + $0x1e8] sm:$0xff] }
  0x1d   : > { %525 = vmatpush.msra.mxu0 %v504_v17  ;;  %v1332_v1 = vld [vmem:[%s2188_s1 + $0x1e0] sm:$0xff]  ;;  %v1331_v2 = vld [vmem:[%s2188_s1 + $0x1d8] sm:$0xff]  ;;  %v1330_v3 = vld [vmem:[%s2188_s1 + $0x1d0] sm:$0xff] }
  0x1e   : > { %569 = vmatpush.msra.mxu1 %v1272_v18  ;;  %606 = vmatpush.msra.mxu2 %v1294_v44  ;;  %v1329_v5 = vld [vmem:[%s2188_s1 + $0x1c8] sm:$0xff]  ;;  %v1380_v10 = vld [vmem:[%s2189_s2 + $0x4] ss:$0 sm:$0xff]  ;;  %v1318_v13 = vld [vmem:[%s2188_s1 + $0xf8] sm:$0xff] }
  0x1f   : > { %526 = vmatpush.msra.mxu0 %v503_v19  ;;  %v1317_v14 = vld [vmem:[%s2188_s1 + $0xf0] sm:$0xff]  ;;  %v1316_v15 = vld [vmem:[%s2188_s1 + $0xe8] sm:$0xff]  ;;  %v1315_v16 = vld [vmem:[%s2188_s1 + $0xe0] sm:$0xff] }
  0x20   : > { %570 = vmatpush.msra.mxu1 %v1271_v20  ;;  %607 = vmatpush.msra.mxu2 %v1293_v45  ;;  %v1314_v17 = vld [vmem:[%s2188_s1 + $0xd8] sm:$0xff]  ;;  %v1313_v18 = vld [vmem:[%s2188_s1 + $0xd0] sm:$0xff]  ;;  %v1312_v19 = vld [vmem:[%s2188_s1 + $0xc8] sm:$0xff] }
  0x21   : > { %527 = vmatpush.msra.mxu0 %v502_v21  ;;  %v1311_v20 = vld [vmem:[%s2188_s1 + $0xc0] sm:$0xff]  ;;  %v1351_v51 = vld [vmem:[%s2188_s1 + $0x2f0] sm:$0xff] }
  0x22   : > { %571 = vmatpush.msra.mxu1 %v1270_v22  ;;  %608 = vmatpush.msra.mxu2 %v1292_v46  ;;  %v1328_v21 = vld [vmem:[%s2188_s1 + $0x1c0] sm:$0xff]  ;;  %v1310_v22 = vld [vmem:[%s2188_s1 + $0xb8] sm:$0xff] }
  0x23   : > { %528 = vmatpush.msra.mxu0 %v501_v23  ;;  %v1327_v23 = vld [vmem:[%s2188_s1 + $0x1b8] sm:$0xff]  ;;  %v1381_v42 = vld [vmem:[%s2189_s2 + $0x3] ss:$0 sm:$0xff]  ;;  %v1382_v46 = vld [vmem:[%s2189_s2 + $0x1] ss:$0 sm:$0xff] }
  0x24   : > { %572 = vmatpush.msra.mxu1 %v1269_v24  ;;  %609 = vmatpush.msra.mxu2 %v1291_v47  ;;  %v1309_v24 = vld [vmem:[%s2188_s1 + $0xb0] sm:$0xff]  ;;  %v1383_v54 = vld [vmem:[%s2189_s2 + $0x5] ss:$0 sm:$0xff] }
  0x25   : > { %529 = vmatpush.msra.mxu0 %v500_v25  ;;  %v1326_v25 = vld [vmem:[%s2188_s1 + $0x1b0] sm:$0xff] }
  0x26   : > { %573 = vmatpush.msra.mxu1 %v1268_v26  ;;  %610 = vmatpush.msra.mxu2 %v1290_v48  ;;  %v1308_v26 = vld [vmem:[%s2188_s1 + $0xa8] sm:$0xff] }
  0x27   : > { %530 = vmatpush.msra.mxu0 %v499_v27  ;;  %v1325_v27 = vld [vmem:[%s2188_s1 + $0x1a8] sm:$0xff] }
  0x28   : > { %574 = vmatpush.msra.mxu1 %v1267_v28  ;;  %611 = vmatpush.msra.mxu2 %v1289_v49  ;;  %v1307_v28 = vld [vmem:[%s2188_s1 + $0xa0] sm:$0xff] }
  0x29   : > { %531 = vmatpush.msra.mxu0 %v498_v29  ;;  %v1324_v29 = vld [vmem:[%s2188_s1 + $0x1a0] sm:$0xff] }
  0x2a   : > { %575 = vmatpush.msra.mxu1 %v1266_v30  ;;  %612 = vmatpush.msra.mxu2 %v1288_v50  ;;  %v1306_v30 = vld [vmem:[%s2188_s1 + $0x98] sm:$0xff] }
  0x2b   : > { %532 = vmatpush.msra.mxu0 %v497_v31  ;;  %576 = vmatmul.f32.vlgmr.msra.gmra.mxu1 %v1610_v32  ;;  %v1323_v31 = vld [vmem:[%s2188_s1 + $0x198] sm:$0xff] }
  0x2c   : > { %533 = vmatmul.f32.vlgmr.msra.gmra.mxu0 %v1610_v32  ;;  %613 = vmatpush.msra.mxu2 %v1287_v52  ;;  %v1352_v50 = vld [vmem:[%s2188_s1 + $0x2f8] sm:$0xff]  ;;  %v1350_v52 = vld [vmem:[%s2188_s1 + $0x2e8] sm:$0xff] }
  0x2d   : > { %758 = vmatpush.msrb.mxu0 %v1335_v62  ;;  %800 = vmatpush.msrb.mxu1 %v1352_v50  ;;  %v1342_v62 = vld [vmem:[%s2188_s1 + $0x2a8] sm:$0xff] }
  0x2e   : > { %614 = vmatpush.msra.mxu2 %v1286_v53  ;;  %v1349_v53 = vld [vmem:[%s2188_s1 + $0x2e0] sm:$0xff] }
  0x2f   : > { %759 = vmatpush.msrb.mxu0 %v1334_v63  ;;  %801 = vmatpush.msrb.mxu1 %v1351_v51  ;;  %v1341_v63 = vld [vmem:[%s2188_s1 + $0x2a0] sm:$0xff] }
  0x30   : > { %615 = vmatpush.msra.mxu2 %v1285_v56  ;;  %v1348_v56 = vld [vmem:[%s2188_s1 + $0x2d8] sm:$0xff] }
  0x31   : > { %760 = vmatpush.msrb.mxu0 %v1333_v0  ;;  %802 = vmatpush.msrb.mxu1 %v1350_v52  ;;  %v1340_v0 = vld [vmem:[%s2188_s1 + $0x298] sm:$0xff] }
  0x32   : > { %616 = vmatpush.msra.mxu2 %v1284_v57  ;;  %v1347_v57 = vld [vmem:[%s2188_s1 + $0x2d0] sm:$0xff] }
  0x33   : > { %761 = vmatpush.msrb.mxu0 %v1332_v1  ;;  %803 = vmatpush.msrb.mxu1 %v1349_v53  ;;  %v1339_v1 = vld [vmem:[%s2188_s1 + $0x290] sm:$0xff] }
  0x34   : > { %617 = vmatpush.msra.mxu2 %v1283_v58  ;;  %v1346_v58 = vld [vmem:[%s2188_s1 + $0x2c8] sm:$0xff] }
  0x35   : > { %618 = vmatmul.f32.vlgmr.msra.gmra.mxu2 %v1610_v32  ;;  %762 = vmatpush.msrb.mxu0 %v1331_v2  ;;  %v1338_v2 = vld [vmem:[%s2188_s1 + $0x288] sm:$0xff] }
  0x36   : > { %804 = vmatpush.msrb.mxu1 %v1348_v56  ;;  %v1004_v56 = vld [vmem:[%s2194_s7 + $0xd0] sm:$0xff] }
  0x37   : > { %763 = vmatpush.msrb.mxu0 %v1330_v3 }
  0x38   : > { %805 = vmatpush.msrb.mxu1 %v1347_v57  ;;  %v1005_v57 = vld [vmem:[%s2194_s7 + $0xd8] sm:$0xff] }
  0x39   : > { %764 = vmatpush.msrb.mxu0 %v1329_v5 }
  0x3a   : > { %806 = vmatpush.msrb.mxu1 %v1346_v58  ;;  %v1002_v58 = vld [vmem:[%s2194_s7 + $0xc0] sm:$0xff] }
  0x3b   : > { %765 = vmatpush.msrb.mxu0 %v1328_v21  ;;  %v1364_v21 = vld [vmem:[%s2190_s3 + $0x78] sm:$0xff] }
  0x3d   : > { %766 = vmatpush.msrb.mxu0 %v1327_v23  ;;  %v1362_v23 = vld [vmem:[%s2190_s3 + $0x68] sm:$0xff] }
  0x3f   : > { %767 = vmatpush.msrb.mxu0 %v1326_v25  ;;  %v1360_v25 = vld [vmem:[%s2190_s3 + $0x58] sm:$0xff] }
  0x41   : > { %768 = vmatpush.msrb.mxu0 %v1325_v27  ;;  %v1358_v27 = vld [vmem:[%s2190_s3 + $0x48] sm:$0xff] }
  0x43   : > { %769 = vmatpush.msrb.mxu0 %v1324_v29 }
  0x45   : > { %770 = vmatpush.msrb.mxu0 %v1323_v31  ;;  %v1357_v31 = vld [vmem:[%s2190_s3 + $0x40] sm:$0xff] }
  0xa8   : > { %v577_v35 = vpop.f32.mrf.mxu1 }
  0xa9   : > { %v534_v36 = vpop.f32.mrf.mxu0  ;;  %v578_v37 = vadd.f32 %v1378_v33, %v577_v35  ;;  %v1305_v33 = vld [vmem:[%s2188_s1 + $0x90] sm:$0xff]  ;;  %v1304_v35 = vld [vmem:[%s2188_s1 + $0x88] sm:$0xff] }
  0xaa   : > { %v535_v38 = vadd.f32 %v1379_v34, %v534_v36  ;;  %v1322_v34 = vld [vmem:[%s2188_s1 + $0x190] sm:$0xff]  ;;  %v1321_v36 = vld [vmem:[%s2188_s1 + $0x188] sm:$0xff] }
  0xab   : > { %1300 = vmatpush.xpose.msk.msra.mxu3 %vm622_vm0, %v578_v37  ;;  %771 = vmatpush.msrb.mxu0 %v1322_v34  ;;  %v1303_v37 = vld [vmem:[%s2188_s1 + $0x80] sm:$0xff] }
  0xac   : > { %v537_v39 = vmul.f32 0.125, %v535_v38  ;;  %v1320_v38 = vld [vmem:[%s2188_s1 + $0x180] sm:$0xff] }
  0xad   : > { %772 = vmatpush.msrb.mxu0 %v1321_v36  ;;  %v1384_v34 = vld [vmem:[%s2191_s4] ss:$0 sm:$0xff] }
  0xae   : > { %1301 = vmatmul.msk.f32.vlgmr.msra.gmra.mxu3 %vm622_vm0, %v537_v39 }
  0xaf   : > { %773 = vmatpush.msrb.mxu0 %v1320_v38 }
  0xb0   : > { %774 = vmatmul.f32.vlgmr.msrb.gmra.mxu0 %v1610_v32 }
  0xb1   : > { %901 = vmatpush.msra.mxu0 %v1364_v21  ;;  %v1072_v21 = vld [vmem:[%s2196_s9 + $0x70] sm:$0xff] }
  0xb8   : > { %v619_v11 = vpop.f32.mrf.mxu2 }
  0xb9   : > { %v620_v12 = vadd.f32 %v1380_v10, %v619_v11 }
  0xbb   : > { %680 = vmatpush.msrb.mxu3 %v620_v12 }
  0xbd   : > { %715 = vmatpush.msra.mxu3 %v1318_v13  ;;  %v692_v13 = vld [vmem:[%s2190_s3 + $0x38] sm:$0xff] }
  0xbf   : > { %716 = vmatpush.msra.mxu3 %v1317_v14  ;;  %v691_v14 = vld [vmem:[%s2190_s3 + $0x30] sm:$0xff] }
  0xc1   : > { %717 = vmatpush.msra.mxu3 %v1316_v15  ;;  %v690_v15 = vld [vmem:[%s2190_s3 + $0x28] sm:$0xff] }
  0xc3   : > { %718 = vmatpush.msra.mxu3 %v1315_v16  ;;  %v689_v16 = vld [vmem:[%s2190_s3 + $0x20] sm:$0xff] }
  0xc5   : > { %719 = vmatpush.msra.mxu3 %v1314_v17  ;;  %v688_v17 = vld [vmem:[%s2190_s3 + $0x18] sm:$0xff] }
  0xc7   : > { %720 = vmatpush.msra.mxu3 %v1313_v18  ;;  %v687_v18 = vld [vmem:[%s2190_s3 + $0x10] sm:$0xff] }
  0xc9   : > { %721 = vmatpush.msra.mxu3 %v1312_v19  ;;  %v686_v19 = vld [vmem:[%s2190_s3 + $0x8] sm:$0xff] }
  0xcb   : > { %722 = vmatpush.msra.mxu3 %v1311_v20  ;;  %v685_v20 = vld [vmem:[%s2190_s3] sm:$0xff] }
  0xcd   : > { %723 = vmatpush.msra.mxu3 %v1310_v22  ;;  %v1363_v22 = vld [vmem:[%s2190_s3 + $0x70] sm:$0xff] }
  0xce   : > { %902 = vmatpush.msra.mxu0 %v1363_v22  ;;  %v1087_v22 = vld [vmem:[%s2196_s9 + $0xe8] sm:$0xff] }
  0xcf   : > { %724 = vmatpush.msra.mxu3 %v1309_v24  ;;  %v1361_v24 = vld [vmem:[%s2190_s3 + $0x60] sm:$0xff] }
  0xd0   : > { %903 = vmatpush.msra.mxu0 %v1362_v23 }
  0xd1   : > { %725 = vmatpush.msra.mxu3 %v1308_v26  ;;  %v1359_v26 = vld [vmem:[%s2190_s3 + $0x50] sm:$0xff] }
  0xd2   : > { %904 = vmatpush.msra.mxu0 %v1361_v24  ;;  %v1071_v24 = vld [vmem:[%s2196_s9 + $0x68] sm:$0xff] }
  0xd3   : > { %726 = vmatpush.msra.mxu3 %v1307_v28 }
  0xd4   : > { %905 = vmatpush.msra.mxu0 %v1360_v25 }
  0xd5   : > { %727 = vmatpush.msra.mxu3 %v1306_v30 }
  0xd6   : > { %906 = vmatpush.msra.mxu0 %v1359_v26  ;;  %v1086_v26 = vld [vmem:[%s2196_s9 + $0xe0] sm:$0xff] }
  0xd7   : > { %728 = vmatpush.msra.mxu3 %v1305_v33 }
  0xd8   : > { %907 = vmatpush.msra.mxu0 %v1358_v27  ;;  %v1070_v27 = vld [vmem:[%s2196_s9 + $0x60] sm:$0xff] }
  0xd9   : > { %729 = vmatpush.msra.mxu3 %v1304_v35 }
  0xda   : > { %908 = vmatpush.msra.mxu0 %v1357_v31  ;;  %v1084_v31 = vld [vmem:[%s2196_s9 + $0xd0] sm:$0xff] }
  0xdb   : > { %730 = vmatpush.msra.mxu3 %v1303_v37 }
 0x12d   : > { %v775_v43 = vpop.f32.mrf.mxu0 }
 0x12e   : > { %v776_v44 = vadd.f32 %v1381_v42, %v775_v43  ;;  %v1009_v42 = vld [vmem:[%s2194_s7 + $0xf8] sm:$0xff]  ;;  %v1006_v43 = vld [vmem:[%s2194_s7 + $0xe0] sm:$0xff] }
 0x12f   : > { %1036 = vmatpush.msrb.mxu0 %v1009_v42  ;;  %v1080_v42 = vld [vmem:[%s2196_s9 + $0xb0] sm:$0xff] }
 0x130   : > { %1354 = vmatpush.xpose.msk.msrb.mxu2 %vm622_vm0, %v776_v44 }
 0x131   : > { %v646_v59 = vpop.f32.mrf.mxu3 }
 0x132   : > { %v649_v60 = vsel %vm496_vm1, %v646_v59, -1e+30  ;;  %v1345_v59 = vld [vmem:[%s2188_s1 + $0x2c0] sm:$0xff] }
 0x133   : > { %v651_v61 = vsel %vm650_vm2, %v649_v60, -inf  ;;  %807 = vmatpush.msrb.mxu1 %v1345_v59  ;;  %v1003_v59 = vld [vmem:[%s2194_s7 + $0xc8] sm:$0xff] }
 0x134   : > { %652 = vmax.xlane.f32.xlu0 %v651_v61  ;;  %v1343_v61 = vld [vmem:[%s2188_s1 + $0x2b0] sm:$0xff] }
 0x1a7   : > { %v653_v4 = vpop.xlane.xlu0 %652 }
 0x1a8   : > { %v654_v6 = vsub.f32 %v649_v60, %v653_v4  ;;  %v1344_v60 = vld [vmem:[%s2188_s1 + $0x2b8] sm:$0xff] }
 0x1a9   : > { %808 = vmatpush.msrb.mxu1 %v1344_v60  ;;  %v1000_v60 = vld [vmem:[%s2194_s7 + $0xb0] sm:$0xff] }
 0x1aa   : > { %v655_v7 = vmul.f32 1.442695, %v654_v6  ;;  %v1337_v6 = vld [vmem:[%s2188_s1 + $0x280] sm:$0xff] }
 0x1ab   : > { %809 = vmatpush.msrb.mxu1 %v1343_v61  ;;  %v1001_v61 = vld [vmem:[%s2194_s7 + $0xb8] sm:$0xff] }
 0x1ac   : > { %1391 = vpow2.f32 %v655_v7 }
 0x1ad   : > { %810 = vmatpush.msrb.mxu1 %v1342_v62  ;;  %v998_v62 = vld [vmem:[%s2194_s7 + $0xa0] sm:$0xff] }
 0x1af   : > { %811 = vmatpush.msrb.mxu1 %v1341_v63  ;;  %v999_v63 = vld [vmem:[%s2194_s7 + $0xa8] sm:$0xff] }
 0x1b1   : > { %812 = vmatpush.msrb.mxu1 %v1340_v0  ;;  %v996_v0 = vld [vmem:[%s2194_s7 + $0x90] sm:$0xff] }
 0x1b2   : > { %v1392_v8 = vpop.eup %1391 }
 0x1b3   : > { %v657_v9 = vsel %vm650_vm2, %v1392_v8, 0.0  ;;  %813 = vmatpush.msrb.mxu1 %v1339_v1  ;;  %v997_v1 = vld [vmem:[%s2194_s7 + $0x98] sm:$0xff] }
 0x1b4   : > { %658 = vadd.xlane.f32.xlu0 %v657_v9 }
 0x1b5   : > { %814 = vmatpush.msrb.mxu1 %v1338_v2  ;;  %v994_v2 = vld [vmem:[%s2194_s7 + $0x80] sm:$0xff] }
 0x1b7   : > { %815 = vmatpush.msrb.mxu1 %v1337_v6  ;;  %v990_v6 = vld [vmem:[%s2194_s7 + $0x60] sm:$0xff] }
 0x1b8   : > { %816 = vmatmul.f32.vlgmr.msrb.gmra.mxu1 %v1610_v32 }
 0x227   : > { %v659_v39 = vpop.xlane.xlu0 %658 }
 0x228   : > { %1393 = vrcp.f32 %v659_v39 }
 0x22e   : > { %v1394_v40 = vpop.eup %1393 }
 0x22f   : > { %v661_v41 = vmul.f32 %v1394_v40, %v1392_v8  ;;  %v1413_v40 = vmov 128.0  }
 0x231   : > { %1302 = vmatmul.msk.f32.vlgmr.msrb.gmra.mxu3 %vm650_vm2, %v661_v41  ;;  %v1008_v41 = vld [vmem:[%s2194_s7 + $0xf0] sm:$0xff] }
 0x232   : > { %1016 = vmatpush.msrb.mxu3 %v1008_v41  ;;  %v1065_v41 = vld [vmem:[%s2196_s9 + $0x38] sm:$0xff] }
 0x234   : > { %1017 = vmatpush.msrb.mxu3 %v1006_v43 }
 0x235   : > { %v817_v55 = vpop.f32.mrf.mxu1 }
 0x236   : > { %v818_v12 = vadd.f32 %v1383_v54, %v817_v55  ;;  %1018 = vmatpush.msrb.mxu3 %v1004_v56  ;;  %v984_v54 = vld [vmem:[%s2194_s7 + $0x30] sm:$0xff]  ;;  %v985_v55 = vld [vmem:[%s2194_s7 + $0x38] sm:$0xff] }
 0x238   : > { %876 = vmatpush.msra.mxu2 %v818_v12  ;;  %1019 = vmatpush.msrb.mxu3 %v1002_v58  ;;  %v982_v12 = vld [vmem:[%s2194_s7 + $0x20] sm:$0xff] }
 0x239   : > { %731 = vmatmul.f32.vlgmr.msra.gmra.mxu3 %v1610_v32 }
 0x23a   : > { %1020 = vmatpush.msrb.mxu3 %v1000_v60  ;;  %v1063_v60 = vld [vmem:[%s2196_s9 + $0x28] sm:$0xff] }
 0x23c   : > { %1021 = vmatpush.msrb.mxu3 %v998_v62  ;;  %v1075_v62 = vld [vmem:[%s2196_s9 + $0x88] sm:$0xff] }
 0x23e   : > { %1022 = vmatpush.msrb.mxu3 %v996_v0  ;;  %v1074_v0 = vld [vmem:[%s2196_s9 + $0x80] sm:$0xff] }
 0x240   : > { %1023 = vmatpush.msrb.mxu3 %v994_v2  ;;  %v1059_v2 = vld [vmem:[%s2196_s9 + $0x8] sm:$0xff] }
 0x2b4   : > { %v1788_v45 = vpop.f32.mrf.mxu3 }
 0x2bc   : > { %v732_v47 = vpop.f32.mrf.mxu3 }
 0x2bd   : > { %v733_v48 = vadd.f32 %v1382_v46, %v732_v47 }
 0x2bf   : > { %v735_v49 = vmul.f32 0.125, %v733_v48 }
 0x2c1   : > { %1355 = vmatmul.msk.f32.vlgmr.msrb.gmra.mxu2 %vm622_vm0, %v735_v49 }
 0x2c2   : > { %924 = vmatpush.msrb.mxu2 %v692_v13  ;;  %v983_v13 = vld [vmem:[%s2194_s7 + $0x28] sm:$0xff] }
 0x2c4   : > { %925 = vmatpush.msrb.mxu2 %v691_v14  ;;  %v980_v14 = vld [vmem:[%s2194_s7 + $0x10] sm:$0xff] }
 0x2c6   : > { %926 = vmatpush.msrb.mxu2 %v690_v15  ;;  %v981_v15 = vld [vmem:[%s2194_s7 + $0x18] sm:$0xff] }
 0x2c8   : > { %927 = vmatpush.msrb.mxu2 %v689_v16  ;;  %v978_v16 = vld [vmem:[%s2194_s7] sm:$0xff] }
 0x2ca   : > { %928 = vmatpush.msrb.mxu2 %v688_v17  ;;  %v979_v17 = vld [vmem:[%s2194_s7 + $0x8] sm:$0xff] }
 0x2cc   : > { %929 = vmatpush.msrb.mxu2 %v687_v18  ;;  %v1089_v18 = vld [vmem:[%s2196_s9 + $0xf8] sm:$0xff] }
 0x2ce   : > { %930 = vmatpush.msrb.mxu2 %v686_v19  ;;  %v1088_v19 = vld [vmem:[%s2196_s9 + $0xf0] sm:$0xff] }
 0x2d0   : > { %931 = vmatpush.msrb.mxu2 %v685_v20  ;;  %v1073_v20 = vld [vmem:[%s2196_s9 + $0x78] sm:$0xff] }
 0x2d1   : > { %1094 = vmatpush.msra.mxu1 %v1073_v20 }
 0x2d3   : > { %1095 = vmatpush.msra.mxu1 %v1072_v21 }
 0x2d5   : > { %1096 = vmatpush.msra.mxu1 %v1071_v24  ;;  %v1177_v24 = vld [vmem:[%s2200_s13 + $0x60] sm:$0xff] }
 0x2d7   : > { %1097 = vmatpush.msra.mxu1 %v1070_v27  ;;  %v1174_v27 = vld [vmem:[%s2200_s13 + $0x48] sm:$0xff] }
 0x344   : > { %v843_v3 = vpop.f32.mrf.mxu2 }
 0x345   : > { %v846_v4 = vsel %vm496_vm1, %v843_v3, -1e+30  ;;  %v995_v3 = vld [vmem:[%s2194_s7 + $0x88] sm:$0xff] }
 0x346   : > { %v847_v5 = vsel %vm650_vm2, %v846_v4, -inf }
 0x347   : > { %848 = vmax.xlane.f32.xlu1 %v847_v5  ;;  %v993_v5 = vld [vmem:[%s2194_s7 + $0x78] sm:$0xff] }
 0x3ba   : > { %v849_v7 = vpop.xlane.xlu1 %848 }
 0x3bb   : > { %v850_v8 = vsub.f32 %v846_v4, %v849_v7  ;;  %v992_v4 = vld [vmem:[%s2194_s7 + $0x70] sm:$0xff]  ;;  %v991_v7 = vld [vmem:[%s2194_s7 + $0x68] sm:$0xff] }
 0x3bc   : > { %1024 = vmatpush.msrb.mxu3 %v992_v4  ;;  %v1010_v4 = vld [vmem:[%s2195_s8] sm:$0x3] }
 0x3bd   : > { %v851_v9 = vmul.f32 1.442695, %v850_v8  ;;  %v988_v8 = vld [vmem:[%s2194_s7 + $0x50] sm:$0xff] }
 0x3be   : > { %1025 = vmatpush.msrb.mxu3 %v990_v6 }
 0x3bf   : > { %1395 = vpow2.f32 %v851_v9  ;;  %v989_v9 = vld [vmem:[%s2194_s7 + $0x58] sm:$0xff] }
 0x3c0   : > { %1026 = vmatpush.msrb.mxu3 %v988_v8 }
 0x3c5   : > { %v1396_v10 = vpop.eup %1395 }
 0x3c6   : > { %v853_v11 = vsel %vm650_vm2, %v1396_v10, 0.0 }
 0x3c7   : > { %854 = vadd.xlane.f32.xlu1 %v853_v11  ;;  %v987_v11 = vld [vmem:[%s2194_s7 + $0x48] sm:$0xff] }
 0x43a   : > { %v855_v28 = vpop.xlane.xlu1 %854 }
 0x43b   : > { %1397 = vrcp.f32 %v855_v28 }
 0x43c   : > { %1399 = vrcp.f32 %v1413_v40 }
 0x441   : > { %v1398_v29 = vpop.eup %1397 }
 0x442   : > { %v857_v30 = vmul.f32 %v1398_v29, %v1396_v10  ;;  %v1400_v44 = vpop.eup %1399  ;;  %v986_v10 = vld [vmem:[%s2194_s7 + $0x40] sm:$0xff]  ;;  %v1085_v29 = vld [vmem:[%s2196_s9 + $0xd8] sm:$0xff] }
 0x443   : > { %vm950_vm3 = vweird.f32 %v1400_v44  ;;  %1027 = vmatpush.msrb.mxu3 %v986_v10 }
 0x444   : > { %1356 = vmatmul.msk.f32.vlgmr.msra.gmra.mxu2 %vm650_vm2, %v857_v30  ;;  %v1069_v30 = vld [vmem:[%s2196_s9 + $0x58] sm:$0xff] }
 0x445   : > { %1028 = vmatpush.msrb.mxu3 %v984_v54  ;;  %1114 = vmatpush.msra.mxu2 %v1089_v18  ;;  %v1179_v18 = vld [vmem:[%s2200_s13 + $0x70] sm:$0xff] }
 0x446   : > { %1098 = vmatpush.msra.mxu1 %v1069_v30  ;;  %v1171_v30 = vld [vmem:[%s2200_s13 + $0x30] sm:$0xff] }
 0x447   : > { %1029 = vmatpush.msrb.mxu3 %v982_v12  ;;  %1115 = vmatpush.msra.mxu2 %v1088_v19 }
 0x449   : > { %1030 = vmatpush.msrb.mxu3 %v980_v14  ;;  %1116 = vmatpush.msra.mxu2 %v1087_v22 }
 0x44b   : > { %1031 = vmatpush.msrb.mxu3 %v978_v16  ;;  %1117 = vmatpush.msra.mxu2 %v1086_v26  ;;  %v1175_v26 = vld [vmem:[%s2200_s13 + $0x50] sm:$0xff] }
 0x44c   : > { %1366 = vmatmul.msk.f32.vlgmr.msrb.gmra.mxu2 %vm622_vm0, %v1788_v45  ;;  %v946_v45 = vmul.f32 128.0, %v1400_v44 }
 0x44d   : > { %1118 = vmatpush.msra.mxu2 %v1085_v29  ;;  %v1172_v29 = vld [vmem:[%s2200_s13 + $0x38] sm:$0xff] }
 0x44e   : > { %v947_v46 = vsub.f32 1.0, %v946_v45 }
 0x44f   : > { %1119 = vmatpush.msra.mxu2 %v1084_v31  ;;  %v1170_v31 = vld [vmem:[%s2200_s13 + $0x28] sm:$0xff] }
 0x450   : > { %v948_v47 = vmul.f32 %v1400_v44, %v947_v46  ;;  %v1078_v46 = vld [vmem:[%s2196_s9 + $0xa0] sm:$0xff] }
 0x452   : > { %v949_v48 = vadd.f32 %v1400_v44, %v948_v47 }
 0x454   : > { %v1919_v49 = vsel %vm950_vm3, %v1400_v44, %v949_v48  ;;  %v1079_v44 = vld [vmem:[%s2196_s9 + $0xa8] sm:$0xff]  ;;  %v1077_v48 = vld [vmem:[%s2196_s9 + $0x98] sm:$0xff] }
 0x4c7   : > { %v878_v33 = vpop.f32.mrf.mxu2 }
 0x4c8   : > { %1365 = vmatmul.msk.f32.vlgmr.msra.gmra.mxu0 %vm622_vm0, %v878_v33  ;;  %v1068_v33 = vld [vmem:[%s2196_s9 + $0x50] sm:$0xff] }
 0x4c9   : > { %1099 = vmatpush.msra.mxu1 %v1068_v33  ;;  %v1169_v33 = vld [vmem:[%s2200_s13 + $0x20] sm:$0xff] }
 0x4cf   : > { %v933_v35 = vpop.f32.mrf.mxu2 }
 0x545   : > { %v910_v36 = vpop.f32.mrf.mxu0 }
 0x546   : > { %v934_v37 = vadd.f32 %v933_v35, %v910_v36  ;;  %v1067_v35 = vld [vmem:[%s2196_s9 + $0x48] sm:$0xff]  ;;  %v1082_v36 = vld [vmem:[%s2196_s9 + $0xc0] sm:$0xff] }
 0x547   : > { %1100 = vmatpush.msra.mxu1 %v1067_v35  ;;  %v1167_v35 = vld [vmem:[%s2200_s13 + $0x10] sm:$0xff] }
 0x548   : > { %v939_v38 = vadd.f32 %v1384_v34, %v934_v37  ;;  %v1083_v34 = vld [vmem:[%s2196_s9 + $0xc8] sm:$0xff]  ;;  %v1066_v37 = vld [vmem:[%s2196_s9 + $0x40] sm:$0xff] }
 0x549   : > { %1120 = vmatpush.msra.mxu2 %v1083_v34  ;;  %1101 = vmatpush.msra.mxu1 %v1066_v37  ;;  %v1168_v34 = vld [vmem:[%s2200_s13 + $0x18] sm:$0xff]  ;;  %v1165_v37 = vld [vmem:[%s2200_s13] sm:$0xff] }
 0x54a   : > { %v940_v39 = vadd.f32 %v939_v38, %v1610_v32  ;;  %v1007_v32 = vld [vmem:[%s2194_s7 + $0xe8] sm:$0xff] }
 0x54b   : > { %1037 = vmatpush.msrb.mxu0 %v1007_v32  ;;  %1121 = vmatpush.msra.mxu2 %v1082_v36  ;;  %v1064_v32 = vld [vmem:[%s2196_s9 + $0x30] sm:$0xff]  ;;  %v1166_v36 = vld [vmem:[%s2200_s13 + $0x8] sm:$0xff] }
 0x54c   : > { %943 = vadd.xlane.f32.xlu2 %v940_v39  ;;  %1102 = vmatpush.msra.mxu1 %v1065_v41 }
 0x54d   : > { %1038 = vmatpush.msrb.mxu0 %v1005_v57  ;;  %v1386_v57 = vld [vmem:[%s2193_s6] ss:$0 sm:$0xff] }
 0x54e   : > { %1103 = vmatpush.msra.mxu1 %v1064_v32 }
 0x54f   : > { %1039 = vmatpush.msrb.mxu0 %v1003_v59 }
 0x550   : > { %1104 = vmatpush.msra.mxu1 %v1063_v60 }
 0x551   : > { %1040 = vmatpush.msrb.mxu0 %v1001_v61  ;;  %v1076_v61 = vld [vmem:[%s2196_s9 + $0x90] sm:$0xff] }
 0x553   : > { %1041 = vmatpush.msrb.mxu0 %v999_v63  ;;  %v1061_v63 = vld [vmem:[%s2196_s9 + $0x18] sm:$0xff] }
 0x555   : > { %1042 = vmatpush.msrb.mxu0 %v997_v1  ;;  %v1060_v1 = vld [vmem:[%s2196_s9 + $0x10] sm:$0xff] }
 0x557   : > { %1043 = vmatpush.msrb.mxu0 %v995_v3  ;;  %v1058_v3 = vld [vmem:[%s2196_s9] sm:$0xff] }
 0x559   : > { %1044 = vmatpush.msrb.mxu0 %v993_v5  ;;  %v1013_v5 = vperm.slane %v1010_v4, 1 }
 0x55b   : > { %1045 = vmatpush.msrb.mxu0 %v991_v7 }
 0x55d   : > { %1046 = vmatpush.msrb.mxu0 %v989_v9  ;;  %v1012_v9 = vperm.slane %v1010_v4, 0 }
 0x55f   : > { %1047 = vmatpush.msrb.mxu0 %v987_v11 }
 0x561   : > { %1048 = vmatpush.msrb.mxu0 %v985_v55  ;;  %v1387_v55 = vld [vmem:[%s2197_s10] ss:$0 sm:$0xff] }
 0x563   : > { %1049 = vmatpush.msrb.mxu0 %v983_v13 }
 0x565   : > { %1050 = vmatpush.msrb.mxu0 %v981_v15 }
 0x567   : > { %1051 = vmatpush.msrb.mxu0 %v979_v17  ;;  %v1180_v17 = vld [vmem:[%s2200_s13 + $0x78] sm:$0xff] }
 0x568   : > { %1185 = vmatpush.msra.mxu3 %v1180_v17 }
 0x56a   : > { %1186 = vmatpush.msra.mxu3 %v1179_v18 }
 0x5bf   : > { %v944_v50 = vpop.xlane.xlu2 %943 }
 0x5c0   : > { %v952_v51 = vmul.f32 %v1919_v49, %v944_v50 }
 0x5c2   : > { %v1922_v52 = vsub.f32 %v940_v39, %v952_v51  ;;  %v1081_v39 = vld [vmem:[%s2196_s9 + $0xb8] sm:$0xff]  ;;  %v1385_v51 = vld [vmem:[%s2192_s5] ss:$0 sm:$0xff] }
 0x5c3   : > { %1122 = vmatpush.msra.mxu2 %v1081_v39 }
 0x5c4   : > { %v954_v53 = vmul.f32 %v1922_v52, %v1922_v52 }
 0x5c5   : > { %1123 = vmatpush.msra.mxu2 %v1080_v42 }
 0x5c6   : > { %955 = vadd.xlane.f32.xlu2 %v954_v53 }
 0x5c7   : > { %1124 = vmatpush.msra.mxu2 %v1079_v44 }
 0x5c9   : > { %1125 = vmatpush.msra.mxu2 %v1078_v46  ;;  %v1388_v46 = vld [vmem:[%s2198_s11] ss:$0 sm:$0xff] }
 0x5cb   : > { %1126 = vmatpush.msra.mxu2 %v1077_v48 }
 0x5cd   : > { %1127 = vmatpush.msra.mxu2 %v1076_v61 }
 0x5cf   : > { %1128 = vmatpush.msra.mxu2 %v1075_v62 }
 0x5d1   : > { %1129 = vmatpush.msra.mxu2 %v1074_v0 }
 0x639   : > { %v956_v23 = vpop.xlane.xlu2 %955 }
 0x63a   : > { %v957_v25 = vmul.f32 %v956_v23, %v1919_v49  ;;  %v1178_v23 = vld [vmem:[%s2200_s13 + $0x68] sm:$0xff] }
 0x63b   : > { %1187 = vmatpush.msra.mxu3 %v1178_v23 }
 0x63c   : > { %v958_v28 = vadd.f32 1e-05, %v957_v25  ;;  %v1176_v25 = vld [vmem:[%s2200_s13 + $0x58] sm:$0xff] }
 0x63d   : > { %1188 = vmatpush.msra.mxu3 %v1177_v24 }
 0x63e   : > { %1401 = vrsqrt.f32 %v958_v28  ;;  %vm965_vm5 = vweird.f32 %v958_v28 }
 0x63f   : > { %1189 = vmatpush.msra.mxu3 %v1176_v25 }
 0x641   : > { %1190 = vmatpush.msra.mxu3 %v1175_v26 }
 0x643   : > { %1191 = vmatpush.msra.mxu3 %v1174_v27 }
 0x644   : > { %v1402_v38 = vpop.eup %1401 }
 0x645   : > { %v960_v40 = vmul.f32 %v1402_v38, %v958_v28  ;;  %vm966_vm4 = vweird.f32 %v1402_v38  ;;  %v1173_v28 = vld [vmem:[%s2200_s13 + $0x40] sm:$0xff] }
 0x646   : > { %vm967_vm6 = vmor %vm965_vm5, %vm966_vm4  ;;  %1192 = vmatpush.msra.mxu3 %v1173_v28 }
 0x647   : > { %v961_v43 = vmul.f32 %v1402_v38, %v960_v40 }
 0x648   : > { %1193 = vmatpush.msra.mxu3 %v1172_v29 }
 0x649   : > { %v962_v45 = vmul.f32 0.5, %v961_v43 }
 0x64a   : > { %1194 = vmatpush.msra.mxu3 %v1171_v30 }
 0x64b   : > { %v963_v47 = vsub.f32 1.5, %v962_v45 }
 0x64c   : > { %1195 = vmatpush.msra.mxu3 %v1170_v31 }
 0x64d   : > { %v964_v50 = vmul.f32 %v1402_v38, %v963_v47 }
 0x64e   : > { %1196 = vmatpush.msra.mxu3 %v1169_v33 }
 0x64f   : > { %v968_v53 = vsel %vm967_vm6, %v1402_v38, %v964_v50 }
 0x650   : > { %v969_v56 = vmul.f32 %v968_v53, %v1922_v52  ;;  %v1062_v52 = vld [vmem:[%s2196_s9 + $0x20] sm:$0xff]  ;;  %1197 = vmatpush.msra.mxu3 %v1168_v34 }
 0x651   : > { %1105 = vmatpush.msra.mxu1 %v1062_v52  ;;  %v1390_v53 = vld [vmem:[%s2201_s14] ss:$0 sm:$0xff] }
 0x652   : > { %v973_v58 = vmul.f32 %v1385_v51, %v969_v56  ;;  %1198 = vmatpush.msra.mxu3 %v1167_v35 }
 0x653   : > { %1106 = vmatpush.msra.mxu1 %v1061_v63 }
 0x654   : > { %v977_v59 = vadd.f32 %v1386_v57, %v973_v58  ;;  %1199 = vmatpush.msra.mxu3 %v1166_v36 }
 0x655   : > { %1107 = vmatpush.msra.mxu1 %v1060_v1 }
 0x656   : > { %1032 = vmatmul.f32.vlgmr.msrb.gmra.mxu3 %v977_v59  ;;  %1052 = vmatmul.f32.vlgmr.msrb.gmra.mxu0 %v977_v59 }
 0x657   : > { %1108 = vmatpush.msra.mxu1 %v1059_v2  ;;  %1200 = vmatpush.msra.mxu3 %v1165_v37 }
 0x659   : > { %1109 = vmatpush.msra.mxu1 %v1058_v3 }
 0x6d3   : > { %v1053_v6 = vpop.f32.mrf.mxu0 }
 0x6d4   : > { %v1054_v7 = vadd.f32 %v1053_v6, %v1013_v5 }
 0x6d6   : > { %v1057_v8 = vmax.f32 %v1054_v7, 0.0 }
 0x6d8   : > { %1130 = vmatmul.f32.vlgmr.msra.gmra.mxu2 %v1057_v8 }
 0x6d9   : > { %v1033_v10 = vpop.f32.mrf.mxu3 }
 0x6da   : > { %v1034_v11 = vadd.f32 %v1033_v10, %v1012_v9 }
 0x6dc   : > { %v1056_v54 = vmax.f32 %v1034_v11, 0.0 }
 0x6de   : > { %1110 = vmatmul.f32.vlgmr.msra.gmra.mxu1 %v1056_v54 }
 0x75b   : > { %v1111_v12 = vpop.f32.mrf.mxu1  ;;  %v1131_v14 = vpop.f32.mrf.mxu2 }
 0x75c   : > { %v1112_v13 = vadd.f32 %v1387_v55, %v1111_v12 }
 0x75e   : > { %v1132_v15 = vadd.f32 %v1131_v14, %v1112_v13 }
 0x760   : > { %v1134_v16 = vadd.f32 %v1132_v15, %v977_v59 }
 0x762   : > { %1137 = vadd.xlane.f32.xlu0 %v1134_v16 }
 0x7d5   : > { %v1138_v19 = vpop.xlane.xlu0 %1137 }
 0x7d6   : > { %v1139_v20 = vmul.f32 %v1138_v19, %v1919_v49 }
 0x7d8   : > { %v1140_v21 = vsub.f32 %v1134_v16, %v1139_v20 }
 0x7da   : > { %v1141_v22 = vmul.f32 %v1140_v21, %v1140_v21 }
 0x7dc   : > { %1142 = vadd.xlane.f32.xlu1 %v1141_v22 }
 0x84f   : > { %v1143_v38 = vpop.xlane.xlu1 %1142 }
 0x850   : > { %v1144_v39 = vmul.f32 %v1143_v38, %v1919_v49  ;;  %v1389_v49 = vld [vmem:[%s2199_s12] ss:$0 sm:$0xff] }
 0x852   : > { %v1145_v40 = vadd.f32 1e-05, %v1144_v39 }
 0x854   : > { %1403 = vrsqrt.f32 %v1145_v40  ;;  %vm1152_vm8 = vweird.f32 %v1145_v40 }
 0x85a   : > { %v1404_v41 = vpop.eup %1403 }
 0x85b   : > { %v1147_v42 = vmul.f32 %v1404_v41, %v1145_v40  ;;  %vm1153_vm7 = vweird.f32 %v1404_v41 }
 0x85c   : > { %vm1154_vm9 = vmor %vm1152_vm8, %vm1153_vm7 }
 0x85d   : > { %v1148_v43 = vmul.f32 %v1404_v41, %v1147_v42 }
 0x85f   : > { %v1149_v32 = vmul.f32 0.5, %v1148_v43 }
 0x861   : > { %v1150_v44 = vsub.f32 1.5, %v1149_v32 }
 0x863   : > { %v1151_v45 = vmul.f32 %v1404_v41, %v1150_v44 }
 0x865   : > { %v1155_v47 = vsel %vm1154_vm9, %v1404_v41, %v1151_v45 }
 0x866   : > { %v1156_v48 = vmul.f32 %v1155_v47, %v1140_v21 }
 0x868   : > { %v1160_v50 = vmul.f32 %v1388_v46, %v1156_v48 }
 0x86a   : > { %v1164_v51 = vadd.f32 %v1389_v49, %v1160_v50 }
 0x86c   : > { %1201 = vmatmul.f32.vlgmr.msra.gmra.mxu3 %v1164_v51 }
 0x8ef   : > { %v1202_v56 = vpop.f32.mrf.mxu3 }
 0x8f0   : > { %v1203_v57 = vadd.f32 %v1390_v53, %v1202_v56 }
 0x8f2   : > { %1205 = vst [vmem:[%s489_s26] sm:$0xff] %v1203_v57 }
 0x8f3 PF: > { %s25_s18 = sadd.s32 1, %s1411_s18  }
 0x8f4   : > { %p22_p4 = scmp.ge.s32.totalorder %s25_s18, 4  }
 0x8f6   :  { %24 = sbr.rel (!%p22_p4) target bundleno = 1 (0x1), region = 121 }

// kernel: trajgpt_forward.7
= control target key start
LH: loop header
LB: loop body
LE: loop exit
PB: predicated region body
PF: predicated region fallthrough
CT: control target
= control target key end

     0   :  { %s2969_s0 = inlined_call_operand.vmem [shape: f32[2,8,96], index: 0, kind: input, shape index: {}]   ;;  %s2970_s1 = inlined_call_operand.vmem [shape: f32[2,8,96], index: 1, kind: input, shape index: {}]   ;;  %s2971_s2 = inlined_call_operand.vmem [shape: f32[6,96,48], index: 2, kind: input, shape index: {}]   ;;  %s2972_s3 = inlined_call_operand.vmem [shape: f32[6,1,48], index: 3, kind: input, shape index: {}]   ;;  %s2973_s4 = inlined_call_operand.vmem [shape: f32[2,48,96], index: 4, kind: input, shape index: {}]   ;;  %s2974_s5 = inlined_call_operand.vmem [shape: f32[1,96], index: 5, kind: input, shape index: {}]   ;;  %s2975_s6 = inlined_call_operand.vmem [shape: f32[1,96], index: 6, kind: input, shape index: {}]   ;;  %s2976_s7 = inlined_call_operand.vmem [shape: f32[1,96], index: 7, kind: input, shape index: {}]   ;;  %s2977_s8 = inlined_call_operand.vmem [shape: f32[6,96,48], index: 8, kind: input, shape index: {}]   ;;  %s2978_s9 = inlined_call_operand.vmem [shape: f32[6,1,48], index: 9, kind: input, shape index: {}]   ;;  %s2979_s10 = inlined_call_operand.vmem [shape: f32[2,48,96], index: 10, kind: input, shape index: {}]   ;;  %s2980_s11 = inlined_call_operand.vmem [shape: f32[1,96], index: 11, kind: input, shape index: {}]   ;;  %s2981_s12 = inlined_call_operand.vmem [shape: f32[1,96], index: 12, kind: input, shape index: {}]   ;;  %s2982_s13 = inlined_call_operand.vmem [shape: f32[1,96], index: 13, kind: input, shape index: {}]   ;;  %s2983_s14 = inlined_call_operand.vmem [shape: f32[96,32], index: 14, kind: input, shape index: {}]   ;;  %s2984_s15 = inlined_call_operand.vmem [shape: f32[1,32], index: 15, kind: input, shape index: {}]   ;;  %s2985_s16 = inlined_call_operand.vmem [shape: f32[32,96], index: 16, kind: input, shape index: {}]   ;;  %s2986_s17 = inlined_call_operand.vmem [shape: f32[1,96], index: 17, kind: input, shape index: {}]   ;;  %s2987_s18 = inlined_call_operand.vmem [shape: f32[1,96], index: 18, kind: input, shape index: {}]   ;;  %s2988_s19 = inlined_call_operand.vmem [shape: f32[1,96], index: 19, kind: input, shape index: {}]   ;;  %s2989_s20 = inlined_call_operand.vmem [shape: f32[96,128], index: 20, kind: input, shape index: {}]   ;;  %s2990_s21 = inlined_call_operand.vmem [shape: f32[1,128], index: 21, kind: input, shape index: {}]   ;;  %s2991_s22 = inlined_call_operand.vmem [shape: f32[2,8,128], index: 22, kind: output, shape index: {}]  }
   0x1   :  { %2997 = sst [smem:[#allocation2_spill]] %s2969_s0 }
   0x2   :  { %2998 = sst [smem:[#allocation3_spill]] %s2970_s1 }
   0x3   :  { %2999 = sst [smem:[#allocation4_spill]] %s2971_s2 }
   0x4   :  { %3000 = sst [smem:[#allocation5_spill]] %s2972_s3  ;;  %s2189_s3 = smov 0  }
   0x5   :  { %3001 = sst [smem:[#allocation6_spill]] %s2973_s4 }
   0x6   :  { %3002 = sst [smem:[#allocation7_spill]] %s2974_s5 }
   0x7   :  { %3003 = sst [smem:[#allocation8_spill]] %s2975_s6 }
   0x8 LB: > { %s1826_s28 = sadd.s32 4294967295, %s2071_s3   ;;  %p1830_p0 = scmp.ge.s32.totalorder %s2071_s3, 1  ;;  %s2071_s3 = sphi %s2189_s3, %s32_s3  }
   0x9   : > { %p620_p1 = scmp.lt.s32.totalorder %s2071_s3, 3 }
   0xb   : > { %p621_p2 = pnand %p1830_p0, %p620_p1 }
   0xc   : > { %s3004_s4 = sld [smem:[#allocation4_spill]] (!%p621_p2)  ;;  %p684_p3 = scmp.lt.s32.totalorder (!%p621_p2), %s1826_s28, 1 }
   0xd   : > { %624 = sbr.rel (%p621_p2) target bundleno = 3872 (0xf20), region = 108  ;;  %s3005_s27 = sld [smem:[#allocation2_spill]] (!%p621_p2) }
   0xe   : > { %s3006_s6 = sld [smem:[#allocation5_spill]] (!%p621_p2) }
   0xf   : > { %s3007_s5 = sld [smem:[#allocation6_spill]] (!%p621_p2) }
  0x12   : > { %v1846_v0 = vld [vmem:[%s3004_s4 + $0x118] sm:$0xff]  ;;  %v1845_v2 = vld [vmem:[%s3004_s4 + $0x110] sm:$0xff]  ;;  %v1844_v4 = vld [vmem:[%s3004_s4 + $0x108] sm:$0xff]  ;;  %s3012_s28 = smov (!%p684_p3, %s1826_s28), 1  ;;  %vm720_vm0 = vcmask 785408   ;;  %vm821_vm1 = vcmask 392192   ;;  %v699_v43 = vlaneseq }
  0x13   : > { %v715_v1 = vld [vmem:[%s3004_s4 + $0x58] sm:$0xff]  ;;  %767 = vmatpush.msra.mxu1 %v1846_v0  ;;  %v714_v3 = vld [vmem:[%s3004_s4 + $0x50] sm:$0xff]  ;;  %v713_v5 = vld [vmem:[%s3004_s4 + $0x48] sm:$0xff]  ;;  %s2239_s1 = sshll.u32 %s3012_s28, 3  ;;  %vm849_vm3 = vcmask 64512   ;;  %vm1664_vm11 = vcmask 261120  }
  0x14   : > { %728 = vmatpush.msra.mxu0 %v715_v1  ;;  %v1843_v6 = vld [vmem:[%s3004_s4 + $0x100] sm:$0xff]  ;;  %v1842_v8 = vld [vmem:[%s3004_s4 + $0xf8] sm:$0xff]  ;;  %v1841_v10 = vld [vmem:[%s3004_s4 + $0xf0] sm:$0xff]  ;;  %s687_s28 = scalar_lea.vmem %s3005_s27, %s2239_s1  ;;  %v2325_v45 = vshrl.u32 %v699_v43, 7  ;;  %v2327_v46 = vand.u32 127, %v699_v43  ;;  %s3008_s27 = sld [smem:[#allocation7_spill]] }
  0x15   : > { %768 = vmatpush.msra.mxu1 %v1845_v2  ;;  %v712_v7 = vld [vmem:[%s3004_s4 + $0x40] sm:$0xff]  ;;  %v711_v9 = vld [vmem:[%s3004_s4 + $0x38] sm:$0xff]  ;;  %v710_v11 = vld [vmem:[%s3004_s4 + $0x30] sm:$0xff]  ;;  %s695_s24 = scalar_lea.vmem %s2991_s22, %s2239_s1 }
  0x16   : > { %729 = vmatpush.msra.mxu0 %v714_v3  ;;  %v1840_v12 = vld [vmem:[%s3004_s4 + $0xe8] sm:$0xff]  ;;  %v1839_v14 = vld [vmem:[%s3004_s4 + $0xe0] sm:$0xff]  ;;  %v1838_v16 = vld [vmem:[%s3004_s4 + $0xd8] sm:$0xff]  ;;  %vm703_vm2 = vcmp.le.s32.totalorder %v2327_v46, %v2325_v45 }
  0x17   : > { %769 = vmatpush.msra.mxu1 %v1844_v4  ;;  %v709_v13 = vld [vmem:[%s3004_s4 + $0x28] sm:$0xff]  ;;  %v708_v15 = vld [vmem:[%s3004_s4 + $0x20] sm:$0xff]  ;;  %v707_v17 = vld [vmem:[%s3004_s4 + $0x18] sm:$0xff] }
  0x18   : > { %730 = vmatpush.msra.mxu0 %v713_v5  ;;  %v1837_v18 = vld [vmem:[%s3004_s4 + $0xd0] sm:$0xff]  ;;  %v1836_v20 = vld [vmem:[%s3004_s4 + $0xc8] sm:$0xff]  ;;  %v1835_v22 = vld [vmem:[%s3004_s4 + $0xc0] sm:$0xff] }
  0x19   : > { %770 = vmatpush.msra.mxu1 %v1843_v6  ;;  %v706_v19 = vld [vmem:[%s3004_s4 + $0x10] sm:$0xff]  ;;  %v705_v21 = vld [vmem:[%s3004_s4 + $0x8] sm:$0xff]  ;;  %v704_v23 = vld [vmem:[%s3004_s4] sm:$0xff] }
  0x1a   : > { %731 = vmatpush.msra.mxu0 %v712_v7  ;;  %v2275_v24 = vld [vmem:[%s687_s28] sm:$0xff]  ;;  %v1860_v32 = vld [vmem:[%s3004_s4 + $0x1d8] sm:$0xff]  ;;  %v1859_v33 = vld [vmem:[%s3004_s4 + $0x1d0] sm:$0xff]  ;;  %s3010_s28 = sld [smem:[#allocation8_spill]] }
  0x1b   : > { %771 = vmatpush.msra.mxu1 %v1842_v8  ;;  %v2018_v25 = vld [vmem:[%s3006_s6 + $0x2] ss:$0 sm:$0xff]  ;;  %v2019_v26 = vld [vmem:[%s3006_s6] ss:$0 sm:$0xff]  ;;  %805 = vmatpush.msra.mxu2 %v1860_v32  ;;  %v1858_v34 = vld [vmem:[%s3004_s4 + $0x1c8] sm:$0xff] }
  0x1c   : > { %732 = vmatpush.msra.mxu0 %v711_v9  ;;  %v1857_v35 = vld [vmem:[%s3004_s4 + $0x1c0] sm:$0xff]  ;;  %v1856_v36 = vld [vmem:[%s3004_s4 + $0x1b8] sm:$0xff]  ;;  %v1855_v37 = vld [vmem:[%s3004_s4 + $0x1b0] sm:$0xff] }
  0x1d   : > { %772 = vmatpush.msra.mxu1 %v1841_v10  ;;  %806 = vmatpush.msra.mxu2 %v1859_v33  ;;  %v1854_v38 = vld [vmem:[%s3004_s4 + $0x1a8] sm:$0xff]  ;;  %v1853_v39 = vld [vmem:[%s3004_s4 + $0x1a0] sm:$0xff]  ;;  %v1852_v40 = vld [vmem:[%s3004_s4 + $0x198] sm:$0xff] }
  0x1e   : > { %733 = vmatpush.msra.mxu0 %v710_v11  ;;  %v1851_v41 = vld [vmem:[%s3004_s4 + $0x190] sm:$0xff]  ;;  %v1850_v42 = vld [vmem:[%s3004_s4 + $0x188] sm:$0xff]  ;;  %v1849_v44 = vld [vmem:[%s3004_s4 + $0x180] sm:$0xff] }
  0x1f   : > { %773 = vmatpush.msra.mxu1 %v1840_v12  ;;  %807 = vmatpush.msra.mxu2 %v1858_v34  ;;  %v1891_v50 = vld [vmem:[%s3004_s4 + $0x178] sm:$0xff]  ;;  %v2020_v54 = vld [vmem:[%s3006_s6 + $0x4] ss:$0 sm:$0xff]  ;;  %v1876_v59 = vld [vmem:[%s3004_s4 + $0xb0] sm:$0xff] }
  0x20   : > { %734 = vmatpush.msra.mxu0 %v709_v13  ;;  %v1877_v57 = vld [vmem:[%s3004_s4 + $0xb8] sm:$0xff]  ;;  %v1875_v61 = vld [vmem:[%s3004_s4 + $0xa8] sm:$0xff]  ;;  %v1874_v62 = vld [vmem:[%s3004_s4 + $0xa0] sm:$0xff] }
  0x21   : > { %774 = vmatpush.msra.mxu1 %v1839_v14  ;;  %808 = vmatpush.msra.mxu2 %v1857_v35  ;;  %v1890_v63 = vld [vmem:[%s3004_s4 + $0x170] sm:$0xff]  ;;  %v1873_v0 = vld [vmem:[%s3004_s4 + $0x98] sm:$0xff]  ;;  %v1889_v1 = vld [vmem:[%s3004_s4 + $0x168] sm:$0xff] }
  0x22   : > { %735 = vmatpush.msra.mxu0 %v708_v15  ;;  %v1872_v2 = vld [vmem:[%s3004_s4 + $0x90] sm:$0xff]  ;;  %v1888_v3 = vld [vmem:[%s3004_s4 + $0x160] sm:$0xff]  ;;  %v1871_v4 = vld [vmem:[%s3004_s4 + $0x88] sm:$0xff] }
  0x23   : > { %775 = vmatpush.msra.mxu1 %v1838_v16  ;;  %809 = vmatpush.msra.mxu2 %v1856_v36  ;;  %v1887_v5 = vld [vmem:[%s3004_s4 + $0x158] sm:$0xff]  ;;  %v1870_v6 = vld [vmem:[%s3004_s4 + $0x80] sm:$0xff]  ;;  %v1886_v7 = vld [vmem:[%s3004_s4 + $0x150] sm:$0xff] }
  0x24   : > { %736 = vmatpush.msra.mxu0 %v707_v17  ;;  %v1869_v8 = vld [vmem:[%s3004_s4 + $0x78] sm:$0xff]  ;;  %v1885_v9 = vld [vmem:[%s3004_s4 + $0x148] sm:$0xff]  ;;  %v1868_v10 = vld [vmem:[%s3004_s4 + $0x70] sm:$0xff] }
  0x25   : > { %776 = vmatpush.msra.mxu1 %v1837_v18  ;;  %810 = vmatpush.msra.mxu2 %v1855_v37  ;;  %v1884_v11 = vld [vmem:[%s3004_s4 + $0x140] sm:$0xff]  ;;  %v1867_v12 = vld [vmem:[%s3004_s4 + $0x68] sm:$0xff]  ;;  %v1883_v13 = vld [vmem:[%s3004_s4 + $0x138] sm:$0xff] }
  0x26   : > { %737 = vmatpush.msra.mxu0 %v706_v19  ;;  %v1866_v14 = vld [vmem:[%s3004_s4 + $0x60] sm:$0xff]  ;;  %v1882_v15 = vld [vmem:[%s3004_s4 + $0x130] sm:$0xff]  ;;  %v1881_v16 = vld [vmem:[%s3004_s4 + $0x128] sm:$0xff] }
  0x27   : > { %777 = vmatpush.msra.mxu1 %v1836_v20  ;;  %811 = vmatpush.msra.mxu2 %v1854_v38  ;;  %v1880_v17 = vld [vmem:[%s3004_s4 + $0x120] sm:$0xff]  ;;  %v1903_v32 = vld [vmem:[%s3004_s4 + $0x228] sm:$0xff]  ;;  %v1901_v34 = vld [vmem:[%s3004_s4 + $0x218] sm:$0xff] }
  0x28   : > { %738 = vmatpush.msra.mxu0 %v705_v21  ;;  %v2021_v21 = vld [vmem:[%s3006_s6 + $0x3] ss:$0 sm:$0xff]  ;;  %v1900_v35 = vld [vmem:[%s3004_s4 + $0x210] sm:$0xff]  ;;  %v1899_v36 = vld [vmem:[%s3004_s4 + $0x208] sm:$0xff] }
  0x29   : > { %778 = vmatpush.msra.mxu1 %v1835_v22  ;;  %812 = vmatpush.msra.mxu2 %v1853_v39  ;;  %v1902_v33 = vld [vmem:[%s3004_s4 + $0x220] sm:$0xff]  ;;  %v1897_v38 = vld [vmem:[%s3004_s4 + $0x1f8] sm:$0xff]  ;;  %v1895_v43 = vld [vmem:[%s3004_s4 + $0x1e8] sm:$0xff] }
  0x2a   : > { %739 = vmatpush.msra.mxu0 %v704_v23  ;;  %1848 = vmatmul.msk.f32.vlgmr.msra.gmra.mxu1 %vm720_vm0, %v2275_v24  ;;  %v1898_v37 = vld [vmem:[%s3004_s4 + $0x200] sm:$0xff] }
  0x2b   : > { %1834 = vmatmul.msk.f32.vlgmr.msra.gmra.mxu0 %vm720_vm0, %v2275_v24  ;;  %813 = vmatpush.msra.mxu2 %v1852_v40 }
  0x2c   : > { %951 = vmatpush.msrb.mxu0 %v1891_v50 }
  0x2d   : > { %814 = vmatpush.msra.mxu2 %v1851_v41 }
  0x2e   : > { %952 = vmatpush.msrb.mxu0 %v1890_v63  ;;  %v1914_v63 = vld [vmem:[%s3007_s5 + $0x48] sm:$0xff] }
  0x2f   : > { %815 = vmatpush.msra.mxu2 %v1850_v42  ;;  %v1896_v42 = vld [vmem:[%s3004_s4 + $0x1f0] sm:$0xff] }
  0x30   : > { %953 = vmatpush.msrb.mxu0 %v1889_v1  ;;  %v1912_v1 = vld [vmem:[%s3007_s5 + $0x38] sm:$0xff] }
  0x31   : > { %816 = vmatpush.msra.mxu2 %v1849_v44  ;;  %v1894_v44 = vld [vmem:[%s3004_s4 + $0x1e0] sm:$0xff] }
  0x32   : > { %1862 = vmatmul.msk.f32.vlgmr.msra.gmra.mxu2 %vm720_vm0, %v2275_v24  ;;  %954 = vmatpush.msrb.mxu0 %v1888_v3 }
  0x34   : > { %955 = vmatpush.msrb.mxu0 %v1887_v5  ;;  %v1911_v5 = vld [vmem:[%s3007_s5 + $0x30] sm:$0xff] }
  0x36   : > { %956 = vmatpush.msrb.mxu0 %v1886_v7  ;;  %v2024_v7 = vld [vmem:[%s3008_s27] ss:$0 sm:$0xff] }
  0x38   : > { %957 = vmatpush.msrb.mxu0 %v1885_v9 }
  0x3a   : > { %958 = vmatpush.msrb.mxu0 %v1884_v11 }
  0x3c   : > { %959 = vmatpush.msrb.mxu0 %v1883_v13 }
  0x3e   : > { %960 = vmatpush.msrb.mxu0 %v1882_v15 }
  0x40   : > { %961 = vmatpush.msrb.mxu0 %v1881_v16 }
  0x42   : > { %962 = vmatpush.msrb.mxu0 %v1880_v17 }
  0x43   : > { %1893 = vmatmul.msk.f32.vlgmr.msrb.gmra.mxu0 %vm720_vm0, %v2275_v24 }
  0xa7   : > { %v780_v27 = vpop.f32.mrf.mxu1 }
  0xa8   : > { %v741_v28 = vpop.f32.mrf.mxu0  ;;  %v781_v29 = vadd.f32 %v2018_v25, %v780_v27 }
  0xa9   : > { %v742_v30 = vadd.f32 %v2019_v26, %v741_v28  ;;  %v2022_v26 = vld [vmem:[%s3006_s6 + $0x1] ss:$0 sm:$0xff] }
  0xaa   : > { %1863 = vmatpush.xpose.msk.msrb.mxu1 %vm821_vm1, %v781_v29 }
  0xab   : > { %v744_v31 = vmul.f32 0.14433756, %v742_v30  ;;  %v1905_v30 = vld [vmem:[%s3004_s4 + $0x238] sm:$0xff] }
  0xad   : > { %1864 = vmatmul.msk.f32.vlgmr.msrb.gmra.mxu1 %vm821_vm1, %v744_v31  ;;  %v1904_v31 = vld [vmem:[%s3004_s4 + $0x230] sm:$0xff]  ;;  %s3009_s4 = sld [smem:[#allocation3_spill]] }
  0xae   : > { %989 = vmatpush.msra.mxu1 %v1905_v30  ;;  %v1929_v30 = vld [vmem:[%s2977_s8 + $0x108] sm:$0xff] }
  0xb0   : > { %990 = vmatpush.msra.mxu1 %v1904_v31  ;;  %v1173_v31 = vld [vmem:[%s2977_s8 + $0x48] sm:$0xff] }
  0xb2   : > { %991 = vmatpush.msra.mxu1 %v1903_v32  ;;  %v1928_v32 = vld [vmem:[%s2977_s8 + $0x100] sm:$0xff] }
  0xb3   : > { %s691_s30 = scalar_lea.vmem %s3009_s4, %s2239_s1 }
  0xb4   : > { %992 = vmatpush.msra.mxu1 %v1902_v33  ;;  %v1172_v33 = vld [vmem:[%s2977_s8 + $0x40] sm:$0xff] }
  0xb5   : > { %v818_v55 = vpop.f32.mrf.mxu2 }
  0xb6   : > { %v819_v56 = vadd.f32 %v2020_v54, %v818_v55  ;;  %993 = vmatpush.msra.mxu1 %v1901_v34  ;;  %v889_v55 = vld [vmem:[%s3007_s5 + $0x28] sm:$0xff]  ;;  %v1927_v34 = vld [vmem:[%s2977_s8 + $0xf8] sm:$0xff] }
  0xb8   : > { %879 = vmatpush.msra.mxu3 %v819_v56  ;;  %994 = vmatpush.msra.mxu1 %v1900_v35  ;;  %v888_v56 = vld [vmem:[%s3007_s5 + $0x20] sm:$0xff]  ;;  %v1171_v35 = vld [vmem:[%s2977_s8 + $0x38] sm:$0xff] }
  0xba   : > { %912 = vmatpush.msrb.mxu3 %v1877_v57  ;;  %995 = vmatpush.msra.mxu1 %v1899_v36  ;;  %v887_v57 = vld [vmem:[%s3007_s5 + $0x18] sm:$0xff]  ;;  %v1926_v36 = vld [vmem:[%s2977_s8 + $0xf0] sm:$0xff] }
  0xbc   : > { %913 = vmatpush.msrb.mxu3 %v1876_v59  ;;  %996 = vmatpush.msra.mxu1 %v1898_v37  ;;  %v885_v59 = vld [vmem:[%s3007_s5 + $0x8] sm:$0xff]  ;;  %v1170_v37 = vld [vmem:[%s2977_s8 + $0x30] sm:$0xff] }
  0xbe   : > { %914 = vmatpush.msrb.mxu3 %v1875_v61  ;;  %997 = vmatpush.msra.mxu1 %v1897_v38  ;;  %v1916_v61 = vld [vmem:[%s3007_s5 + $0x58] sm:$0xff]  ;;  %v1925_v38 = vld [vmem:[%s2977_s8 + $0xe8] sm:$0xff] }
  0xc0   : > { %915 = vmatpush.msrb.mxu3 %v1874_v62  ;;  %v964_v22 = vpop.f32.mrf.mxu0  ;;  %998 = vmatpush.msra.mxu1 %v1896_v42  ;;  %v1915_v62 = vld [vmem:[%s3007_s5 + $0x50] sm:$0xff]  ;;  %v1923_v42 = vld [vmem:[%s2977_s8 + $0xd8] sm:$0xff] }
  0xc1   : > { %v965_v23 = vadd.f32 %v2021_v21, %v964_v22 }
  0xc2   : > { %916 = vmatpush.msrb.mxu3 %v1873_v0  ;;  %999 = vmatpush.msra.mxu1 %v1895_v43  ;;  %v1913_v0 = vld [vmem:[%s3007_s5 + $0x40] sm:$0xff]  ;;  %v1167_v43 = vld [vmem:[%s2977_s8 + $0x18] sm:$0xff] }
  0xc3   : > { %1908 = vmatpush.xpose.msk.msrb.mxu2 %vm821_vm1, %v965_v23 }
  0xc4   : > { %917 = vmatpush.msrb.mxu3 %v1872_v2  ;;  %1000 = vmatpush.msra.mxu1 %v1894_v44  ;;  %v1922_v44 = vld [vmem:[%s2977_s8 + $0xd0] sm:$0xff] }
  0xc5   : > { %1907 = vmatmul.msk.f32.vlgmr.msra.gmra.mxu1 %vm720_vm0, %v2275_v24 }
  0xc6   : > { %918 = vmatpush.msrb.mxu3 %v1871_v4 }
  0xc8   : > { %919 = vmatpush.msrb.mxu3 %v1870_v6 }
  0xca   : > { %920 = vmatpush.msrb.mxu3 %v1869_v8 }
  0xcc   : > { %921 = vmatpush.msrb.mxu3 %v1868_v10 }
  0xce   : > { %922 = vmatpush.msrb.mxu3 %v1867_v12 }
  0xd0   : > { %923 = vmatpush.msrb.mxu3 %v1866_v14  ;;  %v2073_v14 = vmov 96.0  }
 0x12a   : > { %v845_v47 = vpop.f32.mrf.mxu1 }
 0x12b   : > { %v848_v48 = vsel %vm703_vm2, %v845_v47, -1e+30 }
 0x12c   : > { %v850_v49 = vsel %vm849_vm3, %v848_v48, -inf }
 0x12d   : > { %851 = vmax.xlane.f32.xlu0 %v850_v49 }
 0x1a0   : > { %v852_v51 = vpop.xlane.xlu0 %851 }
 0x1a1   : > { %v853_v52 = vsub.f32 %v848_v48, %v852_v51 }
 0x1a3   : > { %v854_v53 = vmul.f32 1.442695, %v853_v52  ;;  %v2023_v52 = vld [vmem:[%s3006_s6 + $0x5] ss:$0 sm:$0xff] }
 0x1a5   : > { %2041 = vpow2.f32 %v854_v53  ;;  %v1002_v53 = vpop.f32.mrf.mxu1 }
 0x1a6   : > { %v1003_v54 = vadd.f32 %v2023_v52, %v1002_v53  ;;  %v2603_v52 = vld [vmem:[%s691_s30] sm:$0xff] }
 0x1a8   : > { %1061 = vmatpush.msra.mxu2 %v1003_v54 }
 0x1ab   : > { %v2042_v58 = vpop.eup %2041 }
 0x1ac   : > { %v856_v60 = vsel %vm849_vm3, %v2042_v58, 0.0 }
 0x1ad   : > { %857 = vadd.xlane.f32.xlu0 %v856_v60  ;;  %v884_v60 = vld [vmem:[%s3007_s5] sm:$0xff] }
 0x220   : > { %v858_v18 = vpop.xlane.xlu0 %857 }
 0x221   : > { %2043 = vrcp.f32 %v858_v18 }
 0x227   : > { %v2044_v19 = vpop.eup %2043 }
 0x228   : > { %v860_v20 = vmul.f32 %v2044_v19, %v2042_v58  ;;  %v886_v58 = vld [vmem:[%s3007_s5 + $0x10] sm:$0xff] }
 0x22a   : > { %1865 = vmatmul.msk.f32.vlgmr.msra.gmra.mxu3 %vm849_vm3, %v860_v20 }
 0x22b   : > { %1086 = vmatpush.msra.mxu3 %v1916_v61 }
 0x22d   : > { %1087 = vmatpush.msra.mxu3 %v1915_v62  ;;  %v2025_v62 = vld [vmem:[%s3010_s28] ss:$0 sm:$0xff] }
 0x22f   : > { %1088 = vmatpush.msra.mxu3 %v1914_v63 }
 0x231   : > { %1089 = vmatpush.msra.mxu3 %v1913_v0 }
 0x232   : > { %1879 = vmatmul.msk.f32.vlgmr.msrb.gmra.mxu3 %vm720_vm0, %v2275_v24 }
 0x233   : > { %1090 = vmatpush.msra.mxu3 %v1912_v1  ;;  %v2026_v1 = vld [vmem:[%s2976_s7] ss:$0 sm:$0xff] }
 0x235   : > { %1091 = vmatpush.msra.mxu3 %v1911_v5 }
 0x2ad   : > { %v2422_v25 = vpop.f32.mrf.mxu3 }
 0x2b5   : > { %v925_v27 = vpop.f32.mrf.mxu3 }
 0x2b6   : > { %v926_v28 = vadd.f32 %v2022_v26, %v925_v27  ;;  %v1931_v26 = vld [vmem:[%s2977_s8 + $0x118] sm:$0xff] }
 0x2b7   : > { %1229 = vmatpush.msrb.mxu1 %v1931_v26  ;;  %v1175_v27 = vld [vmem:[%s2977_s8 + $0x58] sm:$0xff] }
 0x2b8   : > { %v928_v29 = vmul.f32 0.14433756, %v926_v28  ;;  %1187 = vmatpush.msra.mxu0 %v1175_v27  ;;  %v1930_v28 = vld [vmem:[%s2977_s8 + $0x110] sm:$0xff]  ;;  %v1976_v27 = vld [vmem:[%s2977_s8 + $0x178] sm:$0xff] }
 0x2b9   : > { %1230 = vmatpush.msrb.mxu1 %v1930_v28 }
 0x2ba   : > { %1909 = vmatmul.msk.f32.vlgmr.msrb.gmra.mxu2 %vm821_vm1, %v928_v29  ;;  %v1174_v29 = vld [vmem:[%s2977_s8 + $0x50] sm:$0xff] }
 0x2bb   : > { %1109 = vmatpush.msrb.mxu2 %v889_v55  ;;  %1188 = vmatpush.msra.mxu0 %v1174_v29 }
 0x2bc   : > { %1231 = vmatpush.msrb.mxu1 %v1929_v30 }
 0x2bd   : > { %1110 = vmatpush.msrb.mxu2 %v888_v56  ;;  %1189 = vmatpush.msra.mxu0 %v1173_v31  ;;  %v2029_v31 = vld [vmem:[%s2978_s9 + $0x4] ss:$0 sm:$0xff] }
 0x2be   : > { %1232 = vmatpush.msrb.mxu1 %v1928_v32 }
 0x2bf   : > { %1111 = vmatpush.msrb.mxu2 %v887_v57  ;;  %1190 = vmatpush.msra.mxu0 %v1172_v33 }
 0x2c0   : > { %1233 = vmatpush.msrb.mxu1 %v1927_v34  ;;  %v1962_v34 = vld [vmem:[%s2977_s8 + $0xb8] sm:$0xff] }
 0x2c1   : > { %1112 = vmatpush.msrb.mxu2 %v886_v58  ;;  %1191 = vmatpush.msra.mxu0 %v1171_v35 }
 0x2c2   : > { %1234 = vmatpush.msrb.mxu1 %v1926_v36  ;;  %v1961_v36 = vld [vmem:[%s2977_s8 + $0xb0] sm:$0xff] }
 0x2c3   : > { %1113 = vmatpush.msrb.mxu2 %v885_v59  ;;  %1192 = vmatpush.msra.mxu0 %v1170_v37 }
 0x2c4   : > { %1235 = vmatpush.msrb.mxu1 %v1925_v38  ;;  %v1960_v38 = vld [vmem:[%s2977_s8 + $0xa8] sm:$0xff] }
 0x2c5   : > { %1114 = vmatpush.msrb.mxu2 %v884_v60 }
 0x33d   : > { %v1028_v39 = vpop.f32.mrf.mxu2 }
 0x33e   : > { %v1031_v40 = vsel %vm703_vm2, %v1028_v39, -1e+30  ;;  %v1169_v39 = vld [vmem:[%s2977_s8 + $0x28] sm:$0xff] }
 0x33f   : > { %v1032_v41 = vsel %vm849_vm3, %v1031_v40, -inf  ;;  %1193 = vmatpush.msra.mxu0 %v1169_v39  ;;  %v1959_v39 = vld [vmem:[%s2977_s8 + $0xa0] sm:$0xff] }
 0x340   : > { %1033 = vmax.xlane.f32.xlu1 %v1032_v41  ;;  %v1168_v41 = vld [vmem:[%s2977_s8 + $0x20] sm:$0xff] }
 0x341   : > { %1194 = vmatpush.msra.mxu0 %v1168_v41  ;;  %v1958_v41 = vld [vmem:[%s2977_s8 + $0x98] sm:$0xff] }
 0x343   : > { %1195 = vmatpush.msra.mxu0 %v1167_v43  ;;  %v1957_v43 = vld [vmem:[%s2977_s8 + $0x90] sm:$0xff] }
 0x3b3   : > { %v1034_v47 = vpop.xlane.xlu1 %1033 }
 0x3b4   : > { %v1035_v48 = vsub.f32 %v1031_v40, %v1034_v47  ;;  %v1924_v40 = vld [vmem:[%s2977_s8 + $0xe0] sm:$0xff]  ;;  %v1166_v47 = vld [vmem:[%s2977_s8 + $0x10] sm:$0xff] }
 0x3b5   : > { %1236 = vmatpush.msrb.mxu1 %v1924_v40  ;;  %1196 = vmatpush.msra.mxu0 %v1166_v47  ;;  %v1975_v40 = vld [vmem:[%s2977_s8 + $0x170] sm:$0xff]  ;;  %v1956_v47 = vld [vmem:[%s2977_s8 + $0x88] sm:$0xff] }
 0x3b6   : > { %v1036_v49 = vmul.f32 1.442695, %v1035_v48  ;;  %v1921_v48 = vld [vmem:[%s2977_s8 + $0xc8] sm:$0xff] }
 0x3b7   : > { %1237 = vmatpush.msrb.mxu1 %v1923_v42  ;;  %v1974_v42 = vld [vmem:[%s2977_s8 + $0x168] sm:$0xff] }
 0x3b8   : > { %2045 = vpow2.f32 %v1036_v49  ;;  %v1165_v49 = vld [vmem:[%s2977_s8 + $0x8] sm:$0xff] }
 0x3b9   : > { %1238 = vmatpush.msrb.mxu1 %v1922_v44  ;;  %1197 = vmatpush.msra.mxu0 %v1165_v49  ;;  %v1973_v44 = vld [vmem:[%s2977_s8 + $0x160] sm:$0xff] }
 0x3ba   : > { %v1955_v49 = vld [vmem:[%s2977_s8 + $0x80] sm:$0xff] }
 0x3bb   : > { %1239 = vmatpush.msrb.mxu1 %v1921_v48  ;;  %v1972_v48 = vld [vmem:[%s2977_s8 + $0x158] sm:$0xff] }
 0x3be   : > { %v2046_v50 = vpop.eup %2045 }
 0x3bf   : > { %v1038_v51 = vsel %vm849_vm3, %v2046_v50, 0.0 }
 0x3c0   : > { %1039 = vadd.xlane.f32.xlu1 %v1038_v51  ;;  %v1164_v51 = vld [vmem:[%s2977_s8] sm:$0xff] }
 0x3c1   : > { %1198 = vmatpush.msra.mxu0 %v1164_v51  ;;  %v1954_v51 = vld [vmem:[%s2977_s8 + $0x78] sm:$0xff] }
 0x3c3   : > { %1411 = vmatpush.msrb.mxu0 %v1976_v27 }
 0x3c5   : > { %1412 = vmatpush.msrb.mxu0 %v1975_v40  ;;  %v1998_v40 = vld [vmem:[%s2979_s10 + $0x40] sm:$0xff] }
 0x3c7   : > { %1413 = vmatpush.msrb.mxu0 %v1974_v42 }
 0x3c9   : > { %1414 = vmatpush.msrb.mxu0 %v1973_v44 }
 0x3cb   : > { %1415 = vmatpush.msrb.mxu0 %v1972_v48 }
 0x433   : > { %v1040_v2 = vpop.xlane.xlu1 %1039 }
 0x434   : > { %2047 = vrcp.f32 %v1040_v2 }
 0x435   : > { %2049 = vrcp.f32 %v2073_v14  ;;  %v1942_v14 = vld [vmem:[%s2977_s8 + $0x1c0] sm:$0xff] }
 0x43a   : > { %v2048_v3 = vpop.eup %2047 }
 0x43b   : > { %v1042_v4 = vmul.f32 %v2048_v3, %v2046_v50  ;;  %v2050_v15 = vpop.eup %2049  ;;  %v1920_v50 = vld [vmem:[%s2977_s8 + $0xc0] sm:$0xff] }
 0x43c   : > { %v1130_v16 = vmul.f32 96.0, %v2050_v15  ;;  %vm1134_vm4 = vweird.f32 %v2050_v15  ;;  %1240 = vmatpush.msrb.mxu1 %v1920_v50  ;;  %v1971_v50 = vld [vmem:[%s2977_s8 + $0x150] sm:$0xff] }
 0x43d   : > { %1910 = vmatmul.msk.f32.vlgmr.msra.gmra.mxu2 %vm849_vm3, %v1042_v4  ;;  %1933 = vmatmul.msk.f32.vlgmr.msrb.gmra.mxu1 %vm720_vm0, %v2603_v52  ;;  %v2027_v4 = vld [vmem:[%s2978_s9 + $0x2] ss:$0 sm:$0xff] }
 0x43e   : > { %v1131_v17 = vsub.f32 1.0, %v1130_v16  ;;  %v1940_v16 = vld [vmem:[%s2977_s8 + $0x1b0] sm:$0xff]  ;;  %1416 = vmatpush.msrb.mxu0 %v1971_v50 }
 0x440   : > { %v1132_v18 = vmul.f32 %v2050_v15, %v1131_v17  ;;  %v1939_v17 = vld [vmem:[%s2977_s8 + $0x1a8] sm:$0xff] }
 0x442   : > { %v1133_v19 = vadd.f32 %v2050_v15, %v1132_v18  ;;  %v1938_v18 = vld [vmem:[%s2977_s8 + $0x1a0] sm:$0xff] }
 0x444   : > { %v2519_v20 = vsel %vm1134_vm4, %v2050_v15, %v1133_v19  ;;  %v1941_v15 = vld [vmem:[%s2977_s8 + $0x1b8] sm:$0xff] }
 0x445   : > { %1918 = vmatmul.msk.f32.vlgmr.msrb.gmra.mxu2 %vm821_vm1, %v2422_v25  ;;  %v1937_v19 = vld [vmem:[%s2977_s8 + $0x198] sm:$0xff] }
 0x4ba   : > { %v1242_v5 = vpop.f32.mrf.mxu1 }
 0x4c0   : > { %v1063_v6 = vpop.f32.mrf.mxu2 }
 0x4c1   : > { %1917 = vmatmul.msk.f32.vlgmr.msra.gmra.mxu3 %vm821_vm1, %v1063_v6  ;;  %v1243_v6 = vadd.f32 %v2027_v4, %v1242_v5  ;;  %v1347_v4 = vld [vmem:[%s2979_s10 + $0x18] sm:$0xff]  ;;  %v1346_v5 = vld [vmem:[%s2979_s10 + $0x10] sm:$0xff] }
 0x4c3   : > { %1948 = vmatpush.xpose.msk.msra.mxu2 %vm821_vm1, %v1243_v6  ;;  %v1345_v6 = vld [vmem:[%s2979_s10 + $0x8] sm:$0xff] }
 0x4c8   : > { %v1116_v8 = vpop.f32.mrf.mxu2 }
 0x544   : > { %v1093_v9 = vpop.f32.mrf.mxu3 }
 0x545   : > { %v1117_v10 = vadd.f32 %v1116_v8, %v1093_v9 }
 0x547   : > { %v1122_v11 = vadd.f32 %v2024_v7, %v1117_v10  ;;  %v2028_v7 = vld [vmem:[%s2978_s9] ss:$0 sm:$0xff] }
 0x549   : > { %v1123_v12 = vadd.f32 %v1122_v11, %v2275_v24  ;;  %v1945_v11 = vld [vmem:[%s2977_s8 + $0x1d8] sm:$0xff] }
 0x54a   : > { %1267 = vmatpush.msrb.mxu3 %v1945_v11 }
 0x54b   : > { %v1126_v13 = vsel %vm720_vm0, %v1123_v12, 0.0 }
 0x54c   : > { %1127 = vadd.xlane.f32.xlu2 %v1126_v13  ;;  %v1943_v13 = vld [vmem:[%s2977_s8 + $0x1c8] sm:$0xff] }
 0x5bf   : > { %v1128_v21 = vpop.xlane.xlu2 %1127 }
 0x5c0   : > { %v1136_v22 = vmul.f32 %v2519_v20, %v1128_v21  ;;  %v1936_v21 = vld [vmem:[%s2977_s8 + $0x190] sm:$0xff] }
 0x5c2   : > { %v2522_v23 = vsub.f32 %v1123_v12, %v1136_v22  ;;  %v1944_v12 = vld [vmem:[%s2977_s8 + $0x1d0] sm:$0xff]  ;;  %v1935_v22 = vld [vmem:[%s2977_s8 + $0x188] sm:$0xff] }
 0x5c3   : > { %1268 = vmatpush.msrb.mxu3 %v1944_v12  ;;  %v2031_v12 = vld [vmem:[%s2978_s9 + $0x1] ss:$0 sm:$0xff] }
 0x5c4   : > { %v1138_v24 = vmul.f32 %v2522_v23, %v2522_v23 }
 0x5c5   : > { %1269 = vmatpush.msrb.mxu3 %v1943_v13 }
 0x5c6   : > { %v1139_v25 = vsel %vm720_vm0, %v1138_v24, 0.0 }
 0x5c7   : > { %1140 = vadd.xlane.f32.xlu2 %v1139_v25  ;;  %1270 = vmatpush.msrb.mxu3 %v1942_v14 }
 0x5c9   : > { %1271 = vmatpush.msrb.mxu3 %v1941_v15 }
 0x5cb   : > { %1272 = vmatpush.msrb.mxu3 %v1940_v16  ;;  %v1990_v16 = vld [vmem:[%s2977_s8 + $0x238] sm:$0xff] }
 0x5cc   : > { %1449 = vmatpush.msra.mxu1 %v1990_v16 }
 0x5cd   : > { %1273 = vmatpush.msrb.mxu3 %v1939_v17  ;;  %v1989_v17 = vld [vmem:[%s2977_s8 + $0x230] sm:$0xff] }
 0x5ce   : > { %1450 = vmatpush.msra.mxu1 %v1989_v17 }
 0x5cf   : > { %1274 = vmatpush.msrb.mxu3 %v1938_v18  ;;  %v1988_v18 = vld [vmem:[%s2977_s8 + $0x228] sm:$0xff] }
 0x5d0   : > { %1451 = vmatpush.msra.mxu1 %v1988_v18 }
 0x5d1   : > { %1275 = vmatpush.msrb.mxu3 %v1937_v19  ;;  %v1987_v19 = vld [vmem:[%s2977_s8 + $0x220] sm:$0xff] }
 0x5d2   : > { %1452 = vmatpush.msra.mxu1 %v1987_v19 }
 0x5d3   : > { %1276 = vmatpush.msrb.mxu3 %v1936_v21  ;;  %v1986_v21 = vld [vmem:[%s2977_s8 + $0x218] sm:$0xff] }
 0x5d4   : > { %1453 = vmatpush.msra.mxu1 %v1986_v21  ;;  %v2034_v21 = vld [vmem:[%s2981_s12] ss:$0 sm:$0xff] }
 0x5d5   : > { %1277 = vmatpush.msrb.mxu3 %v1935_v22  ;;  %v1985_v22 = vld [vmem:[%s2977_s8 + $0x210] sm:$0xff] }
 0x5d6   : > { %1454 = vmatpush.msra.mxu1 %v1985_v22 }
 0x63a   : > { %v1141_v53 = vpop.xlane.xlu2 %1140 }
 0x63b   : > { %v1142_v54 = vmul.f32 %v1141_v53, %v2519_v20  ;;  %v1970_v53 = vld [vmem:[%s2977_s8 + $0x148] sm:$0xff] }
 0x63c   : > { %1417 = vmatpush.msrb.mxu0 %v1970_v53 }
 0x63d   : > { %v1143_v55 = vadd.f32 1e-05, %v1142_v54  ;;  %v1953_v54 = vld [vmem:[%s2977_s8 + $0x70] sm:$0xff] }
 0x63f   : > { %2051 = vrsqrt.f32 %v1143_v55  ;;  %vm1150_vm6 = vweird.f32 %v1143_v55 }
 0x645   : > { %v2052_v56 = vpop.eup %2051 }
 0x646   : > { %v1145_v57 = vmul.f32 %v2052_v56, %v1143_v55  ;;  %vm1151_vm5 = vweird.f32 %v2052_v56  ;;  %v1969_v55 = vld [vmem:[%s2977_s8 + $0x140] sm:$0xff] }
 0x647   : > { %vm1152_vm7 = vmor %vm1150_vm6, %vm1151_vm5  ;;  %1418 = vmatpush.msrb.mxu0 %v1969_v55 }
 0x648   : > { %v1146_v58 = vmul.f32 %v2052_v56, %v1145_v57  ;;  %v1968_v57 = vld [vmem:[%s2977_s8 + $0x138] sm:$0xff] }
 0x649   : > { %1419 = vmatpush.msrb.mxu0 %v1968_v57 }
 0x64a   : > { %v1147_v59 = vmul.f32 0.5, %v1146_v58  ;;  %v1951_v58 = vld [vmem:[%s2977_s8 + $0x60] sm:$0xff] }
 0x64c   : > { %v1148_v60 = vsub.f32 1.5, %v1147_v59  ;;  %v1967_v59 = vld [vmem:[%s2977_s8 + $0x130] sm:$0xff] }
 0x64d   : > { %1420 = vmatpush.msrb.mxu0 %v1967_v59 }
 0x64e   : > { %v1149_v61 = vmul.f32 %v2052_v56, %v1148_v60  ;;  %v1966_v60 = vld [vmem:[%s2977_s8 + $0x128] sm:$0xff] }
 0x64f   : > { %1421 = vmatpush.msrb.mxu0 %v1966_v60 }
 0x650   : > { %v1153_v63 = vsel %vm1152_vm7, %v2052_v56, %v1149_v61  ;;  %v1952_v56 = vld [vmem:[%s2977_s8 + $0x68] sm:$0xff]  ;;  %v1965_v61 = vld [vmem:[%s2977_s8 + $0x120] sm:$0xff] }
 0x651   : > { %v1154_v0 = vmul.f32 %v1153_v63, %v2522_v23  ;;  %v1934_v23 = vld [vmem:[%s2977_s8 + $0x180] sm:$0xff]  ;;  %1422 = vmatpush.msrb.mxu0 %v1965_v61 }
 0x652   : > { %1278 = vmatpush.msrb.mxu3 %v1934_v23  ;;  %v1984_v23 = vld [vmem:[%s2977_s8 + $0x208] sm:$0xff] }
 0x653   : > { %v1158_v2 = vmul.f32 %v2025_v62, %v1154_v0  ;;  %1947 = vmatmul.msk.f32.vlgmr.msrb.gmra.mxu3 %vm720_vm0, %v2603_v52  ;;  %1455 = vmatpush.msra.mxu1 %v1984_v23 }
 0x655   : > { %v2615_v3 = vadd.f32 %v2026_v1, %v1158_v2  ;;  %v1349_v1 = vld [vmem:[%s2979_s10 + $0x28] sm:$0xff]  ;;  %v1348_v2 = vld [vmem:[%s2979_s10 + $0x20] sm:$0xff] }
 0x657   : > { %1919 = vmatmul.msk.f32.vlgmr.msra.gmra.mxu0 %vm720_vm0, %v2615_v3 }
 0x65f   : > { %1978 = vmatmul.msk.f32.vlgmr.msrb.gmra.mxu0 %vm720_vm0, %v2603_v52 }
 0x6d4   : > { %v1200_v8 = vpop.f32.mrf.mxu0 }
 0x6d5   : > { %v1201_v9 = vadd.f32 %v2028_v7, %v1200_v8  ;;  %v1344_v7 = vld [vmem:[%s2979_s10] sm:$0xff] }
 0x6d6   : > { %v1280_v32 = vpop.f32.mrf.mxu3  ;;  %v2030_v8 = vld [vmem:[%s2978_s9 + $0x3] ss:$0 sm:$0xff] }
 0x6d7   : > { %v1203_v10 = vmul.f32 0.14433756, %v1201_v9  ;;  %v1281_v33 = vadd.f32 %v2029_v31, %v1280_v32  ;;  %v1979_v31 = vld [vmem:[%s2977_s8 + $0x1e0] sm:$0xff] }
 0x6d9   : > { %1949 = vmatmul.msk.f32.vlgmr.msra.gmra.mxu2 %vm821_vm1, %v1203_v10 }
 0x6da   : > { %1339 = vmatpush.msrb.mxu2 %v1281_v33 }
 0x6dc   : > { %1372 = vmatpush.msra.mxu2 %v1962_v34  ;;  %v1424_v9 = vpop.f32.mrf.mxu0 }
 0x6dd   : > { %v1425_v10 = vadd.f32 %v2030_v8, %v1424_v9  ;;  %v1617_v8 = vld [vmem:[%s2983_s14 + $0x8] sm:$0xff]  ;;  %v1616_v9 = vld [vmem:[%s2983_s14] sm:$0xff] }
 0x6de   : > { %1373 = vmatpush.msra.mxu2 %v1961_v36 }
 0x6df   : > { %1993 = vmatpush.xpose.msk.msra.mxu3 %vm821_vm1, %v1425_v10  ;;  %v1659_v10 = vld [vmem:[%s2985_s16 + $0x18] sm:$0xff] }
 0x6e0   : > { %1374 = vmatpush.msra.mxu2 %v1960_v38  ;;  %v2001_v38 = vld [vmem:[%s2979_s10 + $0x58] sm:$0xff] }
 0x6e2   : > { %1375 = vmatpush.msra.mxu2 %v1959_v39  ;;  %v1999_v39 = vld [vmem:[%s2979_s10 + $0x48] sm:$0xff] }
 0x6e4   : > { %1376 = vmatpush.msra.mxu2 %v1958_v41  ;;  %v1997_v41 = vld [vmem:[%s2979_s10 + $0x38] sm:$0xff] }
 0x6e6   : > { %1377 = vmatpush.msra.mxu2 %v1957_v43 }
 0x6e8   : > { %1378 = vmatpush.msra.mxu2 %v1956_v47  ;;  %v1996_v47 = vld [vmem:[%s2979_s10 + $0x30] sm:$0xff] }
 0x6ea   : > { %1379 = vmatpush.msra.mxu2 %v1955_v49  ;;  %v2033_v49 = vld [vmem:[%s2980_s11] ss:$0 sm:$0xff] }
 0x6ec   : > { %1380 = vmatpush.msra.mxu2 %v1954_v51 }
 0x6ee   : > { %1381 = vmatpush.msra.mxu2 %v1953_v54 }
 0x6f0   : > { %1382 = vmatpush.msra.mxu2 %v1952_v56 }
 0x6f2   : > { %1383 = vmatpush.msra.mxu2 %v1951_v58 }
 0x75c   : > { %v1306_v24 = vpop.f32.mrf.mxu2 }
 0x75d   : > { %v1309_v25 = vsel %vm703_vm2, %v1306_v24, -1e+30  ;;  %v1983_v24 = vld [vmem:[%s2977_s8 + $0x200] sm:$0xff] }
 0x75e   : > { %v1310_v26 = vsel %vm849_vm3, %v1309_v25, -inf  ;;  %1456 = vmatpush.msra.mxu1 %v1983_v24  ;;  %v2035_v24 = vld [vmem:[%s2982_s13] ss:$0 sm:$0xff] }
 0x75f   : > { %1311 = vmax.xlane.f32.xlu0 %v1310_v26 }
 0x7d2   : > { %v1312_v28 = vpop.xlane.xlu0 %1311 }
 0x7d3   : > { %v1313_v29 = vsub.f32 %v1309_v25, %v1312_v28  ;;  %v1982_v25 = vld [vmem:[%s2977_s8 + $0x1f8] sm:$0xff] }
 0x7d4   : > { %1457 = vmatpush.msra.mxu1 %v1982_v25 }
 0x7d5   : > { %v1314_v30 = vmul.f32 1.442695, %v1313_v29  ;;  %v1981_v29 = vld [vmem:[%s2977_s8 + $0x1f0] sm:$0xff] }
 0x7d6   : > { %1458 = vmatpush.msra.mxu1 %v1981_v29  ;;  %v1656_v29 = vld [vmem:[%s2985_s16] sm:$0xff] }
 0x7d7   : > { %2053 = vpow2.f32 %v1314_v30  ;;  %v1980_v30 = vld [vmem:[%s2977_s8 + $0x1e8] sm:$0xff] }
 0x7d8   : > { %1459 = vmatpush.msra.mxu1 %v1980_v30  ;;  %v2036_v30 = vld [vmem:[%s2984_s15] ss:$0 sm:$0xff] }
 0x7da   : > { %1460 = vmatpush.msra.mxu1 %v1979_v31 }
 0x7db   : > { %1992 = vmatmul.msk.f32.vlgmr.msra.gmra.mxu1 %vm720_vm0, %v2603_v52  ;;  %v2000_v52 = vld [vmem:[%s2979_s10 + $0x50] sm:$0xff] }
 0x7dc   : > { %1680 = vmatpush.msrb.mxu1 %v1659_v10 }
 0x7dd   : > { %v2054_v35 = vpop.eup %2053 }
 0x7de   : > { %v1316_v37 = vsel %vm849_vm3, %v2054_v35, 0.0 }
 0x7df   : > { %1317 = vadd.xlane.f32.xlu1 %v1316_v37 }
 0x852   : > { %v1318_v62 = vpop.xlane.xlu1 %1317 }
 0x853   : > { %2055 = vrcp.f32 %v1318_v62  ;;  %v1627_v62 = vld [vmem:[%s2983_s14 + $0x58] sm:$0xff] }
 0x854   : > { %1639 = vmatpush.msra.mxu0 %v1627_v62 }
 0x858   : > { %v1462_v36 = vpop.f32.mrf.mxu1 }
 0x859   : > { %v2056_v63 = vpop.eup %2055 }
 0x85a   : > { %v1320_v0 = vmul.f32 %v2056_v63, %v2054_v35  ;;  %v2032_v35 = vld [vmem:[%s2978_s9 + $0x5] ss:$0 sm:$0xff]  ;;  %v1625_v63 = vld [vmem:[%s2983_s14 + $0x48] sm:$0xff] }
 0x85b   : > { %v1463_v37 = vadd.f32 %v2032_v35, %v1462_v36 }
 0x85c   : > { %1950 = vmatmul.msk.f32.vlgmr.msrb.gmra.mxu2 %vm849_vm3, %v1320_v0  ;;  %v1624_v0 = vld [vmem:[%s2983_s14 + $0x40] sm:$0xff] }
 0x85d   : > { %1569 = vmatpush.msrb.mxu2 %v1349_v1  ;;  %1521 = vmatpush.msrb.mxu3 %v1463_v37  ;;  %v1623_v1 = vld [vmem:[%s2983_s14 + $0x38] sm:$0xff] }
 0x85f   : > { %1570 = vmatpush.msrb.mxu2 %v1348_v2  ;;  %v1622_v2 = vld [vmem:[%s2983_s14 + $0x30] sm:$0xff] }
 0x861   : > { %1571 = vmatpush.msrb.mxu2 %v1347_v4  ;;  %v1621_v4 = vld [vmem:[%s2983_s14 + $0x28] sm:$0xff] }
 0x863   : > { %1572 = vmatpush.msrb.mxu2 %v1346_v5  ;;  %v1620_v5 = vld [vmem:[%s2983_s14 + $0x20] sm:$0xff] }
 0x864   : > { %1964 = vmatmul.msk.f32.vlgmr.msra.gmra.mxu2 %vm720_vm0, %v2615_v3 }
 0x865   : > { %1573 = vmatpush.msrb.mxu2 %v1345_v6  ;;  %v1619_v6 = vld [vmem:[%s2983_s14 + $0x18] sm:$0xff] }
 0x867   : > { %1574 = vmatpush.msrb.mxu2 %v1344_v7  ;;  %v1618_v7 = vld [vmem:[%s2983_s14 + $0x10] sm:$0xff] }
 0x8df   : > { %v1341_v11 = vpop.f32.mrf.mxu2 }
 0x8e0   : > { %2003 = vmatmul.msk.f32.vlgmr.msrb.gmra.mxu2 %vm821_vm1, %v1341_v11 }
 0x8e7   : > { %v1385_v13 = vpop.f32.mrf.mxu2 }
 0x8e8   : > { %v1386_v14 = vadd.f32 %v2031_v12, %v1385_v13 }
 0x8ea   : > { %v1388_v15 = vmul.f32 0.14433756, %v1386_v14 }
 0x8ec   : > { %1994 = vmatmul.msk.f32.vlgmr.msra.gmra.mxu3 %vm821_vm1, %v1388_v15 }
 0x8ed   : > { %1546 = vmatpush.msra.mxu3 %v2001_v38 }
 0x8ef   : > { %1547 = vmatpush.msra.mxu3 %v2000_v52 }
 0x8f1   : > { %1548 = vmatpush.msra.mxu3 %v1999_v39 }
 0x8f3   : > { %1549 = vmatpush.msra.mxu3 %v1998_v40 }
 0x8f5   : > { %1550 = vmatpush.msra.mxu3 %v1997_v41  ;;  %v1732_v41 = vld [vmem:[%s2989_s20 + $0x58] sm:$0xff] }
 0x8f7   : > { %1551 = vmatpush.msra.mxu3 %v1996_v47  ;;  %v1728_v47 = vld [vmem:[%s2989_s20 + $0x38] sm:$0xff] }
 0x963   : > { %v1576_v50 = vpop.f32.mrf.mxu2 }
 0x96f   : > { %v1488_v26 = vpop.f32.mrf.mxu3 }
 0x970   : > { %v1491_v27 = vsel %vm703_vm2, %v1488_v26, -1e+30 }
 0x971   : > { %v1492_v28 = vsel %vm849_vm3, %v1491_v27, -inf }
 0x972   : > { %1493 = vmax.xlane.f32.xlu2 %v1492_v28  ;;  %v1657_v28 = vld [vmem:[%s2985_s16 + $0x8] sm:$0xff] }
 0x9e5   : > { %v1494_v45 = vpop.xlane.xlu2 %1493 }
 0x9e6   : > { %v1495_v46 = vsub.f32 %v1491_v27, %v1494_v45  ;;  %v1658_v27 = vld [vmem:[%s2985_s16 + $0x10] sm:$0xff] }
 0x9e7   : > { %1681 = vmatpush.msrb.mxu1 %v1658_v27 }
 0x9e8   : > { %v1496_v32 = vmul.f32 1.442695, %v1495_v46 }
 0x9e9   : > { %1682 = vmatpush.msrb.mxu1 %v1657_v28 }
 0x9ea   : > { %2057 = vpow2.f32 %v1496_v32  ;;  %v2037_v32 = vld [vmem:[%s2986_s17] ss:$0 sm:$0xff] }
 0x9eb   : > { %1683 = vmatpush.msrb.mxu1 %v1656_v29 }
 0x9f0   : > { %v2058_v33 = vpop.eup %2057 }
 0x9f1   : > { %v1498_v34 = vsel %vm849_vm3, %v2058_v33, 0.0 }
 0x9f2   : > { %1499 = vadd.xlane.f32.xlu0 %v1498_v34 }
 0xa65   : > { %v1500_v42 = vpop.xlane.xlu0 %1499 }
 0xa66   : > { %2059 = vrcp.f32 %v1500_v42  ;;  %v1731_v42 = vld [vmem:[%s2989_s20 + $0x50] sm:$0xff] }
 0xa6c   : > { %v2060_v43 = vpop.eup %2059 }
 0xa6d   : > { %v1502_v44 = vmul.f32 %v2060_v43, %v2058_v33  ;;  %v1730_v43 = vld [vmem:[%s2989_s20 + $0x48] sm:$0xff] }
 0xa6f   : > { %1995 = vmatmul.msk.f32.vlgmr.msrb.gmra.mxu3 %vm849_vm3, %v1502_v44  ;;  %v1729_v44 = vld [vmem:[%s2989_s20 + $0x40] sm:$0xff] }
 0xa70   : > { %1744 = vmatpush.msrb.mxu3 %v1732_v41 }
 0xa72   : > { %1745 = vmatpush.msrb.mxu3 %v1731_v42 }
 0xa74   : > { %1746 = vmatpush.msrb.mxu3 %v1730_v43 }
 0xa76   : > { %1747 = vmatpush.msrb.mxu3 %v1729_v44 }
 0xa78   : > { %1748 = vmatpush.msrb.mxu3 %v1728_v47 }
 0xaf2   : > { %v1523_v48 = vpop.f32.mrf.mxu3 }
 0xaf3   : > { %2002 = vmatmul.msk.f32.vlgmr.msra.gmra.mxu3 %vm821_vm1, %v1523_v48  ;;  %v1727_v48 = vld [vmem:[%s2989_s20 + $0x30] sm:$0xff] }
 0xaf4   : > { %1749 = vmatpush.msrb.mxu3 %v1727_v48 }
 0xb76   : > { %v1553_v51 = vpop.f32.mrf.mxu3 }
 0xb77   : > { %v1577_v53 = vadd.f32 %v1576_v50, %v1553_v51  ;;  %v1725_v50 = vld [vmem:[%s2989_s20 + $0x20] sm:$0xff]  ;;  %v1724_v51 = vld [vmem:[%s2989_s20 + $0x18] sm:$0xff] }
 0xb79   : > { %v1582_v54 = vadd.f32 %v2033_v49, %v1577_v53  ;;  %v1726_v49 = vld [vmem:[%s2989_s20 + $0x28] sm:$0xff]  ;;  %v1723_v53 = vld [vmem:[%s2989_s20 + $0x10] sm:$0xff] }
 0xb7a   : > { %1750 = vmatpush.msrb.mxu3 %v1726_v49 }
 0xb7b   : > { %v1583_v55 = vadd.f32 %v1582_v54, %v2615_v3  ;;  %v1626_v3 = vld [vmem:[%s2983_s14 + $0x50] sm:$0xff]  ;;  %v1722_v54 = vld [vmem:[%s2989_s20 + $0x8] sm:$0xff] }
 0xb7c   : > { %1640 = vmatpush.msra.mxu0 %v1626_v3  ;;  %1751 = vmatpush.msrb.mxu3 %v1725_v50 }
 0xb7d   : > { %v1586_v56 = vsel %vm720_vm0, %v1583_v55, 0.0 }
 0xb7e   : > { %1587 = vadd.xlane.f32.xlu1 %v1586_v56  ;;  %1641 = vmatpush.msra.mxu0 %v1625_v63 }
 0xb7f   : > { %1752 = vmatpush.msrb.mxu3 %v1724_v51 }
 0xb80   : > { %1642 = vmatpush.msra.mxu0 %v1624_v0  ;;  %v2038_v0 = vld [vmem:[%s2987_s18] ss:$0 sm:$0xff] }
 0xb81   : > { %1753 = vmatpush.msrb.mxu3 %v1723_v53 }
 0xb82   : > { %1643 = vmatpush.msra.mxu0 %v1623_v1 }
 0xb83   : > { %1754 = vmatpush.msrb.mxu3 %v1722_v54 }
 0xb84   : > { %1644 = vmatpush.msra.mxu0 %v1622_v2 }
 0xb86   : > { %1645 = vmatpush.msra.mxu0 %v1621_v4 }
 0xb88   : > { %1646 = vmatpush.msra.mxu0 %v1620_v5 }
 0xb8a   : > { %1647 = vmatpush.msra.mxu0 %v1619_v6  ;;  %v2040_v6 = vld [vmem:[%s2990_s21] ss:$0 sm:$0xff] }
 0xb8c   : > { %1648 = vmatpush.msra.mxu0 %v1618_v7 }
 0xb8e   : > { %1649 = vmatpush.msra.mxu0 %v1617_v8 }
 0xb90   : > { %1650 = vmatpush.msra.mxu0 %v1616_v9 }
 0xbf1   : > { %v1588_v57 = vpop.xlane.xlu1 %1587 }
 0xbf2   : > { %v1589_v58 = vmul.f32 %v1588_v57, %v2519_v20 }
 0xbf4   : > { %v1590_v59 = vsub.f32 %v1583_v55, %v1589_v58  ;;  %v1721_v55 = vld [vmem:[%s2989_s20] sm:$0xff] }
 0xbf5   : > { %1755 = vmatpush.msrb.mxu3 %v1721_v55 }
 0xbf6   : > { %v1591_v60 = vmul.f32 %v1590_v59, %v1590_v59 }
 0xbf8   : > { %v1592_v61 = vsel %vm720_vm0, %v1591_v60, 0.0 }
 0xbf9   : > { %1593 = vadd.xlane.f32.xlu2 %v1592_v61 }
 0xc6c   : > { %v1594_v11 = vpop.xlane.xlu2 %1593 }
 0xc6d   : > { %v1595_v12 = vmul.f32 %v1594_v11, %v2519_v20 }
 0xc6f   : > { %v1596_v13 = vadd.f32 1e-05, %v1595_v12 }
 0xc71   : > { %2061 = vrsqrt.f32 %v1596_v13  ;;  %vm1603_vm9 = vweird.f32 %v1596_v13 }
 0xc77   : > { %v2062_v14 = vpop.eup %2061 }
 0xc78   : > { %v1598_v15 = vmul.f32 %v2062_v14, %v1596_v13  ;;  %vm1604_vm8 = vweird.f32 %v2062_v14 }
 0xc79   : > { %vm1605_vm10 = vmor %vm1603_vm9, %vm1604_vm8 }
 0xc7a   : > { %v1599_v16 = vmul.f32 %v2062_v14, %v1598_v15 }
 0xc7c   : > { %v1600_v17 = vmul.f32 0.5, %v1599_v16 }
 0xc7e   : > { %v1601_v18 = vsub.f32 1.5, %v1600_v17 }
 0xc80   : > { %v1602_v19 = vmul.f32 %v2062_v14, %v1601_v18 }
 0xc82   : > { %v1606_v22 = vsel %vm1605_vm10, %v2062_v14, %v1602_v19 }
 0xc83   : > { %v1607_v23 = vmul.f32 %v1606_v22, %v1590_v59 }
 0xc85   : > { %v1611_v25 = vmul.f32 %v2034_v21, %v1607_v23 }
 0xc87   : > { %v1615_v26 = vadd.f32 %v2035_v24, %v1611_v25 }
 0xc89   : > { %2004 = vmatmul.msk.f32.vlgmr.msra.gmra.mxu0 %vm720_vm0, %v1615_v26 }
 0xd06   : > { %v1652_v31 = vpop.f32.mrf.mxu0 }
 0xd07   : > { %v1653_v45 = vadd.f32 %v2036_v30, %v1652_v31 }
 0xd09   : > { %v1655_v46 = vmax.f32 %v1653_v45, 0.0 }
 0xd0b   : > { %2005 = vmatmul.msk.f32.vlgmr.msrb.gmra.mxu1 %vm1664_vm11, %v1655_v46 }
 0xd88   : > { %v1685_v33 = vpop.f32.mrf.mxu1 }
 0xd89   : > { %v1686_v34 = vadd.f32 %v2037_v32, %v1685_v33 }
 0xd8b   : > { %v1688_v35 = vadd.f32 %v1686_v34, %v1615_v26 }
 0xd8d   : > { %v1691_v36 = vsel %vm720_vm0, %v1688_v35, 0.0 }
 0xd8e   : > { %1692 = vadd.xlane.f32.xlu0 %v1691_v36 }
 0xe01   : > { %v1693_v37 = vpop.xlane.xlu0 %1692 }
 0xe02   : > { %v1694_v38 = vmul.f32 %v1693_v37, %v2519_v20 }
 0xe04   : > { %v1695_v52 = vsub.f32 %v1688_v35, %v1694_v38 }
 0xe06   : > { %v1696_v39 = vmul.f32 %v1695_v52, %v1695_v52 }
 0xe08   : > { %v1697_v40 = vsel %vm720_vm0, %v1696_v39, 0.0 }
 0xe09   : > { %1698 = vadd.xlane.f32.xlu1 %v1697_v40 }
 0xe7c   : > { %v1699_v56 = vpop.xlane.xlu1 %1698 }
 0xe7d   : > { %v1700_v57 = vmul.f32 %v1699_v56, %v2519_v20  ;;  %v2039_v20 = vld [vmem:[%s2988_s19] ss:$0 sm:$0xff] }
 0xe7f   : > { %v1701_v58 = vadd.f32 1e-05, %v1700_v57 }
 0xe81   : > { %2063 = vrsqrt.f32 %v1701_v58  ;;  %vm1708_vm13 = vweird.f32 %v1701_v58 }
 0xe87   : > { %v2064_v59 = vpop.eup %2063 }
 0xe88   : > { %v1703_v60 = vmul.f32 %v2064_v59, %v1701_v58  ;;  %vm1709_vm12 = vweird.f32 %v2064_v59 }
 0xe89   : > { %vm1710_vm14 = vmor %vm1708_vm13, %vm1709_vm12 }
 0xe8a   : > { %v1704_v61 = vmul.f32 %v2064_v59, %v1703_v60 }
 0xe8c   : > { %v1705_v62 = vmul.f32 0.5, %v1704_v61 }
 0xe8e   : > { %v1706_v3 = vsub.f32 1.5, %v1705_v62 }
 0xe90   : > { %v1707_v63 = vmul.f32 %v2064_v59, %v1706_v3 }
 0xe92   : > { %v1711_v1 = vsel %vm1710_vm14, %v2064_v59, %v1707_v63 }
 0xe93   : > { %v1712_v2 = vmul.f32 %v1711_v1, %v1695_v52 }
 0xe95   : > { %v1716_v4 = vmul.f32 %v2038_v0, %v1712_v2 }
 0xe97   : > { %v1720_v5 = vadd.f32 %v2039_v20, %v1716_v4 }
 0xe99   : > { %2006 = vmatmul.msk.f32.vlgmr.msrb.gmra.mxu3 %vm720_vm0, %v1720_v5 }
 0xf1c   : > { %v1757_v7 = vpop.f32.mrf.mxu3 }
 0xf1d   : > { %v1758_v8 = vadd.f32 %v2040_v6, %v1757_v7 }
 0xf1f   : > { %1760 = vst [vmem:[%s695_s24] sm:$0xff] %v1758_v8 }
 0xf20 PF: > { %s32_s3 = sadd.s32 1, %s2071_s3  }
 0xf21   : > { %p29_p4 = scmp.ge.s32.totalorder %s32_s3, 4  }
 0xf23   :  { %31 = sbr.rel (!%p29_p4) target bundleno = 8 (0x8), region = 163 }

</bundles_post_ra>
